<compile_context>
chip_gen: v7x
topology: tpu7x:2x2x1
jax: 0.10.0
libtpu: 0.0.40
codegen_flags: <defaults>
</compile_context>

<pallas_src>
import functools
import math

import jax
import jax.numpy as jnp
from jax import lax
from jax.experimental import pallas as pl
from jax.experimental.pallas import tpu as pltpu

EPS = 1.1920929e-07       # torch.finfo(torch.float32).eps (F.rms_norm default)
NEG_INF = -1e30           # python float (no captured jnp constants)


# --------------------------- rotary tables (host side) ---------------------------
def _rotary_half_tables(seq_len, head_dim, base=10000.0):
    """cos/sin of shape (seq_len, head_dim//2), bf16-rounded exactly like torch Rotary."""
    inv_freq = 1.0 / (base ** (jnp.arange(0, head_dim, 2, dtype=jnp.float32) / head_dim))
    t = jnp.arange(seq_len, dtype=jnp.float32)
    freqs = t[:, None] * inv_freq[None, :]
    cos = jnp.cos(freqs).astype(jnp.bfloat16).astype(jnp.float32)
    sin = jnp.sin(freqs).astype(jnp.bfloat16).astype(jnp.float32)
    return cos, sin


# ------------------------------- fused Pallas kernel ------------------------------
def _digit_mixin_kernel(we_ref, de_ref, dw_ref, dwp_ref, xwq_ref, xwkv_ref, xwp_ref,
                        cos_k_ref, sin_k_ref, cos_q_ref, sin_q_ref,
                        pos_r_ref, pos_c_ref, o_ref,
                        *, block_b, n_head, head_dim, length_factor):
    C = n_head * head_dim
    D = head_dim
    half = D // 2
    L = length_factor
    scale = 1.0 / math.sqrt(D)
    bf16 = jnp.bfloat16

    we = we_ref[...]                      # (block_b*Tq,  C) f32, natural row order
    de = de_ref[...]                      # (block_b*Tkv, C) f32, rows permuted to l*Tq + t
    rows_q, rows_kv = we.shape[0], de.shape[0]
    t_q, t_kv = rows_q // block_b, rows_kv // block_b

    cos_k, sin_k = cos_k_ref[...], sin_k_ref[...]    # (rows_kv, D/2), permuted positions
    cos_q, sin_q = cos_q_ref[...], sin_q_ref[...]    # (rows_q,  D/2), natural positions

    def rms_inv(x, gain=1.0):
        # 1 / rms over the last dim (column vector), optionally fused with a gain.
        return lax.rsqrt(jnp.mean(x * x, axis=-1, keepdims=True) + EPS) * gain

    def norm_rope(xh, cos, sin, gain=1.0):
        # rms_norm over the head dim followed by rotary; rope is linear so the 1/rms
        # factor (optionally fused with the 1/sqrt(D) attention scale) is applied last.
        x1, x2 = xh[:, :half], xh[:, half:]
        rot = jnp.concatenate([x1 * cos + x2 * sin, x2 * cos - x1 * sin], axis=-1)
        return rot * rms_inv(xh, gain)

    # ---------------- 1) digit causal self-attention + residual ----------------
    xn = (de * rms_inv(de)).astype(bf16)
    qkv = jnp.dot(xn, dw_ref[...], preferred_element_type=jnp.float32)   # (rows_kv, 3C)

    # causal mask in ORIGINAL kv positions (host precomputed per permuted row).
    causal = pos_c_ref[...] <= pos_r_ref[...]                            # (Tkv, Tkv)

    head_outs = []
    for h in range(n_head):                                   # static unroll, H small
        lo = h * D
        qh = norm_rope(qkv[:, lo:lo + D], cos_k, sin_k, scale).astype(bf16)
        kh = norm_rope(qkv[:, C + lo:C + lo + D], cos_k, sin_k).astype(bf16)
        vh = qkv[:, 2 * C + lo:2 * C + lo + D].astype(bf16)
        ys = []
        for b in range(block_b):
            r0 = b * t_kv
            s = lax.dot_general(qh[r0:r0 + t_kv], kh[r0:r0 + t_kv],
                                (((1,), (1,)), ((), ())),
                                preferred_element_type=jnp.float32)      # (Tkv, Tkv)
            s = jnp.where(causal, s, NEG_INF)
            e = jnp.exp(s - jnp.max(s, axis=-1, keepdims=True))
            y = jnp.dot(e.astype(bf16), vh[r0:r0 + t_kv],
                        preferred_element_type=jnp.float32)              # (Tkv, D)
            # deferred softmax normalization; reciprocal runs on the EUP slot.
            y = y * pl.reciprocal(jnp.sum(e, axis=-1, keepdims=True), approx=True)
            ys.append(y)
        head_outs.append(jnp.concatenate(ys, axis=0))
    y_all = jnp.concatenate(head_outs, axis=-1).astype(bf16)             # (rows_kv, C)
    # single K=C output projection (heads already sit in their lane slots)
    de_new = de + jnp.dot(y_all, dwp_ref[...], preferred_element_type=jnp.float32)

    # ------- 2) cross-attention, block mask q_idx == kv_idx // L (k_gt_q=True) -------
    # kv rows are permuted to l*Tq + t order, so the L valid keys of query t are L
    # CONTIGUOUS (Tq, D) slices: no dense (Tq, Tkv) scores, no mask, softmax over L.
    xq = (we * rms_inv(we)).astype(bf16)
    xkv = (de_new * rms_inv(de_new)).astype(bf16)
    q_all = jnp.dot(xq, xwq_ref[...], preferred_element_type=jnp.float32)     # (rows_q, C)
    kv_all = jnp.dot(xkv, xwkv_ref[...], preferred_element_type=jnp.float32)  # (rows_kv, 2C)

    x_heads = []
    for h in range(n_head):
        lo = h * D
        qh = norm_rope(q_all[:, lo:lo + D], cos_q, sin_q, scale)          # (rows_q, D)
        kh = norm_rope(kv_all[:, lo:lo + D], cos_k, sin_k)                # (rows_kv, D)
        vh = kv_all[:, C + lo:C + lo + D]                                 # (rows_kv, D)
        ys = []
        for b in range(block_b):
            qb = qh[b * t_q:(b + 1) * t_q]                                # (Tq, D)
            base = b * t_kv
            s_l = [jnp.sum(qb * kh[base + l * t_q: base + (l + 1) * t_q],
                           axis=-1, keepdims=True) for l in range(L)]     # L x (Tq, 1)
            m = s_l[0]
            for l in range(1, L):
                m = jnp.maximum(m, s_l[l])
            e_l = [jnp.exp(s - m) for s in s_l]
            denom = e_l[0]
            for l in range(1, L):
                denom = denom + e_l[l]
            y = jnp.zeros((t_q, D), jnp.float32)
            for l in range(L):
                y = y + e_l[l] * vh[base + l * t_q: base + (l + 1) * t_q]
            y = y * pl.reciprocal(denom, approx=True)
            ys.append(y)
        x_heads.append(jnp.concatenate(ys, axis=0))
    y_cross = jnp.concatenate(x_heads, axis=-1).astype(bf16)              # (rows_q, C)
    o_ref[...] = jnp.dot(y_cross, xwp_ref[...], preferred_element_type=jnp.float32)


# ----------------------------------- wrapper -----------------------------------
def _prepare_weights(params):
    """torch nn.Linear weights (out, in) -> bf16 'x @ W' layout, fused along columns."""
    def xw(w):
        return jnp.asarray(w, jnp.float32).T.astype(jnp.bfloat16)
    dw = jnp.concatenate([xw(params['d_wq']), xw(params['d_wk']), xw(params['d_wv'])],
                         axis=1)                                           # (C, 3C)
    xwkv = jnp.concatenate([xw(params['x_wk']), xw(params['x_wv'])], axis=1)  # (C, 2C)
    return dw, xw(params['d_wp']), xw(params['x_wq']), xwkv, xw(params['x_wp'])


def digit_mixin_cross_attention(we, de, params, n_head, length_factor, block_b=None):
    B, t_q, C = we.shape
    t_kv = de.shape[1]
    L = length_factor
    assert t_kv == t_q * L, "k_gt_q=True requires T_kv == T_q * length_factor"
    D = C // n_head
    if block_b is None:
        block_b = B                      # fold the whole batch into one grid step
    assert B % block_b == 0
    rows_q, rows_kv = block_b * t_q, block_b * t_kv

    dw, dwp, xwq, xwkv, xwp = _prepare_weights(params)

    # rope tables; the kv-side tables follow the permuted (l-major, t-minor) row order.
    cos_k, sin_k = _rotary_half_tables(t_kv, D)
    p = jnp.arange(t_kv)
    orig_pos = (p % t_q) * L + p // t_q          # original kv position of permuted row p
    cos_kp = jnp.tile(cos_k[orig_pos], (block_b, 1))
    sin_kp = jnp.tile(sin_k[orig_pos], (block_b, 1))
    cos_qb = jnp.tile(cos_k[:t_q], (block_b, 1))
    sin_qb = jnp.tile(sin_k[:t_q], (block_b, 1))
    pos_r = orig_pos.astype(jnp.int32).reshape(t_kv, 1)
    pos_c = orig_pos.astype(jnp.int32).reshape(1, t_kv)

    # flatten batch into rows; permute kv rows (within each batch element) from
    # kv = t*L + l to l*Tq + t so each query's L keys become contiguous blocks.
    we_flat = we.reshape(B * t_q, C)
    de_perm = de.reshape(B, t_q, L, C).transpose(0, 2, 1, 3).reshape(B * t_kv, C)

    kernel = functools.partial(_digit_mixin_kernel, block_b=block_b, n_head=n_head,
                               head_dim=D, length_factor=L)

    out_flat = pl.pallas_call(
        kernel,
        out_shape=jax.ShapeDtypeStruct((B * t_q, C), jnp.float32),
        grid=(B // block_b,),
        in_specs=[
            pl.BlockSpec((rows_q, C), lambda i: (i, 0)),          # we (flattened)
            pl.BlockSpec((rows_kv, C), lambda i: (i, 0)),         # de (flattened, permuted)
            pl.BlockSpec((C, 3 * C), lambda i: (0, 0)),           # digit fused QKV weight
            pl.BlockSpec((C, C), lambda i: (0, 0)),               # digit out-proj
            pl.BlockSpec((C, C), lambda i: (0, 0)),               # cross Q weight
            pl.BlockSpec((C, 2 * C), lambda i: (0, 0)),           # cross fused KV weight
            pl.BlockSpec((C, C), lambda i: (0, 0)),               # cross out-proj
            pl.BlockSpec((rows_kv, D // 2), lambda i: (0, 0)),    # cos (kv, permuted)
            pl.BlockSpec((rows_kv, D // 2), lambda i: (0, 0)),    # sin (kv, permuted)
            pl.BlockSpec((rows_q, D // 2), lambda i: (0, 0)),     # cos (q)
            pl.BlockSpec((rows_q, D // 2), lambda i: (0, 0)),     # sin (q)
            pl.BlockSpec((t_kv, 1), lambda i: (0, 0)),            # orig positions (rows)
            pl.BlockSpec((1, t_kv), lambda i: (0, 0)),            # orig positions (cols)
        ],
        out_specs=pl.BlockSpec((rows_q, C), lambda i: (i, 0)),
        compiler_params=pltpu.CompilerParams(
            dimension_semantics=("parallel",),
            vmem_limit_bytes=32 * 1024 * 1024),
    )(we_flat, de_perm, dw, dwp, xwq, xwkv, xwp,
      cos_kp, sin_kp, cos_qb, sin_qb, pos_r, pos_c)
    return out_flat.reshape(B, t_q, C)


# ------------------------------ pure-JAX reference ------------------------------
def _ref_rms(x):
    return x * lax.rsqrt(jnp.mean(x * x, axis=-1, keepdims=True) + EPS)


def _ref_rope(x, cos, sin):
    d = x.shape[-1] // 2
    x1, x2 = x[..., :d], x[..., d:]
    return jnp.concatenate([x1 * cos + x2 * sin, -x1 * sin + x2 * cos], axis=-1)


def _ref_forward(we, de, params, n_head, length_factor):
    hp = lax.Precision.HIGHEST
    B, Tq, C = we.shape
    Tkv = de.shape[1]
    D = C // n_head
    scale = 1.0 / math.sqrt(D)

    def attn(xq, xkv, wq, wk, wv, wp, mask, cos_q, sin_q, cos_k, sin_k):
        q = jnp.einsum('btc,dc->btd', xq, wq, precision=hp).reshape(B, xq.shape[1], n_head, D)
        k = jnp.einsum('btc,dc->btd', xkv, wk, precision=hp).reshape(B, xkv.shape[1], n_head, D)
        v = jnp.einsum('btc,dc->btd', xkv, wv, precision=hp).reshape(B, xkv.shape[1], n_head, D)
        q = _ref_rope(_ref_rms(q), cos_q[None, :, None, :], sin_q[None, :, None, :])
        k = _ref_rope(_ref_rms(k), cos_k[None, :, None, :], sin_k[None, :, None, :])
        s = jnp.einsum('bthd,bshd->bhts', q, k, precision=hp) * scale
        p = jax.nn.softmax(jnp.where(mask[None, None], s, -jnp.inf), axis=-1)
        y = jnp.einsum('bhts,bshd->bthd', p, v, precision=hp).reshape(B, xq.shape[1], C)
        return jnp.einsum('btc,dc->btd', y, wp, precision=hp)

    cos_k, sin_k = _rotary_half_tables(Tkv, D)
    cos_q, sin_q = _rotary_half_tables(Tq, D)

    causal = jnp.tril(jnp.ones((Tkv, Tkv), bool))
    de_new = de + attn(_ref_rms(de), _ref_rms(de),
                       params['d_wq'], params['d_wk'], params['d_wv'], params['d_wp'],
                       causal, cos_k, sin_k, cos_k, sin_k)

    cross_mask = jnp.arange(Tq)[:, None] == (jnp.arange(Tkv)[None, :] // length_factor)
    return attn(_ref_rms(we), _ref_rms(de_new),
                params['x_wq'], params['x_wk'], params['x_wv'], params['x_wp'],
                cross_mask, cos_q, sin_q, cos_k, sin_k)


# ------------------------------------- main -------------------------------------
if __name__ == "__main__":
    B, n_head, head_dim, T_q, L = 2, 4, 16, 8, 3   # length_factor = 3 (k_gt_q=True)
    C = n_head * head_dim                          # n_embd = 64
    T_kv = T_q * L                                 # 24

    key = jax.random.PRNGKey(0)
    keys = jax.random.split(key, 10)

    def w(k):
        return 0.02 * jax.random.normal(k, (C, C), jnp.float32)

    # NOTE: PyTorch zero-inits digit_attn.c_proj; small random weights are used
    # here so the digit-attention path is numerically exercised.
    params = {
        'd_wq': w(keys[0]), 'd_wk': w(keys[1]), 'd_wv': w(keys[2]), 'd_wp': w(keys[3]),
        'x_wq': w(keys[4]), 'x_wk': w(keys[5]), 'x_wv': w(keys[6]), 'x_wp': w(keys[7]),
    }

    we = jax.random.normal(keys[8], (B, T_q, C), jnp.float32)
    de = jax.random.normal(keys[9], (B, T_kv, C), jnp.float32)

    out = digit_mixin_cross_attention(we, de, params, n_head, L)
    out = jax.block_until_ready(out)

    ref = _ref_forward(we, de, params, n_head, L)
    assert out.shape == (B, T_q, C)
    assert bool(jnp.all(jnp.isfinite(out)))
    max_err = float(jnp.max(jnp.abs(out - ref)))
    assert bool(jnp.allclose(out, ref, atol=2e-2, rtol=2e-2)), max_err

    print("KERNEL_OK")
</pallas_src>

<mosaic_0001>
module attributes {stable_mosaic.version = 11 : i64} {
  func.func @_digit_mixin_kernel(%arg0: i32, %arg1: memref<16x64xf32, #tpu.memory_space<vmem>>, %arg2: memref<48x64xf32, #tpu.memory_space<vmem>>, %arg3: memref<64x192xbf16, #tpu.memory_space<vmem>>, %arg4: memref<64x64xbf16, #tpu.memory_space<vmem>>, %arg5: memref<64x64xbf16, #tpu.memory_space<vmem>>, %arg6: memref<64x128xbf16, #tpu.memory_space<vmem>>, %arg7: memref<64x64xbf16, #tpu.memory_space<vmem>>, %arg8: memref<48x8xf32, #tpu.memory_space<vmem>>, %arg9: memref<48x8xf32, #tpu.memory_space<vmem>>, %arg10: memref<16x8xf32, #tpu.memory_space<vmem>>, %arg11: memref<16x8xf32, #tpu.memory_space<vmem>>, %arg12: memref<24x1xi32, #tpu.memory_space<vmem>>, %arg13: memref<1x24xi32, #tpu.memory_space<vmem>>, %arg14: memref<16x64xf32, #tpu.memory_space<vmem>>) attributes {dimension_semantics = [#tpu.dimension_semantics<parallel>], iteration_bounds = array<i64: 1>, scalar_prefetch = 0 : i64, scratch_operands = 0 : i64, tpu.core_type = #tpu.core_type<tc>, window_params = [{transform_indices = @transform_0, window_bounds = array<i64: 16, 64>}, {transform_indices = @transform_1, window_bounds = array<i64: 48, 64>}, {pipeline_mode = #tpu.pipeline_mode<synchronous>, transform_indices = @transform_2, window_bounds = array<i64: 64, 192>}, {pipeline_mode = #tpu.pipeline_mode<synchronous>, transform_indices = @transform_3, window_bounds = array<i64: 64, 64>}, {pipeline_mode = #tpu.pipeline_mode<synchronous>, transform_indices = @transform_4, window_bounds = array<i64: 64, 64>}, {pipeline_mode = #tpu.pipeline_mode<synchronous>, transform_indices = @transform_5, window_bounds = array<i64: 64, 128>}, {pipeline_mode = #tpu.pipeline_mode<synchronous>, transform_indices = @transform_6, window_bounds = array<i64: 64, 64>}, {pipeline_mode = #tpu.pipeline_mode<synchronous>, transform_indices = @transform_7, window_bounds = array<i64: 48, 8>}, {pipeline_mode = #tpu.pipeline_mode<synchronous>, transform_indices = @transform_8, window_bounds = array<i64: 48, 8>}, {pipeline_mode = #tpu.pipeline_mode<synchronous>, transform_indices = @transform_9, window_bounds = array<i64: 16, 8>}, {pipeline_mode = #tpu.pipeline_mode<synchronous>, transform_indices = @transform_10, window_bounds = array<i64: 16, 8>}, {pipeline_mode = #tpu.pipeline_mode<synchronous>, transform_indices = @transform_11, window_bounds = array<i64: 24, 1>}, {pipeline_mode = #tpu.pipeline_mode<synchronous>, transform_indices = @transform_12, window_bounds = array<i64: 1, 24>}, {transform_indices = @transform_13, window_bounds = array<i64: 16, 64>}]} {
    %c0 = arith.constant 0 : index
    %c0_0 = arith.constant 0 : index
    %0 = vector.load %arg1[%c0, %c0_0] : memref<16x64xf32, #tpu.memory_space<vmem>>, vector<16x64xf32>
    %c0_1 = arith.constant 0 : index
    %c0_2 = arith.constant 0 : index
    %1 = vector.load %arg2[%c0_1, %c0_2] : memref<48x64xf32, #tpu.memory_space<vmem>>, vector<48x64xf32>
    %c0_3 = arith.constant 0 : index
    %c0_4 = arith.constant 0 : index
    %2 = vector.load %arg8[%c0_3, %c0_4] : memref<48x8xf32, #tpu.memory_space<vmem>>, vector<48x8xf32>
    %c0_5 = arith.constant 0 : index
    %c0_6 = arith.constant 0 : index
    %3 = vector.load %arg9[%c0_5, %c0_6] : memref<48x8xf32, #tpu.memory_space<vmem>>, vector<48x8xf32>
    %c0_7 = arith.constant 0 : index
    %c0_8 = arith.constant 0 : index
    %4 = vector.load %arg10[%c0_7, %c0_8] : memref<16x8xf32, #tpu.memory_space<vmem>>, vector<16x8xf32>
    %c0_9 = arith.constant 0 : index
    %c0_10 = arith.constant 0 : index
    %5 = vector.load %arg11[%c0_9, %c0_10] : memref<16x8xf32, #tpu.memory_space<vmem>>, vector<16x8xf32>
    %6 = arith.mulf %1, %1 : vector<48x64xf32>
    %cst = arith.constant dense<0.000000e+00> : vector<48xf32>
    %7 = vector.multi_reduction <add>, %6, %cst [1] : vector<48x64xf32> to vector<48xf32>
    %8 = vector.shape_cast %7 : vector<48xf32> to vector<48x1xf32>
    %cst_11 = arith.constant 6.400000e+01 : f32
    %9 = vector.broadcast %cst_11 : f32 to vector<48x1xf32>
    %10 = arith.divf %8, %9 : vector<48x1xf32>
    %cst_12 = arith.constant 1.1920929E-7 : f32
    %11 = vector.broadcast %cst_12 : f32 to vector<48x1xf32>
    %12 = arith.addf %10, %11 : vector<48x1xf32>
    %13 = math.rsqrt %12 : vector<48x1xf32>
    %cst_13 = arith.constant 1.000000e+00 : f32
    %14 = vector.broadcast %cst_13 : f32 to vector<48x1xf32>
    %15 = arith.mulf %13, %14 : vector<48x1xf32>
    %16 = vector.broadcast %15 : vector<48x1xf32> to vector<48x64xf32>
    %17 = arith.mulf %1, %16 : vector<48x64xf32>
    %18 = arith.truncf %17 : vector<48x64xf32> to vector<48x64xbf16>
    %c0_14 = arith.constant 0 : index
    %c0_15 = arith.constant 0 : index
    %19 = vector.load %arg3[%c0_14, %c0_15] : memref<64x192xbf16, #tpu.memory_space<vmem>>, vector<64x192xbf16>
    %cst_16 = arith.constant dense<0.000000e+00> : vector<48x192xf32>
    %20 = tpu.matmul %18, %19, %cst_16 {dimension_numbers = #tpu.dot_dimension_numbers<[1], [0], [0], [1], [0, 0, 1, 1], [], []>} : vector<48x64xbf16>, vector<64x192xbf16>, vector<48x192xf32> -> vector<48x192xf32>
    %c0_17 = arith.constant 0 : index
    %c0_18 = arith.constant 0 : index
    %21 = vector.load %arg13[%c0_17, %c0_18] : memref<1x24xi32, #tpu.memory_space<vmem>>, vector<1x24xi32>
    %c0_19 = arith.constant 0 : index
    %c0_20 = arith.constant 0 : index
    %22 = vector.load %arg12[%c0_19, %c0_20] : memref<24x1xi32, #tpu.memory_space<vmem>>, vector<24x1xi32>
    %23 = vector.broadcast %21 : vector<1x24xi32> to vector<24x24xi32>
    %24 = vector.broadcast %22 : vector<24x1xi32> to vector<24x24xi32>
    %25 = arith.cmpi sle, %23, %24 : vector<24x24xi32>
    %26 = vector.extract_strided_slice %20 {offsets = [0, 0], sizes = [48, 16], strides = [1, 1]} : vector<48x192xf32> to vector<48x16xf32>
    %27 = vector.extract_strided_slice %26 {offsets = [0, 0], sizes = [48, 8], strides = [1, 1]} : vector<48x16xf32> to vector<48x8xf32>
    %28 = vector.extract_strided_slice %26 {offsets = [0, 8], sizes = [48, 8], strides = [1, 1]} : vector<48x16xf32> to vector<48x8xf32>
    %29 = arith.mulf %27, %2 : vector<48x8xf32>
    %30 = arith.mulf %28, %3 : vector<48x8xf32>
    %31 = arith.addf %29, %30 : vector<48x8xf32>
    %32 = arith.mulf %28, %2 : vector<48x8xf32>
    %33 = arith.mulf %27, %3 : vector<48x8xf32>
    %34 = arith.subf %32, %33 : vector<48x8xf32>
    %35 = tpu.concatenate %31, %34 in 1 : vector<48x8xf32>, vector<48x8xf32> -> vector<48x16xf32>
    %36 = arith.mulf %26, %26 : vector<48x16xf32>
    %cst_21 = arith.constant dense<0.000000e+00> : vector<48xf32>
    %37 = vector.multi_reduction <add>, %36, %cst_21 [1] : vector<48x16xf32> to vector<48xf32>
    %38 = vector.shape_cast %37 : vector<48xf32> to vector<48x1xf32>
    %cst_22 = arith.constant 1.600000e+01 : f32
    %39 = vector.broadcast %cst_22 : f32 to vector<48x1xf32>
    %40 = arith.divf %38, %39 : vector<48x1xf32>
    %cst_23 = arith.constant 1.1920929E-7 : f32
    %41 = vector.broadcast %cst_23 : f32 to vector<48x1xf32>
    %42 = arith.addf %40, %41 : vector<48x1xf32>
    %43 = math.rsqrt %42 : vector<48x1xf32>
    %cst_24 = arith.constant 2.500000e-01 : f32
    %44 = vector.broadcast %cst_24 : f32 to vector<48x1xf32>
    %45 = arith.mulf %43, %44 : vector<48x1xf32>
    %46 = vector.broadcast %45 : vector<48x1xf32> to vector<48x16xf32>
    %47 = arith.mulf %35, %46 : vector<48x16xf32>
    %48 = arith.truncf %47 : vector<48x16xf32> to vector<48x16xbf16>
    %49 = vector.extract_strided_slice %20 {offsets = [0, 64], sizes = [48, 16], strides = [1, 1]} : vector<48x192xf32> to vector<48x16xf32>
    %50 = vector.extract_strided_slice %49 {offsets = [0, 0], sizes = [48, 8], strides = [1, 1]} : vector<48x16xf32> to vector<48x8xf32>
    %51 = vector.extract_strided_slice %49 {offsets = [0, 8], sizes = [48, 8], strides = [1, 1]} : vector<48x16xf32> to vector<48x8xf32>
    %52 = arith.mulf %50, %2 : vector<48x8xf32>
    %53 = arith.mulf %51, %3 : vector<48x8xf32>
    %54 = arith.addf %52, %53 : vector<48x8xf32>
    %55 = arith.mulf %51, %2 : vector<48x8xf32>
    %56 = arith.mulf %50, %3 : vector<48x8xf32>
    %57 = arith.subf %55, %56 : vector<48x8xf32>
    %58 = tpu.concatenate %54, %57 in 1 : vector<48x8xf32>, vector<48x8xf32> -> vector<48x16xf32>
    %59 = arith.mulf %49, %49 : vector<48x16xf32>
    %cst_25 = arith.constant dense<0.000000e+00> : vector<48xf32>
    %60 = vector.multi_reduction <add>, %59, %cst_25 [1] : vector<48x16xf32> to vector<48xf32>
    %61 = vector.shape_cast %60 : vector<48xf32> to vector<48x1xf32>
    %cst_26 = arith.constant 1.600000e+01 : f32
    %62 = vector.broadcast %cst_26 : f32 to vector<48x1xf32>
    %63 = arith.divf %61, %62 : vector<48x1xf32>
    %cst_27 = arith.constant 1.1920929E-7 : f32
    %64 = vector.broadcast %cst_27 : f32 to vector<48x1xf32>
    %65 = arith.addf %63, %64 : vector<48x1xf32>
    %66 = math.rsqrt %65 : vector<48x1xf32>
    %cst_28 = arith.constant 1.000000e+00 : f32
    %67 = vector.broadcast %cst_28 : f32 to vector<48x1xf32>
    %68 = arith.mulf %66, %67 : vector<48x1xf32>
    %69 = vector.broadcast %68 : vector<48x1xf32> to vector<48x16xf32>
    %70 = arith.mulf %58, %69 : vector<48x16xf32>
    %71 = arith.truncf %70 : vector<48x16xf32> to vector<48x16xbf16>
    %72 = vector.extract_strided_slice %20 {offsets = [0, 128], sizes = [48, 16], strides = [1, 1]} : vector<48x192xf32> to vector<48x16xf32>
    %73 = arith.truncf %72 : vector<48x16xf32> to vector<48x16xbf16>
    %74 = vector.extract_strided_slice %48 {offsets = [0, 0], sizes = [24, 16], strides = [1, 1]} : vector<48x16xbf16> to vector<24x16xbf16>
    %75 = vector.extract_strided_slice %71 {offsets = [0, 0], sizes = [24, 16], strides = [1, 1]} : vector<48x16xbf16> to vector<24x16xbf16>
    %cst_29 = arith.constant dense<0.000000e+00> : vector<24x24xf32>
    %76 = tpu.matmul %74, %75, %cst_29 {dimension_numbers = #tpu.dot_dimension_numbers<[1], [1], [0], [0], [0, 0, 1, 0], [], []>} : vector<24x16xbf16>, vector<24x16xbf16>, vector<24x24xf32> -> vector<24x24xf32>
    %cst_30 = arith.constant -1.000000e+30 : f32
    %77 = vector.broadcast %cst_30 : f32 to vector<24x24xf32>
    %78 = arith.select %25, %76, %77 : vector<24x24xi1>, vector<24x24xf32>
    %cst_31 = arith.constant dense<0xFF800000> : vector<24xf32>
    %79 = vector.multi_reduction <maximumf>, %78, %cst_31 [1] : vector<24x24xf32> to vector<24xf32>
    %80 = vector.shape_cast %79 : vector<24xf32> to vector<24x1xf32>
    %81 = vector.broadcast %80 : vector<24x1xf32> to vector<24x24xf32>
    %82 = arith.subf %78, %81 : vector<24x24xf32>
    %83 = math.exp %82 : vector<24x24xf32>
    %84 = arith.truncf %83 : vector<24x24xf32> to vector<24x24xbf16>
    %85 = vector.extract_strided_slice %73 {offsets = [0, 0], sizes = [24, 16], strides = [1, 1]} : vector<48x16xbf16> to vector<24x16xbf16>
    %cst_32 = arith.constant dense<0.000000e+00> : vector<24x16xf32>
    %86 = tpu.matmul %84, %85, %cst_32 {dimension_numbers = #tpu.dot_dimension_numbers<[1], [0], [0], [1], [0, 0, 1, 1], [], []>} : vector<24x24xbf16>, vector<24x16xbf16>, vector<24x16xf32> -> vector<24x16xf32>
    %cst_33 = arith.constant dense<0.000000e+00> : vector<24xf32>
    %87 = vector.multi_reduction <add>, %83, %cst_33 [1] : vector<24x24xf32> to vector<24xf32>
    %88 = vector.shape_cast %87 : vector<24xf32> to vector<24x1xf32>
    %89 = tpu.reciprocal %88 {approx = true} : vector<24x1xf32> -> vector<24x1xf32>
    %90 = vector.broadcast %89 : vector<24x1xf32> to vector<24x16xf32>
    %91 = arith.mulf %86, %90 : vector<24x16xf32>
    %92 = vector.extract_strided_slice %48 {offsets = [24, 0], sizes = [24, 16], strides = [1, 1]} : vector<48x16xbf16> to vector<24x16xbf16>
    %93 = vector.extract_strided_slice %71 {offsets = [24, 0], sizes = [24, 16], strides = [1, 1]} : vector<48x16xbf16> to vector<24x16xbf16>
    %cst_34 = arith.constant dense<0.000000e+00> : vector<24x24xf32>
    %94 = tpu.matmul %92, %93, %cst_34 {dimension_numbers = #tpu.dot_dimension_numbers<[1], [1], [0], [0], [0, 0, 1, 0], [], []>} : vector<24x16xbf16>, vector<24x16xbf16>, vector<24x24xf32> -> vector<24x24xf32>
    %cst_35 = arith.constant -1.000000e+30 : f32
    %95 = vector.broadcast %cst_35 : f32 to vector<24x24xf32>
    %96 = arith.select %25, %94, %95 : vector<24x24xi1>, vector<24x24xf32>
    %cst_36 = arith.constant dense<0xFF800000> : vector<24xf32>
    %97 = vector.multi_reduction <maximumf>, %96, %cst_36 [1] : vector<24x24xf32> to vector<24xf32>
    %98 = vector.shape_cast %97 : vector<24xf32> to vector<24x1xf32>
    %99 = vector.broadcast %98 : vector<24x1xf32> to vector<24x24xf32>
    %100 = arith.subf %96, %99 : vector<24x24xf32>
    %101 = math.exp %100 : vector<24x24xf32>
    %102 = arith.truncf %101 : vector<24x24xf32> to vector<24x24xbf16>
    %103 = vector.extract_strided_slice %73 {offsets = [24, 0], sizes = [24, 16], strides = [1, 1]} : vector<48x16xbf16> to vector<24x16xbf16>
    %cst_37 = arith.constant dense<0.000000e+00> : vector<24x16xf32>
    %104 = tpu.matmul %102, %103, %cst_37 {dimension_numbers = #tpu.dot_dimension_numbers<[1], [0], [0], [1], [0, 0, 1, 1], [], []>} : vector<24x24xbf16>, vector<24x16xbf16>, vector<24x16xf32> -> vector<24x16xf32>
    %cst_38 = arith.constant dense<0.000000e+00> : vector<24xf32>
    %105 = vector.multi_reduction <add>, %101, %cst_38 [1] : vector<24x24xf32> to vector<24xf32>
    %106 = vector.shape_cast %105 : vector<24xf32> to vector<24x1xf32>
    %107 = tpu.reciprocal %106 {approx = true} : vector<24x1xf32> -> vector<24x1xf32>
    %108 = vector.broadcast %107 : vector<24x1xf32> to vector<24x16xf32>
    %109 = arith.mulf %104, %108 : vector<24x16xf32>
    %110 = tpu.concatenate %91, %109 in 0 : vector<24x16xf32>, vector<24x16xf32> -> vector<48x16xf32>
    %111 = vector.extract_strided_slice %20 {offsets = [0, 16], sizes = [48, 16], strides = [1, 1]} : vector<48x192xf32> to vector<48x16xf32>
    %112 = vector.extract_strided_slice %111 {offsets = [0, 0], sizes = [48, 8], strides = [1, 1]} : vector<48x16xf32> to vector<48x8xf32>
    %113 = vector.extract_strided_slice %111 {offsets = [0, 8], sizes = [48, 8], strides = [1, 1]} : vector<48x16xf32> to vector<48x8xf32>
    %114 = arith.mulf %112, %2 : vector<48x8xf32>
    %115 = arith.mulf %113, %3 : vector<48x8xf32>
    %116 = arith.addf %114, %115 : vector<48x8xf32>
    %117 = arith.mulf %113, %2 : vector<48x8xf32>
    %118 = arith.mulf %112, %3 : vector<48x8xf32>
    %119 = arith.subf %117, %118 : vector<48x8xf32>
    %120 = tpu.concatenate %116, %119 in 1 : vector<48x8xf32>, vector<48x8xf32> -> vector<48x16xf32>
    %121 = arith.mulf %111, %111 : vector<48x16xf32>
    %cst_39 = arith.constant dense<0.000000e+00> : vector<48xf32>
    %122 = vector.multi_reduction <add>, %121, %cst_39 [1] : vector<48x16xf32> to vector<48xf32>
    %123 = vector.shape_cast %122 : vector<48xf32> to vector<48x1xf32>
    %cst_40 = arith.constant 1.600000e+01 : f32
    %124 = vector.broadcast %cst_40 : f32 to vector<48x1xf32>
    %125 = arith.divf %123, %124 : vector<48x1xf32>
    %cst_41 = arith.constant 1.1920929E-7 : f32
    %126 = vector.broadcast %cst_41 : f32 to vector<48x1xf32>
    %127 = arith.addf %125, %126 : vector<48x1xf32>
    %128 = math.rsqrt %127 : vector<48x1xf32>
    %cst_42 = arith.constant 2.500000e-01 : f32
    %129 = vector.broadcast %cst_42 : f32 to vector<48x1xf32>
    %130 = arith.mulf %128, %129 : vector<48x1xf32>
    %131 = vector.broadcast %130 : vector<48x1xf32> to vector<48x16xf32>
    %132 = arith.mulf %120, %131 : vector<48x16xf32>
    %133 = arith.truncf %132 : vector<48x16xf32> to vector<48x16xbf16>
    %134 = vector.extract_strided_slice %20 {offsets = [0, 80], sizes = [48, 16], strides = [1, 1]} : vector<48x192xf32> to vector<48x16xf32>
    %135 = vector.extract_strided_slice %134 {offsets = [0, 0], sizes = [48, 8], strides = [1, 1]} : vector<48x16xf32> to vector<48x8xf32>
    %136 = vector.extract_strided_slice %134 {offsets = [0, 8], sizes = [48, 8], strides = [1, 1]} : vector<48x16xf32> to vector<48x8xf32>
    %137 = arith.mulf %135, %2 : vector<48x8xf32>
    %138 = arith.mulf %136, %3 : vector<48x8xf32>
    %139 = arith.addf %137, %138 : vector<48x8xf32>
    %140 = arith.mulf %136, %2 : vector<48x8xf32>
    %141 = arith.mulf %135, %3 : vector<48x8xf32>
    %142 = arith.subf %140, %141 : vector<48x8xf32>
    %143 = tpu.concatenate %139, %142 in 1 : vector<48x8xf32>, vector<48x8xf32> -> vector<48x16xf32>
    %144 = arith.mulf %134, %134 : vector<48x16xf32>
    %cst_43 = arith.constant dense<0.000000e+00> : vector<48xf32>
    %145 = vector.multi_reduction <add>, %144, %cst_43 [1] : vector<48x16xf32> to vector<48xf32>
    %146 = vector.shape_cast %145 : vector<48xf32> to vector<48x1xf32>
    %cst_44 = arith.constant 1.600000e+01 : f32
    %147 = vector.broadcast %cst_44 : f32 to vector<48x1xf32>
    %148 = arith.divf %146, %147 : vector<48x1xf32>
    %cst_45 = arith.constant 1.1920929E-7 : f32
    %149 = vector.broadcast %cst_45 : f32 to vector<48x1xf32>
    %150 = arith.addf %148, %149 : vector<48x1xf32>
    %151 = math.rsqrt %150 : vector<48x1xf32>
    %cst_46 = arith.constant 1.000000e+00 : f32
    %152 = vector.broadcast %cst_46 : f32 to vector<48x1xf32>
    %153 = arith.mulf %151, %152 : vector<48x1xf32>
    %154 = vector.broadcast %153 : vector<48x1xf32> to vector<48x16xf32>
    %155 = arith.mulf %143, %154 : vector<48x16xf32>
    %156 = arith.truncf %155 : vector<48x16xf32> to vector<48x16xbf16>
    %157 = vector.extract_strided_slice %20 {offsets = [0, 144], sizes = [48, 16], strides = [1, 1]} : vector<48x192xf32> to vector<48x16xf32>
    %158 = arith.truncf %157 : vector<48x16xf32> to vector<48x16xbf16>
    %159 = vector.extract_strided_slice %133 {offsets = [0, 0], sizes = [24, 16], strides = [1, 1]} : vector<48x16xbf16> to vector<24x16xbf16>
    %160 = vector.extract_strided_slice %156 {offsets = [0, 0], sizes = [24, 16], strides = [1, 1]} : vector<48x16xbf16> to vector<24x16xbf16>
    %cst_47 = arith.constant dense<0.000000e+00> : vector<24x24xf32>
    %161 = tpu.matmul %159, %160, %cst_47 {dimension_numbers = #tpu.dot_dimension_numbers<[1], [1], [0], [0], [0, 0, 1, 0], [], []>} : vector<24x16xbf16>, vector<24x16xbf16>, vector<24x24xf32> -> vector<24x24xf32>
    %cst_48 = arith.constant -1.000000e+30 : f32
    %162 = vector.broadcast %cst_48 : f32 to vector<24x24xf32>
    %163 = arith.select %25, %161, %162 : vector<24x24xi1>, vector<24x24xf32>
    %cst_49 = arith.constant dense<0xFF800000> : vector<24xf32>
    %164 = vector.multi_reduction <maximumf>, %163, %cst_49 [1] : vector<24x24xf32> to vector<24xf32>
    %165 = vector.shape_cast %164 : vector<24xf32> to vector<24x1xf32>
    %166 = vector.broadcast %165 : vector<24x1xf32> to vector<24x24xf32>
    %167 = arith.subf %163, %166 : vector<24x24xf32>
    %168 = math.exp %167 : vector<24x24xf32>
    %169 = arith.truncf %168 : vector<24x24xf32> to vector<24x24xbf16>
    %170 = vector.extract_strided_slice %158 {offsets = [0, 0], sizes = [24, 16], strides = [1, 1]} : vector<48x16xbf16> to vector<24x16xbf16>
    %cst_50 = arith.constant dense<0.000000e+00> : vector<24x16xf32>
    %171 = tpu.matmul %169, %170, %cst_50 {dimension_numbers = #tpu.dot_dimension_numbers<[1], [0], [0], [1], [0, 0, 1, 1], [], []>} : vector<24x24xbf16>, vector<24x16xbf16>, vector<24x16xf32> -> vector<24x16xf32>
    %cst_51 = arith.constant dense<0.000000e+00> : vector<24xf32>
    %172 = vector.multi_reduction <add>, %168, %cst_51 [1] : vector<24x24xf32> to vector<24xf32>
    %173 = vector.shape_cast %172 : vector<24xf32> to vector<24x1xf32>
    %174 = tpu.reciprocal %173 {approx = true} : vector<24x1xf32> -> vector<24x1xf32>
    %175 = vector.broadcast %174 : vector<24x1xf32> to vector<24x16xf32>
    %176 = arith.mulf %171, %175 : vector<24x16xf32>
    %177 = vector.extract_strided_slice %133 {offsets = [24, 0], sizes = [24, 16], strides = [1, 1]} : vector<48x16xbf16> to vector<24x16xbf16>
    %178 = vector.extract_strided_slice %156 {offsets = [24, 0], sizes = [24, 16], strides = [1, 1]} : vector<48x16xbf16> to vector<24x16xbf16>
    %cst_52 = arith.constant dense<0.000000e+00> : vector<24x24xf32>
    %179 = tpu.matmul %177, %178, %cst_52 {dimension_numbers = #tpu.dot_dimension_numbers<[1], [1], [0], [0], [0, 0, 1, 0], [], []>} : vector<24x16xbf16>, vector<24x16xbf16>, vector<24x24xf32> -> vector<24x24xf32>
    %cst_53 = arith.constant -1.000000e+30 : f32
    %180 = vector.broadcast %cst_53 : f32 to vector<24x24xf32>
    %181 = arith.select %25, %179, %180 : vector<24x24xi1>, vector<24x24xf32>
    %cst_54 = arith.constant dense<0xFF800000> : vector<24xf32>
    %182 = vector.multi_reduction <maximumf>, %181, %cst_54 [1] : vector<24x24xf32> to vector<24xf32>
    %183 = vector.shape_cast %182 : vector<24xf32> to vector<24x1xf32>
    %184 = vector.broadcast %183 : vector<24x1xf32> to vector<24x24xf32>
    %185 = arith.subf %181, %184 : vector<24x24xf32>
    %186 = math.exp %185 : vector<24x24xf32>
    %187 = arith.truncf %186 : vector<24x24xf32> to vector<24x24xbf16>
    %188 = vector.extract_strided_slice %158 {offsets = [24, 0], sizes = [24, 16], strides = [1, 1]} : vector<48x16xbf16> to vector<24x16xbf16>
    %cst_55 = arith.constant dense<0.000000e+00> : vector<24x16xf32>
    %189 = tpu.matmul %187, %188, %cst_55 {dimension_numbers = #tpu.dot_dimension_numbers<[1], [0], [0], [1], [0, 0, 1, 1], [], []>} : vector<24x24xbf16>, vector<24x16xbf16>, vector<24x16xf32> -> vector<24x16xf32>
    %cst_56 = arith.constant dense<0.000000e+00> : vector<24xf32>
    %190 = vector.multi_reduction <add>, %186, %cst_56 [1] : vector<24x24xf32> to vector<24xf32>
    %191 = vector.shape_cast %190 : vector<24xf32> to vector<24x1xf32>
    %192 = tpu.reciprocal %191 {approx = true} : vector<24x1xf32> -> vector<24x1xf32>
    %193 = vector.broadcast %192 : vector<24x1xf32> to vector<24x16xf32>
    %194 = arith.mulf %189, %193 : vector<24x16xf32>
    %195 = tpu.concatenate %176, %194 in 0 : vector<24x16xf32>, vector<24x16xf32> -> vector<48x16xf32>
    %196 = vector.extract_strided_slice %20 {offsets = [0, 32], sizes = [48, 16], strides = [1, 1]} : vector<48x192xf32> to vector<48x16xf32>
    %197 = vector.extract_strided_slice %196 {offsets = [0, 0], sizes = [48, 8], strides = [1, 1]} : vector<48x16xf32> to vector<48x8xf32>
    %198 = vector.extract_strided_slice %196 {offsets = [0, 8], sizes = [48, 8], strides = [1, 1]} : vector<48x16xf32> to vector<48x8xf32>
    %199 = arith.mulf %197, %2 : vector<48x8xf32>
    %200 = arith.mulf %198, %3 : vector<48x8xf32>
    %201 = arith.addf %199, %200 : vector<48x8xf32>
    %202 = arith.mulf %198, %2 : vector<48x8xf32>
    %203 = arith.mulf %197, %3 : vector<48x8xf32>
    %204 = arith.subf %202, %203 : vector<48x8xf32>
    %205 = tpu.concatenate %201, %204 in 1 : vector<48x8xf32>, vector<48x8xf32> -> vector<48x16xf32>
    %206 = arith.mulf %196, %196 : vector<48x16xf32>
    %cst_57 = arith.constant dense<0.000000e+00> : vector<48xf32>
    %207 = vector.multi_reduction <add>, %206, %cst_57 [1] : vector<48x16xf32> to vector<48xf32>
    %208 = vector.shape_cast %207 : vector<48xf32> to vector<48x1xf32>
    %cst_58 = arith.constant 1.600000e+01 : f32
    %209 = vector.broadcast %cst_58 : f32 to vector<48x1xf32>
    %210 = arith.divf %208, %209 : vector<48x1xf32>
    %cst_59 = arith.constant 1.1920929E-7 : f32
    %211 = vector.broadcast %cst_59 : f32 to vector<48x1xf32>
    %212 = arith.addf %210, %211 : vector<48x1xf32>
    %213 = math.rsqrt %212 : vector<48x1xf32>
    %cst_60 = arith.constant 2.500000e-01 : f32
    %214 = vector.broadcast %cst_60 : f32 to vector<48x1xf32>
    %215 = arith.mulf %213, %214 : vector<48x1xf32>
    %216 = vector.broadcast %215 : vector<48x1xf32> to vector<48x16xf32>
    %217 = arith.mulf %205, %216 : vector<48x16xf32>
    %218 = arith.truncf %217 : vector<48x16xf32> to vector<48x16xbf16>
    %219 = vector.extract_strided_slice %20 {offsets = [0, 96], sizes = [48, 16], strides = [1, 1]} : vector<48x192xf32> to vector<48x16xf32>
    %220 = vector.extract_strided_slice %219 {offsets = [0, 0], sizes = [48, 8], strides = [1, 1]} : vector<48x16xf32> to vector<48x8xf32>
    %221 = vector.extract_strided_slice %219 {offsets = [0, 8], sizes = [48, 8], strides = [1, 1]} : vector<48x16xf32> to vector<48x8xf32>
    %222 = arith.mulf %220, %2 : vector<48x8xf32>
    %223 = arith.mulf %221, %3 : vector<48x8xf32>
    %224 = arith.addf %222, %223 : vector<48x8xf32>
    %225 = arith.mulf %221, %2 : vector<48x8xf32>
    %226 = arith.mulf %220, %3 : vector<48x8xf32>
    %227 = arith.subf %225, %226 : vector<48x8xf32>
    %228 = tpu.concatenate %224, %227 in 1 : vector<48x8xf32>, vector<48x8xf32> -> vector<48x16xf32>
    %229 = arith.mulf %219, %219 : vector<48x16xf32>
    %cst_61 = arith.constant dense<0.000000e+00> : vector<48xf32>
    %230 = vector.multi_reduction <add>, %229, %cst_61 [1] : vector<48x16xf32> to vector<48xf32>
    %231 = vector.shape_cast %230 : vector<48xf32> to vector<48x1xf32>
    %cst_62 = arith.constant 1.600000e+01 : f32
    %232 = vector.broadcast %cst_62 : f32 to vector<48x1xf32>
    %233 = arith.divf %231, %232 : vector<48x1xf32>
    %cst_63 = arith.constant 1.1920929E-7 : f32
    %234 = vector.broadcast %cst_63 : f32 to vector<48x1xf32>
    %235 = arith.addf %233, %234 : vector<48x1xf32>
    %236 = math.rsqrt %235 : vector<48x1xf32>
    %cst_64 = arith.constant 1.000000e+00 : f32
    %237 = vector.broadcast %cst_64 : f32 to vector<48x1xf32>
    %238 = arith.mulf %236, %237 : vector<48x1xf32>
    %239 = vector.broadcast %238 : vector<48x1xf32> to vector<48x16xf32>
    %240 = arith.mulf %228, %239 : vector<48x16xf32>
    %241 = arith.truncf %240 : vector<48x16xf32> to vector<48x16xbf16>
    %242 = vector.extract_strided_slice %20 {offsets = [0, 160], sizes = [48, 16], strides = [1, 1]} : vector<48x192xf32> to vector<48x16xf32>
    %243 = arith.truncf %242 : vector<48x16xf32> to vector<48x16xbf16>
    %244 = vector.extract_strided_slice %218 {offsets = [0, 0], sizes = [24, 16], strides = [1, 1]} : vector<48x16xbf16> to vector<24x16xbf16>
    %245 = vector.extract_strided_slice %241 {offsets = [0, 0], sizes = [24, 16], strides = [1, 1]} : vector<48x16xbf16> to vector<24x16xbf16>
    %cst_65 = arith.constant dense<0.000000e+00> : vector<24x24xf32>
    %246 = tpu.matmul %244, %245, %cst_65 {dimension_numbers = #tpu.dot_dimension_numbers<[1], [1], [0], [0], [0, 0, 1, 0], [], []>} : vector<24x16xbf16>, vector<24x16xbf16>, vector<24x24xf32> -> vector<24x24xf32>
    %cst_66 = arith.constant -1.000000e+30 : f32
    %247 = vector.broadcast %cst_66 : f32 to vector<24x24xf32>
    %248 = arith.select %25, %246, %247 : vector<24x24xi1>, vector<24x24xf32>
    %cst_67 = arith.constant dense<0xFF800000> : vector<24xf32>
    %249 = vector.multi_reduction <maximumf>, %248, %cst_67 [1] : vector<24x24xf32> to vector<24xf32>
    %250 = vector.shape_cast %249 : vector<24xf32> to vector<24x1xf32>
    %251 = vector.broadcast %250 : vector<24x1xf32> to vector<24x24xf32>
    %252 = arith.subf %248, %251 : vector<24x24xf32>
    %253 = math.exp %252 : vector<24x24xf32>
    %254 = arith.truncf %253 : vector<24x24xf32> to vector<24x24xbf16>
    %255 = vector.extract_strided_slice %243 {offsets = [0, 0], sizes = [24, 16], strides = [1, 1]} : vector<48x16xbf16> to vector<24x16xbf16>
    %cst_68 = arith.constant dense<0.000000e+00> : vector<24x16xf32>
    %256 = tpu.matmul %254, %255, %cst_68 {dimension_numbers = #tpu.dot_dimension_numbers<[1], [0], [0], [1], [0, 0, 1, 1], [], []>} : vector<24x24xbf16>, vector<24x16xbf16>, vector<24x16xf32> -> vector<24x16xf32>
    %cst_69 = arith.constant dense<0.000000e+00> : vector<24xf32>
    %257 = vector.multi_reduction <add>, %253, %cst_69 [1] : vector<24x24xf32> to vector<24xf32>
    %258 = vector.shape_cast %257 : vector<24xf32> to vector<24x1xf32>
    %259 = tpu.reciprocal %258 {approx = true} : vector<24x1xf32> -> vector<24x1xf32>
    %260 = vector.broadcast %259 : vector<24x1xf32> to vector<24x16xf32>
    %261 = arith.mulf %256, %260 : vector<24x16xf32>
    %262 = vector.extract_strided_slice %218 {offsets = [24, 0], sizes = [24, 16], strides = [1, 1]} : vector<48x16xbf16> to vector<24x16xbf16>
    %263 = vector.extract_strided_slice %241 {offsets = [24, 0], sizes = [24, 16], strides = [1, 1]} : vector<48x16xbf16> to vector<24x16xbf16>
    %cst_70 = arith.constant dense<0.000000e+00> : vector<24x24xf32>
    %264 = tpu.matmul %262, %263, %cst_70 {dimension_numbers = #tpu.dot_dimension_numbers<[1], [1], [0], [0], [0, 0, 1, 0], [], []>} : vector<24x16xbf16>, vector<24x16xbf16>, vector<24x24xf32> -> vector<24x24xf32>
    %cst_71 = arith.constant -1.000000e+30 : f32
    %265 = vector.broadcast %cst_71 : f32 to vector<24x24xf32>
    %266 = arith.select %25, %264, %265 : vector<24x24xi1>, vector<24x24xf32>
    %cst_72 = arith.constant dense<0xFF800000> : vector<24xf32>
    %267 = vector.multi_reduction <maximumf>, %266, %cst_72 [1] : vector<24x24xf32> to vector<24xf32>
    %268 = vector.shape_cast %267 : vector<24xf32> to vector<24x1xf32>
    %269 = vector.broadcast %268 : vector<24x1xf32> to vector<24x24xf32>
    %270 = arith.subf %266, %269 : vector<24x24xf32>
    %271 = math.exp %270 : vector<24x24xf32>
    %272 = arith.truncf %271 : vector<24x24xf32> to vector<24x24xbf16>
    %273 = vector.extract_strided_slice %243 {offsets = [24, 0], sizes = [24, 16], strides = [1, 1]} : vector<48x16xbf16> to vector<24x16xbf16>
    %cst_73 = arith.constant dense<0.000000e+00> : vector<24x16xf32>
    %274 = tpu.matmul %272, %273, %cst_73 {dimension_numbers = #tpu.dot_dimension_numbers<[1], [0], [0], [1], [0, 0, 1, 1], [], []>} : vector<24x24xbf16>, vector<24x16xbf16>, vector<24x16xf32> -> vector<24x16xf32>
    %cst_74 = arith.constant dense<0.000000e+00> : vector<24xf32>
    %275 = vector.multi_reduction <add>, %271, %cst_74 [1] : vector<24x24xf32> to vector<24xf32>
    %276 = vector.shape_cast %275 : vector<24xf32> to vector<24x1xf32>
    %277 = tpu.reciprocal %276 {approx = true} : vector<24x1xf32> -> vector<24x1xf32>
    %278 = vector.broadcast %277 : vector<24x1xf32> to vector<24x16xf32>
    %279 = arith.mulf %274, %278 : vector<24x16xf32>
    %280 = tpu.concatenate %261, %279 in 0 : vector<24x16xf32>, vector<24x16xf32> -> vector<48x16xf32>
    %281 = vector.extract_strided_slice %20 {offsets = [0, 48], sizes = [48, 16], strides = [1, 1]} : vector<48x192xf32> to vector<48x16xf32>
    %282 = vector.extract_strided_slice %281 {offsets = [0, 0], sizes = [48, 8], strides = [1, 1]} : vector<48x16xf32> to vector<48x8xf32>
    %283 = vector.extract_strided_slice %281 {offsets = [0, 8], sizes = [48, 8], strides = [1, 1]} : vector<48x16xf32> to vector<48x8xf32>
    %284 = arith.mulf %282, %2 : vector<48x8xf32>
    %285 = arith.mulf %283, %3 : vector<48x8xf32>
    %286 = arith.addf %284, %285 : vector<48x8xf32>
    %287 = arith.mulf %283, %2 : vector<48x8xf32>
    %288 = arith.mulf %282, %3 : vector<48x8xf32>
    %289 = arith.subf %287, %288 : vector<48x8xf32>
    %290 = tpu.concatenate %286, %289 in 1 : vector<48x8xf32>, vector<48x8xf32> -> vector<48x16xf32>
    %291 = arith.mulf %281, %281 : vector<48x16xf32>
    %cst_75 = arith.constant dense<0.000000e+00> : vector<48xf32>
    %292 = vector.multi_reduction <add>, %291, %cst_75 [1] : vector<48x16xf32> to vector<48xf32>
    %293 = vector.shape_cast %292 : vector<48xf32> to vector<48x1xf32>
    %cst_76 = arith.constant 1.600000e+01 : f32
    %294 = vector.broadcast %cst_76 : f32 to vector<48x1xf32>
    %295 = arith.divf %293, %294 : vector<48x1xf32>
    %cst_77 = arith.constant 1.1920929E-7 : f32
    %296 = vector.broadcast %cst_77 : f32 to vector<48x1xf32>
    %297 = arith.addf %295, %296 : vector<48x1xf32>
    %298 = math.rsqrt %297 : vector<48x1xf32>
    %cst_78 = arith.constant 2.500000e-01 : f32
    %299 = vector.broadcast %cst_78 : f32 to vector<48x1xf32>
    %300 = arith.mulf %298, %299 : vector<48x1xf32>
    %301 = vector.broadcast %300 : vector<48x1xf32> to vector<48x16xf32>
    %302 = arith.mulf %290, %301 : vector<48x16xf32>
    %303 = arith.truncf %302 : vector<48x16xf32> to vector<48x16xbf16>
    %304 = vector.extract_strided_slice %20 {offsets = [0, 112], sizes = [48, 16], strides = [1, 1]} : vector<48x192xf32> to vector<48x16xf32>
    %305 = vector.extract_strided_slice %304 {offsets = [0, 0], sizes = [48, 8], strides = [1, 1]} : vector<48x16xf32> to vector<48x8xf32>
    %306 = vector.extract_strided_slice %304 {offsets = [0, 8], sizes = [48, 8], strides = [1, 1]} : vector<48x16xf32> to vector<48x8xf32>
    %307 = arith.mulf %305, %2 : vector<48x8xf32>
    %308 = arith.mulf %306, %3 : vector<48x8xf32>
    %309 = arith.addf %307, %308 : vector<48x8xf32>
    %310 = arith.mulf %306, %2 : vector<48x8xf32>
    %311 = arith.mulf %305, %3 : vector<48x8xf32>
    %312 = arith.subf %310, %311 : vector<48x8xf32>
    %313 = tpu.concatenate %309, %312 in 1 : vector<48x8xf32>, vector<48x8xf32> -> vector<48x16xf32>
    %314 = arith.mulf %304, %304 : vector<48x16xf32>
    %cst_79 = arith.constant dense<0.000000e+00> : vector<48xf32>
    %315 = vector.multi_reduction <add>, %314, %cst_79 [1] : vector<48x16xf32> to vector<48xf32>
    %316 = vector.shape_cast %315 : vector<48xf32> to vector<48x1xf32>
    %cst_80 = arith.constant 1.600000e+01 : f32
    %317 = vector.broadcast %cst_80 : f32 to vector<48x1xf32>
    %318 = arith.divf %316, %317 : vector<48x1xf32>
    %cst_81 = arith.constant 1.1920929E-7 : f32
    %319 = vector.broadcast %cst_81 : f32 to vector<48x1xf32>
    %320 = arith.addf %318, %319 : vector<48x1xf32>
    %321 = math.rsqrt %320 : vector<48x1xf32>
    %cst_82 = arith.constant 1.000000e+00 : f32
    %322 = vector.broadcast %cst_82 : f32 to vector<48x1xf32>
    %323 = arith.mulf %321, %322 : vector<48x1xf32>
    %324 = vector.broadcast %323 : vector<48x1xf32> to vector<48x16xf32>
    %325 = arith.mulf %313, %324 : vector<48x16xf32>
    %326 = arith.truncf %325 : vector<48x16xf32> to vector<48x16xbf16>
    %327 = vector.extract_strided_slice %20 {offsets = [0, 176], sizes = [48, 16], strides = [1, 1]} : vector<48x192xf32> to vector<48x16xf32>
    %328 = arith.truncf %327 : vector<48x16xf32> to vector<48x16xbf16>
    %329 = vector.extract_strided_slice %303 {offsets = [0, 0], sizes = [24, 16], strides = [1, 1]} : vector<48x16xbf16> to vector<24x16xbf16>
    %330 = vector.extract_strided_slice %326 {offsets = [0, 0], sizes = [24, 16], strides = [1, 1]} : vector<48x16xbf16> to vector<24x16xbf16>
    %cst_83 = arith.constant dense<0.000000e+00> : vector<24x24xf32>
    %331 = tpu.matmul %329, %330, %cst_83 {dimension_numbers = #tpu.dot_dimension_numbers<[1], [1], [0], [0], [0, 0, 1, 0], [], []>} : vector<24x16xbf16>, vector<24x16xbf16>, vector<24x24xf32> -> vector<24x24xf32>
    %cst_84 = arith.constant -1.000000e+30 : f32
    %332 = vector.broadcast %cst_84 : f32 to vector<24x24xf32>
    %333 = arith.select %25, %331, %332 : vector<24x24xi1>, vector<24x24xf32>
    %cst_85 = arith.constant dense<0xFF800000> : vector<24xf32>
    %334 = vector.multi_reduction <maximumf>, %333, %cst_85 [1] : vector<24x24xf32> to vector<24xf32>
    %335 = vector.shape_cast %334 : vector<24xf32> to vector<24x1xf32>
    %336 = vector.broadcast %335 : vector<24x1xf32> to vector<24x24xf32>
    %337 = arith.subf %333, %336 : vector<24x24xf32>
    %338 = math.exp %337 : vector<24x24xf32>
    %339 = arith.truncf %338 : vector<24x24xf32> to vector<24x24xbf16>
    %340 = vector.extract_strided_slice %328 {offsets = [0, 0], sizes = [24, 16], strides = [1, 1]} : vector<48x16xbf16> to vector<24x16xbf16>
    %cst_86 = arith.constant dense<0.000000e+00> : vector<24x16xf32>
    %341 = tpu.matmul %339, %340, %cst_86 {dimension_numbers = #tpu.dot_dimension_numbers<[1], [0], [0], [1], [0, 0, 1, 1], [], []>} : vector<24x24xbf16>, vector<24x16xbf16>, vector<24x16xf32> -> vector<24x16xf32>
    %cst_87 = arith.constant dense<0.000000e+00> : vector<24xf32>
    %342 = vector.multi_reduction <add>, %338, %cst_87 [1] : vector<24x24xf32> to vector<24xf32>
    %343 = vector.shape_cast %342 : vector<24xf32> to vector<24x1xf32>
    %344 = tpu.reciprocal %343 {approx = true} : vector<24x1xf32> -> vector<24x1xf32>
    %345 = vector.broadcast %344 : vector<24x1xf32> to vector<24x16xf32>
    %346 = arith.mulf %341, %345 : vector<24x16xf32>
    %347 = vector.extract_strided_slice %303 {offsets = [24, 0], sizes = [24, 16], strides = [1, 1]} : vector<48x16xbf16> to vector<24x16xbf16>
    %348 = vector.extract_strided_slice %326 {offsets = [24, 0], sizes = [24, 16], strides = [1, 1]} : vector<48x16xbf16> to vector<24x16xbf16>
    %cst_88 = arith.constant dense<0.000000e+00> : vector<24x24xf32>
    %349 = tpu.matmul %347, %348, %cst_88 {dimension_numbers = #tpu.dot_dimension_numbers<[1], [1], [0], [0], [0, 0, 1, 0], [], []>} : vector<24x16xbf16>, vector<24x16xbf16>, vector<24x24xf32> -> vector<24x24xf32>
    %cst_89 = arith.constant -1.000000e+30 : f32
    %350 = vector.broadcast %cst_89 : f32 to vector<24x24xf32>
    %351 = arith.select %25, %349, %350 : vector<24x24xi1>, vector<24x24xf32>
    %cst_90 = arith.constant dense<0xFF800000> : vector<24xf32>
    %352 = vector.multi_reduction <maximumf>, %351, %cst_90 [1] : vector<24x24xf32> to vector<24xf32>
    %353 = vector.shape_cast %352 : vector<24xf32> to vector<24x1xf32>
    %354 = vector.broadcast %353 : vector<24x1xf32> to vector<24x24xf32>
    %355 = arith.subf %351, %354 : vector<24x24xf32>
    %356 = math.exp %355 : vector<24x24xf32>
    %357 = arith.truncf %356 : vector<24x24xf32> to vector<24x24xbf16>
    %358 = vector.extract_strided_slice %328 {offsets = [24, 0], sizes = [24, 16], strides = [1, 1]} : vector<48x16xbf16> to vector<24x16xbf16>
    %cst_91 = arith.constant dense<0.000000e+00> : vector<24x16xf32>
    %359 = tpu.matmul %357, %358, %cst_91 {dimension_numbers = #tpu.dot_dimension_numbers<[1], [0], [0], [1], [0, 0, 1, 1], [], []>} : vector<24x24xbf16>, vector<24x16xbf16>, vector<24x16xf32> -> vector<24x16xf32>
    %cst_92 = arith.constant dense<0.000000e+00> : vector<24xf32>
    %360 = vector.multi_reduction <add>, %356, %cst_92 [1] : vector<24x24xf32> to vector<24xf32>
    %361 = vector.shape_cast %360 : vector<24xf32> to vector<24x1xf32>
    %362 = tpu.reciprocal %361 {approx = true} : vector<24x1xf32> -> vector<24x1xf32>
    %363 = vector.broadcast %362 : vector<24x1xf32> to vector<24x16xf32>
    %364 = arith.mulf %359, %363 : vector<24x16xf32>
    %365 = tpu.concatenate %346, %364 in 0 : vector<24x16xf32>, vector<24x16xf32> -> vector<48x16xf32>
    %366 = tpu.concatenate %110, %195, %280, %365 in 1 : vector<48x16xf32>, vector<48x16xf32>, vector<48x16xf32>, vector<48x16xf32> -> vector<48x64xf32>
    %367 = arith.truncf %366 : vector<48x64xf32> to vector<48x64xbf16>
    %c0_93 = arith.constant 0 : index
    %c0_94 = arith.constant 0 : index
    %368 = vector.load %arg4[%c0_93, %c0_94] : memref<64x64xbf16, #tpu.memory_space<vmem>>, vector<64x64xbf16>
    %cst_95 = arith.constant dense<0.000000e+00> : vector<48x64xf32>
    %369 = tpu.matmul %367, %368, %cst_95 {dimension_numbers = #tpu.dot_dimension_numbers<[1], [0], [0], [1], [0, 0, 1, 1], [], []>} : vector<48x64xbf16>, vector<64x64xbf16>, vector<48x64xf32> -> vector<48x64xf32>
    %370 = arith.addf %1, %369 : vector<48x64xf32>
    %371 = arith.mulf %0, %0 : vector<16x64xf32>
    %cst_96 = arith.constant dense<0.000000e+00> : vector<16xf32>
    %372 = vector.multi_reduction <add>, %371, %cst_96 [1] : vector<16x64xf32> to vector<16xf32>
    %373 = vector.shape_cast %372 : vector<16xf32> to vector<16x1xf32>
    %cst_97 = arith.constant 6.400000e+01 : f32
    %374 = vector.broadcast %cst_97 : f32 to vector<16x1xf32>
    %375 = arith.divf %373, %374 : vector<16x1xf32>
    %cst_98 = arith.constant 1.1920929E-7 : f32
    %376 = vector.broadcast %cst_98 : f32 to vector<16x1xf32>
    %377 = arith.addf %375, %376 : vector<16x1xf32>
    %378 = math.rsqrt %377 : vector<16x1xf32>
    %cst_99 = arith.constant 1.000000e+00 : f32
    %379 = vector.broadcast %cst_99 : f32 to vector<16x1xf32>
    %380 = arith.mulf %378, %379 : vector<16x1xf32>
    %381 = vector.broadcast %380 : vector<16x1xf32> to vector<16x64xf32>
    %382 = arith.mulf %0, %381 : vector<16x64xf32>
    %383 = arith.truncf %382 : vector<16x64xf32> to vector<16x64xbf16>
    %384 = arith.mulf %370, %370 : vector<48x64xf32>
    %cst_100 = arith.constant dense<0.000000e+00> : vector<48xf32>
    %385 = vector.multi_reduction <add>, %384, %cst_100 [1] : vector<48x64xf32> to vector<48xf32>
    %386 = vector.shape_cast %385 : vector<48xf32> to vector<48x1xf32>
    %cst_101 = arith.constant 6.400000e+01 : f32
    %387 = vector.broadcast %cst_101 : f32 to vector<48x1xf32>
    %388 = arith.divf %386, %387 : vector<48x1xf32>
    %cst_102 = arith.constant 1.1920929E-7 : f32
    %389 = vector.broadcast %cst_102 : f32 to vector<48x1xf32>
    %390 = arith.addf %388, %389 : vector<48x1xf32>
    %391 = math.rsqrt %390 : vector<48x1xf32>
    %cst_103 = arith.constant 1.000000e+00 : f32
    %392 = vector.broadcast %cst_103 : f32 to vector<48x1xf32>
    %393 = arith.mulf %391, %392 : vector<48x1xf32>
    %394 = vector.broadcast %393 : vector<48x1xf32> to vector<48x64xf32>
    %395 = arith.mulf %370, %394 : vector<48x64xf32>
    %396 = arith.truncf %395 : vector<48x64xf32> to vector<48x64xbf16>
    %c0_104 = arith.constant 0 : index
    %c0_105 = arith.constant 0 : index
    %397 = vector.load %arg5[%c0_104, %c0_105] : memref<64x64xbf16, #tpu.memory_space<vmem>>, vector<64x64xbf16>
    %cst_106 = arith.constant dense<0.000000e+00> : vector<16x64xf32>
    %398 = tpu.matmul %383, %397, %cst_106 {dimension_numbers = #tpu.dot_dimension_numbers<[1], [0], [0], [1], [0, 0, 1, 1], [], []>} : vector<16x64xbf16>, vector<64x64xbf16>, vector<16x64xf32> -> vector<16x64xf32>
    %c0_107 = arith.constant 0 : index
    %c0_108 = arith.constant 0 : index
    %399 = vector.load %arg6[%c0_107, %c0_108] : memref<64x128xbf16, #tpu.memory_space<vmem>>, vector<64x128xbf16>
    %cst_109 = arith.constant dense<0.000000e+00> : vector<48x128xf32>
    %400 = tpu.matmul %396, %399, %cst_109 {dimension_numbers = #tpu.dot_dimension_numbers<[1], [0], [0], [1], [0, 0, 1, 1], [], []>} : vector<48x64xbf16>, vector<64x128xbf16>, vector<48x128xf32> -> vector<48x128xf32>
    %401 = vector.extract_strided_slice %398 {offsets = [0, 0], sizes = [16, 16], strides = [1, 1]} : vector<16x64xf32> to vector<16x16xf32>
    %402 = vector.extract_strided_slice %401 {offsets = [0, 0], sizes = [16, 8], strides = [1, 1]} : vector<16x16xf32> to vector<16x8xf32>
    %403 = vector.extract_strided_slice %401 {offsets = [0, 8], sizes = [16, 8], strides = [1, 1]} : vector<16x16xf32> to vector<16x8xf32>
    %404 = arith.mulf %402, %4 : vector<16x8xf32>
    %405 = arith.mulf %403, %5 : vector<16x8xf32>
    %406 = arith.addf %404, %405 : vector<16x8xf32>
    %407 = arith.mulf %403, %4 : vector<16x8xf32>
    %408 = arith.mulf %402, %5 : vector<16x8xf32>
    %409 = arith.subf %407, %408 : vector<16x8xf32>
    %410 = tpu.concatenate %406, %409 in 1 : vector<16x8xf32>, vector<16x8xf32> -> vector<16x16xf32>
    %411 = arith.mulf %401, %401 : vector<16x16xf32>
    %cst_110 = arith.constant dense<0.000000e+00> : vector<16xf32>
    %412 = vector.multi_reduction <add>, %411, %cst_110 [1] : vector<16x16xf32> to vector<16xf32>
    %413 = vector.shape_cast %412 : vector<16xf32> to vector<16x1xf32>
    %cst_111 = arith.constant 1.600000e+01 : f32
    %414 = vector.broadcast %cst_111 : f32 to vector<16x1xf32>
    %415 = arith.divf %413, %414 : vector<16x1xf32>
    %cst_112 = arith.constant 1.1920929E-7 : f32
    %416 = vector.broadcast %cst_112 : f32 to vector<16x1xf32>
    %417 = arith.addf %415, %416 : vector<16x1xf32>
    %418 = math.rsqrt %417 : vector<16x1xf32>
    %cst_113 = arith.constant 2.500000e-01 : f32
    %419 = vector.broadcast %cst_113 : f32 to vector<16x1xf32>
    %420 = arith.mulf %418, %419 : vector<16x1xf32>
    %421 = vector.broadcast %420 : vector<16x1xf32> to vector<16x16xf32>
    %422 = arith.mulf %410, %421 : vector<16x16xf32>
    %423 = vector.extract_strided_slice %400 {offsets = [0, 0], sizes = [48, 16], strides = [1, 1]} : vector<48x128xf32> to vector<48x16xf32>
    %424 = vector.extract_strided_slice %423 {offsets = [0, 0], sizes = [48, 8], strides = [1, 1]} : vector<48x16xf32> to vector<48x8xf32>
    %425 = vector.extract_strided_slice %423 {offsets = [0, 8], sizes = [48, 8], strides = [1, 1]} : vector<48x16xf32> to vector<48x8xf32>
    %426 = arith.mulf %424, %2 : vector<48x8xf32>
    %427 = arith.mulf %425, %3 : vector<48x8xf32>
    %428 = arith.addf %426, %427 : vector<48x8xf32>
    %429 = arith.mulf %425, %2 : vector<48x8xf32>
    %430 = arith.mulf %424, %3 : vector<48x8xf32>
    %431 = arith.subf %429, %430 : vector<48x8xf32>
    %432 = tpu.concatenate %428, %431 in 1 : vector<48x8xf32>, vector<48x8xf32> -> vector<48x16xf32>
    %433 = arith.mulf %423, %423 : vector<48x16xf32>
    %cst_114 = arith.constant dense<0.000000e+00> : vector<48xf32>
    %434 = vector.multi_reduction <add>, %433, %cst_114 [1] : vector<48x16xf32> to vector<48xf32>
    %435 = vector.shape_cast %434 : vector<48xf32> to vector<48x1xf32>
    %cst_115 = arith.constant 1.600000e+01 : f32
    %436 = vector.broadcast %cst_115 : f32 to vector<48x1xf32>
    %437 = arith.divf %435, %436 : vector<48x1xf32>
    %cst_116 = arith.constant 1.1920929E-7 : f32
    %438 = vector.broadcast %cst_116 : f32 to vector<48x1xf32>
    %439 = arith.addf %437, %438 : vector<48x1xf32>
    %440 = math.rsqrt %439 : vector<48x1xf32>
    %cst_117 = arith.constant 1.000000e+00 : f32
    %441 = vector.broadcast %cst_117 : f32 to vector<48x1xf32>
    %442 = arith.mulf %440, %441 : vector<48x1xf32>
    %443 = vector.broadcast %442 : vector<48x1xf32> to vector<48x16xf32>
    %444 = arith.mulf %432, %443 : vector<48x16xf32>
    %445 = vector.extract_strided_slice %400 {offsets = [0, 64], sizes = [48, 16], strides = [1, 1]} : vector<48x128xf32> to vector<48x16xf32>
    %446 = vector.extract_strided_slice %422 {offsets = [0, 0], sizes = [8, 16], strides = [1, 1]} : vector<16x16xf32> to vector<8x16xf32>
    %447 = vector.extract_strided_slice %444 {offsets = [0, 0], sizes = [8, 16], strides = [1, 1]} : vector<48x16xf32> to vector<8x16xf32>
    %448 = arith.mulf %446, %447 : vector<8x16xf32>
    %cst_118 = arith.constant dense<0.000000e+00> : vector<8xf32>
    %449 = vector.multi_reduction <add>, %448, %cst_118 [1] : vector<8x16xf32> to vector<8xf32>
    %450 = vector.shape_cast %449 : vector<8xf32> to vector<8x1xf32>
    %451 = vector.extract_strided_slice %444 {offsets = [8, 0], sizes = [8, 16], strides = [1, 1]} : vector<48x16xf32> to vector<8x16xf32>
    %452 = arith.mulf %446, %451 : vector<8x16xf32>
    %cst_119 = arith.constant dense<0.000000e+00> : vector<8xf32>
    %453 = vector.multi_reduction <add>, %452, %cst_119 [1] : vector<8x16xf32> to vector<8xf32>
    %454 = vector.shape_cast %453 : vector<8xf32> to vector<8x1xf32>
    %455 = vector.extract_strided_slice %444 {offsets = [16, 0], sizes = [8, 16], strides = [1, 1]} : vector<48x16xf32> to vector<8x16xf32>
    %456 = arith.mulf %446, %455 : vector<8x16xf32>
    %cst_120 = arith.constant dense<0.000000e+00> : vector<8xf32>
    %457 = vector.multi_reduction <add>, %456, %cst_120 [1] : vector<8x16xf32> to vector<8xf32>
    %458 = vector.shape_cast %457 : vector<8xf32> to vector<8x1xf32>
    %459 = arith.maximumf %450, %454 : vector<8x1xf32>
    %460 = arith.maximumf %459, %458 : vector<8x1xf32>
    %461 = arith.subf %450, %460 : vector<8x1xf32>
    %462 = math.exp %461 : vector<8x1xf32>
    %463 = arith.subf %454, %460 : vector<8x1xf32>
    %464 = math.exp %463 : vector<8x1xf32>
    %465 = arith.subf %458, %460 : vector<8x1xf32>
    %466 = math.exp %465 : vector<8x1xf32>
    %467 = arith.addf %462, %464 : vector<8x1xf32>
    %468 = arith.addf %467, %466 : vector<8x1xf32>
    %cst_121 = arith.constant 0.000000e+00 : f32
    %469 = vector.broadcast %cst_121 : f32 to vector<8x16xf32>
    %470 = vector.extract_strided_slice %445 {offsets = [0, 0], sizes = [8, 16], strides = [1, 1]} : vector<48x16xf32> to vector<8x16xf32>
    %471 = vector.broadcast %462 : vector<8x1xf32> to vector<8x16xf32>
    %472 = arith.mulf %471, %470 : vector<8x16xf32>
    %473 = arith.addf %469, %472 : vector<8x16xf32>
    %474 = vector.extract_strided_slice %445 {offsets = [8, 0], sizes = [8, 16], strides = [1, 1]} : vector<48x16xf32> to vector<8x16xf32>
    %475 = vector.broadcast %464 : vector<8x1xf32> to vector<8x16xf32>
    %476 = arith.mulf %475, %474 : vector<8x16xf32>
    %477 = arith.addf %473, %476 : vector<8x16xf32>
    %478 = vector.extract_strided_slice %445 {offsets = [16, 0], sizes = [8, 16], strides = [1, 1]} : vector<48x16xf32> to vector<8x16xf32>
    %479 = vector.broadcast %466 : vector<8x1xf32> to vector<8x16xf32>
    %480 = arith.mulf %479, %478 : vector<8x16xf32>
    %481 = arith.addf %477, %480 : vector<8x16xf32>
    %482 = tpu.reciprocal %468 {approx = true} : vector<8x1xf32> -> vector<8x1xf32>
    %483 = vector.broadcast %482 : vector<8x1xf32> to vector<8x16xf32>
    %484 = arith.mulf %481, %483 : vector<8x16xf32>
    %485 = vector.extract_strided_slice %422 {offsets = [8, 0], sizes = [8, 16], strides = [1, 1]} : vector<16x16xf32> to vector<8x16xf32>
    %486 = vector.extract_strided_slice %444 {offsets = [24, 0], sizes = [8, 16], strides = [1, 1]} : vector<48x16xf32> to vector<8x16xf32>
    %487 = arith.mulf %485, %486 : vector<8x16xf32>
    %cst_122 = arith.constant dense<0.000000e+00> : vector<8xf32>
    %488 = vector.multi_reduction <add>, %487, %cst_122 [1] : vector<8x16xf32> to vector<8xf32>
    %489 = vector.shape_cast %488 : vector<8xf32> to vector<8x1xf32>
    %490 = vector.extract_strided_slice %444 {offsets = [32, 0], sizes = [8, 16], strides = [1, 1]} : vector<48x16xf32> to vector<8x16xf32>
    %491 = arith.mulf %485, %490 : vector<8x16xf32>
    %cst_123 = arith.constant dense<0.000000e+00> : vector<8xf32>
    %492 = vector.multi_reduction <add>, %491, %cst_123 [1] : vector<8x16xf32> to vector<8xf32>
    %493 = vector.shape_cast %492 : vector<8xf32> to vector<8x1xf32>
    %494 = vector.extract_strided_slice %444 {offsets = [40, 0], sizes = [8, 16], strides = [1, 1]} : vector<48x16xf32> to vector<8x16xf32>
    %495 = arith.mulf %485, %494 : vector<8x16xf32>
    %cst_124 = arith.constant dense<0.000000e+00> : vector<8xf32>
    %496 = vector.multi_reduction <add>, %495, %cst_124 [1] : vector<8x16xf32> to vector<8xf32>
    %497 = vector.shape_cast %496 : vector<8xf32> to vector<8x1xf32>
    %498 = arith.maximumf %489, %493 : vector<8x1xf32>
    %499 = arith.maximumf %498, %497 : vector<8x1xf32>
    %500 = arith.subf %489, %499 : vector<8x1xf32>
    %501 = math.exp %500 : vector<8x1xf32>
    %502 = arith.subf %493, %499 : vector<8x1xf32>
    %503 = math.exp %502 : vector<8x1xf32>
    %504 = arith.subf %497, %499 : vector<8x1xf32>
    %505 = math.exp %504 : vector<8x1xf32>
    %506 = arith.addf %501, %503 : vector<8x1xf32>
    %507 = arith.addf %506, %505 : vector<8x1xf32>
    %cst_125 = arith.constant 0.000000e+00 : f32
    %508 = vector.broadcast %cst_125 : f32 to vector<8x16xf32>
    %509 = vector.extract_strided_slice %445 {offsets = [24, 0], sizes = [8, 16], strides = [1, 1]} : vector<48x16xf32> to vector<8x16xf32>
    %510 = vector.broadcast %501 : vector<8x1xf32> to vector<8x16xf32>
    %511 = arith.mulf %510, %509 : vector<8x16xf32>
    %512 = arith.addf %508, %511 : vector<8x16xf32>
    %513 = vector.extract_strided_slice %445 {offsets = [32, 0], sizes = [8, 16], strides = [1, 1]} : vector<48x16xf32> to vector<8x16xf32>
    %514 = vector.broadcast %503 : vector<8x1xf32> to vector<8x16xf32>
    %515 = arith.mulf %514, %513 : vector<8x16xf32>
    %516 = arith.addf %512, %515 : vector<8x16xf32>
    %517 = vector.extract_strided_slice %445 {offsets = [40, 0], sizes = [8, 16], strides = [1, 1]} : vector<48x16xf32> to vector<8x16xf32>
    %518 = vector.broadcast %505 : vector<8x1xf32> to vector<8x16xf32>
    %519 = arith.mulf %518, %517 : vector<8x16xf32>
    %520 = arith.addf %516, %519 : vector<8x16xf32>
    %521 = tpu.reciprocal %507 {approx = true} : vector<8x1xf32> -> vector<8x1xf32>
    %522 = vector.broadcast %521 : vector<8x1xf32> to vector<8x16xf32>
    %523 = arith.mulf %520, %522 : vector<8x16xf32>
    %524 = tpu.concatenate %484, %523 in 0 : vector<8x16xf32>, vector<8x16xf32> -> vector<16x16xf32>
    %525 = vector.extract_strided_slice %398 {offsets = [0, 16], sizes = [16, 16], strides = [1, 1]} : vector<16x64xf32> to vector<16x16xf32>
    %526 = vector.extract_strided_slice %525 {offsets = [0, 0], sizes = [16, 8], strides = [1, 1]} : vector<16x16xf32> to vector<16x8xf32>
    %527 = vector.extract_strided_slice %525 {offsets = [0, 8], sizes = [16, 8], strides = [1, 1]} : vector<16x16xf32> to vector<16x8xf32>
    %528 = arith.mulf %526, %4 : vector<16x8xf32>
    %529 = arith.mulf %527, %5 : vector<16x8xf32>
    %530 = arith.addf %528, %529 : vector<16x8xf32>
    %531 = arith.mulf %527, %4 : vector<16x8xf32>
    %532 = arith.mulf %526, %5 : vector<16x8xf32>
    %533 = arith.subf %531, %532 : vector<16x8xf32>
    %534 = tpu.concatenate %530, %533 in 1 : vector<16x8xf32>, vector<16x8xf32> -> vector<16x16xf32>
    %535 = arith.mulf %525, %525 : vector<16x16xf32>
    %cst_126 = arith.constant dense<0.000000e+00> : vector<16xf32>
    %536 = vector.multi_reduction <add>, %535, %cst_126 [1] : vector<16x16xf32> to vector<16xf32>
    %537 = vector.shape_cast %536 : vector<16xf32> to vector<16x1xf32>
    %cst_127 = arith.constant 1.600000e+01 : f32
    %538 = vector.broadcast %cst_127 : f32 to vector<16x1xf32>
    %539 = arith.divf %537, %538 : vector<16x1xf32>
    %cst_128 = arith.constant 1.1920929E-7 : f32
    %540 = vector.broadcast %cst_128 : f32 to vector<16x1xf32>
    %541 = arith.addf %539, %540 : vector<16x1xf32>
    %542 = math.rsqrt %541 : vector<16x1xf32>
    %cst_129 = arith.constant 2.500000e-01 : f32
    %543 = vector.broadcast %cst_129 : f32 to vector<16x1xf32>
    %544 = arith.mulf %542, %543 : vector<16x1xf32>
    %545 = vector.broadcast %544 : vector<16x1xf32> to vector<16x16xf32>
    %546 = arith.mulf %534, %545 : vector<16x16xf32>
    %547 = vector.extract_strided_slice %400 {offsets = [0, 16], sizes = [48, 16], strides = [1, 1]} : vector<48x128xf32> to vector<48x16xf32>
    %548 = vector.extract_strided_slice %547 {offsets = [0, 0], sizes = [48, 8], strides = [1, 1]} : vector<48x16xf32> to vector<48x8xf32>
    %549 = vector.extract_strided_slice %547 {offsets = [0, 8], sizes = [48, 8], strides = [1, 1]} : vector<48x16xf32> to vector<48x8xf32>
    %550 = arith.mulf %548, %2 : vector<48x8xf32>
    %551 = arith.mulf %549, %3 : vector<48x8xf32>
    %552 = arith.addf %550, %551 : vector<48x8xf32>
    %553 = arith.mulf %549, %2 : vector<48x8xf32>
    %554 = arith.mulf %548, %3 : vector<48x8xf32>
    %555 = arith.subf %553, %554 : vector<48x8xf32>
    %556 = tpu.concatenate %552, %555 in 1 : vector<48x8xf32>, vector<48x8xf32> -> vector<48x16xf32>
    %557 = arith.mulf %547, %547 : vector<48x16xf32>
    %cst_130 = arith.constant dense<0.000000e+00> : vector<48xf32>
    %558 = vector.multi_reduction <add>, %557, %cst_130 [1] : vector<48x16xf32> to vector<48xf32>
    %559 = vector.shape_cast %558 : vector<48xf32> to vector<48x1xf32>
    %cst_131 = arith.constant 1.600000e+01 : f32
    %560 = vector.broadcast %cst_131 : f32 to vector<48x1xf32>
    %561 = arith.divf %559, %560 : vector<48x1xf32>
    %cst_132 = arith.constant 1.1920929E-7 : f32
    %562 = vector.broadcast %cst_132 : f32 to vector<48x1xf32>
    %563 = arith.addf %561, %562 : vector<48x1xf32>
    %564 = math.rsqrt %563 : vector<48x1xf32>
    %cst_133 = arith.constant 1.000000e+00 : f32
    %565 = vector.broadcast %cst_133 : f32 to vector<48x1xf32>
    %566 = arith.mulf %564, %565 : vector<48x1xf32>
    %567 = vector.broadcast %566 : vector<48x1xf32> to vector<48x16xf32>
    %568 = arith.mulf %556, %567 : vector<48x16xf32>
    %569 = vector.extract_strided_slice %400 {offsets = [0, 80], sizes = [48, 16], strides = [1, 1]} : vector<48x128xf32> to vector<48x16xf32>
    %570 = vector.extract_strided_slice %546 {offsets = [0, 0], sizes = [8, 16], strides = [1, 1]} : vector<16x16xf32> to vector<8x16xf32>
    %571 = vector.extract_strided_slice %568 {offsets = [0, 0], sizes = [8, 16], strides = [1, 1]} : vector<48x16xf32> to vector<8x16xf32>
    %572 = arith.mulf %570, %571 : vector<8x16xf32>
    %cst_134 = arith.constant dense<0.000000e+00> : vector<8xf32>
    %573 = vector.multi_reduction <add>, %572, %cst_134 [1] : vector<8x16xf32> to vector<8xf32>
    %574 = vector.shape_cast %573 : vector<8xf32> to vector<8x1xf32>
    %575 = vector.extract_strided_slice %568 {offsets = [8, 0], sizes = [8, 16], strides = [1, 1]} : vector<48x16xf32> to vector<8x16xf32>
    %576 = arith.mulf %570, %575 : vector<8x16xf32>
    %cst_135 = arith.constant dense<0.000000e+00> : vector<8xf32>
    %577 = vector.multi_reduction <add>, %576, %cst_135 [1] : vector<8x16xf32> to vector<8xf32>
    %578 = vector.shape_cast %577 : vector<8xf32> to vector<8x1xf32>
    %579 = vector.extract_strided_slice %568 {offsets = [16, 0], sizes = [8, 16], strides = [1, 1]} : vector<48x16xf32> to vector<8x16xf32>
    %580 = arith.mulf %570, %579 : vector<8x16xf32>
    %cst_136 = arith.constant dense<0.000000e+00> : vector<8xf32>
    %581 = vector.multi_reduction <add>, %580, %cst_136 [1] : vector<8x16xf32> to vector<8xf32>
    %582 = vector.shape_cast %581 : vector<8xf32> to vector<8x1xf32>
    %583 = arith.maximumf %574, %578 : vector<8x1xf32>
    %584 = arith.maximumf %583, %582 : vector<8x1xf32>
    %585 = arith.subf %574, %584 : vector<8x1xf32>
    %586 = math.exp %585 : vector<8x1xf32>
    %587 = arith.subf %578, %584 : vector<8x1xf32>
    %588 = math.exp %587 : vector<8x1xf32>
    %589 = arith.subf %582, %584 : vector<8x1xf32>
    %590 = math.exp %589 : vector<8x1xf32>
    %591 = arith.addf %586, %588 : vector<8x1xf32>
    %592 = arith.addf %591, %590 : vector<8x1xf32>
    %cst_137 = arith.constant 0.000000e+00 : f32
    %593 = vector.broadcast %cst_137 : f32 to vector<8x16xf32>
    %594 = vector.extract_strided_slice %569 {offsets = [0, 0], sizes = [8, 16], strides = [1, 1]} : vector<48x16xf32> to vector<8x16xf32>
    %595 = vector.broadcast %586 : vector<8x1xf32> to vector<8x16xf32>
    %596 = arith.mulf %595, %594 : vector<8x16xf32>
    %597 = arith.addf %593, %596 : vector<8x16xf32>
    %598 = vector.extract_strided_slice %569 {offsets = [8, 0], sizes = [8, 16], strides = [1, 1]} : vector<48x16xf32> to vector<8x16xf32>
    %599 = vector.broadcast %588 : vector<8x1xf32> to vector<8x16xf32>
    %600 = arith.mulf %599, %598 : vector<8x16xf32>
    %601 = arith.addf %597, %600 : vector<8x16xf32>
    %602 = vector.extract_strided_slice %569 {offsets = [16, 0], sizes = [8, 16], strides = [1, 1]} : vector<48x16xf32> to vector<8x16xf32>
    %603 = vector.broadcast %590 : vector<8x1xf32> to vector<8x16xf32>
    %604 = arith.mulf %603, %602 : vector<8x16xf32>
    %605 = arith.addf %601, %604 : vector<8x16xf32>
    %606 = tpu.reciprocal %592 {approx = true} : vector<8x1xf32> -> vector<8x1xf32>
    %607 = vector.broadcast %606 : vector<8x1xf32> to vector<8x16xf32>
    %608 = arith.mulf %605, %607 : vector<8x16xf32>
    %609 = vector.extract_strided_slice %546 {offsets = [8, 0], sizes = [8, 16], strides = [1, 1]} : vector<16x16xf32> to vector<8x16xf32>
    %610 = vector.extract_strided_slice %568 {offsets = [24, 0], sizes = [8, 16], strides = [1, 1]} : vector<48x16xf32> to vector<8x16xf32>
    %611 = arith.mulf %609, %610 : vector<8x16xf32>
    %cst_138 = arith.constant dense<0.000000e+00> : vector<8xf32>
    %612 = vector.multi_reduction <add>, %611, %cst_138 [1] : vector<8x16xf32> to vector<8xf32>
    %613 = vector.shape_cast %612 : vector<8xf32> to vector<8x1xf32>
    %614 = vector.extract_strided_slice %568 {offsets = [32, 0], sizes = [8, 16], strides = [1, 1]} : vector<48x16xf32> to vector<8x16xf32>
    %615 = arith.mulf %609, %614 : vector<8x16xf32>
    %cst_139 = arith.constant dense<0.000000e+00> : vector<8xf32>
    %616 = vector.multi_reduction <add>, %615, %cst_139 [1] : vector<8x16xf32> to vector<8xf32>
    %617 = vector.shape_cast %616 : vector<8xf32> to vector<8x1xf32>
    %618 = vector.extract_strided_slice %568 {offsets = [40, 0], sizes = [8, 16], strides = [1, 1]} : vector<48x16xf32> to vector<8x16xf32>
    %619 = arith.mulf %609, %618 : vector<8x16xf32>
    %cst_140 = arith.constant dense<0.000000e+00> : vector<8xf32>
    %620 = vector.multi_reduction <add>, %619, %cst_140 [1] : vector<8x16xf32> to vector<8xf32>
    %621 = vector.shape_cast %620 : vector<8xf32> to vector<8x1xf32>
    %622 = arith.maximumf %613, %617 : vector<8x1xf32>
    %623 = arith.maximumf %622, %621 : vector<8x1xf32>
    %624 = arith.subf %613, %623 : vector<8x1xf32>
    %625 = math.exp %624 : vector<8x1xf32>
    %626 = arith.subf %617, %623 : vector<8x1xf32>
    %627 = math.exp %626 : vector<8x1xf32>
    %628 = arith.subf %621, %623 : vector<8x1xf32>
    %629 = math.exp %628 : vector<8x1xf32>
    %630 = arith.addf %625, %627 : vector<8x1xf32>
    %631 = arith.addf %630, %629 : vector<8x1xf32>
    %cst_141 = arith.constant 0.000000e+00 : f32
    %632 = vector.broadcast %cst_141 : f32 to vector<8x16xf32>
    %633 = vector.extract_strided_slice %569 {offsets = [24, 0], sizes = [8, 16], strides = [1, 1]} : vector<48x16xf32> to vector<8x16xf32>
    %634 = vector.broadcast %625 : vector<8x1xf32> to vector<8x16xf32>
    %635 = arith.mulf %634, %633 : vector<8x16xf32>
    %636 = arith.addf %632, %635 : vector<8x16xf32>
    %637 = vector.extract_strided_slice %569 {offsets = [32, 0], sizes = [8, 16], strides = [1, 1]} : vector<48x16xf32> to vector<8x16xf32>
    %638 = vector.broadcast %627 : vector<8x1xf32> to vector<8x16xf32>
    %639 = arith.mulf %638, %637 : vector<8x16xf32>
    %640 = arith.addf %636, %639 : vector<8x16xf32>
    %641 = vector.extract_strided_slice %569 {offsets = [40, 0], sizes = [8, 16], strides = [1, 1]} : vector<48x16xf32> to vector<8x16xf32>
    %642 = vector.broadcast %629 : vector<8x1xf32> to vector<8x16xf32>
    %643 = arith.mulf %642, %641 : vector<8x16xf32>
    %644 = arith.addf %640, %643 : vector<8x16xf32>
    %645 = tpu.reciprocal %631 {approx = true} : vector<8x1xf32> -> vector<8x1xf32>
    %646 = vector.broadcast %645 : vector<8x1xf32> to vector<8x16xf32>
    %647 = arith.mulf %644, %646 : vector<8x16xf32>
    %648 = tpu.concatenate %608, %647 in 0 : vector<8x16xf32>, vector<8x16xf32> -> vector<16x16xf32>
    %649 = vector.extract_strided_slice %398 {offsets = [0, 32], sizes = [16, 16], strides = [1, 1]} : vector<16x64xf32> to vector<16x16xf32>
    %650 = vector.extract_strided_slice %649 {offsets = [0, 0], sizes = [16, 8], strides = [1, 1]} : vector<16x16xf32> to vector<16x8xf32>
    %651 = vector.extract_strided_slice %649 {offsets = [0, 8], sizes = [16, 8], strides = [1, 1]} : vector<16x16xf32> to vector<16x8xf32>
    %652 = arith.mulf %650, %4 : vector<16x8xf32>
    %653 = arith.mulf %651, %5 : vector<16x8xf32>
    %654 = arith.addf %652, %653 : vector<16x8xf32>
    %655 = arith.mulf %651, %4 : vector<16x8xf32>
    %656 = arith.mulf %650, %5 : vector<16x8xf32>
    %657 = arith.subf %655, %656 : vector<16x8xf32>
    %658 = tpu.concatenate %654, %657 in 1 : vector<16x8xf32>, vector<16x8xf32> -> vector<16x16xf32>
    %659 = arith.mulf %649, %649 : vector<16x16xf32>
    %cst_142 = arith.constant dense<0.000000e+00> : vector<16xf32>
    %660 = vector.multi_reduction <add>, %659, %cst_142 [1] : vector<16x16xf32> to vector<16xf32>
    %661 = vector.shape_cast %660 : vector<16xf32> to vector<16x1xf32>
    %cst_143 = arith.constant 1.600000e+01 : f32
    %662 = vector.broadcast %cst_143 : f32 to vector<16x1xf32>
    %663 = arith.divf %661, %662 : vector<16x1xf32>
    %cst_144 = arith.constant 1.1920929E-7 : f32
    %664 = vector.broadcast %cst_144 : f32 to vector<16x1xf32>
    %665 = arith.addf %663, %664 : vector<16x1xf32>
    %666 = math.rsqrt %665 : vector<16x1xf32>
    %cst_145 = arith.constant 2.500000e-01 : f32
    %667 = vector.broadcast %cst_145 : f32 to vector<16x1xf32>
    %668 = arith.mulf %666, %667 : vector<16x1xf32>
    %669 = vector.broadcast %668 : vector<16x1xf32> to vector<16x16xf32>
    %670 = arith.mulf %658, %669 : vector<16x16xf32>
    %671 = vector.extract_strided_slice %400 {offsets = [0, 32], sizes = [48, 16], strides = [1, 1]} : vector<48x128xf32> to vector<48x16xf32>
    %672 = vector.extract_strided_slice %671 {offsets = [0, 0], sizes = [48, 8], strides = [1, 1]} : vector<48x16xf32> to vector<48x8xf32>
    %673 = vector.extract_strided_slice %671 {offsets = [0, 8], sizes = [48, 8], strides = [1, 1]} : vector<48x16xf32> to vector<48x8xf32>
    %674 = arith.mulf %672, %2 : vector<48x8xf32>
    %675 = arith.mulf %673, %3 : vector<48x8xf32>
    %676 = arith.addf %674, %675 : vector<48x8xf32>
    %677 = arith.mulf %673, %2 : vector<48x8xf32>
    %678 = arith.mulf %672, %3 : vector<48x8xf32>
    %679 = arith.subf %677, %678 : vector<48x8xf32>
    %680 = tpu.concatenate %676, %679 in 1 : vector<48x8xf32>, vector<48x8xf32> -> vector<48x16xf32>
    %681 = arith.mulf %671, %671 : vector<48x16xf32>
    %cst_146 = arith.constant dense<0.000000e+00> : vector<48xf32>
    %682 = vector.multi_reduction <add>, %681, %cst_146 [1] : vector<48x16xf32> to vector<48xf32>
    %683 = vector.shape_cast %682 : vector<48xf32> to vector<48x1xf32>
    %cst_147 = arith.constant 1.600000e+01 : f32
    %684 = vector.broadcast %cst_147 : f32 to vector<48x1xf32>
    %685 = arith.divf %683, %684 : vector<48x1xf32>
    %cst_148 = arith.constant 1.1920929E-7 : f32
    %686 = vector.broadcast %cst_148 : f32 to vector<48x1xf32>
    %687 = arith.addf %685, %686 : vector<48x1xf32>
    %688 = math.rsqrt %687 : vector<48x1xf32>
    %cst_149 = arith.constant 1.000000e+00 : f32
    %689 = vector.broadcast %cst_149 : f32 to vector<48x1xf32>
    %690 = arith.mulf %688, %689 : vector<48x1xf32>
    %691 = vector.broadcast %690 : vector<48x1xf32> to vector<48x16xf32>
    %692 = arith.mulf %680, %691 : vector<48x16xf32>
    %693 = vector.extract_strided_slice %400 {offsets = [0, 96], sizes = [48, 16], strides = [1, 1]} : vector<48x128xf32> to vector<48x16xf32>
    %694 = vector.extract_strided_slice %670 {offsets = [0, 0], sizes = [8, 16], strides = [1, 1]} : vector<16x16xf32> to vector<8x16xf32>
    %695 = vector.extract_strided_slice %692 {offsets = [0, 0], sizes = [8, 16], strides = [1, 1]} : vector<48x16xf32> to vector<8x16xf32>
    %696 = arith.mulf %694, %695 : vector<8x16xf32>
    %cst_150 = arith.constant dense<0.000000e+00> : vector<8xf32>
    %697 = vector.multi_reduction <add>, %696, %cst_150 [1] : vector<8x16xf32> to vector<8xf32>
    %698 = vector.shape_cast %697 : vector<8xf32> to vector<8x1xf32>
    %699 = vector.extract_strided_slice %692 {offsets = [8, 0], sizes = [8, 16], strides = [1, 1]} : vector<48x16xf32> to vector<8x16xf32>
    %700 = arith.mulf %694, %699 : vector<8x16xf32>
    %cst_151 = arith.constant dense<0.000000e+00> : vector<8xf32>
    %701 = vector.multi_reduction <add>, %700, %cst_151 [1] : vector<8x16xf32> to vector<8xf32>
    %702 = vector.shape_cast %701 : vector<8xf32> to vector<8x1xf32>
    %703 = vector.extract_strided_slice %692 {offsets = [16, 0], sizes = [8, 16], strides = [1, 1]} : vector<48x16xf32> to vector<8x16xf32>
    %704 = arith.mulf %694, %703 : vector<8x16xf32>
    %cst_152 = arith.constant dense<0.000000e+00> : vector<8xf32>
    %705 = vector.multi_reduction <add>, %704, %cst_152 [1] : vector<8x16xf32> to vector<8xf32>
    %706 = vector.shape_cast %705 : vector<8xf32> to vector<8x1xf32>
    %707 = arith.maximumf %698, %702 : vector<8x1xf32>
    %708 = arith.maximumf %707, %706 : vector<8x1xf32>
    %709 = arith.subf %698, %708 : vector<8x1xf32>
    %710 = math.exp %709 : vector<8x1xf32>
    %711 = arith.subf %702, %708 : vector<8x1xf32>
    %712 = math.exp %711 : vector<8x1xf32>
    %713 = arith.subf %706, %708 : vector<8x1xf32>
    %714 = math.exp %713 : vector<8x1xf32>
    %715 = arith.addf %710, %712 : vector<8x1xf32>
    %716 = arith.addf %715, %714 : vector<8x1xf32>
    %cst_153 = arith.constant 0.000000e+00 : f32
    %717 = vector.broadcast %cst_153 : f32 to vector<8x16xf32>
    %718 = vector.extract_strided_slice %693 {offsets = [0, 0], sizes = [8, 16], strides = [1, 1]} : vector<48x16xf32> to vector<8x16xf32>
    %719 = vector.broadcast %710 : vector<8x1xf32> to vector<8x16xf32>
    %720 = arith.mulf %719, %718 : vector<8x16xf32>
    %721 = arith.addf %717, %720 : vector<8x16xf32>
    %722 = vector.extract_strided_slice %693 {offsets = [8, 0], sizes = [8, 16], strides = [1, 1]} : vector<48x16xf32> to vector<8x16xf32>
    %723 = vector.broadcast %712 : vector<8x1xf32> to vector<8x16xf32>
    %724 = arith.mulf %723, %722 : vector<8x16xf32>
    %725 = arith.addf %721, %724 : vector<8x16xf32>
    %726 = vector.extract_strided_slice %693 {offsets = [16, 0], sizes = [8, 16], strides = [1, 1]} : vector<48x16xf32> to vector<8x16xf32>
    %727 = vector.broadcast %714 : vector<8x1xf32> to vector<8x16xf32>
    %728 = arith.mulf %727, %726 : vector<8x16xf32>
    %729 = arith.addf %725, %728 : vector<8x16xf32>
    %730 = tpu.reciprocal %716 {approx = true} : vector<8x1xf32> -> vector<8x1xf32>
    %731 = vector.broadcast %730 : vector<8x1xf32> to vector<8x16xf32>
    %732 = arith.mulf %729, %731 : vector<8x16xf32>
    %733 = vector.extract_strided_slice %670 {offsets = [8, 0], sizes = [8, 16], strides = [1, 1]} : vector<16x16xf32> to vector<8x16xf32>
    %734 = vector.extract_strided_slice %692 {offsets = [24, 0], sizes = [8, 16], strides = [1, 1]} : vector<48x16xf32> to vector<8x16xf32>
    %735 = arith.mulf %733, %734 : vector<8x16xf32>
    %cst_154 = arith.constant dense<0.000000e+00> : vector<8xf32>
    %736 = vector.multi_reduction <add>, %735, %cst_154 [1] : vector<8x16xf32> to vector<8xf32>
    %737 = vector.shape_cast %736 : vector<8xf32> to vector<8x1xf32>
    %738 = vector.extract_strided_slice %692 {offsets = [32, 0], sizes = [8, 16], strides = [1, 1]} : vector<48x16xf32> to vector<8x16xf32>
    %739 = arith.mulf %733, %738 : vector<8x16xf32>
    %cst_155 = arith.constant dense<0.000000e+00> : vector<8xf32>
    %740 = vector.multi_reduction <add>, %739, %cst_155 [1] : vector<8x16xf32> to vector<8xf32>
    %741 = vector.shape_cast %740 : vector<8xf32> to vector<8x1xf32>
    %742 = vector.extract_strided_slice %692 {offsets = [40, 0], sizes = [8, 16], strides = [1, 1]} : vector<48x16xf32> to vector<8x16xf32>
    %743 = arith.mulf %733, %742 : vector<8x16xf32>
    %cst_156 = arith.constant dense<0.000000e+00> : vector<8xf32>
    %744 = vector.multi_reduction <add>, %743, %cst_156 [1] : vector<8x16xf32> to vector<8xf32>
    %745 = vector.shape_cast %744 : vector<8xf32> to vector<8x1xf32>
    %746 = arith.maximumf %737, %741 : vector<8x1xf32>
    %747 = arith.maximumf %746, %745 : vector<8x1xf32>
    %748 = arith.subf %737, %747 : vector<8x1xf32>
    %749 = math.exp %748 : vector<8x1xf32>
    %750 = arith.subf %741, %747 : vector<8x1xf32>
    %751 = math.exp %750 : vector<8x1xf32>
    %752 = arith.subf %745, %747 : vector<8x1xf32>
    %753 = math.exp %752 : vector<8x1xf32>
    %754 = arith.addf %749, %751 : vector<8x1xf32>
    %755 = arith.addf %754, %753 : vector<8x1xf32>
    %cst_157 = arith.constant 0.000000e+00 : f32
    %756 = vector.broadcast %cst_157 : f32 to vector<8x16xf32>
    %757 = vector.extract_strided_slice %693 {offsets = [24, 0], sizes = [8, 16], strides = [1, 1]} : vector<48x16xf32> to vector<8x16xf32>
    %758 = vector.broadcast %749 : vector<8x1xf32> to vector<8x16xf32>
    %759 = arith.mulf %758, %757 : vector<8x16xf32>
    %760 = arith.addf %756, %759 : vector<8x16xf32>
    %761 = vector.extract_strided_slice %693 {offsets = [32, 0], sizes = [8, 16], strides = [1, 1]} : vector<48x16xf32> to vector<8x16xf32>
    %762 = vector.broadcast %751 : vector<8x1xf32> to vector<8x16xf32>
    %763 = arith.mulf %762, %761 : vector<8x16xf32>
    %764 = arith.addf %760, %763 : vector<8x16xf32>
    %765 = vector.extract_strided_slice %693 {offsets = [40, 0], sizes = [8, 16], strides = [1, 1]} : vector<48x16xf32> to vector<8x16xf32>
    %766 = vector.broadcast %753 : vector<8x1xf32> to vector<8x16xf32>
    %767 = arith.mulf %766, %765 : vector<8x16xf32>
    %768 = arith.addf %764, %767 : vector<8x16xf32>
    %769 = tpu.reciprocal %755 {approx = true} : vector<8x1xf32> -> vector<8x1xf32>
    %770 = vector.broadcast %769 : vector<8x1xf32> to vector<8x16xf32>
    %771 = arith.mulf %768, %770 : vector<8x16xf32>
    %772 = tpu.concatenate %732, %771 in 0 : vector<8x16xf32>, vector<8x16xf32> -> vector<16x16xf32>
    %773 = vector.extract_strided_slice %398 {offsets = [0, 48], sizes = [16, 16], strides = [1, 1]} : vector<16x64xf32> to vector<16x16xf32>
    %774 = vector.extract_strided_slice %773 {offsets = [0, 0], sizes = [16, 8], strides = [1, 1]} : vector<16x16xf32> to vector<16x8xf32>
    %775 = vector.extract_strided_slice %773 {offsets = [0, 8], sizes = [16, 8], strides = [1, 1]} : vector<16x16xf32> to vector<16x8xf32>
    %776 = arith.mulf %774, %4 : vector<16x8xf32>
    %777 = arith.mulf %775, %5 : vector<16x8xf32>
    %778 = arith.addf %776, %777 : vector<16x8xf32>
    %779 = arith.mulf %775, %4 : vector<16x8xf32>
    %780 = arith.mulf %774, %5 : vector<16x8xf32>
    %781 = arith.subf %779, %780 : vector<16x8xf32>
    %782 = tpu.concatenate %778, %781 in 1 : vector<16x8xf32>, vector<16x8xf32> -> vector<16x16xf32>
    %783 = arith.mulf %773, %773 : vector<16x16xf32>
    %cst_158 = arith.constant dense<0.000000e+00> : vector<16xf32>
    %784 = vector.multi_reduction <add>, %783, %cst_158 [1] : vector<16x16xf32> to vector<16xf32>
    %785 = vector.shape_cast %784 : vector<16xf32> to vector<16x1xf32>
    %cst_159 = arith.constant 1.600000e+01 : f32
    %786 = vector.broadcast %cst_159 : f32 to vector<16x1xf32>
    %787 = arith.divf %785, %786 : vector<16x1xf32>
    %cst_160 = arith.constant 1.1920929E-7 : f32
    %788 = vector.broadcast %cst_160 : f32 to vector<16x1xf32>
    %789 = arith.addf %787, %788 : vector<16x1xf32>
    %790 = math.rsqrt %789 : vector<16x1xf32>
    %cst_161 = arith.constant 2.500000e-01 : f32
    %791 = vector.broadcast %cst_161 : f32 to vector<16x1xf32>
    %792 = arith.mulf %790, %791 : vector<16x1xf32>
    %793 = vector.broadcast %792 : vector<16x1xf32> to vector<16x16xf32>
    %794 = arith.mulf %782, %793 : vector<16x16xf32>
    %795 = vector.extract_strided_slice %400 {offsets = [0, 48], sizes = [48, 16], strides = [1, 1]} : vector<48x128xf32> to vector<48x16xf32>
    %796 = vector.extract_strided_slice %795 {offsets = [0, 0], sizes = [48, 8], strides = [1, 1]} : vector<48x16xf32> to vector<48x8xf32>
    %797 = vector.extract_strided_slice %795 {offsets = [0, 8], sizes = [48, 8], strides = [1, 1]} : vector<48x16xf32> to vector<48x8xf32>
    %798 = arith.mulf %796, %2 : vector<48x8xf32>
    %799 = arith.mulf %797, %3 : vector<48x8xf32>
    %800 = arith.addf %798, %799 : vector<48x8xf32>
    %801 = arith.mulf %797, %2 : vector<48x8xf32>
    %802 = arith.mulf %796, %3 : vector<48x8xf32>
    %803 = arith.subf %801, %802 : vector<48x8xf32>
    %804 = tpu.concatenate %800, %803 in 1 : vector<48x8xf32>, vector<48x8xf32> -> vector<48x16xf32>
    %805 = arith.mulf %795, %795 : vector<48x16xf32>
    %cst_162 = arith.constant dense<0.000000e+00> : vector<48xf32>
    %806 = vector.multi_reduction <add>, %805, %cst_162 [1] : vector<48x16xf32> to vector<48xf32>
    %807 = vector.shape_cast %806 : vector<48xf32> to vector<48x1xf32>
    %cst_163 = arith.constant 1.600000e+01 : f32
    %808 = vector.broadcast %cst_163 : f32 to vector<48x1xf32>
    %809 = arith.divf %807, %808 : vector<48x1xf32>
    %cst_164 = arith.constant 1.1920929E-7 : f32
    %810 = vector.broadcast %cst_164 : f32 to vector<48x1xf32>
    %811 = arith.addf %809, %810 : vector<48x1xf32>
    %812 = math.rsqrt %811 : vector<48x1xf32>
    %cst_165 = arith.constant 1.000000e+00 : f32
    %813 = vector.broadcast %cst_165 : f32 to vector<48x1xf32>
    %814 = arith.mulf %812, %813 : vector<48x1xf32>
    %815 = vector.broadcast %814 : vector<48x1xf32> to vector<48x16xf32>
    %816 = arith.mulf %804, %815 : vector<48x16xf32>
    %817 = vector.extract_strided_slice %400 {offsets = [0, 112], sizes = [48, 16], strides = [1, 1]} : vector<48x128xf32> to vector<48x16xf32>
    %818 = vector.extract_strided_slice %794 {offsets = [0, 0], sizes = [8, 16], strides = [1, 1]} : vector<16x16xf32> to vector<8x16xf32>
    %819 = vector.extract_strided_slice %816 {offsets = [0, 0], sizes = [8, 16], strides = [1, 1]} : vector<48x16xf32> to vector<8x16xf32>
    %820 = arith.mulf %818, %819 : vector<8x16xf32>
    %cst_166 = arith.constant dense<0.000000e+00> : vector<8xf32>
    %821 = vector.multi_reduction <add>, %820, %cst_166 [1] : vector<8x16xf32> to vector<8xf32>
    %822 = vector.shape_cast %821 : vector<8xf32> to vector<8x1xf32>
    %823 = vector.extract_strided_slice %816 {offsets = [8, 0], sizes = [8, 16], strides = [1, 1]} : vector<48x16xf32> to vector<8x16xf32>
    %824 = arith.mulf %818, %823 : vector<8x16xf32>
    %cst_167 = arith.constant dense<0.000000e+00> : vector<8xf32>
    %825 = vector.multi_reduction <add>, %824, %cst_167 [1] : vector<8x16xf32> to vector<8xf32>
    %826 = vector.shape_cast %825 : vector<8xf32> to vector<8x1xf32>
    %827 = vector.extract_strided_slice %816 {offsets = [16, 0], sizes = [8, 16], strides = [1, 1]} : vector<48x16xf32> to vector<8x16xf32>
    %828 = arith.mulf %818, %827 : vector<8x16xf32>
    %cst_168 = arith.constant dense<0.000000e+00> : vector<8xf32>
    %829 = vector.multi_reduction <add>, %828, %cst_168 [1] : vector<8x16xf32> to vector<8xf32>
    %830 = vector.shape_cast %829 : vector<8xf32> to vector<8x1xf32>
    %831 = arith.maximumf %822, %826 : vector<8x1xf32>
    %832 = arith.maximumf %831, %830 : vector<8x1xf32>
    %833 = arith.subf %822, %832 : vector<8x1xf32>
    %834 = math.exp %833 : vector<8x1xf32>
    %835 = arith.subf %826, %832 : vector<8x1xf32>
    %836 = math.exp %835 : vector<8x1xf32>
    %837 = arith.subf %830, %832 : vector<8x1xf32>
    %838 = math.exp %837 : vector<8x1xf32>
    %839 = arith.addf %834, %836 : vector<8x1xf32>
    %840 = arith.addf %839, %838 : vector<8x1xf32>
    %cst_169 = arith.constant 0.000000e+00 : f32
    %841 = vector.broadcast %cst_169 : f32 to vector<8x16xf32>
    %842 = vector.extract_strided_slice %817 {offsets = [0, 0], sizes = [8, 16], strides = [1, 1]} : vector<48x16xf32> to vector<8x16xf32>
    %843 = vector.broadcast %834 : vector<8x1xf32> to vector<8x16xf32>
    %844 = arith.mulf %843, %842 : vector<8x16xf32>
    %845 = arith.addf %841, %844 : vector<8x16xf32>
    %846 = vector.extract_strided_slice %817 {offsets = [8, 0], sizes = [8, 16], strides = [1, 1]} : vector<48x16xf32> to vector<8x16xf32>
    %847 = vector.broadcast %836 : vector<8x1xf32> to vector<8x16xf32>
    %848 = arith.mulf %847, %846 : vector<8x16xf32>
    %849 = arith.addf %845, %848 : vector<8x16xf32>
    %850 = vector.extract_strided_slice %817 {offsets = [16, 0], sizes = [8, 16], strides = [1, 1]} : vector<48x16xf32> to vector<8x16xf32>
    %851 = vector.broadcast %838 : vector<8x1xf32> to vector<8x16xf32>
    %852 = arith.mulf %851, %850 : vector<8x16xf32>
    %853 = arith.addf %849, %852 : vector<8x16xf32>
    %854 = tpu.reciprocal %840 {approx = true} : vector<8x1xf32> -> vector<8x1xf32>
    %855 = vector.broadcast %854 : vector<8x1xf32> to vector<8x16xf32>
    %856 = arith.mulf %853, %855 : vector<8x16xf32>
    %857 = vector.extract_strided_slice %794 {offsets = [8, 0], sizes = [8, 16], strides = [1, 1]} : vector<16x16xf32> to vector<8x16xf32>
    %858 = vector.extract_strided_slice %816 {offsets = [24, 0], sizes = [8, 16], strides = [1, 1]} : vector<48x16xf32> to vector<8x16xf32>
    %859 = arith.mulf %857, %858 : vector<8x16xf32>
    %cst_170 = arith.constant dense<0.000000e+00> : vector<8xf32>
    %860 = vector.multi_reduction <add>, %859, %cst_170 [1] : vector<8x16xf32> to vector<8xf32>
    %861 = vector.shape_cast %860 : vector<8xf32> to vector<8x1xf32>
    %862 = vector.extract_strided_slice %816 {offsets = [32, 0], sizes = [8, 16], strides = [1, 1]} : vector<48x16xf32> to vector<8x16xf32>
    %863 = arith.mulf %857, %862 : vector<8x16xf32>
    %cst_171 = arith.constant dense<0.000000e+00> : vector<8xf32>
    %864 = vector.multi_reduction <add>, %863, %cst_171 [1] : vector<8x16xf32> to vector<8xf32>
    %865 = vector.shape_cast %864 : vector<8xf32> to vector<8x1xf32>
    %866 = vector.extract_strided_slice %816 {offsets = [40, 0], sizes = [8, 16], strides = [1, 1]} : vector<48x16xf32> to vector<8x16xf32>
    %867 = arith.mulf %857, %866 : vector<8x16xf32>
    %cst_172 = arith.constant dense<0.000000e+00> : vector<8xf32>
    %868 = vector.multi_reduction <add>, %867, %cst_172 [1] : vector<8x16xf32> to vector<8xf32>
    %869 = vector.shape_cast %868 : vector<8xf32> to vector<8x1xf32>
    %870 = arith.maximumf %861, %865 : vector<8x1xf32>
    %871 = arith.maximumf %870, %869 : vector<8x1xf32>
    %872 = arith.subf %861, %871 : vector<8x1xf32>
    %873 = math.exp %872 : vector<8x1xf32>
    %874 = arith.subf %865, %871 : vector<8x1xf32>
    %875 = math.exp %874 : vector<8x1xf32>
    %876 = arith.subf %869, %871 : vector<8x1xf32>
    %877 = math.exp %876 : vector<8x1xf32>
    %878 = arith.addf %873, %875 : vector<8x1xf32>
    %879 = arith.addf %878, %877 : vector<8x1xf32>
    %cst_173 = arith.constant 0.000000e+00 : f32
    %880 = vector.broadcast %cst_173 : f32 to vector<8x16xf32>
    %881 = vector.extract_strided_slice %817 {offsets = [24, 0], sizes = [8, 16], strides = [1, 1]} : vector<48x16xf32> to vector<8x16xf32>
    %882 = vector.broadcast %873 : vector<8x1xf32> to vector<8x16xf32>
    %883 = arith.mulf %882, %881 : vector<8x16xf32>
    %884 = arith.addf %880, %883 : vector<8x16xf32>
    %885 = vector.extract_strided_slice %817 {offsets = [32, 0], sizes = [8, 16], strides = [1, 1]} : vector<48x16xf32> to vector<8x16xf32>
    %886 = vector.broadcast %875 : vector<8x1xf32> to vector<8x16xf32>
    %887 = arith.mulf %886, %885 : vector<8x16xf32>
    %888 = arith.addf %884, %887 : vector<8x16xf32>
    %889 = vector.extract_strided_slice %817 {offsets = [40, 0], sizes = [8, 16], strides = [1, 1]} : vector<48x16xf32> to vector<8x16xf32>
    %890 = vector.broadcast %877 : vector<8x1xf32> to vector<8x16xf32>
    %891 = arith.mulf %890, %889 : vector<8x16xf32>
    %892 = arith.addf %888, %891 : vector<8x16xf32>
    %893 = tpu.reciprocal %879 {approx = true} : vector<8x1xf32> -> vector<8x1xf32>
    %894 = vector.broadcast %893 : vector<8x1xf32> to vector<8x16xf32>
    %895 = arith.mulf %892, %894 : vector<8x16xf32>
    %896 = tpu.concatenate %856, %895 in 0 : vector<8x16xf32>, vector<8x16xf32> -> vector<16x16xf32>
    %897 = tpu.concatenate %524, %648, %772, %896 in 1 : vector<16x16xf32>, vector<16x16xf32>, vector<16x16xf32>, vector<16x16xf32> -> vector<16x64xf32>
    %898 = arith.truncf %897 : vector<16x64xf32> to vector<16x64xbf16>
    %c0_174 = arith.constant 0 : index
    %c0_175 = arith.constant 0 : index
    %899 = vector.load %arg7[%c0_174, %c0_175] : memref<64x64xbf16, #tpu.memory_space<vmem>>, vector<64x64xbf16>
    %cst_176 = arith.constant dense<0.000000e+00> : vector<16x64xf32>
    %900 = tpu.matmul %898, %899, %cst_176 {dimension_numbers = #tpu.dot_dimension_numbers<[1], [0], [0], [1], [0, 0, 1, 1], [], []>} : vector<16x64xbf16>, vector<64x64xbf16>, vector<16x64xf32> -> vector<16x64xf32>
    %c0_177 = arith.constant 0 : index
    %c0_178 = arith.constant 0 : index
    %901 = vector.load %arg14[%c0_177, %c0_178] : memref<16x64xf32, #tpu.memory_space<vmem>>, vector<16x64xf32>
    tpu.vector_store %arg14[%c0_177, %c0_178], %900 {strides = array<i32>} : memref<16x64xf32, #tpu.memory_space<vmem>>, vector<16x64xf32>,
    return
  }
  func.func @transform_0(%arg0: i32) -> (i32, i32) {
    %c0_i32 = arith.constant 0 : i32
    %c0_i32_0 = arith.constant 0 : i32
    return %arg0, %c0_i32 : i32, i32
  }
  func.func @transform_1(%arg0: i32) -> (i32, i32) {
    %c0_i32 = arith.constant 0 : i32
    %c0_i32_0 = arith.constant 0 : i32
    return %arg0, %c0_i32 : i32, i32
  }
  func.func @transform_2(%arg0: i32) -> (i32, i32) {
    %c0_i32 = arith.constant 0 : i32
    %c0_i32_0 = arith.constant 0 : i32
    %c0_i32_1 = arith.constant 0 : i32
    return %c0_i32, %c0_i32_0 : i32, i32
  }
  func.func @transform_3(%arg0: i32) -> (i32, i32) {
    %c0_i32 = arith.constant 0 : i32
    %c0_i32_0 = arith.constant 0 : i32
    %c0_i32_1 = arith.constant 0 : i32
    return %c0_i32, %c0_i32_0 : i32, i32
  }
  func.func @transform_4(%arg0: i32) -> (i32, i32) {
    %c0_i32 = arith.constant 0 : i32
    %c0_i32_0 = arith.constant 0 : i32
    %c0_i32_1 = arith.constant 0 : i32
    return %c0_i32, %c0_i32_0 : i32, i32
  }
  func.func @transform_5(%arg0: i32) -> (i32, i32) {
    %c0_i32 = arith.constant 0 : i32
    %c0_i32_0 = arith.constant 0 : i32
    %c0_i32_1 = arith.constant 0 : i32
    return %c0_i32, %c0_i32_0 : i32, i32
  }
  func.func @transform_6(%arg0: i32) -> (i32, i32) {
    %c0_i32 = arith.constant 0 : i32
    %c0_i32_0 = arith.constant 0 : i32
    %c0_i32_1 = arith.constant 0 : i32
    return %c0_i32, %c0_i32_0 : i32, i32
  }
  func.func @transform_7(%arg0: i32) -> (i32, i32) {
    %c0_i32 = arith.constant 0 : i32
    %c0_i32_0 = arith.constant 0 : i32
    %c0_i32_1 = arith.constant 0 : i32
    return %c0_i32, %c0_i32_0 : i32, i32
  }
  func.func @transform_8(%arg0: i32) -> (i32, i32) {
    %c0_i32 = arith.constant 0 : i32
    %c0_i32_0 = arith.constant 0 : i32
    %c0_i32_1 = arith.constant 0 : i32
    return %c0_i32, %c0_i32_0 : i32, i32
  }
  func.func @transform_9(%arg0: i32) -> (i32, i32) {
    %c0_i32 = arith.constant 0 : i32
    %c0_i32_0 = arith.constant 0 : i32
    %c0_i32_1 = arith.constant 0 : i32
    return %c0_i32, %c0_i32_0 : i32, i32
  }
  func.func @transform_10(%arg0: i32) -> (i32, i32) {
    %c0_i32 = arith.constant 0 : i32
    %c0_i32_0 = arith.constant 0 : i32
    %c0_i32_1 = arith.constant 0 : i32
    return %c0_i32, %c0_i32_0 : i32, i32
  }
  func.func @transform_11(%arg0: i32) -> (i32, i32) {
    %c0_i32 = arith.constant 0 : i32
    %c0_i32_0 = arith.constant 0 : i32
    %c0_i32_1 = arith.constant 0 : i32
    return %c0_i32, %c0_i32_0 : i32, i32
  }
  func.func @transform_12(%arg0: i32) -> (i32, i32) {
    %c0_i32 = arith.constant 0 : i32
    %c0_i32_0 = arith.constant 0 : i32
    %c0_i32_1 = arith.constant 0 : i32
    return %c0_i32, %c0_i32_0 : i32, i32
  }
  func.func @transform_13(%arg0: i32) -> (i32, i32) {
    %c0_i32 = arith.constant 0 : i32
    %c0_i32_0 = arith.constant 0 : i32
    return %arg0, %c0_i32 : i32, i32
  }
}

</mosaic_0001>

<bundles_post_ra>
// kernel: tpu_custom_call.1
= control target key start
LH: loop header
LB: loop body
LE: loop exit
PB: predicated region body
PF: predicated region fallthrough
CT: control target
= control target key end

     0   :  { %18 = vsyncpa [#allocation3], 0  ;;  %s10192_s0 = inlined_call_operand.hbm [shape: f32[16,64], index: 0, kind: input, shape index: {}]   ;;  %s10193_s1 = inlined_call_operand.vmem [shape: f32[48,64], index: 1, kind: input, shape index: {}]   ;;  %s10194_s2 = inlined_call_operand.vmem [shape: bf16[64,192], index: 2, kind: input, shape index: {}]   ;;  %s10195_s3 = inlined_call_operand.vmem [shape: bf16[64,64], index: 3, kind: input, shape index: {}]   ;;  %s10196_s4 = inlined_call_operand.vmem [shape: bf16[64,64], index: 4, kind: input, shape index: {}]   ;;  %s10197_s5 = inlined_call_operand.hbm [shape: bf16[64,128], index: 5, kind: input, shape index: {}]   ;;  %s10198_s6 = inlined_call_operand.hbm [shape: bf16[64,64], index: 6, kind: input, shape index: {}]   ;;  %s10199_s7 = inlined_call_operand.vmem [shape: f32[48,8], index: 7, kind: input, shape index: {}]   ;;  %s10200_s8 = inlined_call_operand.vmem [shape: f32[48,8], index: 8, kind: input, shape index: {}]   ;;  %s10201_s9 = inlined_call_operand.vmem [shape: f32[16,8], index: 9, kind: input, shape index: {}]   ;;  %s10202_s10 = inlined_call_operand.vmem [shape: f32[16,8], index: 10, kind: input, shape index: {}]   ;;  %s10203_s11 = inlined_call_operand.vmem [shape: s32[24,1], index: 11, kind: input, shape index: {}]   ;;  %s10204_s12 = inlined_call_operand.vmem [shape: s32[1,24], index: 12, kind: input, shape index: {}]   ;;  %s10205_s13 = inlined_call_operand.hbm [shape: f32[16,64], index: 13, kind: output, shape index: {}]  }
   0x1   :  { %19 = vsyncpa [#allocation6], 0 }
   0x2   :  { %20 = vsyncpa [#allocation4], 0  ;;  %s6658_s25 = smov [#allocation5]   ;;  %s6564_s29 = scalar_lea.hbm %s10197_s5, 512 }
   0x3   :  { %s46_s26 = sshll.u32 %s6658_s25, 4  ;;  %p6565_p0 = scmp.ne.s32.totalorder %s10197_s5, %s6564_s29  ;;  %s47_s26 = int_to_ptr.vmem [resolvable:$true] %s46_s26 }
   0x4   :  { %p6568_p1 = scmp.lt.u32.totalorder %s6564_s29, %s10197_s5 }
   0x6   :  { %p6570_p2 = pnand %p6568_p1, %p6565_p0 }
   0x8   :  { %6573 = shalt.err (!%p6570_p2)
}
   0x9   :  { %s6574_s17 = scalar_lea.vmem %s47_s26, 512  ;;  %p6579_p4 = scmp.lt.s32.totalorder %s47_s26, %s47_s26 }
   0xa   :  { %p6575_p3 = scmp.ne.s32.totalorder %s47_s26, %s6574_s17  ;;  %p6580_p5 = scmp.lt.s32.totalorder %s6574_s17, %s6574_s17 }
   0xc   :  { %p6581_p6 = por %p6580_p5, %p6579_p4 }
   0xe   :  { %p6582_p7 = pnand %p6581_p6, %p6575_p3 }
  0x10   :  { %6585 = shalt.err (!%p6582_p7)
}
  0x11   :  { %s6659_s18 = smov 64   ;;  %s6660_s19 = smov 4  }
  0x12   :  { %52 = dma.hbm_to_vmem [thread:$0]  %s10197_s5, 512, %s47_s26, [#allocation6], %s6659_s18, %s6659_s18, %s6660_s19  }
  0x13   :  { %s6661_s22 = smov [#allocation2]   ;;  %s6586_s27 = scalar_lea.hbm %s10192_s0, 256 }
  0x14   :  { %s26_s23 = sshll.u32 %s6661_s22, 4  ;;  %p6587_p8 = scmp.ne.s32.totalorder %s10192_s0, %s6586_s27  ;;  %s27_s23 = int_to_ptr.vmem [resolvable:$true] %s26_s23 }
  0x15   :  { %p6590_p9 = scmp.lt.u32.totalorder %s6586_s27, %s10192_s0 }
  0x17   :  { %p6592_p10 = pnand %p6590_p9, %p6587_p8 }
  0x19   :  { %6595 = shalt.err (!%p6592_p10)
}
  0x1a   :  { %s6596_s15 = scalar_lea.vmem %s27_s23, 256  ;;  %p6601_p12 = scmp.lt.s32.totalorder %s27_s23, %s27_s23 }
  0x1b   :  { %p6597_p11 = scmp.ne.s32.totalorder %s27_s23, %s6596_s15  ;;  %p6602_p13 = scmp.lt.s32.totalorder %s6596_s15, %s6596_s15 }
  0x1d   :  { %p6603_p0 = por %p6602_p13, %p6601_p12 }
  0x1f   :  { %p6604_p1 = pnand %p6603_p0, %p6597_p11 }
  0x21   :  { %6607 = shalt.err (!%p6604_p1)
}
  0x22   :  { %s6662_s5 = smov 128   ;;  %s6663_s26 = smov 8  }
  0x23   :  { %32 = dma.hbm_to_vmem [thread:$0]  %s10192_s0, 256, %s27_s23, [#allocation3], %s6662_s5, %s6662_s5, %s6663_s26  }
  0x24   :  { %s6664_s20 = smov [#allocation7]   ;;  %s6608_s25 = scalar_lea.hbm %s10198_s6, 512 }
  0x25   :  { %s58_s21 = sshll.u32 %s6664_s20, 4  ;;  %p6609_p2 = scmp.ne.s32.totalorder %s10198_s6, %s6608_s25  ;;  %s59_s21 = int_to_ptr.vmem [resolvable:$true] %s58_s21 }
  0x26   :  { %p6612_p3 = scmp.lt.u32.totalorder %s6608_s25, %s10198_s6 }
  0x28   :  { %p6614_p4 = pnand %p6612_p3, %p6609_p2 }
  0x2a   :  { %6617 = shalt.err (!%p6614_p4)
}
  0x2b   :  { %s6618_s14 = scalar_lea.vmem %s59_s21, 512  ;;  %p6623_p6 = scmp.lt.s32.totalorder %s59_s21, %s59_s21 }
  0x2c   :  { %p6619_p5 = scmp.ne.s32.totalorder %s59_s21, %s6618_s14  ;;  %p6624_p7 = scmp.lt.s32.totalorder %s6618_s14, %s6618_s14 }
  0x2e   :  { %p6625_p8 = por %p6624_p7, %p6623_p6 }
  0x30   :  { %p6626_p9 = pnand %p6625_p8, %p6619_p5 }
  0x32   :  { %6629 = shalt.err (!%p6626_p9)
}
  0x33   :  { %64 = dma.hbm_to_vmem [thread:$0]  %s10198_s6, 512, %s59_s21, [#allocation6], %s6659_s18, %s6659_s18, %s6660_s19  }
  0x34   :  { %6652 = dma.done.wait [#allocation3], 256  }
  0x35   :  { %6653 = vsyncadd [#allocation3], 4294967040 }
  0x36   :  { %6654 = dma.done.wait [#allocation6], 1024  }
  0x37   :  { %6655 = vsyncadd [#allocation6], 4294966272  ;;  %v6800_v0 = vld [vmem:[%s10193_s1] sm:$0xff]  ;;  %vm117_vm0 = vcmask 523264   ;;  %v6805_v1 = vld [vmem:[%s10193_s1 + $0x8] sm:$0xff]  ;;  %s6665_s19 = smov 72  }
  0x38   :  { %v6810_v2 = vld [vmem:[%s10193_s1 + $0x10] sm:$0xff]  ;;  %v111_v3 = vmul.f32 %v6800_v0, %v6800_v0  ;;  %v112_v4 = vmul.f32 %v6805_v1, %v6805_v1  ;;  %v6821_v6 = vld [vmem:[%s10193_s1 + $0x18] sm:$0xff]  ;;  %v6826_v7 = vld [vmem:[%s10193_s1 + $0x28] sm:$0xff]  ;;  %v6666_v27 = vmov 0   ;;  %s6668_s17 = smov 80   ;;  %s6669_s25 = smov 24  }
  0x39   :  { %v113_v5 = vmul.f32 %v6810_v2, %v6810_v2  ;;  %v6831_v8 = vld [vmem:[%s10193_s1 + $0x20] sm:$0xff]  ;;  %v114_v9 = vmul.f32 %v6821_v6, %v6821_v6  ;;  %v116_v10 = vmul.f32 %v6826_v7, %v6826_v7  ;;  %v6854_v20 = vld [vmem:[%s10200_s8 + $0x8] sm:$0xff]  ;;  %v6146_v21 = vld [vmem:[%s10194_s2 + $0x14] ss:$8 sps:$4 sm:$0xff]   ;;  %253 = vmatprep.mubr.bf16.mxu0 %v6666_v27  ;;  %6077 = vset.pattern.permute.xlu1 %v6666_v27  ;;  %s6670_s27 = smov 16   ;;  %vm449_vm1 = vcmask 130048  }
  0x3a   :  { %v115_v11 = vmul.f32 %v6831_v8, %v6831_v8  ;;  %v118_v12 = vsel %vm117_vm0, %v111_v3, 0.0  ;;  %v121_v13 = vsel %vm117_vm0, %v112_v4, 0.0  ;;  %v6143_v18 = vld [vmem:[%s10194_s2 + $0x4] ss:$8 sps:$4 sm:$0xff]   ;;  %v6145_v19 = vld [vmem:[%s10194_s2] ss:$8 sps:$4 sm:$0xff]   ;;  %6076 = vset.pattern.permute.xlu0 %v6666_v27 }
  0x3b   :  { %v124_v14 = vsel %vm117_vm0, %v113_v5, 0.0  ;;  %119 = vadd.xlane.f32.xlu0 %v118_v12  ;;  %v127_v15 = vsel %vm117_vm0, %v114_v9, 0.0  ;;  %v133_v16 = vsel %vm117_vm0, %v116_v10, 0.0  ;;  %221 = vmatprep.subr.bf16.mxu0 %v6143_v18  ;;  %v6148_v22 = vld [vmem:[%s10194_s2 + $0x10] ss:$8 sps:$4 sm:$0xff]   ;;  %v6870_v24 = vld [vmem:[%s10200_s8] sm:$0xff] }
  0x3c   :  { %125 = vadd.xlane.f32.xlu1 %v124_v14  ;;  %v130_v17 = vsel %vm117_vm0, %v115_v11, 0.0  ;;  %222 = vmatpush1.bf16.msra.mxu0 %v6145_v19  ;;  %v6149_v23 = vld [vmem:[%s10194_s2 + $0x24] ss:$8 sps:$4 sm:$0xff]   ;;  %v6151_v25 = vld [vmem:[%s10194_s2 + $0x20] ss:$8 sps:$4 sm:$0xff]   ;;  %v6891_v29 = vld [vmem:[%s10200_s8 + $0x10] sm:$0xff] }
  0x3d   :  { %223 = vmatprep.subr.bf16.mxu0 %v6146_v21  ;;  %v6152_v26 = vld [vmem:[%s10194_s2 + $0x34] ss:$8 sps:$4 sm:$0xff]   ;;  %v6154_v28 = vld [vmem:[%s10194_s2 + $0x30] ss:$8 sps:$4 sm:$0xff]   ;;  %v6909_v31 = vld [vmem:[%s10200_s8 + $0x20] sm:$0xff]  ;;  %vm436_vm2 = vcmask 64512  }
  0x3e   :  { %v6898_v30 = vld [vmem:[%s10200_s8 + $0x18] sm:$0xff]  ;;  %v6916_v32 = vld [vmem:[%s10200_s8 + $0x28] sm:$0xff]  ;;  %v6927_v33 = vld [vmem:[%s10199_s7] sm:$0xff]  ;;  %s6672_s28 = smov 48   ;;  %vm874_vm3 = vcmask 1043456   ;;  %s6673_s29 = smov 112  }
  0x3f   :  { %122 = vadd.xlane.f32.xlu0 %v121_v13  ;;  %v6934_v34 = vld [vmem:[%s10199_s7 + $0x8] sm:$0xff]  ;;  %v6945_v35 = vld [vmem:[%s10199_s7 + $0x10] sm:$0xff]  ;;  %v6952_v36 = vld [vmem:[%s10199_s7 + $0x18] sm:$0xff]  ;;  %vm847_vm4 = vcmask 195584   ;;  %s6674_s2 = smov 104   ;;  %s6675_s20 = smov 96  }
  0x40   :  { %128 = vadd.xlane.f32.xlu1 %v127_v15  ;;  %224 = vmatpush1.bf16.msra.mxu0 %v6148_v22  ;;  %v6963_v37 = vld [vmem:[%s10199_s7 + $0x20] sm:$0xff]  ;;  %v6970_v38 = vld [vmem:[%s10199_s7 + $0x28] sm:$0xff]  ;;  %v287_v41 = vld [vmem:[%s10203_s11 + $0x10] sm:$0xff]  ;;  %s6676_s30 = smov 40   ;;  %s6677_s23 = smov 32   ;;  %vm6680_vm8 = vmmov 0  }
  0x41   :  { %225 = vmatprep.subr.bf16.mxu0 %v6149_v23  ;;  %v285_v39 = vld [vmem:[%s10203_s11] sm:$0xff]  ;;  %v286_v40 = vld [vmem:[%s10203_s11 + $0x8] sm:$0xff]  ;;  %s6671_s11 = smov 120   ;;  %s6678_s0 = smov 56   ;;  %vm3838_vm9 = vcmask 261120   ;;  %vm3845_vm10 = vcmask 392192  }
  0x43   :  { %131 = vadd.xlane.f32.xlu0 %v130_v17 }
  0x44   :  { %134 = vadd.xlane.f32.xlu1 %v133_v16  ;;  %226 = vmatpush1.bf16.msra.mxu0 %v6151_v25 }
  0x45   :  { %227 = vmatprep.subr.bf16.mxu0 %v6152_v26 }
  0x48   :  { %228 = vmatpush1.bf16.msra.mxu0 %v6154_v28 }
  0x55   :  { %528 = vrot.lane.b32.xlu1 %v6854_v20, %s6665_s19 }
  0x59   :  { %604 = vrot.lane.b32.xlu1 %v6870_v24, %s6659_s18  ;;  %526 = vrot.lane.b32.xlu0 %v6870_v24, %s6665_s19 }
  0x5d   :  { %606 = vrot.lane.b32.xlu1 %v6854_v20, %s6659_s18  ;;  %530 = vrot.lane.b32.xlu0 %v6891_v29, %s6665_s19 }
  0x61   :  { %532 = vrot.lane.b32.xlu1 %v6898_v30, %s6665_s19  ;;  %608 = vrot.lane.b32.xlu0 %v6891_v29, %s6659_s18 }
  0x65   :  { %610 = vrot.lane.b32.xlu1 %v6898_v30, %s6659_s18  ;;  %534 = vrot.lane.b32.xlu0 %v6909_v31, %s6665_s19 }
  0x69   :  { %536 = vrot.lane.b32.xlu1 %v6916_v32, %s6665_s19  ;;  %612 = vrot.lane.b32.xlu0 %v6909_v31, %s6659_s18 }
  0x6d   :  { %614 = vrot.lane.b32.xlu1 %v6916_v32, %s6659_s18  ;;  %502 = vrot.lane.b32.xlu0 %v6927_v33, %s6659_s18 }
  0x71   :  { %504 = vrot.lane.b32.xlu1 %v6934_v34, %s6659_s18  ;;  %580 = vrot.lane.b32.xlu0 %v6927_v33, %s6665_s19 }
  0x75   :  { %582 = vrot.lane.b32.xlu1 %v6934_v34, %s6665_s19  ;;  %506 = vrot.lane.b32.xlu0 %v6945_v35, %s6659_s18 }
  0x79   :  { %508 = vrot.lane.b32.xlu1 %v6952_v36, %s6659_s18  ;;  %584 = vrot.lane.b32.xlu0 %v6945_v35, %s6665_s19 }
  0x7d   :  { %586 = vrot.lane.b32.xlu1 %v6952_v36, %s6665_s19  ;;  %510 = vrot.lane.b32.xlu0 %v6963_v37, %s6659_s18 }
  0x81   :  { %512 = vrot.lane.b32.xlu1 %v6970_v38, %s6659_s18  ;;  %588 = vrot.lane.b32.xlu0 %v6963_v37, %s6665_s19 }
  0x85   :  { %590 = vrot.lane.b32.xlu1 %v6970_v38, %s6665_s19  ;;  %316 = vrot.lane.b32.xlu0 %v6870_v24, %s6663_s26  ;;  %s6667_s19 = smov 88  }
  0x89   :  { %318 = vrot.lane.b32.xlu1 %v6854_v20, %s6663_s26  ;;  %320 = vrot.lane.b32.xlu0 %v6891_v29, %s6663_s26 }
  0x8d   :  { %322 = vrot.lane.b32.xlu1 %v6898_v30, %s6663_s26  ;;  %324 = vrot.lane.b32.xlu0 %v6909_v31, %s6663_s26 }
  0x91   :  { %326 = vrot.lane.b32.xlu1 %v6916_v32, %s6663_s26  ;;  %376 = vrot.lane.b32.xlu0 %v6927_v33, %s6663_s26 }
  0x95   :  { %378 = vrot.lane.b32.xlu1 %v6934_v34, %s6663_s26  ;;  %380 = vrot.lane.b32.xlu0 %v6945_v35, %s6663_s26 }
  0x99   :  { %382 = vrot.lane.b32.xlu1 %v6952_v36, %s6663_s26  ;;  %384 = vrot.lane.b32.xlu0 %v6963_v37, %s6663_s26 }
  0x9d   :  { %386 = vrot.lane.b32.xlu1 %v6970_v38, %s6663_s26  ;;  %1416 = vrot.lane.b32.xlu0 %v6870_v24, %s6667_s19 }
  0xa1   :  { %1418 = vrot.lane.b32.xlu1 %v6854_v20, %s6667_s19  ;;  %1494 = vrot.lane.b32.xlu0 %v6870_v24, %s6668_s17 }
  0xa5   :  { %1496 = vrot.lane.b32.xlu1 %v6854_v20, %s6668_s17  ;;  %1420 = vrot.lane.b32.xlu0 %v6891_v29, %s6667_s19 }
  0xa9   :  { %1422 = vrot.lane.b32.xlu1 %v6898_v30, %s6667_s19  ;;  %1498 = vrot.lane.b32.xlu0 %v6891_v29, %s6668_s17 }
  0xad   :  { %1500 = vrot.lane.b32.xlu1 %v6898_v30, %s6668_s17  ;;  %1424 = vrot.lane.b32.xlu0 %v6909_v31, %s6667_s19 }
  0xb1   :  { %1426 = vrot.lane.b32.xlu1 %v6916_v32, %s6667_s19  ;;  %1502 = vrot.lane.b32.xlu0 %v6909_v31, %s6668_s17 }
  0xb5   :  { %1504 = vrot.lane.b32.xlu1 %v6916_v32, %s6668_s17  ;;  %293 = vperm.xlu0 %6076, %v285_v39  }
  0xb9   :  { %296 = vperm.xlu1 %6077, %v286_v40   ;;  %1137 = vrot.lane.b32.xlu0 %v6870_v24, %s6669_s25 }
  0xbd   :  { %299 = vperm.xlu1 %6077, %v287_v41   ;;  %1215 = vrot.lane.b32.xlu0 %v6870_v24, %s6670_s27 }
  0xc1   :  { %1139 = vrot.lane.b32.xlu1 %v6854_v20, %s6669_s25  ;;  %1141 = vrot.lane.b32.xlu0 %v6891_v29, %s6669_s25 }
  0xc5   :  { %1217 = vrot.lane.b32.xlu1 %v6854_v20, %s6670_s27 }
  0xc8   :  { %v120_v42 = vpop.xlane.xlu0 %119 }
  0xc9   :  { %v126_v43 = vpop.xlane.xlu1 %125  ;;  %1143 = vrot.lane.b32.xlu1 %v6898_v30, %s6669_s25  ;;  %v137_v44 = vmul.f32 0.015625, %v120_v42 }
  0xca   :  { %v139_v45 = vmul.f32 0.015625, %v126_v43 }
  0xcb   :  { %v143_v46 = vadd.f32 1.1920929e-07, %v137_v44 }
  0xcc   :  { %v123_v47 = vpop.xlane.xlu0 %122  ;;  %v145_v51 = vadd.f32 1.1920929e-07, %v139_v45 }
  0xcd   :  { %v129_v48 = vpop.xlane.xlu1 %128  ;;  %v138_v49 = vmul.f32 0.015625, %v123_v47  ;;  %6171 = vrsqrt.f32 %v143_v46 }
  0xce   :  { %v140_v50 = vmul.f32 0.015625, %v129_v48 }
  0xcf   :  { %v144_v52 = vadd.f32 1.1920929e-07, %v138_v49 }
  0xd0   :  { %v146_v53 = vadd.f32 1.1920929e-07, %v140_v50  ;;  %v132_v55 = vpop.xlane.xlu0 %131 }
  0xd1   :  { %v135_v54 = vpop.xlane.xlu1 %134  ;;  %6173 = vrsqrt.f32 %v144_v52  ;;  %v141_v57 = vmul.f32 0.015625, %v132_v55 }
  0xd2   :  { %6175 = vrsqrt.f32 %v145_v51  ;;  %v142_v56 = vmul.f32 0.015625, %v135_v54 }
  0xd3   :  { %6177 = vrsqrt.f32 %v146_v53  ;;  %v147_v59 = vadd.f32 1.1920929e-07, %v141_v57 }
  0xd4   :  { %v148_v58 = vadd.f32 1.1920929e-07, %v142_v56  ;;  %v527_v16 = vpop.permute.xlu0 %526 }
  0xd5   :  { %v529_v15 = vpop.permute.xlu1 %528 }
  0xd6   :  { %6179 = vrsqrt.f32 %v148_v58 }
  0xd7   :  { %v6172_v60 = vpop.eup %6171  ;;  %6181 = vrsqrt.f32 %v147_v59 }
  0xd8   :  { %v155_v63 = vmul.f32 %v6172_v60, %v6800_v0  ;;  %v7060_v17 = vpop.permute.xlu0 %530 }
  0xdb   :  { %v6174_v61 = vpop.eup %6173 }
  0xdc   :  { %v6176_v62 = vpop.eup %6175  ;;  %v156_v3 = vmul.f32 %v6174_v61, %v6805_v1  ;;  %v7064_v19 = vpop.permute.xlu0 %608 }
  0xdd   :  { %v6178_v4 = vpop.eup %6177  ;;  %v157_v9 = vmul.f32 %v6176_v62, %v6810_v2  ;;  %v605_v2 = vpop.permute.xlu1 %604 }
  0xde   :  { %v161_v5 = vpack.c.bf16 %v156_v3, %v155_v63  ;;  %v158_v10 = vmul.f32 %v6178_v4, %v6821_v6 }
  0xe0   :  { %5688 = vmatmul.mubr.msk.bf16.vlgmr.msra.gmra.mrb[0].mxu0 %vm117_vm0, %v161_v5  ;;  %v6180_v11 = vpop.eup %6179  ;;  %v162_v12 = vpack.c.bf16 %v158_v10, %v157_v9 }
  0xe1   :  { %263 = vmatprep.mubr.bf16.mxu0 %v6666_v27  ;;  %v6182_v13 = vpop.eup %6181  ;;  %v160_v0 = vmul.f32 %v6180_v11, %v6826_v7  ;;  %v607_v6 = vpop.permute.xlu1 %606 }
  0xe2   :  { %v159_v14 = vmul.f32 %v6182_v13, %v6831_v8  ;;  %v7068_v8 = vpop.permute.xlu0 %534 }
  0xe4   :  { %v163_v1 = vpack.c.bf16 %v160_v0, %v159_v14 }
  0xe5   :  { %v7062_v18 = vpop.permute.xlu1 %532 }
  0xe6   :  { %v7072_v22 = vpop.permute.xlu0 %612 }
  0xe8   :  { %5689 = vmatmul.mubr.msk.bf16.gmra.mrb[4].mxu0 %vm117_vm0, %v162_v12 }
  0xe9   :  { %273 = vmatprep.mubr.bf16.mxu0 %v6666_v27  ;;  %v7066_v21 = vpop.permute.xlu1 %610 }
  0xea   :  { %v7076_v25 = vpop.permute.xlu0 %502 }
  0xed   :  { %v7070_v7 = vpop.permute.xlu1 %536 }
  0xee   :  { %v7080_v27 = vpop.permute.xlu0 %580 }
  0xf0   :  { %5690 = vmatmul.mubr.msk.bf16.gmra.mrb[8].mxu0 %vm117_vm0, %v163_v1 }
  0xf1   :  { %v7074_v23 = vpop.permute.xlu1 %614 }
  0xf2   :  { %v7084_v39 = vpop.permute.xlu0 %506 }
  0xf5   :  { %v7078_v26 = vpop.permute.xlu1 %504 }
  0xf6   :  { %v7088_v41 = vpop.permute.xlu0 %584 }
  0xf9   :  { %v7082_v28 = vpop.permute.xlu1 %582 }
  0xfa   :  { %v7092_v43 = vpop.permute.xlu0 %510 }
  0xfd   :  { %v7086_v40 = vpop.permute.xlu1 %508 }
  0xfe   :  { %v7115_v53 = vpop.permute.xlu0 %588 }
 0x101   :  { %v7090_v42 = vpop.permute.xlu1 %586 }
 0x102   :  { %v7129_v62 = vpop.permute.xlu0 %316 }
 0x103   :  { %10306 = vst [vmem:[#allocation14_spill] sm:$0xff] %v7129_v62 }
 0x105   :  { %v7100_v47 = vpop.permute.xlu1 %512 }
 0x109   :  { %v7119_v55 = vpop.permute.xlu1 %590 }
 0x10d   :  { %v7136_v4 = vpop.permute.xlu1 %318 }
 0x10e   :  { %10308 = vst [vmem:[#allocation16_spill] sm:$0xff] %v7136_v4 }
 0x1b3   :  { %v7094_v44 = vpop.f32.mrb[0].mxu0 }
 0x1b4   :  { %v257_v45 = vpop.f32.mrb[1].mxu0  ;;  %v7098_v46 = vmul.f32 %v7094_v44, %v7094_v44  ;;  %v544_v52 = vmul.f32 %v527_v16, %v7094_v44  ;;  %v622_v58 = vmul.f32 %v605_v2, %v7094_v44  ;;  %v334_v3 = vmul.f32 %v7129_v62, %v7094_v44 }
 0x1b5   :  { %v7102_v48 = vpop.f32.mrb[2].mxu0  ;;  %v400_v11 = vmul.f32 %v7094_v44, %v6870_v24 }
 0x1b6   :  { %718 = vrot.lane.b32.xlu0 %v7098_v46, %s6659_s18  ;;  %v261_v49 = vpop.f32.mrb[3].mxu0  ;;  %v7108_v50 = vmul.f32 %v7102_v48, %v7102_v48  ;;  %v545_v54 = vmul.f32 %v529_v15, %v7102_v48  ;;  %v623_v60 = vmul.f32 %v607_v6, %v7102_v48  ;;  %v335_v5 = vmul.f32 %v7136_v4, %v7102_v48  ;;  %v7179_v6 = vpop.permute.xlu0 %320 }
 0x1b7   :  { %v7110_v51 = vpack.c.bf16 %v261_v49, %v257_v45  ;;  %v401_v13 = vmul.f32 %v7102_v48, %v6854_v20  ;;  %v450_v1 = vsel %vm449_vm1, %v7098_v46, 0.0  ;;  %10312 = vst [vmem:[#allocation20_spill] sm:$0xff] %v7179_v6  ;;  %v7181_v45 = vpop.permute.xlu1 %322 }
 0x1b8   :  { %10304 = vst [vmem:[#allocation12_spill] sm:$0xff] %v7108_v50  ;;  %720 = vrot.lane.b32.xlu1 %v7108_v50, %s6659_s18  ;;  %v453_v24 = vsel %vm449_vm1, %v7108_v50, 0.0  ;;  %10313 = vst [vmem:[#allocation21_spill] sm:$0xff] %v7181_v45 }
 0x1b9   :  { %10305 = vst [vmem:[#allocation13_spill] sm:$0xff] %v7110_v51 }
 0x1ba   :  { %556 = vrot.lane.b32.xlu0 %v544_v52, %s6671_s11 }
 0x1bb   :  { %v7121_v56 = vpop.f32.mrb[4].mxu0 }
 0x1bc   :  { %558 = vrot.lane.b32.xlu1 %v545_v54, %s6671_s11  ;;  %v267_v57 = vpop.f32.mrb[5].mxu0  ;;  %v7164_v15 = vmul.f32 %v7121_v56, %v7121_v56  ;;  %v546_v2 = vmul.f32 %v7060_v17, %v7121_v56  ;;  %v624_v49 = vmul.f32 %v7064_v19, %v7121_v56  ;;  %v336_v17 = vmul.f32 %v7179_v6, %v7121_v56  ;;  %v7194_v54 = vpop.permute.xlu1 %326 }
 0x1bd   :  { %v7125_v59 = vpop.f32.mrb[6].mxu0  ;;  %10315 = vst [vmem:[#allocation23_spill] sm:$0xff] %v7194_v54  ;;  %v402_v19 = vmul.f32 %v7121_v56, %v6891_v29 }
 0x1be   :  { %634 = vrot.lane.b32.xlu0 %v622_v58, %s6663_s26  ;;  %v271_v61 = vpop.f32.mrb[7].mxu0  ;;  %v7170_v20 = vmul.f32 %v7125_v59, %v7125_v59  ;;  %v547_v16 = vmul.f32 %v7062_v18, %v7125_v59  ;;  %v625_v52 = vmul.f32 %v7066_v21, %v7125_v59  ;;  %v7192_v18 = vpop.permute.xlu0 %324  ;;  %v403_v21 = vmul.f32 %v7125_v59, %v6898_v30 }
 0x1bf   :  { %v7131_v63 = vpack.c.bf16 %v271_v61, %v267_v57  ;;  %10314 = vst [vmem:[#allocation22_spill] sm:$0xff] %v7192_v18  ;;  %v337_v57 = vmul.f32 %v7181_v45, %v7125_v59 }
 0x1c0   :  { %636 = vrot.lane.b32.xlu1 %v623_v60, %s6663_s26  ;;  %10311 = vst [vmem:[#allocation19_spill] sm:$0xff] %v7170_v20  ;;  %v7207_v60 = vpop.permute.xlu1 %378 }
 0x1c1   :  { %10307 = vst [vmem:[#allocation15_spill] sm:$0xff] %v7131_v63  ;;  %10317 = vst [vmem:[#allocation25_spill] sm:$0xff] %v7207_v60 }
 0x1c2   :  { %346 = vrot.lane.b32.xlu0 %v334_v3, %s6671_s11  ;;  %v7205_v58 = vpop.permute.xlu0 %376 }
 0x1c3   :  { %v7141_v9 = vpop.f32.mrb[8].mxu0  ;;  %10316 = vst [vmem:[#allocation24_spill] sm:$0xff] %v7205_v58 }
 0x1c4   :  { %348 = vrot.lane.b32.xlu1 %v335_v5, %s6671_s11  ;;  %v7144_v10 = vpop.f32.mrb[9].mxu0  ;;  %v7212_v3 = vpop.permute.xlu1 %382  ;;  %v7246_v6 = vmul.f32 %v7141_v9, %v7141_v9  ;;  %v548_v62 = vmul.f32 %v7068_v8, %v7141_v9 }
 0x1c5   :  { %10309 = vst [vmem:[#allocation17_spill] sm:$0xff] %v7144_v10  ;;  %v7148_v12 = vpop.f32.mrb[10].mxu0  ;;  %10319 = vst [vmem:[#allocation27_spill] sm:$0xff] %v7212_v3 }
 0x1c6   :  { %412 = vrot.lane.b32.xlu0 %v400_v11, %s6663_s26  ;;  %v7153_v14 = vpop.f32.mrb[11].mxu0  ;;  %v7210_v61 = vpop.permute.xlu0 %380  ;;  %v7254_v4 = vmul.f32 %v7148_v12, %v7148_v12  ;;  %v549_v10 = vmul.f32 %v7070_v7, %v7148_v12  ;;  %v339_v7 = vmul.f32 %v7194_v54, %v7148_v12 }
 0x1c7   :  { %10310 = vst [vmem:[#allocation18_spill] sm:$0xff] %v7153_v14  ;;  %10318 = vst [vmem:[#allocation26_spill] sm:$0xff] %v7210_v61  ;;  %v626_v14 = vmul.f32 %v7072_v22, %v7141_v9 }
 0x1c8   :  { %414 = vrot.lane.b32.xlu1 %v401_v13, %s6663_s26  ;;  %v7216_v11 = vpop.permute.xlu1 %386 }
 0x1c9   :  { %10321 = vst [vmem:[#allocation29_spill] sm:$0xff] %v7216_v11 }
 0x1ca   :  { %v7214_v5 = vpop.permute.xlu0 %384 }
 0x1cb   :  { %10320 = vst [vmem:[#allocation28_spill] sm:$0xff] %v7214_v5 }
 0x1ce   :  { %v7218_v13 = vpop.permute.xlu0 %1416 }
 0x1cf   :  { %10322 = vst [vmem:[#allocation30_spill] sm:$0xff] %v7218_v13 }
 0x1e5   :  { %451 = vadd.xlane.f32.xlu0 %v450_v1  ;;  %v7220_v1 = vpop.permute.xlu1 %1418 }
 0x1e6   :  { %10323 = vst [vmem:[#allocation31_spill] sm:$0xff] %v7220_v1 }
 0x1ec   :  { %454 = vadd.xlane.f32.xlu1 %v453_v24  ;;  %v7222_v24 = vpop.permute.xlu0 %1494 }
 0x1ed   :  { %10324 = vst [vmem:[#allocation32_spill] sm:$0xff] %v7222_v24 }
 0x1fb   :  { %722 = vrot.lane.b32.xlu0 %v7164_v15, %s6659_s18 }
 0x1fd   :  { %724 = vrot.lane.b32.xlu1 %v7170_v20, %s6659_s18 }
 0x1ff   :  { %560 = vrot.lane.b32.xlu0 %v546_v2, %s6671_s11  ;;  %v7224_v2 = vpop.permute.xlu1 %1496 }
 0x200   :  { %10325 = vst [vmem:[#allocation33_spill] sm:$0xff] %v7224_v2 }
 0x201   :  { %562 = vrot.lane.b32.xlu1 %v547_v16, %s6671_s11  ;;  %v456_v16 = vsel %vm449_vm1, %v7164_v15, 0.0 }
 0x203   :  { %638 = vrot.lane.b32.xlu0 %v624_v49, %s6663_s26  ;;  %v7228_v49 = vpop.permute.xlu0 %1420 }
 0x204   :  { %10326 = vst [vmem:[#allocation34_spill] sm:$0xff] %v7228_v49  ;;  %v598_v49 = vmul.f32 %v7080_v27, %v7094_v44 }
 0x205   :  { %640 = vrot.lane.b32.xlu1 %v625_v52, %s6663_s26  ;;  %v7230_v52 = vpop.permute.xlu1 %1422 }
 0x206   :  { %10327 = vst [vmem:[#allocation35_spill] sm:$0xff] %v7230_v52 }
 0x207   :  { %350 = vrot.lane.b32.xlu0 %v336_v17, %s6671_s11  ;;  %v7232_v17 = vpop.permute.xlu0 %1498 }
 0x208   :  { %10328 = vst [vmem:[#allocation36_spill] sm:$0xff] %v7232_v17 }
 0x209   :  { %352 = vrot.lane.b32.xlu1 %v337_v57, %s6671_s11  ;;  %v459_v57 = vsel %vm449_vm1, %v7170_v20, 0.0 }
 0x20b   :  { %416 = vrot.lane.b32.xlu0 %v402_v19, %s6663_s26  ;;  %v7236_v19 = vpop.permute.xlu1 %1500 }
 0x20c   :  { %10329 = vst [vmem:[#allocation37_spill] sm:$0xff] %v7236_v19 }
 0x20d   :  { %418 = vrot.lane.b32.xlu1 %v403_v21, %s6663_s26  ;;  %v7238_v21 = vpop.permute.xlu0 %1424 }
 0x20e   :  { %10330 = vst [vmem:[#allocation38_spill] sm:$0xff] %v7238_v21 }
 0x20f   :  { %v7240_v0 = vpop.permute.xlu1 %1426 }
 0x210   :  { %10331 = vst [vmem:[#allocation39_spill] sm:$0xff] %v7240_v0 }
 0x211   :  { %v7242_v45 = vpop.permute.xlu0 %1502 }
 0x212   :  { %10332 = vst [vmem:[#allocation40_spill] sm:$0xff] %v7242_v45 }
 0x22a   :  { %457 = vadd.xlane.f32.xlu0 %v456_v16  ;;  %v7248_v16 = vpop.permute.xlu1 %1504 }
 0x22b   :  { %10333 = vst [vmem:[#allocation41_spill] sm:$0xff] %v7248_v16  ;;  %v462_v16 = vsel %vm449_vm1, %v7246_v6, 0.0 }
 0x22e   :  { %v7262_v63 = vpop.permute.xlu1 %296 }
 0x22f   :  { %10335 = vst [vmem:[#allocation43_spill] sm:$0xff] %v7262_v63 }
 0x231   :  { %460 = vadd.xlane.f32.xlu1 %v459_v57  ;;  %v7256_v57 = vpop.permute.xlu0 %293 }
 0x232   :  { %10334 = vst [vmem:[#allocation42_spill] sm:$0xff] %v7256_v57  ;;  %v627_v57 = vmul.f32 %v7074_v23, %v7148_v12  ;;  %v7275_v8 = vpop.permute.xlu1 %299 }
 0x233   :  { %10337 = vst [vmem:[#allocation45_spill] sm:$0xff] %v7275_v8 }
 0x235   :  { %v7270_v51 = vpop.permute.xlu0 %1137 }
 0x236   :  { %10336 = vst [vmem:[#allocation44_spill] sm:$0xff] %v7270_v51  ;;  %v7288_v23 = vpop.permute.xlu1 %1139 }
 0x237   :  { %10339 = vst [vmem:[#allocation47_spill] sm:$0xff] %v7288_v23 }
 0x239   :  { %v7283_v22 = vpop.permute.xlu0 %1215 }
 0x23a   :  { %10338 = vst [vmem:[#allocation46_spill] sm:$0xff] %v7283_v22 }
 0x240   :  { %726 = vrot.lane.b32.xlu0 %v7246_v6, %s6659_s18 }
 0x242   :  { %728 = vrot.lane.b32.xlu1 %v7254_v4, %s6659_s18 }
 0x244   :  { %564 = vrot.lane.b32.xlu0 %v548_v62, %s6671_s11  ;;  %v338_v62 = vmul.f32 %v7192_v18, %v7141_v9 }
 0x246   :  { %566 = vrot.lane.b32.xlu1 %v549_v10, %s6671_s11  ;;  %v404_v10 = vmul.f32 %v7141_v9, %v6909_v31 }
 0x248   :  { %642 = vrot.lane.b32.xlu0 %v626_v14, %s6663_s26  ;;  %v405_v14 = vmul.f32 %v7148_v12, %v6916_v32 }
 0x24a   :  { %644 = vrot.lane.b32.xlu1 %v627_v57, %s6663_s26  ;;  %v7293_v57 = vpop.permute.xlu0 %1141 }
 0x24b   :  { %10340 = vst [vmem:[#allocation48_spill] sm:$0xff] %v7293_v57 }
 0x24c   :  { %354 = vrot.lane.b32.xlu0 %v338_v62, %s6671_s11  ;;  %v7296_v62 = vpop.permute.xlu1 %1217 }
 0x24d   :  { %10341 = vst [vmem:[#allocation49_spill] sm:$0xff] %v7296_v62 }
 0x24e   :  { %356 = vrot.lane.b32.xlu1 %v339_v7, %s6671_s11  ;;  %v719_v54 = vpop.permute.xlu0 %718 }
 0x250   :  { %420 = vrot.lane.b32.xlu0 %v404_v10, %s6663_s26  ;;  %v7298_v18 = vpop.permute.xlu1 %1143 }
 0x251   :  { %10342 = vst [vmem:[#allocation50_spill] sm:$0xff] %v7298_v18  ;;  %v465_v18 = vsel %vm449_vm1, %v7254_v4, 0.0 }
 0x252   :  { %422 = vrot.lane.b32.xlu1 %v405_v14, %s6663_s26  ;;  %v557_v7 = vpop.permute.xlu0 %556  ;;  %v736_v14 = vsel %vm449_vm1, %v719_v54, 0.0  ;;  %v394_v54 = vmul.f32 %v7205_v58, %v7094_v44 }
 0x254   :  { %v721_v63 = vpop.permute.xlu1 %720 }
 0x256   :  { %v635_v8 = vpop.permute.xlu0 %634 }
 0x258   :  { %v559_v22 = vpop.permute.xlu1 %558 }
 0x25a   :  { %v347_v51 = vpop.permute.xlu0 %346 }
 0x25c   :  { %v7300_v23 = vpop.permute.xlu1 %636 }
 0x25e   :  { %v413_v10 = vpop.permute.xlu0 %412 }
 0x260   :  { %v349_v45 = vpop.permute.xlu1 %348 }
 0x264   :  { %v415_v0 = vpop.permute.xlu1 %414 }
 0x26f   :  { %463 = vadd.xlane.f32.xlu0 %v462_v16 }
 0x272   :  { %v452_v57 = vpop.xlane.xlu0 %451 }
 0x273   :  { %v469_v62 = vmul.f32 0.0625, %v452_v57  ;;  %737 = vadd.xlane.f32.xlu0 %v736_v14  ;;  %v395_v57 = vmul.f32 %v7207_v60, %v7102_v48  ;;  %v520_v14 = vmul.f32 %v7076_v25, %v7094_v44 }
 0x275   :  { %v475_v21 = vadd.f32 1.1920929e-07, %v469_v62  ;;  %v652_v62 = vsub.f32 %v598_v49, %v635_v8  ;;  %v574_v27 = vadd.f32 %v557_v7, %v520_v14 }
 0x276   :  { %466 = vadd.xlane.f32.xlu1 %v465_v18  ;;  %v304_v18 = vmul.f32 %v7094_v44, %v6927_v33 }
 0x277   :  { %6183 = vrsqrt.f32 %v475_v21 }
 0x278   :  { %v364_v2 = vadd.f32 %v347_v51, %v304_v18 }
 0x279   :  { %v455_v19 = vpop.xlane.xlu1 %454 }
 0x27a   :  { %v470_v17 = vmul.f32 0.0625, %v455_v19  ;;  %v431_v19 = vsub.f32 %v395_v57, %v415_v0  ;;  %v723_v0 = vpop.permute.xlu0 %722 }
 0x27c   :  { %v476_v52 = vadd.f32 1.1920929e-07, %v470_v17  ;;  %v430_v17 = vsub.f32 %v394_v54, %v413_v10 }
 0x27d   :  { %v725_v10 = vpop.permute.xlu1 %724 }
 0x27e   :  { %6185 = vrsqrt.f32 %v476_v52  ;;  %v305_v52 = vmul.f32 %v7102_v48, %v6934_v34  ;;  %v437_v49 = vsel %vm436_vm2, %v364_v2, %v430_v17  ;;  %v561_v7 = vpop.permute.xlu0 %560  ;;  %v599_v17 = vmul.f32 %v7082_v28, %v7102_v48 }
 0x280   :  { %v365_v60 = vadd.f32 %v349_v45, %v305_v52  ;;  %v739_v45 = vsel %vm449_vm1, %v721_v63, 0.0 }
 0x281   :  { %v6184_v16 = vpop.eup %6183  ;;  %v563_v51 = vpop.permute.xlu1 %562 }
 0x282   :  { %v487_v21 = vmul.f32 0.25, %v6184_v16  ;;  %v438_v8 = vsel %vm436_vm2, %v365_v60, %v431_v19  ;;  %v639_v54 = vpop.permute.xlu0 %638  ;;  %v742_v16 = vsel %vm449_vm1, %v723_v0, 0.0  ;;  %v653_v19 = vsub.f32 %v599_v17, %v7300_v23 }
 0x283   :  { %v601_v23 = vmul.f32 %v7090_v42, %v7125_v59  ;;  %v306_v0 = vmul.f32 %v7121_v56, %v6945_v35 }
 0x284   :  { %v493_v24 = vmul.f32 %v487_v21, %v437_v49 }
 0x285   :  { %v641_v2 = vpop.permute.xlu1 %640 }
 0x287   :  { %688 = vrot.lane.b32.xlu1 %v652_v62, %s6659_s18  ;;  %v522_v62 = vmul.f32 %v7084_v39, %v7121_v56  ;;  %v523_v39 = vmul.f32 %v7086_v40, %v7125_v59  ;;  %v397_v40 = vmul.f32 %v7212_v3, %v7125_v59 }
 0x288   :  { %v6186_v58 = vpop.eup %6185 }
 0x289   :  { %664 = vrot.lane.b32.xlu0 %v574_v27, %s6659_s18  ;;  %v488_v25 = vmul.f32 0.25, %v6186_v58  ;;  %v351_v58 = vpop.permute.xlu0 %350  ;;  %v353_v60 = vpop.permute.xlu1 %352  ;;  %v576_v63 = vadd.f32 %v561_v7, %v522_v62  ;;  %v600_v27 = vmul.f32 %v7088_v41, %v7121_v56  ;;  %v655_v41 = vsub.f32 %v601_v23, %v641_v2 }
 0x28a   :  { %v602_v23 = vmul.f32 %v7115_v53, %v7141_v9 }
 0x28b   :  { %v494_v1 = vmul.f32 %v488_v25, %v438_v8  ;;  %v577_v25 = vadd.f32 %v563_v51, %v523_v39  ;;  %v396_v8 = vmul.f32 %v7210_v61, %v7121_v56 }
 0x28d   :  { %v499_v13 = vpack.c.bf16 %v494_v1, %v493_v24  ;;  %v417_v57 = vpop.permute.xlu0 %416  ;;  %v521_v1 = vmul.f32 %v7078_v26, %v7102_v48  ;;  %v419_v18 = vpop.permute.xlu1 %418 }
 0x28e   :  { %v432_v7 = vsub.f32 %v396_v8, %v417_v57  ;;  %v433_v42 = vsub.f32 %v397_v40, %v419_v18  ;;  %v745_v57 = vsel %vm449_vm1, %v725_v10, 0.0  ;;  %v525_v10 = vmul.f32 %v7100_v47, %v7148_v12 }
 0x28f   :  { %5840 = vmatprep.mubr.msk.bf16.mxu1 %vm449_vm1, %v499_v13  ;;  %v575_v24 = vadd.f32 %v559_v22, %v521_v1  ;;  %v654_v22 = vsub.f32 %v600_v27, %v639_v54  ;;  %v307_v54 = vmul.f32 %v7125_v59, %v6952_v36  ;;  %v603_v40 = vmul.f32 %v7119_v55, %v7148_v12 }
 0x291   :  { %v367_v2 = vadd.f32 %v353_v60, %v307_v54 }
 0x2a8   :  { %743 = vadd.xlane.f32.xlu0 %v742_v16 }
 0x2ab   :  { %740 = vadd.xlane.f32.xlu1 %v739_v45  ;;  %v366_v45 = vadd.f32 %v351_v58, %v306_v0 }
 0x2ad   :  { %v439_v1 = vsel %vm436_vm2, %v366_v45, %v432_v7 }
 0x2b7   :  { %v458_v14 = vpop.xlane.xlu0 %457 }
 0x2b8   :  { %v471_v13 = vmul.f32 0.0625, %v458_v14 }
 0x2ba   :  { %v477_v52 = vadd.f32 1.1920929e-07, %v471_v13  ;;  %v440_v13 = vsel %vm436_vm2, %v367_v2, %v433_v42  ;;  %v398_v42 = vmul.f32 %v7214_v5, %v7141_v9 }
 0x2bb   :  { %v727_v17 = vpop.permute.xlu0 %726 }
 0x2bc   :  { %666 = vrot.lane.b32.xlu1 %v575_v24, %s6659_s18  ;;  %6187 = vrsqrt.f32 %v477_v52 }
 0x2be   :  { %v461_v21 = vpop.xlane.xlu1 %460  ;;  %668 = vrot.lane.b32.xlu0 %v576_v63, %s6659_s18  ;;  %v748_v63 = vsel %vm449_vm1, %v727_v17, 0.0 }
 0x2bf   :  { %v472_v26 = vmul.f32 0.0625, %v461_v21  ;;  %v565_v18 = vpop.permute.xlu0 %564 }
 0x2c0   :  { %690 = vrot.lane.b32.xlu1 %v653_v19, %s6659_s18 }
 0x2c1   :  { %v478_v28 = vadd.f32 1.1920929e-07, %v472_v26 }
 0x2c2   :  { %692 = vrot.lane.b32.xlu0 %v654_v22, %s6659_s18  ;;  %v729_v19 = vpop.permute.xlu1 %728  ;;  %v524_v22 = vmul.f32 %v7092_v43, %v7141_v9 }
 0x2c3   :  { %6189 = vrsqrt.f32 %v478_v28  ;;  %v751_v58 = vsel %vm449_vm1, %v729_v19, 0.0  ;;  %v643_v60 = vpop.permute.xlu0 %642 }
 0x2c4   :  { %670 = vrot.lane.b32.xlu1 %v577_v25, %s6659_s18  ;;  %v578_v28 = vadd.f32 %v565_v18, %v524_v22  ;;  %v656_v8 = vsub.f32 %v602_v23, %v643_v60  ;;  %v10343_v60 = vld [vmem:[#allocation30_spill] sm:$0xff] }
 0x2c6   :  { %v6188_v49 = vpop.eup %6187  ;;  %v567_v27 = vpop.permute.xlu1 %566 }
 0x2c7   :  { %v489_v16 = vmul.f32 0.25, %v6188_v49  ;;  %v355_v21 = vpop.permute.xlu0 %354 }
 0x2c8   :  { %694 = vrot.lane.b32.xlu1 %v655_v41, %s6659_s18  ;;  %v579_v41 = vadd.f32 %v567_v27, %v525_v10  ;;  %v1434_v27 = vmul.f32 %v10343_v60, %v7094_v44 }
 0x2c9   :  { %v495_v24 = vmul.f32 %v489_v16, %v439_v1  ;;  %v308_v16 = vmul.f32 %v7141_v9, %v6963_v37 }
 0x2ca   :  { %v645_v26 = vpop.permute.xlu1 %644 }
 0x2cb   :  { %v421_v39 = vpop.permute.xlu0 %420  ;;  %v657_v43 = vsub.f32 %v603_v40, %v645_v26 }
 0x2cd   :  { %v6190_v51 = vpop.eup %6189 }
 0x2ce   :  { %v490_v14 = vmul.f32 0.25, %v6190_v51  ;;  %v357_v25 = vpop.permute.xlu1 %356  ;;  %v434_v51 = vsub.f32 %v398_v42, %v421_v39  ;;  %v10345_v39 = vld [vmem:[#allocation32_spill] sm:$0xff] }
 0x2d0   :  { %v496_v62 = vmul.f32 %v490_v14, %v440_v13  ;;  %v368_v14 = vadd.f32 %v355_v21, %v308_v16  ;;  %v10344_v21 = vld [vmem:[#allocation31_spill] sm:$0xff] }
 0x2d1   :  { %v1435_v26 = vmul.f32 %v10344_v21, %v7102_v48  ;;  %v10355_v21 = vld [vmem:[#allocation44_spill] sm:$0xff] }
 0x2d2   :  { %v7355_v52 = vpack.c.bf16 %v496_v62, %v495_v24  ;;  %v423_v7 = vpop.permute.xlu1 %422  ;;  %v441_v24 = vsel %vm436_vm2, %v368_v14, %v434_v51 }
 0x2d4   :  { %v944_v18 = vrot.slane %v7355_v52, 4 }
 0x2e1   :  { %746 = vadd.xlane.f32.xlu0 %v745_v57 }
 0x2e5   :  { %749 = vadd.xlane.f32.xlu0 %v748_v63 }
 0x2ec   :  { %752 = vadd.xlane.f32.xlu1 %v751_v58 }
 0x2fb   :  { %672 = vrot.lane.b32.xlu0 %v578_v28, %s6659_s18  ;;  %v1512_v28 = vmul.f32 %v10345_v39, %v7094_v44 }
 0x2fc   :  { %v464_v49 = vpop.xlane.xlu0 %463 }
 0x2fd   :  { %v473_v0 = vmul.f32 0.0625, %v464_v49  ;;  %674 = vrot.lane.b32.xlu1 %v579_v41, %s6659_s18 }
 0x2ff   :  { %696 = vrot.lane.b32.xlu0 %v656_v8, %s6659_s18  ;;  %v479_v47 = vadd.f32 1.1920929e-07, %v473_v0 }
 0x300   :  { %v738_v22 = vpop.xlane.xlu0 %737 }
 0x301   :  { %698 = vrot.lane.b32.xlu1 %v657_v43, %s6659_s18  ;;  %6191 = vrsqrt.f32 %v479_v47  ;;  %v754_v10 = vmul.f32 0.0625, %v738_v22  ;;  %v10357_v22 = vld [vmem:[#allocation46_spill] sm:$0xff] }
 0x302   :  { %v1233_v39 = vmul.f32 %v10357_v22, %v7094_v44 }
 0x303   :  { %v467_v54 = vpop.xlane.xlu1 %466  ;;  %1219 = vrot.lane.b32.xlu0 %v6891_v29, %s6670_s27  ;;  %v760_v49 = vadd.f32 1.1920929e-07, %v754_v10 }
 0x304   :  { %v474_v53 = vmul.f32 0.0625, %v467_v54  ;;  %v10348_v54 = vld [vmem:[#allocation35_spill] sm:$0xff]  ;;  %v665_v42 = vpop.permute.xlu0 %664 }
 0x305   :  { %1221 = vrot.lane.b32.xlu1 %v6898_v30, %s6670_s27  ;;  %v399_v30 = vmul.f32 %v7216_v11, %v7148_v12 }
 0x306   :  { %v480_v55 = vadd.f32 1.1920929e-07, %v474_v53  ;;  %v1437_v53 = vmul.f32 %v10348_v54, %v7125_v59 }
 0x307   :  { %1145 = vrot.lane.b32.xlu0 %v6909_v31, %s6669_s25  ;;  %v435_v45 = vsub.f32 %v399_v30, %v423_v7  ;;  %v689_v41 = vpop.permute.xlu1 %688  ;;  %v10347_v7 = vld [vmem:[#allocation34_spill] sm:$0xff] }
 0x308   :  { %6193 = vrsqrt.f32 %v480_v55  ;;  %v1436_v47 = vmul.f32 %v10347_v7, %v7121_v56  ;;  %v706_v16 = vsel %vm436_vm2, %v665_v42, %v689_v41 }
 0x309   :  { %1147 = vrot.lane.b32.xlu1 %v6916_v32, %s6669_s25  ;;  %6195 = vrsqrt.f32 %v760_v49 }
 0x30b   :  { %1223 = vrot.lane.b32.xlu0 %v6909_v31, %s6670_s27  ;;  %v6192_v29 = vpop.eup %6191  ;;  %v309_v31 = vmul.f32 %v7148_v12, %v6970_v38 }
 0x30d   :  { %1225 = vrot.lane.b32.xlu1 %v6916_v32, %s6670_s27  ;;  %v491_v32 = vmul.f32 0.25, %v6192_v29  ;;  %v369_v1 = vadd.f32 %v357_v25, %v309_v31  ;;  %v10346_v25 = vld [vmem:[#allocation33_spill] sm:$0xff] }
 0x30e   :  { %v1513_v23 = vmul.f32 %v10346_v25, %v7102_v48  ;;  %v10359_v25 = vld [vmem:[#allocation48_spill] sm:$0xff] }
 0x30f   :  { %1602 = vrot.lane.b32.xlu0 %v7098_v46, %s6672_s28  ;;  %v442_v62 = vsel %vm436_vm2, %v369_v1, %v435_v45  ;;  %v497_v17 = vmul.f32 %v491_v32, %v441_v24  ;;  %v10349_v32 = vld [vmem:[#allocation36_spill] sm:$0xff]  ;;  %v10350_v1 = vld [vmem:[#allocation37_spill] sm:$0xff] }
 0x311   :  { %1604 = vrot.lane.b32.xlu1 %v7108_v50, %s6672_s28 }
 0x312   :  { %v6194_v2 = vpop.eup %6193 }
 0x313   :  { %v492_v13 = vmul.f32 0.25, %v6194_v2  ;;  %1606 = vrot.lane.b32.xlu0 %v7164_v15, %s6672_s28  ;;  %v6196_v29 = vpop.eup %6195  ;;  %v1514_v2 = vmul.f32 %v10349_v32, %v7121_v56 }
 0x314   :  { %v772_v31 = vmul.f32 %v6196_v29, %v706_v16 }
 0x315   :  { %v498_v57 = vmul.f32 %v492_v13, %v442_v62  ;;  %1608 = vrot.lane.b32.xlu1 %v7170_v20, %s6672_s28  ;;  %v1515_v13 = vmul.f32 %v10350_v1, %v7125_v59 }
 0x317   :  { %1610 = vrot.lane.b32.xlu0 %v7246_v6, %s6672_s28  ;;  %v501_v63 = vpack.c.bf16 %v498_v57, %v497_v17  ;;  %v10353_v57 = vld [vmem:[#allocation40_spill] sm:$0xff] }
 0x319   :  { %1612 = vrot.lane.b32.xlu1 %v7254_v4, %s6672_s28  ;;  %v7407_v19 = vrot.slane %v501_v63, 4  ;;  %v1516_v63 = vmul.f32 %v10353_v57, %v7141_v9 }
 0x31b   :  { %1323 = vrot.lane.b32.xlu0 %v7098_v46, %s6673_s29  ;;  %v946_v58 = vsel %vm874_vm3, %v944_v18, %v7407_v19  ;;  %v10354_v18 = vld [vmem:[#allocation41_spill] sm:$0xff] }
 0x31c   :  { %5856 = vmatprep.mubr.msk.bf16.mxu0 %vm449_vm1, %v946_v58  ;;  %v1517_v58 = vmul.f32 %v10354_v18, %v7148_v12 }
 0x31d   :  { %1325 = vrot.lane.b32.xlu1 %v7108_v50, %s6673_s29 }
 0x31f   :  { %1327 = vrot.lane.b32.xlu0 %v7164_v15, %s6673_s29 }
 0x321   :  { %1329 = vrot.lane.b32.xlu1 %v7170_v20, %s6673_s29 }
 0x323   :  { %1331 = vrot.lane.b32.xlu0 %v7246_v6, %s6673_s29 }
 0x325   :  { %1333 = vrot.lane.b32.xlu1 %v7254_v4, %s6673_s29 }
 0x327   :  { %1392 = vrot.lane.b32.xlu0 %v6927_v33, %s6668_s17 }
 0x329   :  { %1394 = vrot.lane.b32.xlu1 %v6934_v34, %s6668_s17 }
 0x32b   :  { %1470 = vrot.lane.b32.xlu0 %v6927_v33, %s6667_s19 }
 0x32d   :  { %1472 = vrot.lane.b32.xlu1 %v6934_v34, %s6667_s19 }
 0x32f   :  { %1446 = vrot.lane.b32.xlu0 %v1434_v27, %s6671_s11 }
 0x331   :  { %1448 = vrot.lane.b32.xlu1 %v1435_v26, %s6671_s11 }
 0x333   :  { %1524 = vrot.lane.b32.xlu0 %v1512_v28, %s6663_s26 }
 0x335   :  { %1526 = vrot.lane.b32.xlu1 %v1513_v23, %s6663_s26  ;;  %v744_v60 = vpop.xlane.xlu0 %743  ;;  %v1157_v23 = vmul.f32 %v10359_v25, %v7121_v56 }
 0x336   :  { %v756_v28 = vmul.f32 0.0625, %v744_v60 }
 0x337   :  { %1396 = vrot.lane.b32.xlu0 %v6945_v35, %s6668_s17 }
 0x338   :  { %v741_v8 = vpop.xlane.xlu1 %740  ;;  %v762_v41 = vadd.f32 1.1920929e-07, %v756_v28 }
 0x339   :  { %v755_v40 = vmul.f32 0.0625, %v741_v8  ;;  %1398 = vrot.lane.b32.xlu1 %v6952_v36, %s6668_s17  ;;  %v669_v27 = vpop.permute.xlu0 %668  ;;  %v10360_v8 = vld [vmem:[#allocation50_spill] sm:$0xff] }
 0x33b   :  { %v761_v0 = vadd.f32 1.1920929e-07, %v755_v40  ;;  %1474 = vrot.lane.b32.xlu0 %v6945_v35, %s6667_s19  ;;  %v1158_v40 = vmul.f32 %v10360_v8, %v7125_v59 }
 0x33c   :  { %v667_v43 = vpop.permute.xlu1 %666 }
 0x33d   :  { %6197 = vrsqrt.f32 %v761_v0  ;;  %1476 = vrot.lane.b32.xlu1 %v6952_v36, %s6667_s19  ;;  %v693_v10 = vpop.permute.xlu0 %692 }
 0x33e   :  { %6199 = vrsqrt.f32 %v762_v41  ;;  %v708_v32 = vsel %vm436_vm2, %v669_v27, %v693_v10  ;;  %v6520_v41 = vld [vmem:[%s10199_s7 + $0x28] sm:$0xff] }
 0x33f   :  { %1400 = vrot.lane.b32.xlu0 %v6963_v37, %s6668_s17 }
 0x340   :  { %v691_v55 = vpop.permute.xlu1 %690 }
 0x341   :  { %1402 = vrot.lane.b32.xlu1 %v6970_v38, %s6668_s17  ;;  %v707_v51 = vsel %vm436_vm2, %v667_v43, %v691_v55 }
 0x343   :  { %1450 = vrot.lane.b32.xlu0 %v1436_v47, %s6671_s11 }
 0x344   :  { %v671_v0 = vpop.permute.xlu1 %670 }
 0x345   :  { %1452 = vrot.lane.b32.xlu1 %v1437_v53, %s6671_s11 }
 0x347   :  { %v6198_v30 = vpop.eup %6197  ;;  %1478 = vrot.lane.b32.xlu0 %v6963_v37, %s6667_s19  ;;  %v10351_v37 = vld [vmem:[#allocation38_spill] sm:$0xff] }
 0x348   :  { %v773_v45 = vmul.f32 %v6198_v30, %v707_v51  ;;  %v1438_v62 = vmul.f32 %v10351_v37, %v7141_v9  ;;  %v695_v53 = vpop.permute.xlu1 %694  ;;  %v6200_v51 = vpop.eup %6199 }
 0x349   :  { %1480 = vrot.lane.b32.xlu1 %v6970_v38, %s6667_s19  ;;  %v10352_v38 = vld [vmem:[#allocation39_spill] sm:$0xff]  ;;  %v774_v1 = vmul.f32 %v6200_v51, %v708_v32 }
 0x34a   :  { %v778_v14 = vpack.c.bf16 %v773_v45, %v772_v31  ;;  %v1439_v17 = vmul.f32 %v10352_v38, %v7148_v12 }
 0x34b   :  { %1528 = vrot.lane.b32.xlu0 %v1514_v2, %s6663_s26  ;;  %v709_v2 = vsel %vm436_vm2, %v671_v0, %v695_v53  ;;  %v10371_v53 = vld [vmem:[#allocation15_spill] sm:$0xff] }
 0x34c   :  { %6028 = vmatprep.subr.msk.bf16.mxu1 %vm449_vm1, %v778_v14  ;;  %v791_v24 = vsel %vm449_vm1, %v778_v14, 0  ;;  %v876_v51 = vsel %vm874_vm3, %v10371_v53, 0 }
 0x34d   :  { %1530 = vrot.lane.b32.xlu1 %v1515_v13, %s6663_s26  ;;  %5837 = vmatpush3.bf16.xpose.msra.mxu1 %v791_v24 }
 0x34f   :  { %1454 = vrot.lane.b32.xlu0 %v1438_v62, %s6671_s11 }
 0x351   :  { %1456 = vrot.lane.b32.xlu1 %v1439_v17, %s6671_s11 }
 0x353   :  { %1532 = vrot.lane.b32.xlu0 %v1516_v63, %s6663_s26  ;;  %v10363_v63 = vld [vmem:[#allocation13_spill] sm:$0xff] }
 0x355   :  { %1534 = vrot.lane.b32.xlu1 %v1517_v58, %s6663_s26  ;;  %v6519_v58 = vld [vmem:[%s10199_s7 + $0x20] sm:$0xff] }
 0x357   :  { %1113 = vrot.lane.b32.xlu0 %v6927_v33, %s6670_s27 }
 0x359   :  { %1115 = vrot.lane.b32.xlu1 %v6934_v34, %s6670_s27 }
 0x35b   :  { %1191 = vrot.lane.b32.xlu0 %v6927_v33, %s6669_s25  ;;  %v1155_v33 = vmul.f32 %v10355_v21, %v7094_v44 }
 0x35d   :  { %1193 = vrot.lane.b32.xlu1 %v6934_v34, %s6669_s25  ;;  %v10356_v34 = vld [vmem:[#allocation47_spill] sm:$0xff] }
 0x35e   :  { %v1156_v26 = vmul.f32 %v10356_v34, %v7102_v48 }
 0x35f   :  { %1117 = vrot.lane.b32.xlu0 %v6945_v35, %s6670_s27 }
 0x361   :  { %1119 = vrot.lane.b32.xlu1 %v6952_v36, %s6670_s27 }
 0x363   :  { %1195 = vrot.lane.b32.xlu0 %v6945_v35, %s6669_s25  ;;  %v10358_v35 = vld [vmem:[#allocation49_spill] sm:$0xff] }
 0x365   :  { %1197 = vrot.lane.b32.xlu1 %v6952_v36, %s6669_s25  ;;  %v1234_v36 = vmul.f32 %v10358_v35, %v7102_v48 }
 0x367   :  { %1167 = vrot.lane.b32.xlu0 %v1155_v33, %s6671_s11 }
 0x369   :  { %1169 = vrot.lane.b32.xlu1 %v1156_v26, %s6671_s11 }
 0x36b   :  { %1245 = vrot.lane.b32.xlu0 %v1233_v39, %s6663_s26 }
 0x36d   :  { %1247 = vrot.lane.b32.xlu1 %v1234_v36, %s6663_s26 }
 0x36e   :  { %v747_v49 = vpop.xlane.xlu0 %746 }
 0x36f   :  { %v757_v43 = vmul.f32 0.0625, %v747_v49  ;;  %1171 = vrot.lane.b32.xlu0 %v1157_v23, %s6671_s11 }
 0x371   :  { %v763_v7 = vadd.f32 1.1920929e-07, %v757_v43  ;;  %1173 = vrot.lane.b32.xlu1 %v1158_v40, %s6671_s11  ;;  %v10367_v43 = vld [vmem:[#allocation18_spill] sm:$0xff] }
 0x372   :  { %v750_v47 = vpop.xlane.xlu0 %749 }
 0x373   :  { %6201 = vrsqrt.f32 %v763_v7  ;;  %v758_v54 = vmul.f32 0.0625, %v750_v47  ;;  %v10368_v7 = vld [vmem:[#allocation17_spill] sm:$0xff] }
 0x374   :  { %v10369_v47 = vpack.c.bf16 %v10367_v43, %v10368_v7 }
 0x375   :  { %v764_v29 = vadd.f32 1.1920929e-07, %v758_v54 }
 0x376   :  { %v673_v55 = vpop.permute.xlu0 %672  ;;  %v7561_v54 = vrot.slane %v10369_v47, 4 }
 0x377   :  { %6203 = vrsqrt.f32 %v764_v29 }
 0x378   :  { %10370 = vst [vmem:[#allocation35_spill] sm:$0xff] %v7561_v54 }
 0x379   :  { %v753_v42 = vpop.xlane.xlu1 %752 }
 0x37a   :  { %v759_v30 = vmul.f32 0.0625, %v753_v42  ;;  %v697_v16 = vpop.permute.xlu0 %696 }
 0x37b   :  { %v710_v39 = vsel %vm436_vm2, %v673_v55, %v697_v16  ;;  %v1037_v55 = vrot.slane %v10371_v53, 4 }
 0x37c   :  { %v765_v31 = vadd.f32 1.1920929e-07, %v759_v30 }
 0x37d   :  { %v6202_v45 = vpop.eup %6201  ;;  %v675_v14 = vpop.permute.xlu1 %674 }
 0x37e   :  { %6205 = vrsqrt.f32 %v765_v31  ;;  %v7524_v13 = vpop.permute.xlu0 %1219  ;;  %v775_v24 = vmul.f32 %v6202_v45, %v709_v2  ;;  %v7579_v45 = vsel %vm874_vm3, %v1037_v55, %v7561_v54 }
 0x37f   :  { %10361 = vst [vmem:[#allocation30_spill] sm:$0xff] %v7524_v13  ;;  %v1235_v37 = vmul.f32 %v7524_v13, %v7121_v56  ;;  %10373 = vst [vmem:[#allocation37_spill] sm:$0xff] %v7579_v45 }
 0x380   :  { %v779_v62 = vpack.c.bf16 %v775_v24, %v774_v1 }
 0x381   :  { %v699_v38 = vpop.permute.xlu1 %698  ;;  %1249 = vrot.lane.b32.xlu0 %v1235_v37, %s6663_s26  ;;  %v6204_v60 = vpop.eup %6203 }
 0x382   :  { %6029 = vmatprep.subr.msk.bf16.mxu1 %vm449_vm1, %v779_v62  ;;  %v7530_v17 = vpop.permute.xlu0 %1145  ;;  %v794_v57 = vsel %vm449_vm1, %v779_v62, 0  ;;  %v711_v28 = vsel %vm436_vm2, %v675_v14, %v699_v38  ;;  %v776_v10 = vmul.f32 %v6204_v60, %v710_v39 }
 0x383   :  { %10362 = vst [vmem:[#allocation31_spill] sm:$0xff] %v7530_v17  ;;  %5839 = vmatpush3.bf16.xpose.msra.mxu1 %v794_v57  ;;  %v1159_v14 = vmul.f32 %v7530_v17, %v7141_v9 }
 0x384   :  { %5844 = vmatprep.subr.bf16.mxu1 %v10363_v63 }
 0x385   :  { %v7534_v18 = vpop.permute.xlu1 %1221  ;;  %1121 = vrot.lane.b32.xlu0 %v6519_v58, %s6670_s27 }
 0x386   :  { %10364 = vst [vmem:[#allocation32_spill] sm:$0xff] %v7534_v18  ;;  %v1236_v27 = vmul.f32 %v7534_v18, %v7125_v59  ;;  %v7542_v33 = vpop.permute.xlu0 %1223 }
 0x387   :  { %10365 = vst [vmem:[#allocation33_spill] sm:$0xff] %v7542_v33  ;;  %v1237_v24 = vmul.f32 %v7542_v33, %v7141_v9 }
 0x388   :  { %v6206_v26 = vpop.eup %6205  ;;  %1251 = vrot.lane.b32.xlu1 %v1236_v27, %s6663_s26 }
 0x389   :  { %v777_v36 = vmul.f32 %v6206_v26, %v711_v28  ;;  %v7547_v23 = vpop.permute.xlu1 %1147  ;;  %1201 = vrot.lane.b32.xlu0 %v6520_v41, %s6669_s25 }
 0x38a   :  { %10366 = vst [vmem:[#allocation34_spill] sm:$0xff] %v7547_v23  ;;  %v1160_v49 = vmul.f32 %v7547_v23, %v7148_v12  ;;  %5841 = vmatmul.mubr.msk.bf16.vlgmr.msra.gmra.mrb[0].mxu1 %vm449_vm1, %v7355_v52  ;;  %v1603_v40 = vpop.permute.xlu0 %1602  ;;  %v949_v52 = vrot.slane %v779_v62, 4 }
 0x38b   :  { %v780_v0 = vpack.c.bf16 %v777_v36, %v776_v10  ;;  %5845 = vmatpush3.bf16.msra.mxu1 %v10363_v63 }
 0x38c   :  { %1123 = vrot.lane.b32.xlu1 %v6520_v41, %s6670_s27  ;;  %6030 = vmatprep.subr.msk.bf16.mxu1 %vm874_vm3, %v10371_v53 }
 0x38d   :  { %v950_v29 = vrot.slane %v780_v0, 4  ;;  %v7567_v42 = vpop.permute.xlu1 %1225  ;;  %1177 = vrot.lane.b32.xlu0 %v1160_v49, %s6671_s11 }
 0x38e   :  { %10372 = vst [vmem:[#allocation36_spill] sm:$0xff] %v7567_v42  ;;  %v1238_v30 = vmul.f32 %v7567_v42, %v7148_v12  ;;  %v1607_v16 = vpop.permute.xlu0 %1606 }
 0x38f   :  { %5847 = vmatpush3.bf16.msra.mxu1 %v876_v51  ;;  %v951_v31 = vsel %vm874_vm3, %v949_v52, %v950_v29  ;;  %v962_v38 = vsel %vm449_vm1, %v950_v29, 0  ;;  %v1626_v0 = vsel %vm449_vm1, %v1607_v16, 0.0 }
 0x390   :  { %1199 = vrot.lane.b32.xlu1 %v6519_v58, %s6669_s25  ;;  %6031 = vmatprep.subr.msk.bf16.mxu0 %vm449_vm1, %v951_v31  ;;  %v959_v32 = vsel %vm449_vm1, %v951_v31, 0 }
 0x391   :  { %5860 = vmatprep.subr.bf16.mxu1 %v7579_v45  ;;  %v1605_v2 = vpop.permute.xlu1 %1604  ;;  %5853 = vmatpush3.bf16.xpose.msra.mxu0 %v959_v32 }
 0x392   :  { %1255 = vrot.lane.b32.xlu0 %v1238_v30, %s6663_s26  ;;  %6032 = vmatprep.subr.msk.bf16.mxu0 %vm449_vm1, %v950_v29  ;;  %v1611_v1 = vpop.permute.xlu0 %1610  ;;  %v1623_v36 = vsel %vm449_vm1, %v1605_v2, 0.0 }
 0x393   :  { %v1632_v7 = vsel %vm449_vm1, %v1611_v1, 0.0 }
 0x394   :  { %1175 = vrot.lane.b32.xlu1 %v1159_v14, %s6671_s11 }
 0x395   :  { %v1609_v37 = vpop.permute.xlu1 %1608 }
 0x396   :  { %v1324_v62 = vpop.permute.xlu0 %1323  ;;  %v1629_v52 = vsel %vm449_vm1, %v1609_v37, 0.0 }
 0x397   :  { %v1341_v55 = vsel %vm449_vm1, %v1324_v62, 0.0 }
 0x398   :  { %1253 = vrot.lane.b32.xlu1 %v1237_v24, %s6663_s26 }
 0x399   :  { %5855 = vmatpush3.bf16.xpose.msra.mxu0 %v962_v38  ;;  %v1613_v58 = vpop.permute.xlu1 %1612 }
 0x39a   :  { %v1328_v57 = vpop.permute.xlu0 %1327  ;;  %v1635_v16 = vsel %vm449_vm1, %v1613_v58, 0.0 }
 0x39b   :  { %v1347_v51 = vsel %vm449_vm1, %v1328_v57, 0.0 }
 0x39d   :  { %v1326_v27 = vpop.permute.xlu1 %1325 }
 0x39e   :  { %v1332_v60 = vpop.permute.xlu0 %1331  ;;  %v1344_v2 = vsel %vm449_vm1, %v1326_v27, 0.0 }
 0x39f   :  { %v1353_v32 = vsel %vm449_vm1, %v1332_v60, 0.0 }
 0x3a0   :  { %5857 = vmatmul.mubr.msk.bf16.vlgmr.msra.gmra.mrb[12].mxu0 %vm449_vm1, %v7407_v19  ;;  %v1620_v19 = vsel %vm449_vm1, %v1603_v40, 0.0 }
 0x3a1   :  { %v1330_v39 = vpop.permute.xlu1 %1329 }
 0x3a2   :  { %v1393_v26 = vpop.permute.xlu0 %1392  ;;  %v1350_v1 = vsel %vm449_vm1, %v1330_v39, 0.0 }
 0x3a3   :  { %v1410_v58 = vmul.f32 %v1393_v26, %v7094_v44 }
 0x3a5   :  { %v1334_v10 = vpop.permute.xlu1 %1333 }
 0x3a6   :  { %v1471_v28 = vpop.permute.xlu0 %1470  ;;  %v1356_v37 = vsel %vm449_vm1, %v1334_v10, 0.0 }
 0x3a9   :  { %v1395_v49 = vpop.permute.xlu1 %1394 }
 0x3aa   :  { %v1447_v41 = vpop.permute.xlu0 %1446  ;;  %v1411_v39 = vmul.f32 %v1395_v49, %v7102_v48 }
 0x3ad   :  { %v1473_v47 = vpop.permute.xlu1 %1472 }
 0x3ae   :  { %v1525_v43 = vpop.permute.xlu0 %1524  ;;  %v1489_v49 = vmul.f32 %v1473_v47, %v7102_v48 }
 0x3b1   :  { %1624 = vadd.xlane.f32.xlu0 %v1623_v36  ;;  %v1449_v30 = vpop.permute.xlu1 %1448  ;;  %v1464_v36 = vadd.f32 %v1447_v41, %v1410_v58 }
 0x3b2   :  { %v1397_v29 = vpop.permute.xlu0 %1396 }
 0x3b5   :  { %1627 = vadd.xlane.f32.xlu0 %v1626_v0  ;;  %v1527_v40 = vpop.permute.xlu1 %1526  ;;  %v1412_v0 = vmul.f32 %v1397_v29, %v7121_v56 }
 0x3b6   :  { %v1475_v31 = vpop.permute.xlu0 %1474 }
 0x3b7   :  { %v1490_v10 = vmul.f32 %v1475_v31, %v7121_v56 }
 0x3b9   :  { %1633 = vadd.xlane.f32.xlu0 %v1632_v7  ;;  %v1399_v24 = vpop.permute.xlu1 %1398 }
 0x3ba   :  { %v1401_v14 = vpop.permute.xlu0 %1400 }
 0x3bb   :  { %v1414_v29 = vmul.f32 %v1401_v14, %v7141_v9 }
 0x3bc   :  { %1621 = vadd.xlane.f32.xlu1 %v1620_v19 }
 0x3bd   :  { %1342 = vadd.xlane.f32.xlu0 %v1341_v55  ;;  %v1477_v38 = vpop.permute.xlu1 %1476  ;;  %v1465_v55 = vadd.f32 %v1449_v30, %v1411_v39  ;;  %v1543_v30 = vsub.f32 %v1489_v49, %v1527_v40  ;;  %v5691_v40 = vld [vmem:[%s10204_s12] ss:$0 sm:$0xff] }
 0x3be   :  { %v1451_v62 = vpop.permute.xlu0 %1450 }
 0x3bf   :  { %v1466_v7 = vadd.f32 %v1451_v62, %v1412_v0 }
 0x3c0   :  { %1630 = vadd.xlane.f32.xlu1 %v1629_v52  ;;  %v1488_v52 = vmul.f32 %v1471_v28, %v7094_v44  ;;  %v1413_v28 = vmul.f32 %v1399_v24, %v7125_v59  ;;  %v10374_v24 = vld [vmem:[#allocation45_spill] sm:$0xff] }
 0x3c1   :  { %1348 = vadd.xlane.f32.xlu0 %v1347_v51  ;;  %v1403_v60 = vpop.permute.xlu1 %1402  ;;  %vm7632_vm5 = vcmp.le.s32.totalorder %v5691_v40, %v10374_v24 }
 0x3c2   :  { %v7606_v57 = vpop.permute.xlu0 %1478  ;;  %v1542_v41 = vsub.f32 %v1488_v52, %v1525_v43  ;;  %v1491_v43 = vmul.f32 %v1477_v38, %v7125_v59  ;;  %v1415_v47 = vmul.f32 %v1403_v60, %v7148_v12 }
 0x3c4   :  { %1636 = vadd.xlane.f32.xlu1 %v1635_v16 }
 0x3c5   :  { %1354 = vadd.xlane.f32.xlu0 %v1353_v32  ;;  %v1453_v19 = vpop.permute.xlu1 %1452 }
 0x3c6   :  { %v1529_v27 = vpop.permute.xlu0 %1528 }
 0x3c7   :  { %v1544_v51 = vsub.f32 %v1490_v10, %v1529_v27 }
 0x3c8   :  { %1345 = vadd.xlane.f32.xlu1 %v1344_v2  ;;  %v1467_v2 = vadd.f32 %v1453_v19, %v1413_v28 }
 0x3c9   :  { %v1481_v16 = vpop.permute.xlu1 %1480 }
 0x3ca   :  { %v1455_v26 = vpop.permute.xlu0 %1454  ;;  %v1493_v28 = vmul.f32 %v1481_v16, %v7148_v12 }
 0x3cb   :  { %v1468_v32 = vadd.f32 %v1455_v26, %v1414_v29 }
 0x3cc   :  { %1351 = vadd.xlane.f32.xlu1 %v1350_v1 }
 0x3cd   :  { %v1531_v31 = vpop.permute.xlu1 %1530 }
 0x3ce   :  { %v1545_v14 = vsub.f32 %v1491_v43, %v1531_v31  ;;  %v1533_v49 = vpop.permute.xlu0 %1532 }
 0x3d0   :  { %1357 = vadd.xlane.f32.xlu1 %v1356_v37 }
 0x3d1   :  { %v1457_v1 = vpop.permute.xlu1 %1456 }
 0x3d2   :  { %v1469_v37 = vadd.f32 %v1457_v1, %v1415_v47 }
 0x3db   :  { %1554 = vrot.lane.b32.xlu0 %v1464_v36, %s6672_s28  ;;  %v10377_v36 = vld [vmem:[#allocation42_spill] sm:$0xff] }
 0x3dc   :  { %vm7641_vm6 = vcmp.le.s32.totalorder %v5691_v40, %v10377_v36 }
 0x3df   :  { %1558 = vrot.lane.b32.xlu0 %v1466_v7, %s6672_s28  ;;  %v10380_v7 = vld [vmem:[#allocation43_spill] sm:$0xff] }
 0x3e0   :  { %vm7648_vm7 = vcmp.le.s32.totalorder %v5691_v40, %v10380_v7 }
 0x3e1   :  { %1556 = vrot.lane.b32.xlu1 %v1465_v55, %s6672_s28  ;;  %v1535_v55 = vpop.permute.xlu1 %1534 }
 0x3e2   :  { %v1547_v31 = vsub.f32 %v1493_v28, %v1535_v55 }
 0x3e3   :  { %1582 = vrot.lane.b32.xlu0 %v1544_v51, %s6672_s28 }
 0x3e5   :  { %1578 = vrot.lane.b32.xlu1 %v1542_v41, %s6672_s28  ;;  %v7664_v29 = vpop.permute.xlu1 %1115 }
 0x3e6   :  { %10383 = vst [vmem:[#allocation38_spill] sm:$0xff] %v7664_v29  ;;  %v1132_v3 = vmul.f32 %v7664_v29, %v7102_v48 }
 0x3e7   :  { %1562 = vrot.lane.b32.xlu0 %v1468_v32, %s6672_s28 }
 0x3e9   :  { %1580 = vrot.lane.b32.xlu1 %v1543_v30, %s6672_s28  ;;  %v7666_v32 = vpop.permute.xlu1 %1193  ;;  %v7668_v30 = vpop.permute.xlu0 %1113 }
 0x3ea   :  { %10384 = vst [vmem:[#allocation39_spill] sm:$0xff] %v7666_v32  ;;  %10385 = vst [vmem:[#allocation40_spill] sm:$0xff] %v7668_v30  ;;  %v1131_v18 = vmul.f32 %v7668_v30, %v7094_v44 }
 0x3ed   :  { %1560 = vrot.lane.b32.xlu1 %v1467_v2, %s6672_s28  ;;  %v7671_v2 = vpop.permute.xlu1 %1119  ;;  %v7674_v1 = vpop.permute.xlu0 %1191 }
 0x3ee   :  { %10386 = vst [vmem:[#allocation41_spill] sm:$0xff] %v7671_v2  ;;  %10387 = vst [vmem:[#allocation13_spill] sm:$0xff] %v7674_v1 }
 0x3f1   :  { %1584 = vrot.lane.b32.xlu1 %v1545_v14, %s6672_s28  ;;  %v7681_v16 = vpop.permute.xlu0 %1117 }
 0x3f2   :  { %10389 = vst [vmem:[#allocation17_spill] sm:$0xff] %v7681_v16 }
 0x3f5   :  { %1564 = vrot.lane.b32.xlu1 %v1469_v37, %s6672_s28  ;;  %v1492_v37 = vmul.f32 %v7606_v57, %v7141_v9  ;;  %v7683_v36 = vpop.permute.xlu0 %1195 }
 0x3f6   :  { %10390 = vst [vmem:[#allocation15_spill] sm:$0xff] %v7683_v36 }
 0x3f7   :  { %v1546_v24 = vsub.f32 %v1492_v37, %v1533_v49 }
 0x45d   :  { %v5842_v38 = vpop.f32.mrb[0].mxu1 }
 0x45e   :  { %v7638_v58 = vsel %vm7632_vm5, %v5842_v38, -1e+30  ;;  %v830_v60 = vpop.f32.mrb[1].mxu1  ;;  %v7678_v38 = vpop.permute.xlu1 %1197 }
 0x45f   :  { %v854_v27 = vsel %vm847_vm4, %v7638_v58, -inf  ;;  %v5843_v39 = vpop.f32.mrb[2].mxu1  ;;  %v7654_v10 = vsel %vm7641_vm6, %v830_v60, -1e+30  ;;  %10388 = vst [vmem:[#allocation18_spill] sm:$0xff] %v7678_v38  ;;  %v1212_v17 = vmul.f32 %v7678_v38, %v7125_v59 }
 0x460   :  { %v833_v52 = vpop.f32.mrb[3].mxu1  ;;  %855 = vmax.xlane.f32.xlu0 %v854_v27  ;;  %v848_v41 = vsel %vm847_vm4, %v7654_v10, -inf  ;;  %v1168_v39 = vpop.permute.xlu0 %1167 }
 0x461   :  { %v7658_v51 = vsel %vm7648_vm7, %v833_v52, -1e+30 }
 0x462   :  { %v851_v26 = vsel %vm847_vm4, %v7658_v51, -inf  ;;  %v1170_v60 = vpop.permute.xlu1 %1169 }
 0x463   :  { %852 = vmax.xlane.f32.xlu1 %v851_v26  ;;  %v1186_v42 = vadd.f32 %v1170_v60, %v1132_v3  ;;  %v1185_v60 = vadd.f32 %v1168_v39, %v1131_v18  ;;  %v1133_v39 = vmul.f32 %v7681_v16, %v7121_v56 }
 0x464   :  { %849 = vmax.xlane.f32.xlu0 %v848_v41  ;;  %v1246_v55 = vpop.permute.xlu0 %1245 }
 0x466   :  { %v1248_v27 = vpop.permute.xlu1 %1247 }
 0x468   :  { %v1172_v26 = vpop.permute.xlu0 %1171 }
 0x46a   :  { %v1174_v7 = vpop.permute.xlu1 %1173 }
 0x46c   :  { %v1250_v28 = vpop.permute.xlu0 %1249 }
 0x46e   :  { %v1252_v52 = vpop.permute.xlu1 %1251 }
 0x472   :  { %v7685_v41 = vpop.permute.xlu1 %1123 }
 0x473   :  { %v5858_v43 = vpop.f32.mrb[12].mxu0  ;;  %10391 = vst [vmem:[#allocation45_spill] sm:$0xff] %v7685_v41 }
 0x474   :  { %v998_v14 = vpop.f32.mrb[13].mxu0  ;;  %1588 = vrot.lane.b32.xlu1 %v1547_v31, %s6672_s28  ;;  %v7689_v57 = vsel %vm7632_vm5, %v5858_v43, -1e+30 }
 0x475   :  { %v5859_v47 = vpop.f32.mrb[14].mxu0  ;;  %v7693_v49 = vsel %vm7641_vm6, %v998_v14, -1e+30  ;;  %v1021_v31 = vsel %vm847_vm4, %v7689_v57, -inf  ;;  %v7707_v14 = vpop.permute.xlu0 %1121 }
 0x476   :  { %v1001_v40 = vpop.f32.mrb[15].mxu0  ;;  %v1015_v47 = vsel %vm847_vm4, %v7693_v49, -inf  ;;  %10393 = vst [vmem:[#allocation43_spill] sm:$0xff] %v7707_v14 }
 0x477   :  { %v7701_v37 = vsel %vm7648_vm7, %v1001_v40, -1e+30  ;;  %v1210_v40 = vmul.f32 %v7666_v32, %v7102_v48 }
 0x478   :  { %v1018_v43 = vsel %vm847_vm4, %v7701_v37, -inf }
 0x479   :  { %v7709_v11 = vpop.permute.xlu0 %1201  ;;  %v1264_v5 = vsub.f32 %v1210_v40, %v1248_v27  ;;  %v1266_v27 = vsub.f32 %v1212_v17, %v1252_v52 }
 0x47a   :  { %1586 = vrot.lane.b32.xlu0 %v1546_v24, %s6672_s28  ;;  %v7703_v24 = vpop.permute.xlu1 %1199  ;;  %10394 = vst [vmem:[#allocation51_spill] sm:$0xff] %v7709_v11  ;;  %v1214_v17 = vmul.f32 %v7709_v11, %v7148_v12 }
 0x47b   :  { %10392 = vst [vmem:[#allocation42_spill] sm:$0xff] %v7703_v24 }
 0x47e   :  { %v1176_v61 = vpop.permute.xlu1 %1175 }
 0x498   :  { %1022 = vmax.xlane.f32.xlu1 %v1021_v31  ;;  %v1254_v31 = vpop.permute.xlu1 %1253 }
 0x499   :  { %1016 = vmax.xlane.f32.xlu0 %v1015_v47  ;;  %v1178_v47 = vpop.permute.xlu0 %1177 }
 0x49c   :  { %v7716_v23 = vpop.xlane.xlu1 %1621 }
 0x49d   :  { %1019 = vmax.xlane.f32.xlu0 %v1018_v43  ;;  %v1134_v43 = vmul.f32 %v7671_v2, %v7125_v59  ;;  %v1256_v33 = vpop.permute.xlu0 %1255 }
 0x49f   :  { %v1188_v8 = vadd.f32 %v1174_v7, %v1134_v43 }
 0x4a0   :  { %v7723_v3 = vpop.xlane.xlu1 %1630 }
 0x4a1   :  { %v7732_v40 = vpop.xlane.xlu0 %1624  ;;  %v1641_v11 = vmul.f32 0.0625, %v7723_v3 }
 0x4a3   :  { %v1647_v2 = vadd.f32 1.1920929e-07, %v1641_v11 }
 0x4a4   :  { %v1637_v18 = vpop.xlane.xlu1 %1636 }
 0x4a5   :  { %v1628_v52 = vpop.xlane.xlu0 %1627  ;;  %6207 = vrsqrt.f32 %v1647_v2 }
 0x4a9   :  { %1277 = vrot.lane.b32.xlu1 %v1186_v42, %s6673_s29  ;;  %v1209_v42 = vmul.f32 %v7674_v1, %v7094_v44 }
 0x4ab   :  { %v1263_v7 = vsub.f32 %v1209_v42, %v1246_v55  ;;  %v1268_v55 = vsub.f32 %v1214_v17, %v1256_v33  ;;  %v7745_v42 = vpop.xlane.xlu1 %1345 }
 0x4ad   :  { %1301 = vrot.lane.b32.xlu1 %v1264_v5, %s6673_s29  ;;  %v1136_v5 = vmul.f32 %v7685_v41, %v7148_v12 }
 0x4af   :  { %v1190_v43 = vadd.f32 %v1178_v47, %v1136_v5  ;;  %v1634_v47 = vpop.xlane.xlu0 %1633  ;;  %v7755_v33 = vpop.xlane.xlu1 %1351 }
 0x4b0   :  { %v1642_v38 = vmul.f32 0.0625, %v1634_v47 }
 0x4b1   :  { %1281 = vrot.lane.b32.xlu1 %v1188_v8, %s6673_s29  ;;  %v1187_v8 = vadd.f32 %v1172_v26, %v1133_v39  ;;  %v1135_v26 = vmul.f32 %v7707_v14, %v7141_v9  ;;  %v1643_v14 = vmul.f32 0.0625, %v1637_v18 }
 0x4b2   :  { %v1648_v3 = vadd.f32 1.1920929e-07, %v1642_v38 }
 0x4b3   :  { %1275 = vrot.lane.b32.xlu0 %v1185_v60, %s6673_s29  ;;  %v1211_v60 = vmul.f32 %v7683_v36, %v7121_v56  ;;  %v1189_v5 = vadd.f32 %v1176_v61, %v1135_v26  ;;  %v7764_v61 = vpop.xlane.xlu1 %1357  ;;  %v1649_v16 = vadd.f32 1.1920929e-07, %v1643_v14 }
 0x4b5   :  { %1305 = vrot.lane.b32.xlu1 %v1266_v27, %s6673_s29  ;;  %v1265_v27 = vsub.f32 %v1211_v60, %v1250_v28  ;;  %v1213_v28 = vmul.f32 %v7703_v24, %v7141_v9 }
 0x4b7   :  { %1299 = vrot.lane.b32.xlu0 %v1263_v7, %s6673_s29  ;;  %v6521_v7 = vld [vmem:[%s10200_s8 + $0x8] sm:$0xff]  ;;  %v1267_v39 = vsub.f32 %v1213_v28, %v1254_v31  ;;  %v6523_v31 = vld [vmem:[%s10200_s8] sm:$0xff]  ;;  %v7777_v60 = vpop.permute.xlu1 %1556 }
 0x4b9   :  { %1285 = vrot.lane.b32.xlu1 %v1190_v43, %s6673_s29  ;;  %v7760_v43 = vpop.xlane.xlu0 %1342 }
 0x4bb   :  { %1279 = vrot.lane.b32.xlu0 %v1187_v8, %s6673_s29  ;;  %v6522_v8 = vld [vmem:[%s10200_s8 + $0x18] sm:$0xff]  ;;  %v7787_v26 = vpop.permute.xlu1 %1578 }
 0x4bd   :  { %1309 = vrot.lane.b32.xlu1 %v1268_v55, %s6673_s29  ;;  %v7770_v17 = vpop.xlane.xlu0 %1348 }
 0x4bf   :  { %1303 = vrot.lane.b32.xlu0 %v1265_v27, %s6673_s29  ;;  %v6524_v27 = vld [vmem:[%s10200_s8 + $0x10] sm:$0xff]  ;;  %v7794_v28 = vpop.permute.xlu1 %1580 }
 0x4c1   :  { %2301 = vrot.lane.b32.xlu1 %v6521_v7, %s6674_s2  ;;  %v7780_v55 = vpop.xlane.xlu0 %1354 }
 0x4c3   :  { %1283 = vrot.lane.b32.xlu0 %v1189_v5, %s6673_s29  ;;  %v1561_v41 = vpop.permute.xlu1 %1560 }
 0x4c5   :  { %2379 = vrot.lane.b32.xlu1 %v6521_v7, %s6675_s20  ;;  %v7790_v5 = vpop.permute.xlu0 %1554 }
 0x4c7   :  { %1307 = vrot.lane.b32.xlu0 %v1267_v39, %s6673_s29 }
 0x4c9   :  { %2305 = vrot.lane.b32.xlu1 %v6522_v8, %s6674_s2  ;;  %v1559_v39 = vpop.permute.xlu0 %1558 }
 0x4cb   :  { %2299 = vrot.lane.b32.xlu0 %v6523_v31, %s6674_s2 }
 0x4cd   :  { %2383 = vrot.lane.b32.xlu1 %v6522_v8, %s6675_s20  ;;  %v1583_v24 = vpop.permute.xlu0 %1582 }
 0x4cf   :  { %2377 = vrot.lane.b32.xlu0 %v6523_v31, %s6675_s20 }
 0x4d1   :  { %2022 = vrot.lane.b32.xlu1 %v6521_v7, %s6676_s30 }
 0x4d3   :  { %2303 = vrot.lane.b32.xlu0 %v6524_v27, %s6674_s2 }
 0x4d5   :  { %2100 = vrot.lane.b32.xlu1 %v6521_v7, %s6677_s23  ;;  %v1640_v7 = vmul.f32 0.0625, %v1628_v52 }
 0x4d7   :  { %2381 = vrot.lane.b32.xlu0 %v6524_v27, %s6675_s20  ;;  %v1646_v36 = vadd.f32 1.1920929e-07, %v1640_v7  ;;  %v1598_v7 = vsel %vm436_vm2, %v1559_v39, %v1583_v24 }
 0x4d9   :  { %2026 = vrot.lane.b32.xlu1 %v6522_v8, %s6676_s30  ;;  %6209 = vrsqrt.f32 %v1646_v36 }
 0x4da   :  { %6211 = vrsqrt.f32 %v1649_v16  ;;  %v1639_v16 = vmul.f32 0.0625, %v7732_v40 }
 0x4db   :  { %2020 = vrot.lane.b32.xlu0 %v6523_v31, %s6676_s30  ;;  %6213 = vrsqrt.f32 %v1648_v3 }
 0x4dc   :  { %v1645_v13 = vadd.f32 1.1920929e-07, %v1639_v16 }
 0x4dd   :  { %2104 = vrot.lane.b32.xlu1 %v6522_v8, %s6677_s23  ;;  %v1585_v8 = vpop.permute.xlu1 %1584 }
 0x4de   :  { %v1599_v2 = vsel %vm436_vm2, %v1561_v41, %v1585_v8  ;;  %v1638_v8 = vmul.f32 0.0625, %v7716_v23 }
 0x4df   :  { %2098 = vrot.lane.b32.xlu0 %v6523_v31, %s6677_s23  ;;  %v1563_v31 = vpop.permute.xlu0 %1562 }
 0x4e1   :  { %2487 = vrot.lane.b32.xlu1 %v7108_v50, %s6677_s23  ;;  %v1565_v11 = vpop.permute.xlu1 %1564 }
 0x4e3   :  { %2024 = vrot.lane.b32.xlu0 %v6524_v27, %s6676_s30 }
 0x4e5   :  { %2491 = vrot.lane.b32.xlu1 %v7170_v20, %s6677_s23 }
 0x4e7   :  { %2102 = vrot.lane.b32.xlu0 %v6524_v27, %s6677_s23  ;;  %v7821_v27 = vld [vmem:[%s10199_s7 + $0x8] sm:$0xff] }
 0x4e9   :  { %2208 = vrot.lane.b32.xlu1 %v7108_v50, %s6675_s20 }
 0x4eb   :  { %2485 = vrot.lane.b32.xlu0 %v7098_v46, %s6677_s23 }
 0x4ed   :  { %2212 = vrot.lane.b32.xlu1 %v7170_v20, %s6675_s20  ;;  %v856_v18 = vpop.xlane.xlu0 %855 }
 0x4ee   :  { %v859_v14 = vsub.f32 %v7638_v58, %v856_v18  ;;  %v6208_v58 = vpop.eup %6207 }
 0x4ef   :  { %2489 = vrot.lane.b32.xlu0 %v7164_v15, %s6677_s23  ;;  %v1659_v3 = vmul.f32 %v6208_v58, %v1599_v2  ;;  %v1644_v2 = vadd.f32 1.1920929e-07, %v1638_v8  ;;  %v7842_v58 = vld [vmem:[%s10199_s7] sm:$0xff] }
 0x4f0   :  { %v864_v38 = vmul.f32 1.442695, %v859_v14  ;;  %v853_v52 = vpop.xlane.xlu1 %852 }
 0x4f1   :  { %v858_v36 = vsub.f32 %v7658_v51, %v853_v52  ;;  %v850_v47 = vpop.xlane.xlu0 %849  ;;  %2277 = vrot.lane.b32.xlu1 %v7821_v27, %s6675_s20  ;;  %v6210_v51 = vpop.eup %6209 }
 0x4f2   :  { %v857_v41 = vsub.f32 %v7654_v10, %v850_v47  ;;  %6215 = vpow2.f32 %v864_v38  ;;  %v6212_v52 = vpop.eup %6211  ;;  %v1658_v25 = vmul.f32 %v6210_v51, %v1598_v7  ;;  %v1596_v51 = vsel %vm436_vm2, %v7790_v5, %v7787_v26 }
 0x4f3   :  { %v862_v40 = vmul.f32 1.442695, %v858_v36  ;;  %2206 = vrot.lane.b32.xlu0 %v7098_v46, %s6675_s20  ;;  %v6214_v23 = vpop.eup %6213  ;;  %v1048_v26 = vsel %vm874_vm3, %v7561_v54, 0  ;;  %v1359_v5 = vmul.f32 0.0625, %v7760_v43  ;;  %v1362_v43 = vmul.f32 0.0625, %v7755_v33 }
 0x4f4   :  { %v860_v18 = vmul.f32 1.442695, %v857_v41  ;;  %v1589_v14 = vpop.permute.xlu1 %1588  ;;  %v7834_v36 = vpack.c.bf16 %v1659_v3, %v1658_v25  ;;  %v1597_v41 = vsel %vm436_vm2, %v7777_v60, %v7794_v28 }
 0x4f5   :  { %6217 = vpow2.f32 %v862_v40  ;;  %v1601_v32 = vsel %vm436_vm2, %v1565_v11, %v1589_v14  ;;  %v1587_v24 = vpop.permute.xlu0 %1586  ;;  %2355 = vrot.lane.b32.xlu1 %v7821_v27, %s6674_s2 }
 0x4f6   :  { %6219 = vpow2.f32 %v860_v18  ;;  %v1661_v10 = vmul.f32 %v6212_v52, %v1601_v32  ;;  %v1600_v39 = vsel %vm436_vm2, %v1563_v31, %v1587_v24  ;;  %v1833_v47 = vrot.slane %v7834_v36, 4 }
 0x4f7   :  { %v1660_v38 = vmul.f32 %v6214_v23, %v1600_v39  ;;  %2210 = vrot.lane.b32.xlu0 %v7164_v15, %s6675_s20  ;;  %6221 = vrsqrt.f32 %v1645_v13  ;;  %v1360_v24 = vmul.f32 0.0625, %v7745_v42  ;;  %v1365_v23 = vadd.f32 1.1920929e-07, %v1359_v5 }
 0x4f8   :  { %6223 = vrsqrt.f32 %v1644_v2 }
 0x4f9   :  { %v1664_v16 = vpack.c.bf16 %v1661_v10, %v1660_v38  ;;  %v1366_v38 = vadd.f32 1.1920929e-07, %v1360_v24  ;;  %6225 = vrsqrt.f32 %v1365_v23 }
 0x4fb   :  { %v1834_v11 = vrot.slane %v1664_v16, 4  ;;  %2275 = vrot.lane.b32.xlu0 %v7842_v58, %s6675_s20  ;;  %6227 = vrsqrt.f32 %v1366_v38 }
 0x4fc   :  { %v7847_v32 = vpop.eup %6215 }
 0x4fd   :  { %v1835_v25 = vsel %vm874_vm3, %v1833_v47, %v1834_v11  ;;  %10395 = vst [vmem:[#allocation52_spill] sm:$0xff] %v7847_v32  ;;  %v867_v3 = vpack.c.bf16 %v7847_v32, %v7847_v32  ;;  %v1846_v28 = vsel %vm449_vm1, %v1834_v11, 0 }
 0x4fe   :  { %6037 = vmatprep.subr.msk.bf16.mxu0 %vm449_vm1, %v1835_v25  ;;  %v1843_v13 = vsel %vm449_vm1, %v1835_v25, 0 }
 0x4ff   :  { %v7851_v31 = vpop.eup %6217  ;;  %5885 = vmatpush3.bf16.xpose.msra.mxu0 %v1843_v13  ;;  %2353 = vrot.lane.b32.xlu0 %v7842_v58, %s6674_s2 }
 0x500   :  { %10396 = vst [vmem:[#allocation53_spill] sm:$0xff] %v7851_v31  ;;  %v7855_v7 = vpop.eup %6219  ;;  %6038 = vmatprep.subr.msk.bf16.mxu0 %vm449_vm1, %v1834_v11  ;;  %v1361_v11 = vmul.f32 0.0625, %v7770_v17  ;;  %v1368_v17 = vadd.f32 1.1920929e-07, %v1362_v43 }
 0x501   :  { %10397 = vst [vmem:[#allocation54_spill] sm:$0xff] %v7855_v7  ;;  %v866_v8 = vpack.c.bf16 %v7851_v31, %v7855_v7  ;;  %v6222_v40 = vpop.eup %6221 }
 0x502   :  { %v1657_v18 = vmul.f32 %v6222_v40, %v1597_v41  ;;  %v6224_v14 = vpop.eup %6223 }
 0x503   :  { %5848 = vmatprep.mubr.msk.bf16.mxu1 %vm847_vm4, %v866_v8  ;;  %v1656_v60 = vmul.f32 %v6224_v14, %v1596_v51  ;;  %v1363_v8 = vmul.f32 0.0625, %v7780_v55  ;;  %v6226_v33 = vpop.eup %6225 }
 0x504   :  { %5849 = vmatmul.mubr.msk.bf16.vlgmr.msra.gmra.mrb[4].mxu1 %vm847_vm4, %v867_v3  ;;  %v1367_v3 = vadd.f32 1.1920929e-07, %v1361_v11 }
 0x505   :  { %5861 = vmatpush3.bf16.msra.mxu1 %v7579_v45  ;;  %v7874_v52 = vpack.c.bf16 %v1657_v18, %v1656_v60  ;;  %v1369_v18 = vadd.f32 1.1920929e-07, %v1363_v8 }
 0x506   :  { %6033 = vmatprep.subr.msk.bf16.mxu1 %vm874_vm3, %v7561_v54 }
 0x507   :  { %5887 = vmatpush3.bf16.xpose.msra.mxu0 %v1846_v28 }
 0x509   :  { %5863 = vmatpush3.bf16.msra.mxu1 %v1048_v26  ;;  %v1377_v26 = vmul.f32 0.25, %v6226_v33 }
 0x50a   :  { %6034 = vmatprep.subr.msk.bf16.mxu1 %vm449_vm1, %v7874_v52 }
 0x525   :  { %v1023_v10 = vpop.xlane.xlu1 %1022 }
 0x526   :  { %v1026_v39 = vsub.f32 %v7689_v57, %v1023_v10  ;;  %v1017_v2 = vpop.xlane.xlu0 %1016  ;;  %v1364_v57 = vmul.f32 0.0625, %v7764_v61 }
 0x527   :  { %v1024_v16 = vsub.f32 %v7693_v49, %v1017_v2 }
 0x528   :  { %v1031_v47 = vmul.f32 1.442695, %v1026_v39  ;;  %v1370_v14 = vadd.f32 1.1920929e-07, %v1364_v57  ;;  %v1672_v57 = vsel %vm449_vm1, %v7874_v52, 0 }
 0x529   :  { %v1278_v25 = vpop.permute.xlu1 %1277  ;;  %v1027_v13 = vmul.f32 1.442695, %v1024_v16 }
 0x52a   :  { %v1020_v41 = vpop.xlane.xlu0 %1019  ;;  %6229 = vpow2.f32 %v1031_v47 }
 0x52b   :  { %v1025_v42 = vsub.f32 %v7701_v37, %v1020_v41  ;;  %6231 = vpow2.f32 %v1027_v13  ;;  %v6228_v37 = vpop.eup %6227 }
 0x52c   :  { %v1378_v39 = vmul.f32 0.25, %v6228_v37 }
 0x52d   :  { %v1029_v40 = vmul.f32 1.442695, %v1025_v42  ;;  %v1302_v49 = vpop.permute.xlu1 %1301 }
 0x52e   :  { %v1276_v51 = vpop.permute.xlu0 %1275  ;;  %v1318_v23 = vsel %vm436_vm2, %v1278_v25, %v1302_v49 }
 0x52f   :  { %6233 = vpow2.f32 %v1029_v40  ;;  %v1384_v11 = vmul.f32 %v1378_v39, %v1318_v23 }
 0x530   :  { %6235 = vrsqrt.f32 %v1367_v3 }
 0x531   :  { %v1282_v60 = vpop.permute.xlu1 %1281  ;;  %6237 = vrsqrt.f32 %v1368_v17 }
 0x532   :  { %v1300_v28 = vpop.permute.xlu0 %1299  ;;  %6239 = vrsqrt.f32 %v1369_v18 }
 0x533   :  { %6241 = vrsqrt.f32 %v1370_v14  ;;  %v1317_v55 = vsel %vm436_vm2, %v1276_v51, %v1300_v28 }
 0x534   :  { %v7890_v24 = vpop.eup %6229  ;;  %v1383_v2 = vmul.f32 %v1377_v26, %v1317_v55 }
 0x535   :  { %v1306_v61 = vpop.permute.xlu1 %1305  ;;  %10398 = vst [vmem:[#allocation55_spill] sm:$0xff] %v7890_v24  ;;  %v7893_v10 = vpop.eup %6231  ;;  %v1034_v43 = vpack.c.bf16 %v7890_v24, %v7890_v24 }
 0x536   :  { %v1280_v5 = vpop.permute.xlu0 %1279  ;;  %10399 = vst [vmem:[#allocation56_spill] sm:$0xff] %v7893_v10  ;;  %v1389_v42 = vpack.c.bf16 %v1384_v11, %v1383_v2  ;;  %v1320_v18 = vsel %vm436_vm2, %v1282_v60, %v1306_v61  ;;  %v1675_v61 = vsel %vm449_vm1, %v7834_v36, 0 }
 0x539   :  { %v7895_v38 = vpop.eup %6233  ;;  %v1286_v16 = vpop.permute.xlu1 %1285 }
 0x53a   :  { %10400 = vst [vmem:[#allocation57_spill] sm:$0xff] %v7895_v38  ;;  %v1304_v47 = vpop.permute.xlu0 %1303  ;;  %v1033_v13 = vpack.c.bf16 %v7895_v38, %v7893_v10  ;;  %v6236_v41 = vpop.eup %6235 }
 0x53b   :  { %v6238_v25 = vpop.eup %6237  ;;  %v1319_v8 = vsel %vm436_vm2, %v1280_v5, %v1304_v47  ;;  %v1379_v49 = vmul.f32 0.25, %v6236_v41 }
 0x53c   :  { %5864 = vmatprep.mubr.msk.bf16.mxu1 %vm847_vm4, %v1033_v13  ;;  %v6240_v40 = vpop.eup %6239  ;;  %v1380_v14 = vmul.f32 0.25, %v6238_v25 }
 0x53d   :  { %v1310_v3 = vpop.permute.xlu1 %1309  ;;  %5865 = vmatmul.mubr.msk.bf16.vlgmr.msra.gmra.mrb[8].mxu1 %vm847_vm4, %v1034_v43  ;;  %v6242_v17 = vpop.eup %6241  ;;  %v1385_v28 = vmul.f32 %v1379_v49, %v1319_v8  ;;  %v1381_v5 = vmul.f32 0.25, %v6240_v40  ;;  %v7934_v49 = vld [vmem:[%s10199_s7 + $0x10] sm:$0xff] }
 0x53e   :  { %5869 = vmatpush3.bf16.xpose.msra.mxu1 %v1672_v57  ;;  %5872 = vmatprep.mubr.msk.bf16.mxu1 %vm449_vm1, %v1389_v42  ;;  %v1284_v51 = vpop.permute.xlu0 %1283  ;;  %v1322_v33 = vsel %vm436_vm2, %v1286_v16, %v1310_v3  ;;  %v1386_v55 = vmul.f32 %v1380_v14, %v1320_v18  ;;  %v1382_v26 = vmul.f32 0.25, %v6242_v17 }
 0x53f   :  { %6035 = vmatprep.subr.msk.bf16.mxu1 %vm449_vm1, %v7834_v36  ;;  %v6527_v36 = vld [vmem:[%s10199_s7 + $0x18] sm:$0xff] }
 0x540   :  { %v1390_v2 = vpack.c.bf16 %v1386_v55, %v1385_v28  ;;  %v1388_v11 = vmul.f32 %v1382_v26, %v1322_v33 }
 0x541   :  { %v2302_v37 = vpop.permute.xlu1 %2301 }
 0x542   :  { %v2318_v52 = vmul.f32 %v2302_v37, %v7102_v48  ;;  %v1308_v23 = vpop.permute.xlu0 %1307  ;;  %v1828_v42 = vrot.slane %v1390_v2, 4 }
 0x543   :  { %v1321_v39 = vsel %vm436_vm2, %v1284_v51, %v1308_v23 }
 0x544   :  { %v1387_v47 = vmul.f32 %v1381_v5, %v1321_v39  ;;  %2331 = vrot.lane.b32.xlu1 %v2318_v52, %s6671_s11 }
 0x545   :  { %v2380_v60 = vpop.permute.xlu1 %2379 }
 0x546   :  { %v1391_v13 = vpack.c.bf16 %v1388_v11, %v1387_v47  ;;  %v2396_v16 = vmul.f32 %v2380_v60, %v7102_v48  ;;  %5871 = vmatpush3.bf16.xpose.msra.mxu1 %v1675_v61  ;;  %v2300_v41 = vpop.permute.xlu0 %2299 }
 0x547   :  { %v2317_v43 = vmul.f32 %v2300_v41, %v7094_v44 }
 0x548   :  { %v1829_v25 = vrot.slane %v1391_v13, 4  ;;  %2409 = vrot.lane.b32.xlu1 %v2396_v16, %s6663_s26 }
 0x549   :  { %2329 = vrot.lane.b32.xlu0 %v2317_v43, %s6671_s11  ;;  %v2306_v40 = vpop.permute.xlu1 %2305 }
 0x54a   :  { %v2378_v8 = vpop.permute.xlu0 %2377  ;;  %v1830_v3 = vsel %vm874_vm3, %v1828_v42, %v1829_v25  ;;  %v2320_v51 = vmul.f32 %v2306_v40, %v7125_v59 }
 0x54b   :  { %v2395_v57 = vmul.f32 %v2378_v8, %v7094_v44  ;;  %5888 = vmatprep.mubr.msk.bf16.mxu0 %vm449_vm1, %v1830_v3 }
 0x54c   :  { %2281 = vrot.lane.b32.xlu1 %v6527_v36, %s6675_s20  ;;  %5889 = vmatmul.mubr.msk.bf16.vlgmr.msra.gmra.mrb[16].mxu0 %vm449_vm1, %v1829_v25 }
 0x54d   :  { %5873 = vmatmul.mubr.msk.bf16.vlgmr.msra.gmra.mrb[12].mxu1 %vm449_vm1, %v1390_v2  ;;  %2407 = vrot.lane.b32.xlu0 %v2395_v57, %s6663_s26  ;;  %v2384_v18 = vpop.permute.xlu1 %2383 }
 0x54e   :  { %v2304_v17 = vpop.permute.xlu0 %2303  ;;  %v2398_v14 = vmul.f32 %v2384_v18, %v7125_v59 }
 0x54f   :  { %v2319_v28 = vmul.f32 %v2304_v17, %v7121_v56 }
 0x550   :  { %2359 = vrot.lane.b32.xlu1 %v6527_v36, %s6674_s2 }
 0x551   :  { %2279 = vrot.lane.b32.xlu0 %v7934_v49, %s6675_s20  ;;  %v7952_v55 = vpop.permute.xlu1 %2022 }
 0x552   :  { %v2382_v33 = vpop.permute.xlu0 %2381  ;;  %10401 = vst [vmem:[#allocation58_spill] sm:$0xff] %v7952_v55 }
 0x553   :  { %v2397_v37 = vmul.f32 %v2382_v33, %v7121_v56 }
 0x554   :  { %2335 = vrot.lane.b32.xlu1 %v2320_v51, %s6671_s11 }
 0x555   :  { %2357 = vrot.lane.b32.xlu0 %v7934_v49, %s6674_s2  ;;  %v7961_v52 = vpop.permute.xlu1 %2100 }
 0x556   :  { %v7959_v26 = vpop.permute.xlu0 %2020  ;;  %10403 = vst [vmem:[#allocation60_spill] sm:$0xff] %v7961_v52 }
 0x557   :  { %10402 = vst [vmem:[#allocation59_spill] sm:$0xff] %v7959_v26  ;;  %v2038_v39 = vmul.f32 %v7959_v26, %v7094_v44 }
 0x558   :  { %2413 = vrot.lane.b32.xlu1 %v2398_v14, %s6663_s26 }
 0x559   :  { %2333 = vrot.lane.b32.xlu0 %v2319_v28, %s6671_s11  ;;  %v7971_v23 = vpop.permute.xlu1 %2026 }
 0x55a   :  { %v7968_v5 = vpop.permute.xlu0 %2098  ;;  %10405 = vst [vmem:[#allocation62_spill] sm:$0xff] %v7971_v23  ;;  %v2041_v2 = vmul.f32 %v7971_v23, %v7125_v59 }
 0x55b   :  { %10404 = vst [vmem:[#allocation61_spill] sm:$0xff] %v7968_v5  ;;  %v2116_v47 = vmul.f32 %v7968_v5, %v7094_v44 }
 0x55c   :  { %1998 = vrot.lane.b32.xlu1 %v7821_v27, %s6677_s23 }
 0x55d   :  { %2411 = vrot.lane.b32.xlu0 %v2397_v37, %s6663_s26  ;;  %v7987_v60 = vpop.permute.xlu1 %2104 }
 0x55e   :  { %v7983_v11 = vpop.permute.xlu0 %2024  ;;  %10407 = vst [vmem:[#allocation64_spill] sm:$0xff] %v7987_v60  ;;  %v2119_v61 = vmul.f32 %v7987_v60, %v7125_v59 }
 0x55f   :  { %10406 = vst [vmem:[#allocation63_spill] sm:$0xff] %v7983_v11  ;;  %v2040_v13 = vmul.f32 %v7983_v11, %v7121_v56 }
 0x560   :  { %2076 = vrot.lane.b32.xlu1 %v7821_v27, %s6676_s30  ;;  %v2039_v27 = vmul.f32 %v7952_v55, %v7102_v48 }
 0x561   :  { %1996 = vrot.lane.b32.xlu0 %v7842_v58, %s6677_s23  ;;  %v2488_v42 = vpop.permute.xlu1 %2487 }
 0x562   :  { %v7995_v16 = vpop.permute.xlu0 %2102  ;;  %v2506_v40 = vsel %vm449_vm1, %v2488_v42, 0.0 }
 0x563   :  { %10408 = vst [vmem:[#allocation65_spill] sm:$0xff] %v7995_v16  ;;  %v2118_v41 = vmul.f32 %v7995_v16, %v7121_v56 }
 0x564   :  { %2002 = vrot.lane.b32.xlu1 %v6527_v36, %s6677_s23 }
 0x565   :  { %2074 = vrot.lane.b32.xlu0 %v7842_v58, %s6676_s30  ;;  %v2117_v58 = vmul.f32 %v7961_v52, %v7102_v48  ;;  %v2492_v8 = vpop.permute.xlu1 %2491 }
 0x566   :  { %v2486_v43 = vpop.permute.xlu0 %2485  ;;  %v2512_v3 = vsel %vm449_vm1, %v2492_v8, 0.0 }
 0x567   :  { %v2503_v57 = vsel %vm449_vm1, %v2486_v43, 0.0 }
 0x568   :  { %2080 = vrot.lane.b32.xlu1 %v6527_v36, %s6676_s30 }
 0x569   :  { %2000 = vrot.lane.b32.xlu0 %v7934_v49, %s6677_s23  ;;  %v2209_v17 = vpop.permute.xlu1 %2208 }
 0x56a   :  { %v2490_v25 = vpop.permute.xlu0 %2489  ;;  %v2227_v14 = vsel %vm449_vm1, %v2209_v17, 0.0 }
 0x56b   :  { %v2509_v18 = vsel %vm449_vm1, %v2490_v25, 0.0 }
 0x56c   :  { %2052 = vrot.lane.b32.xlu1 %v2039_v27, %s6671_s11 }
 0x56d   :  { %2078 = vrot.lane.b32.xlu0 %v7934_v49, %s6676_s30  ;;  %v2213_v37 = vpop.permute.xlu1 %2212 }
 0x56e   :  { %v2207_v36 = vpop.permute.xlu0 %2206  ;;  %v2233_v27 = vsel %vm449_vm1, %v2213_v37, 0.0 }
 0x56f   :  { %v2224_v51 = vsel %vm449_vm1, %v2207_v36, 0.0 }
 0x570   :  { %2130 = vrot.lane.b32.xlu1 %v2117_v58, %s6663_s26 }
 0x571   :  { %2050 = vrot.lane.b32.xlu0 %v2038_v39, %s6671_s11  ;;  %v2278_v58 = vpop.permute.xlu1 %2277 }
 0x572   :  { %v2211_v28 = vpop.permute.xlu0 %2210 }
 0x573   :  { %v2230_v33 = vsel %vm449_vm1, %v2211_v28, 0.0 }
 0x574   :  { %2056 = vrot.lane.b32.xlu1 %v2041_v2, %s6671_s11 }
 0x575   :  { %2128 = vrot.lane.b32.xlu0 %v2116_v47, %s6663_s26  ;;  %v8010_v2 = vpop.permute.xlu1 %2355 }
 0x576   :  { %v2276_v39 = vpop.permute.xlu0 %2275  ;;  %v2372_v31 = vmul.f32 %v8010_v2, %v7102_v48 }
 0x577   :  { %v2293_v42 = vmul.f32 %v2276_v39, %v7094_v44 }
 0x578   :  { %2134 = vrot.lane.b32.xlu1 %v2119_v61, %s6663_s26  ;;  %v2294_v61 = vmul.f32 %v2278_v58, %v7102_v48 }
 0x579   :  { %2054 = vrot.lane.b32.xlu0 %v2040_v13, %s6671_s11 }
 0x57a   :  { %v8015_v13 = vpop.permute.xlu0 %2353 }
 0x57d   :  { %2132 = vrot.lane.b32.xlu0 %v2118_v41, %s6663_s26 }
 0x59c   :  { %2513 = vadd.xlane.f32.xlu1 %v2512_v3  ;;  %2504 = vadd.xlane.f32.xlu0 %v2503_v57 }
 0x5a0   :  { %2507 = vadd.xlane.f32.xlu0 %v2506_v40  ;;  %2225 = vadd.xlane.f32.xlu1 %v2224_v51 }
 0x5a4   :  { %2510 = vadd.xlane.f32.xlu0 %v2509_v18  ;;  %2228 = vadd.xlane.f32.xlu1 %v2227_v14 }
 0x5a8   :  { %2231 = vadd.xlane.f32.xlu1 %v2230_v33 }
 0x5ac   :  { %2234 = vadd.xlane.f32.xlu1 %v2233_v27 }
 0x5b6   :  { %v2332_v47 = vpop.permute.xlu1 %2331 }
 0x5b7   :  { %v2348_v41 = vadd.f32 %v2332_v47, %v2294_v61 }
 0x5ba   :  { %1749 = vrot.lane.b32.xlu0 %v10363_v63, %s6673_s29  ;;  %v8032_v40 = vpop.permute.xlu1 %2409 }
 0x5bb   :  { %v2330_v43 = vpop.permute.xlu0 %2329 }
 0x5bc   :  { %v2347_v25 = vadd.f32 %v2330_v43, %v2293_v42 }
 0x5bd   :  { %1751 = vrot.lane.b32.xlu1 %v10371_v53, %s6673_s29 }
 0x5be   :  { %1919 = vrot.lane.b32.xlu0 %v7579_v45, %s6673_s29  ;;  %v8036_v17 = vpop.permute.xlu1 %2281  ;;  %v2426_v45 = vsub.f32 %v2372_v31, %v8032_v40  ;;  %v2371_v31 = vmul.f32 %v8015_v13, %v7094_v44 }
 0x5bf   :  { %v8034_v51 = vpop.permute.xlu0 %2407 }
 0x5c0   :  { %v2425_v2 = vsub.f32 %v2371_v31, %v8034_v51 }
 0x5c1   :  { %2439 = vrot.lane.b32.xlu1 %v2348_v41, %s6677_s23 }
 0x5c2   :  { %1921 = vrot.lane.b32.xlu0 %v7561_v54, %s6673_s29  ;;  %v8040_v14 = vpop.permute.xlu1 %2359 }
 0x5c3   :  { %v8038_v18 = vpop.permute.xlu0 %2279 }
 0x5c6   :  { %2437 = vrot.lane.b32.xlu0 %v2347_v25, %s6677_s23  ;;  %v8044_v33 = vpop.permute.xlu1 %2335 }
 0x5c7   :  { %v8042_v28 = vpop.permute.xlu0 %2357 }
 0x5ca   :  { %v8048_v27 = vpop.permute.xlu1 %2413 }
 0x5cb   :  { %v8046_v37 = vpop.permute.xlu0 %2333 }
 0x5ce   :  { %v8052_v39 = vpop.permute.xlu1 %1998 }
 0x5cf   :  { %v8050_v58 = vpop.permute.xlu0 %2411  ;;  %10412 = vst [vmem:[#allocation69_spill] sm:$0xff] %v8052_v39 }
 0x5d2   :  { %v8056_v61 = vpop.permute.xlu1 %2076 }
 0x5d3   :  { %v8054_v47 = vpop.permute.xlu0 %1996  ;;  %10414 = vst [vmem:[#allocation71_spill] sm:$0xff] %v8056_v61 }
 0x5d4   :  { %10413 = vst [vmem:[#allocation70_spill] sm:$0xff] %v8054_v47  ;;  %v2014_v13 = vmul.f32 %v8054_v47, %v7094_v44 }
 0x5d6   :  { %v8060_v43 = vpop.permute.xlu1 %2002 }
 0x5d7   :  { %v8026_v8 = vpop.f32.mrb[4].mxu1  ;;  %v8058_v41 = vpop.permute.xlu0 %2074  ;;  %10416 = vst [vmem:[#allocation73_spill] sm:$0xff] %v8060_v43 }
 0x5d8   :  { %10409 = vst [vmem:[#allocation66_spill] sm:$0xff] %v8026_v8  ;;  %v8028_v3 = vpop.f32.mrb[5].mxu1  ;;  %10415 = vst [vmem:[#allocation72_spill] sm:$0xff] %v8058_v41 }
 0x5d9   :  { %10410 = vst [vmem:[#allocation67_spill] sm:$0xff] %v8028_v3  ;;  %v5851_v57 = vpop.f32.mrb[6].mxu1 }
 0x5da   :  { %v8030_v36 = vpop.f32.mrb[7].mxu1  ;;  %v8064_v25 = vpop.permute.xlu1 %2080 }
 0x5db   :  { %10411 = vst [vmem:[#allocation68_spill] sm:$0xff] %v8030_v36  ;;  %v8062_v42 = vpop.permute.xlu0 %2000  ;;  %10418 = vst [vmem:[#allocation75_spill] sm:$0xff] %v8064_v25 }
 0x5dc   :  { %10417 = vst [vmem:[#allocation74_spill] sm:$0xff] %v8062_v42 }
 0x5de   :  { %v8072_v16 = vpop.permute.xlu1 %2052 }
 0x5df   :  { %v8066_v57 = vpop.permute.xlu0 %2078 }
 0x5e0   :  { %10419 = vst [vmem:[#allocation76_spill] sm:$0xff] %v8066_v57 }
 0x5e2   :  { %v8076_v30 = vpop.permute.xlu1 %2130 }
 0x5e3   :  { %v2051_v29 = vpop.permute.xlu0 %2050 }
 0x5e4   :  { %v2068_v51 = vadd.f32 %v2051_v29, %v2014_v13  ;;  %v2094_v29 = vmul.f32 %v8066_v57, %v7121_v56  ;;  %v6531_v13 = vld [vmem:[%s10200_s8 + $0x28] sm:$0xff] }
 0x5e6   :  { %v8080_v55 = vpop.permute.xlu1 %2056 }
 0x5e7   :  { %v8078_v52 = vpop.permute.xlu0 %2128 }
 0x5eb   :  { %v2055_v35 = vpop.permute.xlu0 %2054 }
 0x5ef   :  { %v2133_v38 = vpop.permute.xlu0 %2132 }
 0x5f0   :  { %v2148_v31 = vsub.f32 %v2094_v29, %v2133_v38 }
 0x610   :  { %v8068_v60 = vpop.f32.mrb[8].mxu1 }
 0x611   :  { %10420 = vst [vmem:[#allocation77_spill] sm:$0xff] %v8068_v60  ;;  %v8070_v23 = vpop.f32.mrb[9].mxu1 }
 0x612   :  { %10421 = vst [vmem:[#allocation78_spill] sm:$0xff] %v8070_v23  ;;  %v5867_v11 = vpop.f32.mrb[10].mxu1 }
 0x613   :  { %v8074_v1 = vpop.f32.mrb[11].mxu1 }
 0x614   :  { %10422 = vst [vmem:[#allocation79_spill] sm:$0xff] %v8074_v1 }
 0x61f   :  { %v5890_v34 = vpop.f32.mrb[16].mxu0 }
 0x620   :  { %v5874_v5 = vpop.f32.mrb[12].mxu1  ;;  %v8084_v26 = vsel %vm7632_vm5, %v5890_v34, -1e+30  ;;  %v1882_v22 = vpop.f32.mrb[17].mxu0 }
 0x621   :  { %v1905_v11 = vsel %vm847_vm4, %v8084_v26, -inf  ;;  %v1711_v21 = vpop.f32.mrb[13].mxu1  ;;  %v8090_v1 = vsel %vm7641_vm6, %v1882_v22, -1e+30  ;;  %v5891_v8 = vpop.f32.mrb[18].mxu0 }
 0x622   :  { %v5875_v60 = vpop.f32.mrb[14].mxu1  ;;  %1906 = vmax.xlane.f32.xlu1 %v1905_v11  ;;  %v1885_v36 = vpop.f32.mrb[19].mxu0  ;;  %v1899_v32 = vsel %vm847_vm4, %v8090_v1, -inf  ;;  %v8104_v22 = vsel %vm7632_vm5, %v5874_v5, -1e+30 }
 0x623   :  { %v1714_v23 = vpop.f32.mrb[15].mxu1  ;;  %v8094_v3 = vsel %vm7648_vm7, %v1885_v36, -1e+30  ;;  %v8096_v34 = vpop.permute.xlu1 %2134  ;;  %v1734_v60 = vsel %vm847_vm4, %v8104_v22, -inf  ;;  %v8114_v11 = vsel %vm7641_vm6, %v1711_v21, -1e+30 }
 0x624   :  { %v1902_v7 = vsel %vm847_vm4, %v8094_v3, -inf  ;;  %v1728_v24 = vsel %vm847_vm4, %v8114_v11, -inf }
 0x625   :  { %1903 = vmax.xlane.f32.xlu0 %v1902_v7 }
 0x626   :  { %1900 = vmax.xlane.f32.xlu1 %v1899_v32 }
 0x629   :  { %v8108_v8 = vpop.xlane.xlu1 %2513  ;;  %v8110_v36 = vpop.xlane.xlu0 %2504  ;;  %1735 = vmax.xlane.f32.xlu0 %v1734_v60 }
 0x62d   :  { %v8118_v10 = vpop.xlane.xlu1 %2225  ;;  %v8120_v5 = vpop.xlane.xlu0 %2507  ;;  %1729 = vmax.xlane.f32.xlu0 %v1728_v24 }
 0x631   :  { %v8122_v32 = vpop.xlane.xlu1 %2228  ;;  %v8124_v7 = vpop.xlane.xlu0 %2510 }
 0x635   :  { %v8129_v21 = vpop.xlane.xlu1 %2231  ;;  %v1750_v60 = vpop.permute.xlu0 %1749 }
 0x636   :  { %5876 = vmatprep.subr.bf16.mxu1 %v1750_v60 }
 0x637   :  { %2463 = vrot.lane.b32.xlu1 %v2426_v45, %s6677_s23  ;;  %5877 = vmatpush3.bf16.msra.mxu1 %v1750_v60  ;;  %v2295_v45 = vmul.f32 %v8038_v18, %v7121_v56  ;;  %v2092_v18 = vmul.f32 %v8058_v41, %v7094_v44 }
 0x639   :  { %v8132_v54 = vpop.xlane.xlu1 %2234  ;;  %v8136_v50 = vpop.permute.xlu0 %1919  ;;  %v2349_v40 = vadd.f32 %v8046_v37, %v2295_v45  ;;  %v2146_v37 = vsub.f32 %v2092_v18, %v8078_v52  ;;  %v2296_v52 = vmul.f32 %v8036_v17, %v7125_v59 }
 0x63b   :  { %v2350_v38 = vadd.f32 %v8044_v33, %v2296_v52  ;;  %v2093_v33 = vmul.f32 %v8056_v61, %v7102_v48 }
 0x63d   :  { %v1752_v20 = vpop.permute.xlu1 %1751 }
 0x63e   :  { %6036 = vmatprep.subr.msk.bf16.mxu1 %vm874_vm3, %v1752_v20  ;;  %v1761_v24 = vsel %vm874_vm3, %v1752_v20, 0  ;;  %v2373_v20 = vmul.f32 %v8042_v28, %v7121_v56  ;;  %v2016_v28 = vmul.f32 %v8062_v42, %v7121_v56 }
 0x63f   :  { %5879 = vmatpush3.bf16.msra.mxu1 %v1761_v24 }
 0x640   :  { %5892 = vmatprep.subr.bf16.mxu1 %v8136_v50  ;;  %v2427_v60 = vsub.f32 %v2373_v20, %v8050_v58  ;;  %v2070_v24 = vadd.f32 %v2055_v35, %v2016_v28  ;;  %v8162_v58 = vsel %vm7648_vm7, %v1714_v23, -1e+30  ;;  %v6529_v35 = vld [vmem:[%s10200_s8 + $0x20] sm:$0xff]  ;;  %v2374_v23 = vmul.f32 %v8040_v14, %v7125_v59 }
 0x641   :  { %v2147_v14 = vsub.f32 %v2093_v33, %v8076_v30  ;;  %v6530_v20 = vld [vmem:[%s10199_s7 + $0x20] sm:$0xff] }
 0x642   :  { %v2428_v45 = vsub.f32 %v2374_v23, %v8048_v27  ;;  %v2017_v27 = vmul.f32 %v8060_v43, %v7125_v59 }
 0x643   :  { %2461 = vrot.lane.b32.xlu0 %v2425_v2, %s6677_s23  ;;  %v1731_v2 = vsel %vm847_vm4, %v8162_v58, -inf }
 0x647   :  { %2441 = vrot.lane.b32.xlu0 %v2349_v40, %s6677_s23  ;;  %v2015_v40 = vmul.f32 %v8052_v39, %v7102_v48 }
 0x649   :  { %v2069_v17 = vadd.f32 %v8072_v16, %v2015_v40  ;;  %v2071_v16 = vadd.f32 %v8080_v55, %v2017_v27  ;;  %v8224_v55 = vld [vmem:[%s10199_s7 + $0x28] sm:$0xff] }
 0x64b   :  { %2465 = vrot.lane.b32.xlu0 %v2427_v60, %s6677_s23  ;;  %v2095_v60 = vmul.f32 %v8064_v25, %v7125_v59 }
 0x64d   :  { %v2149_v30 = vsub.f32 %v2095_v60, %v8096_v34  ;;  %v8230_v34 = vpop.permute.xlu0 %1921 }
 0x64f   :  { %2158 = vrot.lane.b32.xlu0 %v2068_v51, %s6675_s20 }
 0x651   :  { %v8232_v51 = vpop.permute.xlu0 %2437 }
 0x653   :  { %2182 = vrot.lane.b32.xlu0 %v2146_v37, %s6675_s20 }
 0x657   :  { %2162 = vrot.lane.b32.xlu0 %v2070_v24, %s6675_s20 }
 0x65b   :  { %1732 = vmax.xlane.f32.xlu1 %v1731_v2  ;;  %2186 = vrot.lane.b32.xlu0 %v2148_v31, %s6675_s20 }
 0x65f   :  { %2307 = vrot.lane.b32.xlu0 %v6529_v35, %s6674_s2 }
 0x663   :  { %2385 = vrot.lane.b32.xlu0 %v6529_v35, %s6675_s20 }
 0x667   :  { %2028 = vrot.lane.b32.xlu0 %v6529_v35, %s6676_s30 }
 0x66b   :  { %2106 = vrot.lane.b32.xlu0 %v6529_v35, %s6677_s23 }
 0x66c   :  { %2443 = vrot.lane.b32.xlu1 %v2350_v38, %s6677_s23  ;;  %v8246_v38 = vpop.permute.xlu1 %2439 }
 0x66f   :  { %2493 = vrot.lane.b32.xlu0 %v7246_v6, %s6677_s23 }
 0x670   :  { %2467 = vrot.lane.b32.xlu1 %v2428_v45, %s6677_s23 }
 0x673   :  { %2214 = vrot.lane.b32.xlu0 %v7246_v6, %s6675_s20 }
 0x674   :  { %2160 = vrot.lane.b32.xlu1 %v2069_v17, %s6675_s20 }
 0x677   :  { %2283 = vrot.lane.b32.xlu0 %v6530_v20, %s6675_s20 }
 0x678   :  { %2184 = vrot.lane.b32.xlu1 %v2147_v14, %s6675_s20 }
 0x67b   :  { %2361 = vrot.lane.b32.xlu0 %v6530_v20, %s6674_s2 }
 0x67c   :  { %2164 = vrot.lane.b32.xlu1 %v2071_v16, %s6675_s20 }
 0x680   :  { %2188 = vrot.lane.b32.xlu1 %v2149_v30, %s6675_s20 }
 0x684   :  { %2309 = vrot.lane.b32.xlu1 %v6531_v13, %s6674_s2 }
 0x688   :  { %2387 = vrot.lane.b32.xlu1 %v6531_v13, %s6675_s20 }
 0x68c   :  { %2030 = vrot.lane.b32.xlu1 %v6531_v13, %s6676_s30 }
 0x690   :  { %2108 = vrot.lane.b32.xlu1 %v6531_v13, %s6677_s23 }
 0x694   :  { %2495 = vrot.lane.b32.xlu1 %v7254_v4, %s6677_s23 }
 0x698   :  { %2216 = vrot.lane.b32.xlu1 %v7254_v4, %s6675_s20 }
 0x69c   :  { %2285 = vrot.lane.b32.xlu1 %v8224_v55, %s6675_s20 }
 0x6a0   :  { %2363 = vrot.lane.b32.xlu1 %v8224_v55, %s6674_s2 }
 0x6af   :  { %v1907_v45 = vpop.xlane.xlu1 %1906 }
 0x6b2   :  { %v1904_v18 = vpop.xlane.xlu0 %1903 }
 0x6b3   :  { %v1901_v33 = vpop.xlane.xlu1 %1900  ;;  %v1909_v16 = vsub.f32 %v8094_v3, %v1904_v18  ;;  %v2521_v3 = vmul.f32 0.0625, %v8110_v36 }
 0x6b4   :  { %v1908_v60 = vsub.f32 %v8090_v1, %v1901_v33  ;;  %v2242_v33 = vmul.f32 0.0625, %v8118_v10 }
 0x6b5   :  { %v1913_v43 = vmul.f32 1.442695, %v1909_v16 }
 0x6b6   :  { %v1736_v37 = vpop.xlane.xlu0 %1735  ;;  %v1911_v57 = vmul.f32 1.442695, %v1908_v60  ;;  %v2248_v10 = vadd.f32 1.1920929e-07, %v2242_v33 }
 0x6b7   :  { %v1739_v30 = vsub.f32 %v8104_v22, %v1736_v37  ;;  %v2464_v13 = vpop.permute.xlu1 %2463  ;;  %6243 = vpow2.f32 %v1913_v43 }
 0x6b8   :  { %6245 = vpow2.f32 %v1911_v57 }
 0x6ba   :  { %v1730_v28 = vpop.xlane.xlu0 %1729 }
 0x6bb   :  { %v1737_v25 = vsub.f32 %v8114_v11, %v1730_v28  ;;  %v2522_v11 = vmul.f32 0.0625, %v8120_v5  ;;  %v2527_v28 = vadd.f32 1.1920929e-07, %v2521_v3 }
 0x6bd   :  { %v1740_v18 = vmul.f32 1.442695, %v1737_v25 }
 0x6be   :  { %v8234_v24 = vpop.permute.xlu0 %2461 }
 0x6c2   :  { %v8236_v29 = vpop.permute.xlu0 %2441 }
 0x6c6   :  { %v8238_v31 = vpop.permute.xlu0 %2465 }
 0x6ca   :  { %v8240_v2 = vpop.permute.xlu0 %2158 }
 0x6ce   :  { %v8242_v35 = vpop.permute.xlu0 %2182 }
 0x6d2   :  { %v8244_v52 = vpop.permute.xlu0 %2162 }
 0x6d6   :  { %v8248_v23 = vpop.permute.xlu0 %2186 }
 0x6da   :  { %v2308_v40 = vpop.permute.xlu0 %2307 }
 0x6db   :  { %v2321_v17 = vmul.f32 %v2308_v40, %v7141_v9  ;;  %v2243_v40 = vmul.f32 0.0625, %v8122_v32 }
 0x6dd   :  { %2337 = vrot.lane.b32.xlu0 %v2321_v17, %s6671_s11  ;;  %v1744_v17 = vmul.f32 1.442695, %v1739_v30  ;;  %v2249_v37 = vadd.f32 1.1920929e-07, %v2243_v40 }
 0x6de   :  { %v2386_v14 = vpop.permute.xlu0 %2385 }
 0x6df   :  { %v2399_v27 = vmul.f32 %v2386_v14, %v7141_v9  ;;  %6247 = vpow2.f32 %v1744_v17  ;;  %v1910_v14 = vsub.f32 %v8084_v26, %v1907_v45  ;;  %v2524_v26 = vmul.f32 0.0625, %v8108_v8  ;;  %v8277_v45 = vpop.eup %6243 }
 0x6e0   :  { %6249 = vpow2.f32 %v1740_v18  ;;  %10425 = vst [vmem:[#allocation82_spill] sm:$0xff] %v8277_v45  ;;  %v8280_v16 = vpop.eup %6245  ;;  %v2479_v18 = vsel %vm436_vm2, %v8232_v51, %v8234_v24  ;;  %v2245_v51 = vmul.f32 0.0625, %v8132_v54 }
 0x6e1   :  { %2415 = vrot.lane.b32.xlu0 %v2399_v27, %s6663_s26  ;;  %v1915_v57 = vmul.f32 1.442695, %v1910_v14  ;;  %v2523_v27 = vmul.f32 0.0625, %v8124_v7  ;;  %v2530_v40 = vadd.f32 1.1920929e-07, %v2524_v26 }
 0x6e2   :  { %v8260_v42 = vpop.permute.xlu0 %2028 }
 0x6e3   :  { %10423 = vst [vmem:[#allocation80_spill] sm:$0xff] %v8260_v42  ;;  %v2042_v25 = vmul.f32 %v8260_v42, %v7141_v9  ;;  %v2529_v8 = vadd.f32 1.1920929e-07, %v2523_v27  ;;  %v2251_v27 = vadd.f32 1.1920929e-07, %v2245_v51 }
 0x6e5   :  { %2004 = vrot.lane.b32.xlu0 %v6530_v20, %s6677_s23 }
 0x6e6   :  { %v8270_v43 = vpop.permute.xlu0 %2106 }
 0x6e7   :  { %10424 = vst [vmem:[#allocation81_spill] sm:$0xff] %v8270_v43  ;;  %v2120_v5 = vmul.f32 %v8270_v43, %v7141_v9 }
 0x6e8   :  { %v1733_v1 = vpop.xlane.xlu1 %1732 }
 0x6e9   :  { %v1738_v22 = vsub.f32 %v8162_v58, %v1733_v1  ;;  %2082 = vrot.lane.b32.xlu0 %v6530_v20, %s6676_s30  ;;  %v2528_v58 = vadd.f32 1.1920929e-07, %v2522_v11  ;;  %v8282_v30 = vpop.eup %6247 }
 0x6ea   :  { %v8284_v17 = vpop.eup %6249  ;;  %v2494_v51 = vpop.permute.xlu0 %2493 }
 0x6eb   :  { %v1742_v32 = vmul.f32 1.442695, %v1738_v22  ;;  %v1747_v22 = vpack.c.bf16 %v8282_v30, %v8282_v30 }
 0x6ec   :  { %v2444_v36 = vpop.permute.xlu1 %2443 }
 0x6ed   :  { %6251 = vpow2.f32 %v1742_v32  ;;  %2058 = vrot.lane.b32.xlu0 %v2042_v25, %s6671_s11  ;;  %v1917_v32 = vpack.c.bf16 %v8277_v45, %v8280_v16 }
 0x6ee   :  { %6253 = vrsqrt.f32 %v2249_v37  ;;  %v2480_v37 = vsel %vm436_vm2, %v8246_v38, %v2464_v13  ;;  %v2244_v38 = vmul.f32 0.0625, %v8129_v21 }
 0x6ef   :  { %6255 = vrsqrt.f32 %v2527_v28 }
 0x6f0   :  { %v2468_v20 = vpop.permute.xlu1 %2467  ;;  %6257 = vrsqrt.f32 %v2248_v10 }
 0x6f1   :  { %6259 = vrsqrt.f32 %v2528_v58  ;;  %2136 = vrot.lane.b32.xlu0 %v2120_v5, %s6663_s26 }
 0x6f2   :  { %6261 = vpow2.f32 %v1915_v57  ;;  %v2200_v57 = vsel %vm436_vm2, %v8240_v2, %v8242_v35 }
 0x6f3   :  { %6263 = vrsqrt.f32 %v2530_v40 }
 0x6f4   :  { %v2161_v60 = vpop.permute.xlu1 %2160  ;;  %6265 = vrsqrt.f32 %v2529_v8  ;;  %v2250_v8 = vadd.f32 1.1920929e-07, %v2244_v38 }
 0x6f5   :  { %6267 = vrsqrt.f32 %v2251_v27 }
 0x6f6   :  { %6269 = vrsqrt.f32 %v2250_v8 }
 0x6f7   :  { %v8286_v3 = vpop.eup %6251 }
 0x6f8   :  { %v2185_v1 = vpop.permute.xlu1 %2184  ;;  %v1746_v7 = vpack.c.bf16 %v8286_v3, %v8284_v17  ;;  %v6254_v33 = vpop.eup %6253 }
 0x6f9   :  { %v6256_v11 = vpop.eup %6255  ;;  %v2201_v14 = vsel %vm436_vm2, %v2161_v60, %v2185_v1  ;;  %v2261_v10 = vmul.f32 0.25, %v6254_v33 }
 0x6fa   :  { %5880 = vmatprep.mubr.msk.bf16.mxu1 %vm847_vm4, %v1746_v7  ;;  %v6258_v28 = vpop.eup %6257  ;;  %v2539_v24 = vmul.f32 %v6256_v11, %v2479_v18  ;;  %v2482_v18 = vsel %vm436_vm2, %v2444_v36, %v2468_v20  ;;  %v2481_v7 = vsel %vm436_vm2, %v8236_v29, %v8238_v31 }
 0x6fb   :  { %5881 = vmatmul.mubr.msk.bf16.vlgmr.msra.gmra.mrb[16].mxu1 %vm847_vm4, %v1747_v22  ;;  %v6260_v25 = vpop.eup %6259  ;;  %v2260_v5 = vmul.f32 0.25, %v6258_v28  ;;  %v2267_v26 = vmul.f32 %v2261_v10, %v2201_v14 }
 0x6fc   :  { %5893 = vmatpush3.bf16.msra.mxu1 %v8136_v50  ;;  %v2165_v58 = vpop.permute.xlu1 %2164  ;;  %5896 = vmatprep.mubr.msk.bf16.mxu1 %vm847_vm4, %v1917_v32  ;;  %v2540_v13 = vmul.f32 %v6260_v25, %v2480_v37  ;;  %v8311_v54 = vpop.eup %6261  ;;  %v1931_v50 = vsel %vm874_vm3, %v8230_v34, 0 }
 0x6fd   :  { %6039 = vmatprep.subr.msk.bf16.mxu1 %vm874_vm3, %v8230_v34  ;;  %v2266_v40 = vmul.f32 %v2260_v5, %v2200_v57  ;;  %v1918_v2 = vpack.c.bf16 %v8311_v54, %v8311_v54  ;;  %v6264_v1 = vpop.eup %6263  ;;  %v2202_v57 = vsel %vm436_vm2, %v8244_v52, %v8248_v23 }
 0x6fe   :  { %v2545_v60 = vpack.c.bf16 %v2540_v13, %v2539_v24  ;;  %v2542_v34 = vmul.f32 %v6264_v1, %v2482_v18  ;;  %v6266_v22 = vpop.eup %6265  ;;  %v2515_v13 = vsel %vm449_vm1, %v2494_v51, 0.0 }
 0x6ff   :  { %v2272_v35 = vpack.c.bf16 %v2267_v26, %v2266_v40  ;;  %v2541_v20 = vmul.f32 %v6266_v22, %v2481_v7  ;;  %v6268_v28 = vpop.eup %6267 }
 0x700   :  { %5895 = vmatpush3.bf16.msra.mxu1 %v1931_v50  ;;  %v2189_v21 = vpop.permute.xlu1 %2188  ;;  %v2555_v32 = vsel %vm449_vm1, %v2545_v60, 0  ;;  %v6270_v24 = vpop.eup %6269  ;;  %v2263_v25 = vmul.f32 0.25, %v6268_v28 }
 0x701   :  { %6040 = vmatprep.subr.msk.bf16.mxu1 %vm449_vm1, %v2545_v60  ;;  %v8326_v11 = vpack.c.bf16 %v2542_v34, %v2541_v20  ;;  %v2203_v14 = vsel %vm436_vm2, %v2165_v58, %v2189_v21  ;;  %v2262_v5 = vmul.f32 0.25, %v6270_v24  ;;  %v2215_v21 = vpop.permute.xlu0 %2214 }
 0x702   :  { %v2269_v26 = vmul.f32 %v2263_v25, %v2203_v14  ;;  %v2236_v8 = vsel %vm449_vm1, %v2215_v21, 0.0 }
 0x703   :  { %5897 = vmatmul.mubr.msk.bf16.vlgmr.msra.gmra.mrb[20].mxu1 %vm847_vm4, %v1918_v2  ;;  %v2558_v38 = vsel %vm449_vm1, %v8326_v11, 0  ;;  %v2268_v58 = vmul.f32 %v2262_v5, %v2202_v57  ;;  %v6533_v5 = vld [vmem:[%s10200_s8] sm:$0xff] }
 0x704   :  { %v2310_v33 = vpop.permute.xlu1 %2309  ;;  %5904 = vmatprep.mubr.msk.bf16.mxu1 %vm449_vm1, %v2272_v35 }
 0x705   :  { %v2322_v36 = vmul.f32 %v2310_v33, %v7148_v12  ;;  %v8350_v50 = vpack.c.bf16 %v2269_v26, %v2268_v58  ;;  %v2284_v18 = vpop.permute.xlu0 %2283  ;;  %v6534_v26 = vld [vmem:[%s10200_s8 + $0x10] sm:$0xff] }
 0x706   :  { %v2297_v1 = vmul.f32 %v2284_v18, %v7141_v9 }
 0x707   :  { %2339 = vrot.lane.b32.xlu1 %v2322_v36, %s6671_s11 }
 0x708   :  { %v2388_v37 = vpop.permute.xlu1 %2387 }
 0x709   :  { %v2400_v29 = vmul.f32 %v2388_v37, %v7148_v12  ;;  %5901 = vmatpush3.bf16.xpose.msra.mxu1 %v2555_v32  ;;  %v2362_v2 = vpop.permute.xlu0 %2361 }
 0x70a   :  { %6041 = vmatprep.subr.msk.bf16.mxu1 %vm449_vm1, %v8326_v11  ;;  %v2375_v28 = vmul.f32 %v2362_v2, %v7141_v9 }
 0x70b   :  { %2417 = vrot.lane.b32.xlu1 %v2400_v29, %s6663_s26 }
 0x70c   :  { %v8333_v31 = vpop.permute.xlu1 %2030 }
 0x70d   :  { %10426 = vst [vmem:[#allocation83_spill] sm:$0xff] %v8333_v31  ;;  %v2043_v60 = vmul.f32 %v8333_v31, %v7148_v12 }
 0x70f   :  { %2006 = vrot.lane.b32.xlu1 %v8224_v55, %s6677_s23 }
 0x710   :  { %v8338_v10 = vpop.permute.xlu1 %2108  ;;  %2516 = vadd.xlane.f32.xlu0 %v2515_v13 }
 0x711   :  { %10427 = vst [vmem:[#allocation84_spill] sm:$0xff] %v8338_v10  ;;  %5903 = vmatpush3.bf16.xpose.msra.mxu1 %v2558_v38  ;;  %v2121_v23 = vmul.f32 %v8338_v10, %v7148_v12 }
 0x713   :  { %2084 = vrot.lane.b32.xlu1 %v8224_v55, %s6676_s30 }
 0x714   :  { %v2496_v27 = vpop.permute.xlu1 %2495 }
 0x715   :  { %v2518_v55 = vsel %vm449_vm1, %v2496_v27, 0.0 }
 0x717   :  { %2060 = vrot.lane.b32.xlu1 %v2043_v60, %s6671_s11 }
 0x718   :  { %5905 = vmatmul.mubr.msk.bf16.vlgmr.msra.gmra.mrb[24].mxu1 %vm449_vm1, %v8350_v50  ;;  %v2217_v52 = vpop.permute.xlu1 %2216 }
 0x719   :  { %v2239_v40 = vsel %vm449_vm1, %v2217_v52, 0.0  ;;  %v8412_v52 = vld [vmem:[%s10199_s7] sm:$0xff] }
 0x71a   :  { %2240 = vadd.xlane.f32.xlu0 %v2239_v40 }
 0x71b   :  { %2138 = vrot.lane.b32.xlu1 %v2121_v23, %s6663_s26 }
 0x71c   :  { %v2286_v33 = vpop.permute.xlu1 %2285 }
 0x71d   :  { %v2298_v37 = vmul.f32 %v2286_v33, %v7148_v12 }
 0x720   :  { %v8369_v36 = vpop.permute.xlu1 %2363 }
 0x730   :  { %2633 = vrot.lane.b32.xlu0 %v10371_v53, %s6675_s20 }
 0x73f   :  { %2519 = vadd.xlane.f32.xlu1 %v2518_v55 }
 0x743   :  { %2237 = vadd.xlane.f32.xlu1 %v2236_v8 }
 0x74f   :  { %v2338_v35 = vpop.permute.xlu0 %2337 }
 0x750   :  { %v2351_v7 = vadd.f32 %v2338_v35, %v2297_v1 }
 0x753   :  { %v2416_v34 = vpop.permute.xlu0 %2415 }
 0x754   :  { %2631 = vrot.lane.b32.xlu1 %v10363_v63, %s6675_s20  ;;  %v2429_v24 = vsub.f32 %v2375_v28, %v2416_v34 }
 0x757   :  { %v8367_v22 = vpop.permute.xlu0 %2004 }
 0x758   :  { %2445 = vrot.lane.b32.xlu1 %v2351_v7, %s6677_s23  ;;  %10428 = vst [vmem:[#allocation85_spill] sm:$0xff] %v8367_v22  ;;  %v2018_v14 = vmul.f32 %v8367_v22, %v7141_v9 }
 0x75b   :  { %v8371_v20 = vpop.permute.xlu0 %2082 }
 0x75c   :  { %10429 = vst [vmem:[#allocation86_spill] sm:$0xff] %v8371_v20  ;;  %v2096_v13 = vmul.f32 %v8371_v20, %v7141_v9 }
 0x75f   :  { %v2059_v51 = vpop.permute.xlu0 %2058 }
 0x760   :  { %v2072_v25 = vadd.f32 %v2059_v51, %v2018_v14 }
 0x763   :  { %v2137_v38 = vpop.permute.xlu0 %2136 }
 0x764   :  { %v2150_v57 = vsub.f32 %v2096_v13, %v2137_v38 }
 0x779   :  { %v2340_v32 = vpop.permute.xlu1 %2339 }
 0x77a   :  { %v2352_v29 = vadd.f32 %v2340_v32, %v2298_v37 }
 0x77c   :  { %2447 = vrot.lane.b32.xlu1 %v2352_v29, %s6677_s23 }
 0x77d   :  { %v2418_v58 = vpop.permute.xlu1 %2417 }
 0x780   :  { %2469 = vrot.lane.b32.xlu1 %v2429_v24, %s6677_s23 }
 0x781   :  { %v8403_v27 = vpop.permute.xlu1 %2006 }
 0x782   :  { %10430 = vst [vmem:[#allocation87_spill] sm:$0xff] %v8403_v27  ;;  %v2019_v20 = vmul.f32 %v8403_v27, %v7148_v12 }
 0x784   :  { %2166 = vrot.lane.b32.xlu1 %v2072_v25, %s6675_s20 }
 0x785   :  { %v8407_v60 = vpop.permute.xlu1 %2084 }
 0x786   :  { %10431 = vst [vmem:[#allocation88_spill] sm:$0xff] %v8407_v60 }
 0x788   :  { %2190 = vrot.lane.b32.xlu1 %v2150_v57, %s6675_s20 }
 0x789   :  { %v2061_v23 = vpop.permute.xlu1 %2060 }
 0x78c   :  { %3181 = vrot.lane.b32.xlu1 %v6533_v5, %s6671_s11 }
 0x790   :  { %3259 = vrot.lane.b32.xlu1 %v6533_v5, %s6673_s29 }
 0x794   :  { %3185 = vrot.lane.b32.xlu1 %v6534_v26, %s6671_s11 }
 0x798   :  { %3263 = vrot.lane.b32.xlu1 %v6534_v26, %s6673_s29 }
 0x79c   :  { %2902 = vrot.lane.b32.xlu1 %v6533_v5, %s6678_s0 }
 0x79d   :  { %v8418_v40 = vpop.xlane.xlu0 %2516 }
 0x7a0   :  { %2980 = vrot.lane.b32.xlu1 %v6533_v5, %s6672_s28 }
 0x7a4   :  { %2906 = vrot.lane.b32.xlu1 %v6534_v26, %s6678_s0 }
 0x7a7   :  { %v8424_v21 = vpop.xlane.xlu0 %2240 }
 0x7a8   :  { %2984 = vrot.lane.b32.xlu1 %v6534_v26, %s6672_s28 }
 0x7ab   :  { %v2634_v7 = vpop.permute.xlu0 %2633 }
 0x7ac   :  { %3367 = vrot.lane.b32.xlu1 %v7098_v46, %s6670_s27  ;;  %v2643_v29 = vsel %vm874_vm3, %v2634_v7, 0 }
 0x7b0   :  { %3371 = vrot.lane.b32.xlu1 %v7164_v15, %s6670_s27 }
 0x7b4   :  { %3088 = vrot.lane.b32.xlu1 %v7098_v46, %s6668_s17  ;;  %v2139_v46 = vpop.permute.xlu1 %2138 }
 0x7b8   :  { %3092 = vrot.lane.b32.xlu1 %v7164_v15, %s6668_s17 }
 0x7bc   :  { %3157 = vrot.lane.b32.xlu1 %v8412_v52, %s6673_s29 }
 0x7c0   :  { %3235 = vrot.lane.b32.xlu1 %v8412_v52, %s6671_s11 }
 0x7cc   :  { %v8420_v55 = vpop.xlane.xlu1 %2519 }
 0x7ce   :  { %v8422_v15 = vpop.f32.mrb[16].mxu1 }
 0x7cf   :  { %10432 = vst [vmem:[#allocation89_spill] sm:$0xff] %v8422_v15  ;;  %v8426_v8 = vpop.f32.mrb[17].mxu1 }
 0x7d0   :  { %10433 = vst [vmem:[#allocation90_spill] sm:$0xff] %v8426_v8  ;;  %v5883_v18 = vpop.f32.mrb[18].mxu1  ;;  %v8428_v2 = vpop.xlane.xlu1 %2237 }
 0x7d1   :  { %v8430_v35 = vpop.f32.mrb[19].mxu1 }
 0x7d2   :  { %10434 = vst [vmem:[#allocation91_spill] sm:$0xff] %v8430_v35 }
 0x7d4   :  { %v2632_v1 = vpop.permute.xlu1 %2631 }
 0x7d5   :  { %5908 = vmatprep.subr.bf16.mxu0 %v2632_v1 }
 0x7d6   :  { %v8432_v34 = vpop.f32.mrb[20].mxu1  ;;  %5909 = vmatpush3.bf16.msra.mxu0 %v2632_v1 }
 0x7d7   :  { %10435 = vst [vmem:[#allocation92_spill] sm:$0xff] %v8432_v34  ;;  %v8434_v33 = vpop.f32.mrb[21].mxu1  ;;  %6042 = vmatprep.subr.msk.bf16.mxu0 %vm874_vm3, %v2634_v7 }
 0x7d8   :  { %10436 = vst [vmem:[#allocation93_spill] sm:$0xff] %v8434_v33  ;;  %v5899_v37 = vpop.f32.mrb[22].mxu1  ;;  %v8440_v28 = vpop.permute.xlu1 %2445 }
 0x7d9   :  { %v8437_v32 = vpop.f32.mrb[23].mxu1 }
 0x7da   :  { %10437 = vst [vmem:[#allocation94_spill] sm:$0xff] %v8437_v32  ;;  %5911 = vmatpush3.bf16.msra.mxu0 %v2643_v29 }
 0x7eb   :  { %v5906_v51 = vpop.f32.mrb[24].mxu1 }
 0x7ec   :  { %v8444_v24 = vsel %vm7632_vm5, %v5906_v51, -1e+30  ;;  %v2594_v14 = vpop.f32.mrb[25].mxu1 }
 0x7ed   :  { %v2617_v25 = vsel %vm847_vm4, %v8444_v24, -inf  ;;  %v5907_v38 = vpop.f32.mrb[26].mxu1  ;;  %v8450_v13 = vsel %vm7641_vm6, %v2594_v14, -1e+30 }
 0x7ee   :  { %v2597_v57 = vpop.f32.mrb[27].mxu1  ;;  %2618 = vmax.xlane.f32.xlu0 %v2617_v25  ;;  %v8452_v5 = vpop.permute.xlu1 %2447  ;;  %v2611_v26 = vsel %vm847_vm4, %v8450_v13, -inf }
 0x7ef   :  { %v8458_v18 = vsel %vm7648_vm7, %v2597_v57, -1e+30  ;;  %v2376_v57 = vmul.f32 %v8369_v36, %v7148_v12 }
 0x7f0   :  { %v2614_v7 = vsel %vm847_vm4, %v8458_v18, -inf }
 0x7f2   :  { %2612 = vmax.xlane.f32.xlu0 %v2611_v26  ;;  %v8460_v1 = vpop.permute.xlu1 %2469  ;;  %v2430_v26 = vsub.f32 %v2376_v57, %v2418_v58 }
 0x7f6   :  { %2615 = vmax.xlane.f32.xlu0 %v2614_v7  ;;  %v8464_v37 = vpop.permute.xlu1 %2166 }
 0x7fa   :  { %v8466_v29 = vpop.permute.xlu1 %2190 }
 0x7fe   :  { %v3182_v51 = vpop.permute.xlu1 %3181 }
 0x7ff   :  { %v3199_v14 = vmul.f32 %v3182_v51, %v7094_v44  ;;  %v2073_v51 = vadd.f32 %v2061_v23, %v2019_v20  ;;  %v6536_v20 = vld [vmem:[%s10200_s8 + $0x8] sm:$0xff] }
 0x801   :  { %3211 = vrot.lane.b32.xlu1 %v3199_v14, %s6671_s11 }
 0x802   :  { %v3260_v25 = vpop.permute.xlu1 %3259 }
 0x803   :  { %v3277_v38 = vmul.f32 %v3260_v25, %v7094_v44  ;;  %v2097_v25 = vmul.f32 %v8407_v60, %v7148_v12 }
 0x805   :  { %3289 = vrot.lane.b32.xlu1 %v3277_v38, %s6663_s26  ;;  %v2151_v58 = vsub.f32 %v2097_v25, %v2139_v46  ;;  %v6537_v46 = vld [vmem:[%s10200_s8 + $0x18] sm:$0xff]  ;;  %v10442_v25 = vld [vmem:[#allocation12_spill] sm:$0xff] }
 0x806   :  { %v3186_v7 = vpop.permute.xlu1 %3185 }
 0x807   :  { %v3201_v14 = vmul.f32 %v3186_v7, %v7121_v56 }
 0x809   :  { %3161 = vrot.lane.b32.xlu1 %v7934_v49, %s6673_s29 }
 0x80a   :  { %v3264_v36 = vpop.permute.xlu1 %3263 }
 0x80b   :  { %v3279_v38 = vmul.f32 %v3264_v36, %v7121_v56  ;;  %v10443_v36 = vld [vmem:[#allocation19_spill] sm:$0xff] }
 0x80c   :  { %2471 = vrot.lane.b32.xlu0 %v2430_v26, %s6677_s23 }
 0x80d   :  { %3239 = vrot.lane.b32.xlu1 %v7934_v49, %s6671_s11 }
 0x80e   :  { %v8498_v23 = vpop.permute.xlu1 %2902 }
 0x80f   :  { %10438 = vst [vmem:[#allocation95_spill] sm:$0xff] %v8498_v23 }
 0x810   :  { %2168 = vrot.lane.b32.xlu0 %v2073_v51, %s6675_s20 }
 0x811   :  { %3215 = vrot.lane.b32.xlu1 %v3201_v14, %s6671_s11 }
 0x812   :  { %v8506_v57 = vpop.permute.xlu1 %2980 }
 0x813   :  { %10439 = vst [vmem:[#allocation96_spill] sm:$0xff] %v8506_v57  ;;  %v2998_v7 = vmul.f32 %v8506_v57, %v7094_v44 }
 0x814   :  { %2192 = vrot.lane.b32.xlu0 %v2151_v58, %s6675_s20  ;;  %v8542_v58 = vld [vmem:[%s10199_s7 + $0x8] sm:$0xff] }
 0x815   :  { %3293 = vrot.lane.b32.xlu1 %v3279_v38, %s6663_s26 }
 0x816   :  { %v8515_v26 = vpop.permute.xlu1 %2906 }
 0x817   :  { %10440 = vst [vmem:[#allocation97_spill] sm:$0xff] %v8515_v26  ;;  %v2922_v51 = vmul.f32 %v8515_v26, %v7121_v56 }
 0x818   :  { %3183 = vrot.lane.b32.xlu0 %v6536_v20, %s6671_s11 }
 0x819   :  { %2878 = vrot.lane.b32.xlu1 %v8412_v52, %s6672_s28 }
 0x81c   :  { %3261 = vrot.lane.b32.xlu0 %v6536_v20, %s6673_s29 }
 0x81d   :  { %2956 = vrot.lane.b32.xlu1 %v8412_v52, %s6678_s0  ;;  %v2920_v52 = vmul.f32 %v8498_v23, %v7094_v44 }
 0x820   :  { %3187 = vrot.lane.b32.xlu0 %v6537_v46, %s6671_s11 }
 0x821   :  { %2882 = vrot.lane.b32.xlu1 %v7934_v49, %s6672_s28 }
 0x824   :  { %3265 = vrot.lane.b32.xlu0 %v6537_v46, %s6673_s29 }
 0x825   :  { %2960 = vrot.lane.b32.xlu1 %v7934_v49, %s6678_s0  ;;  %v8523_v49 = vpop.permute.xlu1 %2984 }
 0x826   :  { %10441 = vst [vmem:[#allocation98_spill] sm:$0xff] %v8523_v49  ;;  %v3000_v14 = vmul.f32 %v8523_v49, %v7121_v56 }
 0x828   :  { %2904 = vrot.lane.b32.xlu0 %v6536_v20, %s6678_s0 }
 0x829   :  { %2932 = vrot.lane.b32.xlu1 %v2920_v52, %s6671_s11  ;;  %v3368_v38 = vpop.permute.xlu1 %3367  ;;  %v2526_v52 = vmul.f32 0.0625, %v8420_v55 }
 0x82c   :  { %2982 = vrot.lane.b32.xlu0 %v6536_v20, %s6672_s28  ;;  %v3385_v20 = vsel %vm449_vm1, %v3368_v38, 0.0 }
 0x82d   :  { %3010 = vrot.lane.b32.xlu1 %v2998_v7, %s6663_s26 }
 0x830   :  { %2908 = vrot.lane.b32.xlu0 %v6537_v46, %s6678_s0 }
 0x831   :  { %2936 = vrot.lane.b32.xlu1 %v2922_v51, %s6671_s11  ;;  %v2247_v51 = vmul.f32 0.0625, %v8424_v21 }
 0x833   :  { %v2253_v60 = vadd.f32 1.1920929e-07, %v2247_v51 }
 0x834   :  { %2986 = vrot.lane.b32.xlu0 %v6537_v46, %s6672_s28  ;;  %v2525_v46 = vmul.f32 0.0625, %v8418_v40 }
 0x835   :  { %3014 = vrot.lane.b32.xlu1 %v3000_v14, %s6663_s26  ;;  %v2532_v14 = vadd.f32 1.1920929e-07, %v2526_v52 }
 0x836   :  { %v2531_v7 = vadd.f32 1.1920929e-07, %v2525_v46 }
 0x838   :  { %3369 = vrot.lane.b32.xlu0 %v10442_v25, %s6670_s27  ;;  %6271 = vrsqrt.f32 %v2531_v7 }
 0x839   :  { %6273 = vrsqrt.f32 %v2532_v14 }
 0x83a   :  { %6275 = vrsqrt.f32 %v2253_v60 }
 0x83c   :  { %3373 = vrot.lane.b32.xlu0 %v10443_v36, %s6670_s27 }
 0x840   :  { %3090 = vrot.lane.b32.xlu0 %v10442_v25, %s6668_s17  ;;  %v2246_v25 = vmul.f32 0.0625, %v8428_v2  ;;  %v2483_v2 = vsel %vm436_vm2, %v8440_v28, %v8460_v1  ;;  %v2204_v28 = vsel %vm436_vm2, %v8464_v37, %v8466_v29 }
 0x842   :  { %v2252_v27 = vadd.f32 1.1920929e-07, %v2246_v25  ;;  %v6272_v52 = vpop.eup %6271  ;;  %v2715_v25 = vrot.slane %v8326_v11, 4 }
 0x844   :  { %3094 = vrot.lane.b32.xlu0 %v10443_v36, %s6668_s17  ;;  %6277 = vrsqrt.f32 %v2252_v27  ;;  %v2543_v27 = vmul.f32 %v6272_v52, %v2483_v2 }
 0x848   :  { %3159 = vrot.lane.b32.xlu0 %v8542_v58, %s6673_s29 }
 0x84c   :  { %3237 = vrot.lane.b32.xlu0 %v8542_v58, %s6671_s11 }
 0x859   :  { %3386 = vadd.xlane.f32.xlu1 %v3385_v20 }
 0x87b   :  { %v2619_v36 = vpop.xlane.xlu0 %2618 }
 0x87c   :  { %v2622_v22 = vsub.f32 %v8444_v24, %v2619_v36  ;;  %v6274_v24 = vpop.eup %6273 }
 0x87d   :  { %v6276_v60 = vpop.eup %6275 }
 0x87e   :  { %v2627_v40 = vmul.f32 1.442695, %v2622_v22  ;;  %v2265_v36 = vmul.f32 0.25, %v6276_v60 }
 0x87f   :  { %v2613_v10 = vpop.xlane.xlu0 %2612 }
 0x880   :  { %v2620_v38 = vsub.f32 %v8450_v13, %v2613_v10  ;;  %6279 = vpow2.f32 %v2627_v40 }
 0x882   :  { %v2623_v55 = vmul.f32 1.442695, %v2620_v38 }
 0x883   :  { %v2616_v20 = vpop.xlane.xlu0 %2615 }
 0x884   :  { %v2621_v21 = vsub.f32 %v8458_v18, %v2616_v20  ;;  %6281 = vpow2.f32 %v2623_v55  ;;  %v6278_v18 = vpop.eup %6277 }
 0x885   :  { %v2264_v1 = vmul.f32 0.25, %v6278_v18  ;;  %v6539_v18 = vld [vmem:[%s10199_s7 + $0x18] sm:$0xff] }
 0x886   :  { %v2625_v46 = vmul.f32 1.442695, %v2621_v21 }
 0x887   :  { %v2472_v7 = vpop.permute.xlu0 %2471  ;;  %v2270_v21 = vmul.f32 %v2264_v1, %v2204_v28 }
 0x888   :  { %6283 = vpow2.f32 %v2625_v46  ;;  %v2484_v10 = vsel %vm436_vm2, %v8452_v5, %v2472_v7 }
 0x889   :  { %v2544_v22 = vmul.f32 %v6274_v24, %v2484_v10  ;;  %v2710_v24 = vrot.slane %v8350_v50, 4 }
 0x88a   :  { %v8566_v55 = vpop.eup %6279 }
 0x88b   :  { %v2547_v13 = vpack.c.bf16 %v2544_v22, %v2543_v27  ;;  %v2169_v51 = vpop.permute.xlu0 %2168  ;;  %v2630_v7 = vpack.c.bf16 %v8566_v55, %v8566_v55 }
 0x88d   :  { %v2716_v14 = vrot.slane %v2547_v13, 4 }
 0x88e   :  { %v8570_v20 = vpop.eup %6281 }
 0x88f   :  { %v2193_v38 = vpop.permute.xlu0 %2192  ;;  %v2717_v40 = vsel %vm874_vm3, %v2715_v25, %v2716_v14 }
 0x890   :  { %v2205_v5 = vsel %vm436_vm2, %v2169_v51, %v2193_v38  ;;  %6043 = vmatprep.subr.msk.bf16.mxu0 %vm449_vm1, %v2717_v40  ;;  %v2725_v27 = vsel %vm449_vm1, %v2717_v40, 0  ;;  %v2728_v51 = vsel %vm449_vm1, %v2716_v14, 0 }
 0x891   :  { %v2271_v2 = vmul.f32 %v2265_v36, %v2205_v5 }
 0x892   :  { %v8572_v11 = vpop.eup %6283 }
 0x893   :  { %v2274_v46 = vpack.c.bf16 %v2271_v2, %v2270_v21  ;;  %v3184_v52 = vpop.permute.xlu0 %3183  ;;  %v2629_v37 = vpack.c.bf16 %v8572_v11, %v8570_v20  ;;  %v3372_v21 = vpop.permute.xlu1 %3371 }
 0x894   :  { %v3200_v29 = vmul.f32 %v3184_v52, %v7102_v48 }
 0x895   :  { %v2711_v10 = vrot.slane %v2274_v46, 4  ;;  %5912 = vmatprep.mubr.msk.bf16.mxu0 %vm847_vm4, %v2629_v37 }
 0x896   :  { %5913 = vmatmul.mubr.msk.bf16.vlgmr.msra.gmra.mrb[20].mxu0 %vm847_vm4, %v2630_v7  ;;  %3213 = vrot.lane.b32.xlu0 %v3200_v29, %s6671_s11 }
 0x897   :  { %5917 = vmatpush3.bf16.xpose.msra.mxu0 %v2725_v27  ;;  %v3262_v22 = vpop.permute.xlu0 %3261  ;;  %v2712_v60 = vsel %vm874_vm3, %v2710_v24, %v2711_v10  ;;  %v3089_v52 = vpop.permute.xlu1 %3088 }
 0x898   :  { %6044 = vmatprep.subr.msk.bf16.mxu0 %vm449_vm1, %v2716_v14  ;;  %v3278_v13 = vmul.f32 %v3262_v22, %v7102_v48  ;;  %5920 = vmatprep.mubr.msk.bf16.mxu0 %vm449_vm1, %v2712_v60 }
 0x89a   :  { %3291 = vrot.lane.b32.xlu0 %v3278_v13, %s6663_s26 }
 0x89b   :  { %v3188_v50 = vpop.permute.xlu0 %3187  ;;  %v3093_v27 = vpop.permute.xlu1 %3092 }
 0x89c   :  { %v3202_v1 = vmul.f32 %v3188_v50, %v7125_v59 }
 0x89e   :  { %3163 = vrot.lane.b32.xlu0 %v6539_v18, %s6673_s29 }
 0x89f   :  { %5919 = vmatpush3.bf16.xpose.msra.mxu0 %v2728_v51  ;;  %v3266_v25 = vpop.permute.xlu0 %3265  ;;  %v3158_v60 = vpop.permute.xlu1 %3157 }
 0x8a0   :  { %v3280_v14 = vmul.f32 %v3266_v25, %v7125_v59  ;;  %v10448_v25 = vld [vmem:[#allocation35_spill] sm:$0xff] }
 0x8a2   :  { %3241 = vrot.lane.b32.xlu0 %v6539_v18, %s6671_s11 }
 0x8a3   :  { %v8595_v28 = vpop.permute.xlu0 %2904  ;;  %v3236_v50 = vpop.permute.xlu1 %3235 }
 0x8a4   :  { %10444 = vst [vmem:[#allocation12_spill] sm:$0xff] %v8595_v28  ;;  %v2921_v29 = vmul.f32 %v8595_v28, %v7102_v48 }
 0x8a6   :  { %5921 = vmatmul.mubr.msk.bf16.vlgmr.msra.gmra.mrb[24].mxu0 %vm449_vm1, %v2711_v10  ;;  %3217 = vrot.lane.b32.xlu0 %v3202_v1, %s6671_s11 }
 0x8a7   :  { %v8600_v36 = vpop.permute.xlu0 %2982  ;;  %v3212_v51 = vpop.permute.xlu1 %3211 }
 0x8a8   :  { %10445 = vst [vmem:[#allocation19_spill] sm:$0xff] %v8600_v36  ;;  %v2999_v24 = vmul.f32 %v8600_v36, %v7102_v48 }
 0x8aa   :  { %3295 = vrot.lane.b32.xlu0 %v3280_v14, %s6663_s26 }
 0x8ab   :  { %v8604_v38 = vpop.permute.xlu0 %2908 }
 0x8ac   :  { %10446 = vst [vmem:[#allocation99_spill] sm:$0xff] %v8604_v38  ;;  %v2923_v22 = vmul.f32 %v8604_v38, %v7125_v59 }
 0x8ae   :  { %2880 = vrot.lane.b32.xlu0 %v8542_v58, %s6672_s28 }
 0x8af   :  { %v8608_v40 = vpop.permute.xlu0 %2986 }
 0x8b0   :  { %10447 = vst [vmem:[#allocation100_spill] sm:$0xff] %v8608_v40  ;;  %v3001_v13 = vmul.f32 %v8608_v40, %v7125_v59 }
 0x8b2   :  { %2958 = vrot.lane.b32.xlu0 %v8542_v58, %s6678_s0 }
 0x8b3   :  { %v3370_v5 = vpop.permute.xlu0 %3369 }
 0x8b4   :  { %v3388_v14 = vsel %vm449_vm1, %v3370_v5, 0.0  ;;  %v3253_v5 = vmul.f32 %v3236_v50, %v7094_v44 }
 0x8b6   :  { %2884 = vrot.lane.b32.xlu0 %v6539_v18, %s6672_s28 }
 0x8b7   :  { %v3374_v2 = vpop.permute.xlu0 %3373 }
 0x8b8   :  { %v3394_v46 = vsel %vm449_vm1, %v3374_v2, 0.0  ;;  %v3391_v2 = vsel %vm449_vm1, %v3372_v21, 0.0 }
 0x8b9   :  { %3395 = vadd.xlane.f32.xlu1 %v3394_v46  ;;  %v3106_v46 = vsel %vm449_vm1, %v3089_v52, 0.0 }
 0x8ba   :  { %2962 = vrot.lane.b32.xlu0 %v6539_v18, %s6678_s0  ;;  %v3175_v18 = vmul.f32 %v3158_v60, %v7094_v44 }
 0x8bb   :  { %v3091_v37 = vpop.permute.xlu0 %3090 }
 0x8bc   :  { %v3109_v7 = vsel %vm449_vm1, %v3091_v37, 0.0  ;;  %v3229_v1 = vadd.f32 %v3212_v51, %v3175_v18  ;;  %v3112_v37 = vsel %vm449_vm1, %v3093_v27, 0.0  ;;  %v10449_v51 = vld [vmem:[#allocation37_spill] sm:$0xff] }
 0x8bd   :  { %3110 = vadd.xlane.f32.xlu1 %v3109_v7 }
 0x8be   :  { %2934 = vrot.lane.b32.xlu0 %v2921_v29, %s6671_s11  ;;  %v3290_v29 = vpop.permute.xlu1 %3289 }
 0x8bf   :  { %v3095_v58 = vpop.permute.xlu0 %3094  ;;  %v3307_v18 = vsub.f32 %v3253_v5, %v3290_v29 }
 0x8c0   :  { %v3115_v10 = vsel %vm449_vm1, %v3095_v58, 0.0 }
 0x8c1   :  { %3116 = vadd.xlane.f32.xlu1 %v3115_v10 }
 0x8c2   :  { %3012 = vrot.lane.b32.xlu0 %v2999_v24, %s6663_s26  ;;  %v3162_v58 = vpop.permute.xlu1 %3161 }
 0x8c3   :  { %v3160_v7 = vpop.permute.xlu0 %3159 }
 0x8c6   :  { %2938 = vrot.lane.b32.xlu0 %v2923_v22, %s6671_s11  ;;  %v3240_v10 = vpop.permute.xlu1 %3239  ;;  %v3176_v22 = vmul.f32 %v3160_v7, %v7102_v48 }
 0x8c7   :  { %v3238_v24 = vpop.permute.xlu0 %3237 }
 0x8c8   :  { %v3254_v21 = vmul.f32 %v3238_v24, %v7102_v48 }
 0x8ca   :  { %3016 = vrot.lane.b32.xlu0 %v3001_v13, %s6663_s26  ;;  %v3216_v52 = vpop.permute.xlu1 %3215 }
 0x8ce   :  { %v3294_v50 = vpop.permute.xlu1 %3293 }
 0x8d2   :  { %2803 = vrot.lane.b32.xlu1 %v10448_v25, %s6675_s20 }
 0x8d6   :  { %3319 = vrot.lane.b32.xlu1 %v3229_v1, %s6670_s27 }
 0x8e9   :  { %3389 = vadd.xlane.f32.xlu0 %v3388_v14  ;;  %v3177_v14 = vmul.f32 %v3162_v58, %v7121_v56 }
 0x8ed   :  { %3392 = vadd.xlane.f32.xlu0 %v3391_v2 }
 0x8f1   :  { %3107 = vadd.xlane.f32.xlu0 %v3106_v46  ;;  %v3231_v46 = vadd.f32 %v3216_v52, %v3177_v14 }
 0x8f5   :  { %3113 = vadd.xlane.f32.xlu0 %v3112_v37  ;;  %v3255_v37 = vmul.f32 %v3240_v10, %v7121_v56 }
 0x8f7   :  { %v3309_v24 = vsub.f32 %v3255_v37, %v3294_v50 }
 0x908   :  { %v3214_v60 = vpop.permute.xlu0 %3213 }
 0x909   :  { %v3230_v13 = vadd.f32 %v3214_v60, %v3176_v22 }
 0x90b   :  { %2801 = vrot.lane.b32.xlu0 %v10449_v51, %s6675_s20  ;;  %3321 = vrot.lane.b32.xlu1 %v3230_v13, %s6670_s27 }
 0x90c   :  { %v3292_v27 = vpop.permute.xlu0 %3291 }
 0x90d   :  { %v3308_v1 = vsub.f32 %v3254_v21, %v3292_v27  ;;  %v8653_v21 = vpop.permute.xlu1 %2878 }
 0x90f   :  { %3343 = vrot.lane.b32.xlu0 %v3307_v18, %s6670_s27  ;;  %3345 = vrot.lane.b32.xlu1 %v3308_v1, %s6670_s27 }
 0x910   :  { %v3164_v2 = vpop.permute.xlu0 %3163 }
 0x911   :  { %v3178_v22 = vmul.f32 %v3164_v2, %v7125_v59  ;;  %v8655_v10 = vpop.permute.xlu1 %2956 }
 0x913   :  { %3323 = vrot.lane.b32.xlu0 %v3231_v46, %s6670_s27 }
 0x914   :  { %v3242_v7 = vpop.permute.xlu0 %3241 }
 0x915   :  { %v3256_v58 = vmul.f32 %v3242_v7, %v7125_v59  ;;  %v8657_v52 = vpop.permute.xlu1 %2882 }
 0x917   :  { %3347 = vrot.lane.b32.xlu0 %v3309_v24, %s6670_s27 }
 0x918   :  { %v3218_v29 = vpop.permute.xlu0 %3217 }
 0x919   :  { %v3232_v60 = vadd.f32 %v3218_v29, %v3178_v22  ;;  %v8659_v27 = vpop.permute.xlu1 %2960 }
 0x91b   :  { %3325 = vrot.lane.b32.xlu1 %v3232_v60, %s6670_s27 }
 0x91c   :  { %v3296_v13 = vpop.permute.xlu0 %3295 }
 0x91d   :  { %v3310_v5 = vsub.f32 %v3256_v58, %v3296_v13  ;;  %v8663_v1 = vpop.permute.xlu1 %2932 }
 0x91f   :  { %3349 = vrot.lane.b32.xlu1 %v3310_v5, %s6670_s27 }
 0x920   :  { %v8661_v18 = vpop.permute.xlu0 %2880 }
 0x921   :  { %10450 = vst [vmem:[#allocation35_spill] sm:$0xff] %v8661_v18  ;;  %v8667_v2 = vpop.permute.xlu1 %3010 }
 0x924   :  { %v8665_v14 = vpop.permute.xlu0 %2958 }
 0x925   :  { %v8671_v50 = vpop.permute.xlu1 %2936 }
 0x928   :  { %v8669_v46 = vpop.permute.xlu0 %2884 }
 0x929   :  { %v8675_v7 = vpop.permute.xlu1 %3014 }
 0x92c   :  { %v8673_v37 = vpop.permute.xlu0 %2962 }
 0x92d   :  { %v3387_v22 = vpop.xlane.xlu1 %3386 }
 0x92e   :  { %v3403_v39 = vmul.f32 0.0625, %v3387_v22 }
 0x930   :  { %v2935_v24 = vpop.permute.xlu0 %2934  ;;  %v3409_v32 = vadd.f32 1.1920929e-07, %v3403_v39 }
 0x934   :  { %v3013_v29 = vpop.permute.xlu0 %3012 }
 0x938   :  { %v2939_v5 = vpop.permute.xlu0 %2938 }
 0x93c   :  { %v3017_v40 = vpop.permute.xlu0 %3016 }
 0x946   :  { %v8677_v60 = vpop.xlane.xlu1 %3395 }
 0x94a   :  { %v8683_v43 = vpop.xlane.xlu1 %3110 }
 0x94e   :  { %v8687_v38 = vpop.xlane.xlu1 %3116 }
 0x952   :  { %v2804_v61 = vpop.permute.xlu1 %2803 }
 0x969   :  { %v8679_v58 = vpop.f32.mrb[20].mxu0 }
 0x96a   :  { %10451 = vst [vmem:[#allocation37_spill] sm:$0xff] %v8679_v58  ;;  %v8681_v13 = vpop.f32.mrb[21].mxu0 }
 0x96b   :  { %10452 = vst [vmem:[#allocation101_spill] sm:$0xff] %v8681_v13  ;;  %v5915_v31 = vpop.f32.mrb[22].mxu0 }
 0x96c   :  { %v8685_v42 = vpop.f32.mrb[23].mxu0 }
 0x96d   :  { %10453 = vst [vmem:[#allocation102_spill] sm:$0xff] %v8685_v42 }
 0x976   :  { %v3390_v49 = vpop.xlane.xlu0 %3389 }
 0x977   :  { %v3404_v26 = vmul.f32 0.0625, %v3390_v49 }
 0x979   :  { %v5922_v41 = vpop.f32.mrb[24].mxu0  ;;  %v3410_v31 = vadd.f32 1.1920929e-07, %v3404_v26  ;;  %v3320_v26 = vpop.permute.xlu1 %3319 }
 0x97a   :  { %v8691_v47 = vsel %vm7632_vm5, %v5922_v41, -1e+30  ;;  %v2764_v36 = vpop.f32.mrb[25].mxu0  ;;  %v8693_v28 = vpop.xlane.xlu0 %3392 }
 0x97b   :  { %v2787_v57 = vsel %vm847_vm4, %v8691_v47, -inf  ;;  %v8699_v23 = vsel %vm7641_vm6, %v2764_v36, -1e+30  ;;  %v5923_v34 = vpop.f32.mrb[26].mxu0  ;;  %6285 = vrsqrt.f32 %v3410_v31 }
 0x97c   :  { %v2781_v49 = vsel %vm847_vm4, %v8699_v23, -inf  ;;  %v2767_v22 = vpop.f32.mrb[27].mxu0  ;;  %2788 = vmax.xlane.f32.xlu1 %v2787_v57  ;;  %6287 = vrsqrt.f32 %v3409_v32 }
 0x97d   :  { %v8705_v41 = vsel %vm7648_vm7, %v2767_v22, -1e+30  ;;  %2782 = vmax.xlane.f32.xlu0 %v2781_v49  ;;  %v3322_v34 = vpop.permute.xlu1 %3321  ;;  %v2897_v49 = vmul.f32 %v8661_v18, %v7102_v48 }
 0x97e   :  { %v8707_v58 = vpop.xlane.xlu0 %3107  ;;  %v2784_v36 = vsel %vm847_vm4, %v8705_v41, -inf }
 0x97f   :  { %v2951_v42 = vadd.f32 %v2935_v24, %v2897_v49  ;;  %v2899_v24 = vmul.f32 %v8669_v46, %v7125_v59 }
 0x981   :  { %2785 = vmax.xlane.f32.xlu0 %v2784_v36  ;;  %v3346_v39 = vpop.permute.xlu1 %3345  ;;  %v2813_v36 = vsel %vm874_vm3, %v2804_v61, 0 }
 0x982   :  { %v8711_v33 = vpop.xlane.xlu0 %3113  ;;  %v3362_v13 = vsel %vm436_vm2, %v3322_v34, %v3346_v39  ;;  %v3406_v34 = vmul.f32 0.0625, %v8677_v60 }
 0x985   :  { %v6286_v57 = vpop.eup %6285 }
 0x986   :  { %v2802_v15 = vpop.permute.xlu0 %2801  ;;  %v6288_v31 = vpop.eup %6287  ;;  %v3422_v35 = vmul.f32 %v6286_v57, %v3362_v13  ;;  %v2953_v13 = vadd.f32 %v2939_v5, %v2899_v24  ;;  %v3405_v57 = vmul.f32 0.0625, %v8693_v28 }
 0x987   :  { %5924 = vmatprep.subr.bf16.mxu1 %v2802_v15 }
 0x988   :  { %5925 = vmatpush3.bf16.msra.mxu1 %v2802_v15  ;;  %v2975_v15 = vmul.f32 %v8665_v14, %v7102_v48  ;;  %v2977_v48 = vmul.f32 %v8673_v37, %v7125_v59  ;;  %v6540_v59 = vld [vmem:[%s10200_s8 + $0x28] sm:$0xff] }
 0x989   :  { %6045 = vmatprep.subr.msk.bf16.mxu1 %vm874_vm3, %v2804_v61  ;;  %v2896_v61 = vmul.f32 %v8653_v21, %v7094_v44 }
 0x98a   :  { %v3344_v22 = vpop.permute.xlu0 %3343  ;;  %v3029_v45 = vsub.f32 %v2975_v15, %v3013_v29  ;;  %v3124_v29 = vmul.f32 0.0625, %v8707_v58 }
 0x98b   :  { %v3361_v32 = vsel %vm436_vm2, %v3320_v26, %v3344_v22  ;;  %v2950_v26 = vadd.f32 %v8663_v1, %v2896_v61  ;;  %v3411_v61 = vadd.f32 1.1920929e-07, %v3405_v57 }
 0x98c   :  { %v3421_v8 = vmul.f32 %v6288_v31, %v3361_v32  ;;  %5927 = vmatpush3.bf16.msra.mxu1 %v2813_v36  ;;  %v3130_v49 = vadd.f32 1.1920929e-07, %v3124_v29  ;;  %v3412_v31 = vadd.f32 1.1920929e-07, %v3406_v34 }
 0x98d   :  { %3042 = vrot.lane.b32.xlu1 %v2951_v42, %s6668_s17  ;;  %v2974_v42 = vmul.f32 %v8655_v10, %v7094_v44  ;;  %v2976_v44 = vmul.f32 %v8659_v27, %v7121_v56 }
 0x98e   :  { %v8722_v18 = vpack.c.bf16 %v3422_v35, %v3421_v8  ;;  %v3031_v8 = vsub.f32 %v2977_v48, %v3017_v40  ;;  %6289 = vrsqrt.f32 %v3130_v49 }
 0x98f   :  { %v3028_v35 = vsub.f32 %v2974_v42, %v8667_v2  ;;  %v3030_v40 = vsub.f32 %v2976_v44, %v8675_v7  ;;  %v6541_v2 = vld [vmem:[%s10200_s8 + $0x20] sm:$0xff]  ;;  %v3324_v7 = vpop.permute.xlu0 %3323  ;;  %6291 = vrsqrt.f32 %v3412_v31  ;;  %v3126_v42 = vmul.f32 0.0625, %v8711_v33 }
 0x990   :  { %6046 = vmatprep.subr.msk.bf16.mxu1 %vm449_vm1, %v8722_v18 }
 0x991   :  { %3066 = vrot.lane.b32.xlu1 %v3029_v45, %s6668_s17  ;;  %v2898_v45 = vmul.f32 %v8657_v52, %v7121_v56  ;;  %v8770_v56 = vld [vmem:[%s10199_s7 + $0x28] sm:$0xff] }
 0x993   :  { %v2952_v1 = vadd.f32 %v8671_v50, %v2898_v45  ;;  %v3326_v50 = vpop.permute.xlu1 %3325  ;;  %v3348_v39 = vpop.permute.xlu0 %3347 }
 0x995   :  { %3046 = vrot.lane.b32.xlu1 %v2953_v13, %s6668_s17 }
 0x997   :  { %3040 = vrot.lane.b32.xlu0 %v2950_v26, %s6668_s17  ;;  %v3350_v5 = vpop.permute.xlu1 %3349 }
 0x998   :  { %v6290_v45 = vpop.eup %6289  ;;  %v3364_v34 = vsel %vm436_vm2, %v3326_v50, %v3350_v5 }
 0x999   :  { %3070 = vrot.lane.b32.xlu1 %v3031_v8, %s6668_s17  ;;  %v3127_v8 = vmul.f32 0.0625, %v8687_v38  ;;  %v3142_v57 = vmul.f32 0.25, %v6290_v45 }
 0x99b   :  { %3064 = vrot.lane.b32.xlu0 %v3028_v35, %s6668_s17  ;;  %v3133_v29 = vadd.f32 1.1920929e-07, %v3127_v8 }
 0x99d   :  { %3191 = vrot.lane.b32.xlu1 %v6540_v59, %s6671_s11 }
 0x99f   :  { %3044 = vrot.lane.b32.xlu0 %v2952_v1, %s6668_s17  ;;  %v6292_v1 = vpop.eup %6291 }
 0x9a1   :  { %3269 = vrot.lane.b32.xlu1 %v6540_v59, %s6673_s29 }
 0x9a3   :  { %3068 = vrot.lane.b32.xlu0 %v3030_v40, %s6668_s17 }
 0x9a5   :  { %2912 = vrot.lane.b32.xlu1 %v6540_v59, %s6678_s0 }
 0x9a7   :  { %3189 = vrot.lane.b32.xlu0 %v6541_v2, %s6671_s11 }
 0x9a9   :  { %2990 = vrot.lane.b32.xlu1 %v6540_v59, %s6672_s28  ;;  %v3132_v59 = vadd.f32 1.1920929e-07, %v3126_v42 }
 0x9ab   :  { %3267 = vrot.lane.b32.xlu0 %v6541_v2, %s6673_s29 }
 0x9ad   :  { %3377 = vrot.lane.b32.xlu1 %v7254_v4, %s6670_s27 }
 0x9af   :  { %2910 = vrot.lane.b32.xlu0 %v6541_v2, %s6678_s0 }
 0x9b1   :  { %3098 = vrot.lane.b32.xlu1 %v7254_v4, %s6668_s17  ;;  %v8783_v4 = vld [vmem:[%s10199_s7 + $0x20] sm:$0xff] }
 0x9b3   :  { %2988 = vrot.lane.b32.xlu0 %v6541_v2, %s6672_s28 }
 0x9b5   :  { %3167 = vrot.lane.b32.xlu1 %v8770_v56, %s6673_s29 }
 0x9b7   :  { %3375 = vrot.lane.b32.xlu0 %v7246_v6, %s6670_s27 }
 0x9b9   :  { %3245 = vrot.lane.b32.xlu1 %v8770_v56, %s6671_s11 }
 0x9bb   :  { %3096 = vrot.lane.b32.xlu0 %v7246_v6, %s6668_s17  ;;  %v3125_v6 = vmul.f32 0.0625, %v8683_v43 }
 0x9bd   :  { %v3131_v15 = vadd.f32 1.1920929e-07, %v3125_v6  ;;  %v3363_v6 = vsel %vm436_vm2, %v3324_v7, %v3348_v39 }
 0x9bf   :  { %3165 = vrot.lane.b32.xlu0 %v8783_v4, %s6673_s29  ;;  %6293 = vrsqrt.f32 %v3131_v15  ;;  %v3424_v15 = vmul.f32 %v6292_v1, %v3364_v34 }
 0x9c0   :  { %6295 = vrsqrt.f32 %v3411_v61 }
 0x9c3   :  { %3243 = vrot.lane.b32.xlu0 %v8783_v4, %s6671_s11 }
 0x9c9   :  { %v6294_v44 = vpop.eup %6293 }
 0x9ca   :  { %v6296_v2 = vpop.eup %6295  ;;  %v3143_v31 = vmul.f32 0.25, %v6294_v44 }
 0xa09   :  { %v2789_v22 = vpop.xlane.xlu1 %2788 }
 0xa0a   :  { %v2792_v32 = vsub.f32 %v8691_v47, %v2789_v22  ;;  %v2783_v36 = vpop.xlane.xlu0 %2782 }
 0xa0b   :  { %v2790_v24 = vsub.f32 %v8699_v23, %v2783_v36 }
 0xa0c   :  { %v2797_v58 = vmul.f32 1.442695, %v2792_v32 }
 0xa0d   :  { %v3043_v13 = vpop.permute.xlu1 %3042  ;;  %v2793_v60 = vmul.f32 1.442695, %v2790_v24  ;;  %v3423_v24 = vmul.f32 %v6296_v2, %v3363_v6 }
 0xa0e   :  { %v2786_v26 = vpop.xlane.xlu0 %2785  ;;  %6297 = vpow2.f32 %v2797_v58 }
 0xa0f   :  { %v2791_v43 = vsub.f32 %v8705_v41, %v2786_v26  ;;  %6299 = vpow2.f32 %v2793_v60  ;;  %v8815_v60 = vpack.c.bf16 %v3424_v15, %v3423_v24 }
 0xa11   :  { %v2795_v28 = vmul.f32 1.442695, %v2791_v43  ;;  %v3067_v48 = vpop.permute.xlu1 %3066  ;;  %v3437_v43 = vsel %vm449_vm1, %v8722_v18, 0  ;;  %v3440_v44 = vsel %vm449_vm1, %v8815_v60, 0 }
 0xa12   :  { %v3041_v47 = vpop.permute.xlu0 %3040  ;;  %v3083_v38 = vsel %vm436_vm2, %v3043_v13, %v3067_v48 }
 0xa13   :  { %6301 = vpow2.f32 %v2795_v28  ;;  %v3149_v50 = vmul.f32 %v3143_v31, %v3083_v38 }
 0xa14   :  { %6303 = vrsqrt.f32 %v3132_v59 }
 0xa15   :  { %v3047_v23 = vpop.permute.xlu1 %3046  ;;  %6305 = vrsqrt.f32 %v3133_v29 }
 0xa16   :  { %v3065_v35 = vpop.permute.xlu0 %3064 }
 0xa17   :  { %v3082_v40 = vsel %vm436_vm2, %v3041_v47, %v3065_v35 }
 0xa18   :  { %v8801_v33 = vpop.eup %6297  ;;  %v3148_v32 = vmul.f32 %v3142_v57, %v3082_v40 }
 0xa19   :  { %v3071_v41 = vpop.permute.xlu1 %3070  ;;  %v8804_v22 = vpop.eup %6299  ;;  %v2800_v58 = vpack.c.bf16 %v8801_v33, %v8801_v33 }
 0xa1a   :  { %v3045_v49 = vpop.permute.xlu0 %3044  ;;  %v3154_v13 = vpack.c.bf16 %v3149_v50, %v3148_v32  ;;  %v3085_v40 = vsel %vm436_vm2, %v3047_v23, %v3071_v41 }
 0xa1d   :  { %v8806_v36 = vpop.eup %6301  ;;  %v3192_v61 = vpop.permute.xlu1 %3191 }
 0xa1e   :  { %v3204_v7 = vmul.f32 %v3192_v61, %v7148_v12  ;;  %v3069_v5 = vpop.permute.xlu0 %3068  ;;  %v2799_v39 = vpack.c.bf16 %v8806_v36, %v8804_v22  ;;  %v6304_v42 = vpop.eup %6303 }
 0xa1f   :  { %v6306_v18 = vpop.eup %6305  ;;  %v3084_v45 = vsel %vm436_vm2, %v3045_v49, %v3069_v5  ;;  %v3144_v1 = vmul.f32 0.25, %v6304_v42 }
 0xa20   :  { %3221 = vrot.lane.b32.xlu1 %v3204_v7, %s6671_s11  ;;  %5928 = vmatprep.mubr.msk.bf16.mxu1 %vm847_vm4, %v2799_v39  ;;  %v3145_v2 = vmul.f32 0.25, %v6306_v18 }
 0xa21   :  { %v3270_v26 = vpop.permute.xlu1 %3269  ;;  %5929 = vmatmul.mubr.msk.bf16.vlgmr.msra.gmra.mrb[28].mxu1 %vm847_vm4, %v2800_v58  ;;  %v3150_v29 = vmul.f32 %v3144_v1, %v3084_v45 }
 0xa22   :  { %v3282_v28 = vmul.f32 %v3270_v26, %v7148_v12  ;;  %5933 = vmatpush3.bf16.xpose.msra.mxu1 %v3437_v43  ;;  %5936 = vmatprep.mubr.msk.bf16.mxu1 %vm449_vm1, %v3154_v13  ;;  %v3190_v48 = vpop.permute.xlu0 %3189  ;;  %v3151_v34 = vmul.f32 %v3145_v2, %v3085_v40 }
 0xa23   :  { %6047 = vmatprep.subr.msk.bf16.mxu1 %vm449_vm1, %v8815_v60  ;;  %v3203_v47 = vmul.f32 %v3190_v48, %v7141_v9 }
 0xa24   :  { %3299 = vrot.lane.b32.xlu1 %v3282_v28, %s6663_s26  ;;  %v8845_v49 = vpack.c.bf16 %v3151_v34, %v3150_v29 }
 0xa25   :  { %3219 = vrot.lane.b32.xlu0 %v3203_v47, %s6671_s11  ;;  %v8831_v59 = vpop.permute.xlu1 %2912 }
 0xa26   :  { %v3268_v8 = vpop.permute.xlu0 %3267  ;;  %v2925_v6 = vmul.f32 %v8831_v59, %v7148_v12 }
 0xa27   :  { %v3281_v35 = vmul.f32 %v3268_v8, %v7141_v9 }
 0xa28   :  { %2888 = vrot.lane.b32.xlu1 %v8770_v56, %s6672_s28 }
 0xa29   :  { %3297 = vrot.lane.b32.xlu0 %v3281_v35, %s6663_s26  ;;  %v8847_v38 = vpop.permute.xlu1 %2990 }
 0xa2a   :  { %5935 = vmatpush3.bf16.xpose.msra.mxu1 %v3440_v44  ;;  %v8843_v57 = vpop.permute.xlu0 %2910 }
 0xa2b   :  { %v2924_v23 = vmul.f32 %v8843_v57, %v7141_v9 }
 0xa2c   :  { %2966 = vrot.lane.b32.xlu1 %v8770_v56, %s6678_s0  ;;  %v3003_v56 = vmul.f32 %v8847_v38, %v7148_v12 }
 0xa2d   :  { %2886 = vrot.lane.b32.xlu0 %v8783_v4, %s6672_s28  ;;  %v3378_v32 = vpop.permute.xlu1 %3377 }
 0xa2e   :  { %v8858_v41 = vpop.permute.xlu0 %2988 }
 0xa2f   :  { %v3002_v31 = vmul.f32 %v8858_v41, %v7141_v9 }
 0xa30   :  { %2942 = vrot.lane.b32.xlu1 %v2925_v6, %s6671_s11 }
 0xa31   :  { %5937 = vmatmul.mubr.msk.bf16.vlgmr.msra.gmra.mrb[32].mxu1 %vm449_vm1, %v8845_v49  ;;  %2964 = vrot.lane.b32.xlu0 %v8783_v4, %s6678_s0  ;;  %v3400_v4 = vsel %vm449_vm1, %v3378_v32, 0.0  ;;  %v3099_v61 = vpop.permute.xlu1 %3098 }
 0xa32   :  { %v3376_v15 = vpop.permute.xlu0 %3375  ;;  %v3121_v7 = vsel %vm449_vm1, %v3099_v61, 0.0 }
 0xa33   :  { %v3397_v24 = vsel %vm449_vm1, %v3376_v15, 0.0  ;;  %v1981_v15 = vsel %vm847_vm4, %v8280_v16, 0.0  ;;  %v2869_v16 = vsel %vm847_vm4, %v8801_v33, 0.0 }
 0xa34   :  { %3020 = vrot.lane.b32.xlu1 %v3003_v56, %s6663_s26 }
 0xa35   :  { %2940 = vrot.lane.b32.xlu0 %v2924_v23, %s6671_s11  ;;  %v3168_v58 = vpop.permute.xlu1 %3167 }
 0xa36   :  { %v3097_v50 = vpop.permute.xlu0 %3096  ;;  %v3180_v42 = vmul.f32 %v3168_v58, %v7148_v12 }
 0xa37   :  { %v3118_v5 = vsel %vm449_vm1, %v3097_v50, 0.0 }
 0xa39   :  { %3018 = vrot.lane.b32.xlu0 %v3002_v31, %s6663_s26  ;;  %v8873_v26 = vpop.permute.xlu1 %3245  ;;  %v1811_v31 = vsel %vm847_vm4, %v8284_v17, 0.0  ;;  %v1987_v17 = vsel %vm847_vm4, %v8311_v54, 0.0  ;;  %v10457_v54 = vld [vmem:[#allocation56_spill] sm:$0xff] }
 0xa3a   :  { %v3166_v39 = vpop.permute.xlu0 %3165  ;;  %v1098_v58 = vsel %vm847_vm4, %v10457_v54, 0.0 }
 0xa3b   :  { %v3179_v43 = vmul.f32 %v3166_v39, %v7141_v9 }
 0xa3e   :  { %v3244_v13 = vpop.permute.xlu0 %3243 }
 0xa58   :  { %3401 = vadd.xlane.f32.xlu1 %v3400_v4  ;;  %3398 = vadd.xlane.f32.xlu0 %v3397_v24 }
 0xa5c   :  { %3122 = vadd.xlane.f32.xlu0 %v3121_v7  ;;  %3119 = vadd.xlane.f32.xlu1 %v3118_v5  ;;  %v10456_v5 = vld [vmem:[#allocation53_spill] sm:$0xff] }
 0xa6d   :  { %3513 = vrot.lane.b32.xlu1 %v10363_v63, %s6668_s17  ;;  %v3257_v63 = vmul.f32 %v3244_v13, %v7141_v9 }
 0xa72   :  { %3515 = vrot.lane.b32.xlu0 %v10371_v53, %s6668_s17 }
 0xa92   :  { %v3222_v47 = vpop.permute.xlu1 %3221 }
 0xa93   :  { %v3234_v35 = vadd.f32 %v3222_v47, %v3180_v42 }
 0xa96   :  { %v3300_v6 = vpop.permute.xlu1 %3299 }
 0xa97   :  { %v3220_v28 = vpop.permute.xlu0 %3219 }
 0xa98   :  { %v3233_v48 = vadd.f32 %v3220_v28, %v3179_v43  ;;  %v10458_v28 = vld [vmem:[#allocation55_spill] sm:$0xff] }
 0xa9a   :  { %3327 = vrot.lane.b32.xlu1 %v3233_v48, %s6670_s27  ;;  %v8893_v56 = vpop.permute.xlu1 %2888  ;;  %v1104_v48 = vsel %vm847_vm4, %v10458_v28, 0.0 }
 0xa9b   :  { %v3298_v8 = vpop.permute.xlu0 %3297  ;;  %10454 = vst [vmem:[#allocation103_spill] sm:$0xff] %v8893_v56 }
 0xa9c   :  { %v3311_v18 = vsub.f32 %v3257_v63, %v3298_v8 }
 0xa9e   :  { %3329 = vrot.lane.b32.xlu1 %v3234_v35, %s6670_s27  ;;  %v8895_v23 = vpop.permute.xlu1 %2966 }
 0xa9f   :  { %v8880_v53 = vpop.permute.xlu0 %2886  ;;  %10455 = vst [vmem:[#allocation104_spill] sm:$0xff] %v8895_v23 }
 0xaa0   :  { %v2900_v1 = vmul.f32 %v8880_v53, %v7141_v9 }
 0xaa2   :  { %3351 = vrot.lane.b32.xlu1 %v3311_v18, %s6670_s27  ;;  %v2943_v32 = vpop.permute.xlu1 %2942 }
 0xaa3   :  { %v8883_v45 = vpop.permute.xlu0 %2964 }
 0xaa4   :  { %v2978_v2 = vmul.f32 %v8883_v45, %v7141_v9  ;;  %v2696_v9 = vsel %vm847_vm4, %v8572_v11, 0.0 }
 0xaa6   :  { %v3021_v4 = vpop.permute.xlu1 %3020 }
 0xaa7   :  { %v2941_v44 = vpop.permute.xlu0 %2940 }
 0xaa8   :  { %v2954_v40 = vadd.f32 %v2941_v44, %v2900_v1 }
 0xaaa   :  { %3048 = vrot.lane.b32.xlu1 %v2954_v40, %s6668_s17 }
 0xaab   :  { %v3019_v29 = vpop.permute.xlu0 %3018 }
 0xaac   :  { %v3032_v34 = vsub.f32 %v2978_v2, %v3019_v29 }
 0xaae   :  { %3072 = vrot.lane.b32.xlu1 %v3032_v34, %s6668_s17 }
 0xab2   :  { %3685 = vrot.lane.b32.xlu1 %v10448_v25, %s6668_s17  ;;  %v2863_v25 = vsel %vm847_vm4, %v8804_v22, 0.0  ;;  %v929_v22 = vsel %vm847_vm4, %v10456_v5, 0.0  ;;  %v10461_v5 = vld [vmem:[#allocation52_spill] sm:$0xff] }
 0xad6   :  { %1812 = vadd.xlane.f32.xlu1 %v1811_v31  ;;  %v3258_v31 = vmul.f32 %v8873_v26, %v7148_v12  ;;  %v1814_v26 = vsel %vm847_vm4, %v8286_v3, 0.0  ;;  %v2866_v3 = vsel %vm847_vm4, %v8806_v36, 0.0 }
 0xada   :  { %2697 = vadd.xlane.f32.xlu1 %v2696_v9  ;;  %v3312_v9 = vsub.f32 %v3258_v31, %v3300_v6  ;;  %v2693_v6 = vsel %vm847_vm4, %v8570_v20, 0.0 }
 0xade   :  { %1982 = vadd.xlane.f32.xlu1 %v1981_v15  ;;  %v2901_v15 = vmul.f32 %v8893_v56, %v7148_v12 }
 0xae2   :  { %2864 = vadd.xlane.f32.xlu1 %v2863_v25  ;;  %v2955_v25 = vadd.f32 %v2943_v32, %v2901_v15  ;;  %v1817_v32 = vsel %vm847_vm4, %v8282_v30, 0.0  ;;  %v932_v30 = vsel %vm847_vm4, %v10461_v5, 0.0 }
 0xae5   :  { %v8905_v24 = vpop.xlane.xlu1 %3401  ;;  %v8907_v61 = vpop.xlane.xlu0 %3398 }
 0xae6   :  { %1988 = vadd.xlane.f32.xlu1 %v1987_v17  ;;  %v2979_v17 = vmul.f32 %v8895_v23, %v7148_v12  ;;  %v2699_v12 = vsel %vm847_vm4, %v8566_v55, 0.0 }
 0xae9   :  { %v8911_v11 = vpop.xlane.xlu1 %3119  ;;  %v8913_v50 = vpop.xlane.xlu0 %3122 }
 0xaea   :  { %2870 = vadd.xlane.f32.xlu1 %v2869_v16  ;;  %v3033_v16 = vsub.f32 %v2979_v17, %v3021_v4  ;;  %v10459_v4 = vld [vmem:[#allocation82_spill] sm:$0xff]  ;;  %v3128_v36 = vmul.f32 0.0625, %v8911_v11 }
 0xaed   :  { %v3514_v7 = vpop.permute.xlu1 %3513  ;;  %v3516_v39 = vpop.permute.xlu0 %3515 }
 0xaee   :  { %5940 = vmatprep.subr.bf16.mxu0 %v3514_v7  ;;  %930 = vadd.xlane.f32.xlu1 %v929_v22  ;;  %v3525_v13 = vsel %vm874_vm3, %v3516_v39, 0  ;;  %v10462_v22 = vld [vmem:[#allocation57_spill] sm:$0xff] }
 0xaef   :  { %5941 = vmatpush3.bf16.msra.mxu0 %v3514_v7  ;;  %v1984_v7 = vsel %vm847_vm4, %v10459_v4, 0.0  ;;  %v1101_v55 = vsel %vm847_vm4, %v10462_v22, 0.0 }
 0xaf0   :  { %6048 = vmatprep.subr.msk.bf16.mxu0 %vm874_vm3, %v3516_v39  ;;  %v3408_v39 = vmul.f32 0.0625, %v8905_v24 }
 0xaf2   :  { %1099 = vadd.xlane.f32.xlu1 %v1098_v58  ;;  %v3407_v58 = vmul.f32 0.0625, %v8907_v61 }
 0xaf3   :  { %5943 = vmatpush3.bf16.msra.mxu0 %v3525_v13  ;;  %v3414_v13 = vadd.f32 1.1920929e-07, %v3408_v39 }
 0xaf4   :  { %v8923_v43 = vpop.f32.mrb[28].mxu1  ;;  %v3413_v28 = vadd.f32 1.1920929e-07, %v3407_v58 }
 0xaf5   :  { %v8925_v33 = vpop.f32.mrb[29].mxu1  ;;  %6307 = vrsqrt.f32 %v3414_v13 }
 0xaf6   :  { %v5931_v47 = vpop.f32.mrb[30].mxu1  ;;  %1105 = vadd.xlane.f32.xlu1 %v1104_v48  ;;  %v3129_v48 = vmul.f32 0.0625, %v8913_v50  ;;  %6309 = vrsqrt.f32 %v3413_v28 }
 0xaf7   :  { %v8929_v42 = vpop.f32.mrb[31].mxu1 }
 0xb04   :  { %v5938_v8 = vpop.f32.mrb[32].mxu1 }
 0xb05   :  { %v3492_v35 = vsel %vm7632_vm5, %v5938_v8, -1e+30  ;;  %v3476_v63 = vpop.f32.mrb[33].mxu1 }
 0xb06   :  { %v3499_v18 = vsel %vm847_vm4, %v3492_v35, -inf  ;;  %v5939_v1 = vpop.f32.mrb[34].mxu1  ;;  %v3490_v44 = vsel %vm7641_vm6, %v3476_v63, -1e+30  ;;  %v3134_v63 = vadd.f32 1.1920929e-07, %v3128_v36 }
 0xb07   :  { %v3479_v40 = vpop.f32.mrb[35].mxu1  ;;  %3500 = vmax.xlane.f32.xlu0 %v3499_v18  ;;  %v3493_v2 = vsel %vm847_vm4, %v3490_v44, -inf  ;;  %v3135_v18 = vadd.f32 1.1920929e-07, %v3129_v48 }
 0xb08   :  { %v3491_v29 = vsel %vm7648_vm7, %v3479_v40, -1e+30  ;;  %6311 = vrsqrt.f32 %v3134_v63 }
 0xb09   :  { %v3496_v34 = vsel %vm847_vm4, %v3491_v29, -inf  ;;  %6313 = vrsqrt.f32 %v3135_v18 }
 0xb0b   :  { %3494 = vmax.xlane.f32.xlu0 %v3493_v2 }
 0xb0c   :  { %v3328_v54 = vpop.permute.xlu1 %3327 }
 0xb0f   :  { %3497 = vmax.xlane.f32.xlu0 %v3496_v34 }
 0xb10   :  { %v3330_v47 = vpop.permute.xlu1 %3329 }
 0xb14   :  { %v3352_v24 = vpop.permute.xlu1 %3351 }
 0xb15   :  { %v3365_v15 = vsel %vm436_vm2, %v3328_v54, %v3352_v24 }
 0xb1c   :  { %v3049_v11 = vpop.permute.xlu1 %3048 }
 0xb25   :  { %3353 = vrot.lane.b32.xlu0 %v3312_v9, %s6670_s27 }
 0xb29   :  { %3050 = vrot.lane.b32.xlu0 %v2955_v25, %s6668_s17  ;;  %v6308_v25 = vpop.eup %6307 }
 0xb2d   :  { %3074 = vrot.lane.b32.xlu0 %v3033_v16, %s6668_s17  ;;  %v6310_v16 = vpop.eup %6309 }
 0xb31   :  { %3683 = vrot.lane.b32.xlu0 %v10449_v51, %s6668_s17  ;;  %v10460_v51 = vld [vmem:[#allocation54_spill] sm:$0xff] }
 0xb32   :  { %v926_v20 = vsel %vm847_vm4, %v10460_v51, 0.0 }
 0xb50   :  { %1815 = vadd.xlane.f32.xlu0 %v1814_v26 }
 0xb54   :  { %2694 = vadd.xlane.f32.xlu0 %v2693_v6  ;;  %v6312_v6 = vpop.eup %6311 }
 0xb58   :  { %1818 = vadd.xlane.f32.xlu0 %v1817_v32  ;;  %v3073_v32 = vpop.permute.xlu1 %3072 }
 0xb59   :  { %v3086_v51 = vsel %vm436_vm2, %v3049_v11, %v3073_v32 }
 0xb5c   :  { %2700 = vadd.xlane.f32.xlu0 %v2699_v12  ;;  %v3686_v63 = vpop.permute.xlu1 %3685 }
 0xb60   :  { %1985 = vadd.xlane.f32.xlu0 %v1984_v7  ;;  %v6314_v7 = vpop.eup %6313 }
 0xb61   :  { %v3147_v5 = vmul.f32 0.25, %v6314_v7 }
 0xb63   :  { %v1813_v24 = vpop.xlane.xlu1 %1812 }
 0xb64   :  { %2867 = vadd.xlane.f32.xlu0 %v2866_v3  ;;  %v3597_v3 = vrot.slane %v8815_v60, 4 }
 0xb68   :  { %927 = vadd.xlane.f32.xlu0 %v926_v20  ;;  %v3146_v20 = vmul.f32 0.25, %v6312_v6 }
 0xb6a   :  { %v3152_v58 = vmul.f32 %v3146_v20, %v3086_v51  ;;  %v10466_v20 = vld [vmem:[#allocation102_spill] sm:$0xff] }
 0xb6c   :  { %933 = vadd.xlane.f32.xlu0 %v932_v30 }
 0xb70   :  { %1102 = vadd.xlane.f32.xlu0 %v1101_v55 }
 0xb94   :  { %v3501_v8 = vpop.xlane.xlu0 %3500 }
 0xb95   :  { %v3504_v1 = vsub.f32 %v3492_v35, %v3501_v8  ;;  %v3592_v8 = vrot.slane %v8845_v49, 4  ;;  %v3695_v49 = vsel %vm874_vm3, %v3686_v63, 0 }
 0xb97   :  { %v3509_v34 = vmul.f32 1.442695, %v3504_v1 }
 0xb98   :  { %v3495_v40 = vpop.xlane.xlu0 %3494 }
 0xb99   :  { %v3502_v2 = vsub.f32 %v3490_v44, %v3495_v40  ;;  %6315 = vpow2.f32 %v3509_v34  ;;  %v3425_v44 = vmul.f32 %v6310_v16, %v3365_v15  ;;  %v2698_v34 = vpop.xlane.xlu1 %2697 }
 0xb9b   :  { %v3505_v61 = vmul.f32 1.442695, %v3502_v2 }
 0xb9c   :  { %v3498_v31 = vpop.xlane.xlu0 %3497 }
 0xb9d   :  { %v3503_v9 = vsub.f32 %v3491_v29, %v3498_v31  ;;  %6317 = vpow2.f32 %v3505_v61  ;;  %v1983_v61 = vpop.xlane.xlu1 %1982 }
 0xb9f   :  { %v3507_v50 = vmul.f32 1.442695, %v3503_v9 }
 0xba0   :  { %v3354_v17 = vpop.permute.xlu0 %3353 }
 0xba1   :  { %6319 = vpow2.f32 %v3507_v50  ;;  %v3366_v35 = vsel %vm436_vm2, %v3330_v47, %v3354_v17  ;;  %v2865_v9 = vpop.xlane.xlu1 %2864 }
 0xba2   :  { %v3426_v26 = vmul.f32 %v6308_v25, %v3366_v35  ;;  %6321 = vrcp.f32 %v1813_v24  ;;  %v10463_v35 = vld [vmem:[#allocation90_spill] sm:$0xff] }
 0xba3   :  { %v8978_v55 = vpop.eup %6315 }
 0xba4   :  { %v3429_v12 = vpack.c.bf16 %v3426_v26, %v3425_v44  ;;  %v3051_v4 = vpop.permute.xlu0 %3050  ;;  %v3512_v47 = vpack.c.bf16 %v8978_v55, %v8978_v55  ;;  %v10464_v26 = vld [vmem:[#allocation91_spill] sm:$0xff] }
 0xba5   :  { %v1989_v25 = vpop.xlane.xlu1 %1988 }
 0xba6   :  { %v3598_v29 = vrot.slane %v3429_v12, 4 }
 0xba7   :  { %v8982_v54 = vpop.eup %6317 }
 0xba8   :  { %v3075_v30 = vpop.permute.xlu0 %3074  ;;  %v3599_v22 = vsel %vm874_vm3, %v3597_v3, %v3598_v29  ;;  %v3610_v2 = vsel %vm449_vm1, %v3598_v29, 0  ;;  %v10465_v3 = vld [vmem:[#allocation101_spill] sm:$0xff] }
 0xba9   :  { %v3087_v39 = vsel %vm436_vm2, %v3051_v4, %v3075_v30  ;;  %6049 = vmatprep.subr.msk.bf16.mxu0 %vm449_vm1, %v3599_v22  ;;  %v3607_v1 = vsel %vm449_vm1, %v3599_v22, 0  ;;  %v2871_v7 = vpop.xlane.xlu1 %2870 }
 0xbaa   :  { %v3153_v13 = vmul.f32 %v3147_v5, %v3087_v39 }
 0xbab   :  { %v8984_v36 = vpop.eup %6319 }
 0xbac   :  { %v3156_v60 = vpack.c.bf16 %v3153_v13, %v3152_v58  ;;  %v3684_v28 = vpop.permute.xlu0 %3683  ;;  %v3511_v48 = vpack.c.bf16 %v8984_v36, %v8982_v54  ;;  %v6322_v50 = vpop.eup %6321  ;;  %v10467_v13 = vld [vmem:[#allocation89_spill] sm:$0xff] }
 0xbad   :  { %5956 = vmatprep.subr.bf16.mxu1 %v3684_v28  ;;  %v1823_v44 = vmul.f32 %v6322_v50, %v10463_v35  ;;  %v3578_v35 = vsel %vm847_vm4, %v8984_v36, 0.0 }
 0xbae   :  { %v3593_v18 = vrot.slane %v3156_v60, 4  ;;  %5944 = vmatprep.mubr.msk.bf16.mxu0 %vm847_vm4, %v3511_v48  ;;  %5957 = vmatpush3.bf16.msra.mxu1 %v3684_v28  ;;  %v10468_v28 = vld [vmem:[#allocation93_spill] sm:$0xff] }
 0xbaf   :  { %5945 = vmatmul.mubr.msk.bf16.vlgmr.msra.gmra.mrb[28].mxu0 %vm847_vm4, %v3512_v47  ;;  %6051 = vmatprep.subr.msk.bf16.mxu1 %vm874_vm3, %v3686_v63 }
 0xbb0   :  { %5949 = vmatpush3.bf16.xpose.msra.mxu0 %v3607_v1  ;;  %v3594_v40 = vsel %vm874_vm3, %v3592_v8, %v3593_v18 }
 0xbb1   :  { %6050 = vmatprep.subr.msk.bf16.mxu0 %vm449_vm1, %v3598_v29  ;;  %5952 = vmatprep.mubr.msk.bf16.mxu0 %vm449_vm1, %v3594_v40 }
 0xbb2   :  { %5959 = vmatpush3.bf16.msra.mxu1 %v3695_v49 }
 0xbb8   :  { %5951 = vmatpush3.bf16.xpose.msra.mxu0 %v3610_v2 }
 0xbbf   :  { %5953 = vmatmul.mubr.msk.bf16.vlgmr.msra.gmra.mrb[32].mxu0 %vm449_vm1, %v3593_v18  ;;  %v10469_v18 = vld [vmem:[#allocation37_spill] sm:$0xff] }
 0xbdd   :  { %v1816_v31 = vpop.xlane.xlu0 %1815 }
 0xbde   :  { %6323 = vrcp.f32 %v1816_v31  ;;  %v10471_v31 = vld [vmem:[#allocation92_spill] sm:$0xff] }
 0xbdf   :  { %6325 = vrcp.f32 %v2698_v34  ;;  %v10470_v34 = vld [vmem:[#allocation94_spill] sm:$0xff] }
 0xbe1   :  { %v2695_v11 = vpop.xlane.xlu0 %2694 }
 0xbe2   :  { %6327 = vrcp.f32 %v2695_v11 }
 0xbe3   :  { %6329 = vrcp.f32 %v1983_v61 }
 0xbe5   :  { %v1819_v15 = vpop.xlane.xlu0 %1818 }
 0xbe6   :  { %6331 = vrcp.f32 %v1819_v15 }
 0xbe7   :  { %6333 = vrcp.f32 %v2865_v9 }
 0xbe8   :  { %v6324_v17 = vpop.eup %6323 }
 0xbe9   :  { %v2701_v16 = vpop.xlane.xlu0 %2700  ;;  %v1824_v6 = vmul.f32 %v6324_v17, %v10464_v26  ;;  %v6326_v32 = vpop.eup %6325 }
 0xbea   :  { %6335 = vrcp.f32 %v2701_v16  ;;  %v2706_v5 = vmul.f32 %v6326_v32, %v10466_v20 }
 0xbeb   :  { %v6078_v12 = vpack.i.bf16 %v1824_v6, %v1823_v44  ;;  %6337 = vrcp.f32 %v1989_v25  ;;  %v3575_v44 = vsel %vm847_vm4, %v8982_v54, 0.0 }
 0xbec   :  { %v6328_v4 = vpop.eup %6327 }
 0xbed   :  { %6079 = vrot.lane.b32.xlu0 %v6078_v12, %s6670_s27  ;;  %v1986_v29 = vpop.xlane.xlu0 %1985  ;;  %v2705_v51 = vmul.f32 %v6328_v4, %v10465_v3  ;;  %v6330_v30 = vpop.eup %6329 }
 0xbee   :  { %6339 = vrcp.f32 %v1986_v29  ;;  %v1993_v48 = vmul.f32 %v6330_v30, %v10468_v28  ;;  %v931_v12 = vpop.xlane.xlu1 %930 }
 0xbef   :  { %v6083_v22 = vpack.i.bf16 %v2706_v5, %v2705_v51  ;;  %6341 = vrcp.f32 %v2871_v7 }
 0xbf0   :  { %v6332_v39 = vpop.eup %6331 }
 0xbf1   :  { %6084 = vrot.lane.b32.xlu1 %v6083_v22, %s6677_s23  ;;  %v2868_v58 = vpop.xlane.xlu0 %2867  ;;  %v1825_v60 = vmul.f32 %v6332_v39, %v10467_v13  ;;  %v6334_v47 = vpop.eup %6333 }
 0xbf2   :  { %6343 = vrcp.f32 %v2868_v58  ;;  %v2875_v40 = vmul.f32 %v6334_v47, %v8925_v33  ;;  %v3581_v33 = vsel %vm847_vm4, %v8978_v55, 0.0  ;;  %v9025_v4 = vpop.xlane.xlu1 %1099 }
 0xbf3   :  { %v6088_v8 = vpack.i.bf16 %v1993_v48, %v1825_v60 }
 0xbf4   :  { %v6336_v63 = vpop.eup %6335 }
 0xbf5   :  { %6089 = vrot.lane.b32.xlu1 %v6088_v8, %s6670_s27  ;;  %v2707_v1 = vmul.f32 %v6336_v63, %v10469_v18  ;;  %v6338_v49 = vpop.eup %6337 }
 0xbf6   :  { %v1995_v9 = vmul.f32 %v6338_v49, %v10471_v31  ;;  %v9041_v30 = vpop.xlane.xlu1 %1105 }
 0xbf7   :  { %v6093_v2 = vpack.i.bf16 %v2875_v40, %v2707_v1  ;;  %v9053_v1 = vld [vmem:[#allocation2 + $0x8] sm:$0xff] }
 0xbf8   :  { %v6340_v24 = vpop.eup %6339  ;;  %v3960_v40 = vmul.f32 %v9053_v1, %v9053_v1 }
 0xbf9   :  { %6094 = vrot.lane.b32.xlu0 %v6093_v2, %s6677_s23  ;;  %v1994_v61 = vmul.f32 %v6340_v24, %v10470_v34  ;;  %v6342_v11 = vpop.eup %6341  ;;  %v10294_v34 = vmov 0.0  }
 0xbfa   :  { %v2877_v17 = vmul.f32 %v6342_v11, %v8923_v43  ;;  %v928_v43 = vpop.xlane.xlu0 %927  ;;  %v3964_v49 = vsel %vm117_vm0, %v3960_v40, 0.0  ;;  %5964 = vmatprep.subr.bf16.mxu1 %v10294_v34  ;;  %5984 = vmatprep.subr.bf16.mxu0 %v10294_v34 }
 0xbfb   :  { %v6103_v15 = vpack.i.bf16 %v1995_v9, %v1994_v61  ;;  %v9067_v61 = vld [vmem:[#allocation2] sm:$0xff]  ;;  %5992 = vmatprep.mubr.msk.bf16.mxu0 %vm6680_vm8, %v10294_v34 }
 0xbfc   :  { %v6344_v50 = vpop.eup %6343  ;;  %v3959_v31 = vmul.f32 %v9067_v61, %v9067_v61  ;;  %v6159_v9 = vld [vmem:[%s10196_s4] sm:$0xff]  }
 0xbfd   :  { %v2876_v25 = vmul.f32 %v6344_v50, %v8929_v42  ;;  %5985 = vmatpush3.bf16.msra.mxu0 %v6159_v9 }
 0xbfe   :  { %v9027_v55 = vpop.xlane.xlu0 %933  ;;  %v3961_v0 = vsel %vm117_vm0, %v3959_v31, 0.0  ;;  %5986 = vmatprep.subr.bf16.mxu0 %v10294_v34 }
 0xbff   :  { %v6108_v16 = vpack.i.bf16 %v2877_v17, %v2876_v25 }
 0xc02   :  { %v9043_v22 = vpop.xlane.xlu0 %1102 }
 0xc18   :  { %3582 = vadd.xlane.f32.xlu0 %v3581_v33  ;;  %v6160_v33 = vld [vmem:[%s10196_s4 + $0x8] sm:$0xff]  }
 0xc19   :  { %3579 = vadd.xlane.f32.xlu1 %v3578_v35  ;;  %v10472_v35 = vld [vmem:[#allocation67_spill] sm:$0xff]  ;;  %5987 = vmatpush3.bf16.msra.mxu0 %v6160_v33 }
 0xc1a   :  { %5988 = vmatprep.subr.bf16.mxu0 %v10294_v34  ;;  %v6158_v33 = vld [vmem:[%s10195_s3 + $0x18] sm:$0xff]  }
 0xc1c   :  { %3576 = vadd.xlane.f32.xlu0 %v3575_v44 }
 0xc5f   :  { %v6080_v39 = vpop.permute.xlu0 %6079 }
 0xc60   :  { %v6082_v50 = vunpack.i.h.bf16 %v6080_v39  ;;  %v6081_v25 = vunpack.i.l.bf16 %v6080_v39 }
 0xc63   :  { %v6085_v62 = vpop.permute.xlu1 %6084 }
 0xc64   :  { %v6087_v17 = vunpack.i.h.bf16 %v6085_v62 }
 0xc67   :  { %v9047_v13 = vpop.permute.xlu1 %6089 }
 0xc6b   :  { %v9045_v58 = vpop.permute.xlu0 %6094 }
 0xc82   :  { %v9023_v26 = vpop.f32.mrb[28].mxu0 }
 0xc83   :  { %v3561_v6 = vpop.f32.mrb[29].mxu0 }
 0xc84   :  { %v5947_v32 = vpop.f32.mrb[30].mxu0 }
 0xc85   :  { %v3564_v42 = vpop.f32.mrb[31].mxu0 }
 0xc92   :  { %v5954_v7 = vpop.f32.mrb[32].mxu0 }
 0xc93   :  { %v9031_v36 = vsel %vm7632_vm5, %v5954_v7, -1e+30  ;;  %v3646_v29 = vpop.f32.mrb[33].mxu0 }
 0xc94   :  { %v3669_v54 = vsel %vm847_vm4, %v9031_v36, -inf  ;;  %v5955_v3 = vpop.f32.mrb[34].mxu0  ;;  %v9060_v2 = vsel %vm7641_vm6, %v3646_v29, -1e+30 }
 0xc95   :  { %v3649_v51 = vpop.f32.mrb[35].mxu0  ;;  %3670 = vmax.xlane.f32.xlu0 %v3669_v54  ;;  %v3663_v24 = vsel %vm847_vm4, %v9060_v2, -inf }
 0xc96   :  { %v9037_v20 = vsel %vm7648_vm7, %v3649_v51, -1e+30  ;;  %v6161_v51 = vld [vmem:[%s10196_s4 + $0x10] sm:$0xff]  }
 0xc97   :  { %v3666_v5 = vsel %vm847_vm4, %v9037_v20, -inf  ;;  %5989 = vmatpush3.bf16.msra.mxu0 %v6161_v51 }
 0xc98   :  { %5990 = vmatprep.subr.bf16.mxu0 %v10294_v34 }
 0xc99   :  { %3667 = vmax.xlane.f32.xlu0 %v3666_v5 }
 0xca5   :  { %v9049_v60 = vpop.xlane.xlu0 %3582 }
 0xca6   :  { %v3580_v28 = vpop.xlane.xlu1 %3579 }
 0xca7   :  { %6345 = vrcp.f32 %v3580_v28  ;;  %v6162_v28 = vld [vmem:[%s10196_s4 + $0x18] sm:$0xff]  }
 0xca8   :  { %5991 = vmatpush3.bf16.msra.mxu0 %v6162_v28 }
 0xca9   :  { %v3577_v19 = vpop.xlane.xlu0 %3576  ;;  %5996 = vmatprep.subr.bf16.mxu0 %v10294_v34 }
 0xcaa   :  { %6347 = vrcp.f32 %v3577_v19  ;;  %v9100_v19 = vld [vmem:[%s10202_s10] sm:$0xff] }
 0xcab   :  { %6349 = vrcp.f32 %v931_v12 }
 0xcac   :  { %6351 = vrcp.f32 %v928_v43 }
 0xcaf   :  { %6104 = vrot.lane.b32.xlu0 %v6103_v15, %s6670_s27 }
 0xcb1   :  { %v6346_v48 = vpop.eup %6345 }
 0xcb2   :  { %v3588_v63 = vmul.f32 %v6346_v48, %v3564_v42  ;;  %v9105_v48 = vld [vmem:[%s10202_s10 + $0x8] sm:$0xff] }
 0xcb4   :  { %v6348_v47 = vpop.eup %6347 }
 0xcb5   :  { %v3587_v8 = vmul.f32 %v6348_v47, %v3561_v6  ;;  %v6350_v11 = vpop.eup %6349  ;;  %v10473_v6 = vld [vmem:[#allocation68_spill] sm:$0xff] }
 0xcb6   :  { %v6352_v15 = vpop.eup %6351  ;;  %v939_v32 = vmul.f32 %v6350_v11, %v10473_v6  ;;  %v9114_v47 = vld [vmem:[%s10201_s9] sm:$0xff] }
 0xcb7   :  { %v6098_v18 = vpack.i.bf16 %v3588_v63, %v3587_v8  ;;  %v938_v44 = vmul.f32 %v6352_v15, %v10472_v35  ;;  %v9119_v8 = vld [vmem:[%s10201_s9 + $0x8] sm:$0xff] }
 0xcb8   :  { %v3833_v12 = vsel %vm449_vm1, %v939_v32, %v6082_v50 }
 0xcb9   :  { %6099 = vrot.lane.b32.xlu1 %v6098_v18, %s6672_s28  ;;  %v3832_v43 = vsel %vm449_vm1, %v938_v44, %v6081_v25  ;;  %v3840_v3 = vsel %vm3838_vm9, %v3833_v12, %v6087_v17  ;;  %v6156_v17 = vld [vmem:[%s10195_s3 + $0x8] sm:$0xff]  }
 0xcce   :  { %3965 = vadd.xlane.f32.xlu0 %v3964_v49 }
 0xcdd   :  { %3664 = vmax.xlane.f32.xlu1 %v3663_v24 }
 0xce4   :  { %4207 = vrot.lane.b32.xlu0 %v9105_v48, %s6663_s26 }
 0xce8   :  { %4227 = vrot.lane.b32.xlu0 %v9119_v8, %s6663_s26 }
 0xcec   :  { %4471 = vrot.lane.b32.xlu0 %v9119_v8, %s6670_s27 }
 0xcee   :  { %6109 = vrot.lane.b32.xlu1 %v6108_v16, %s6677_s23  ;;  %v6086_v16 = vunpack.i.l.bf16 %v6085_v62 }
 0xcf0   :  { %v3839_v54 = vsel %vm3838_vm9, %v3832_v43, %v6086_v16  ;;  %4497 = vrot.lane.b32.xlu0 %v9119_v8, %s6669_s25  ;;  %v6157_v16 = vld [vmem:[%s10195_s3 + $0x10] sm:$0xff]  }
 0xcf4   :  { %4505 = vrot.lane.b32.xlu0 %v9105_v48, %s6670_s27 }
 0xd12   :  { %3962 = vadd.xlane.f32.xlu1 %v3961_v0 }
 0xd22   :  { %v3671_v63 = vpop.xlane.xlu0 %3670 }
 0xd23   :  { %4205 = vrot.lane.b32.xlu1 %v9100_v19, %s6663_s26  ;;  %v3674_v40 = vsub.f32 %v9031_v36, %v3671_v63 }
 0xd25   :  { %v3679_v24 = vmul.f32 1.442695, %v3674_v40 }
 0xd26   :  { %v3668_v18 = vpop.xlane.xlu0 %3667 }
 0xd27   :  { %4225 = vrot.lane.b32.xlu1 %v9114_v47, %s6663_s26  ;;  %v3673_v49 = vsub.f32 %v9037_v20, %v3668_v18  ;;  %6353 = vpow2.f32 %v3679_v24  ;;  %v6155_v20 = vld [vmem:[%s10195_s3] sm:$0xff]  }
 0xd29   :  { %v3677_v31 = vmul.f32 1.442695, %v3673_v49 }
 0xd2a   :  { %v9178_v35 = vpop.permute.xlu0 %6104 }
 0xd2b   :  { %v6100_v42 = vpop.permute.xlu1 %6099  ;;  %4469 = vrot.lane.b32.xlu1 %v9114_v47, %s6670_s27  ;;  %6355 = vpow2.f32 %v3677_v31 }
 0xd2c   :  { %v6102_v7 = vunpack.i.h.bf16 %v6100_v42  ;;  %v6101_v29 = vunpack.i.l.bf16 %v6100_v42 }
 0xd2e   :  { %v3846_v5 = vsel %vm3845_vm10, %v3839_v54, %v6101_v29  ;;  %v3847_v62 = vsel %vm3845_vm10, %v3840_v3, %v6102_v7 }
 0xd2f   :  { %v3852_v39 = vpack.c.bf16 %v3847_v62, %v3846_v5  ;;  %4477 = vrot.lane.b32.xlu1 %v9100_v19, %s6669_s25 }
 0xd31   :  { %v9145_v15 = vpop.eup %6353 }
 0xd33   :  { %4479 = vrot.lane.b32.xlu1 %v9105_v48, %s6669_s25 }
 0xd35   :  { %v9147_v50 = vpop.eup %6355 }
 0xd37   :  { %4495 = vrot.lane.b32.xlu1 %v9114_v47, %s6669_s25 }
 0xd3b   :  { %4503 = vrot.lane.b32.xlu1 %v9100_v19, %s6670_s27 }
 0xd5b   :  { %v3966_v44 = vpop.xlane.xlu0 %3965 }
 0xd5c   :  { %v3968_v6 = vmul.f32 0.015625, %v3966_v44 }
 0xd5e   :  { %v3970_v42 = vadd.f32 1.1920929e-07, %v3968_v6 }
 0xd5f   :  { %v4208_v31 = vpop.permute.xlu0 %4207 }
 0xd6a   :  { %v3665_v0 = vpop.xlane.xlu1 %3664 }
 0xd6b   :  { %v3672_v9 = vsub.f32 %v9060_v2, %v3665_v0  ;;  %v3682_v2 = vpack.c.bf16 %v9145_v15, %v9145_v15 }
 0xd6d   :  { %v3675_v11 = vmul.f32 1.442695, %v3672_v9  ;;  %v9199_v9 = vpop.permute.xlu0 %4227 }
 0xd6e   :  { %v9180_v32 = vpop.permute.xlu1 %6109 }
 0xd6f   :  { %6357 = vpow2.f32 %v3675_v11 }
 0xd70   :  { %6359 = vrsqrt.f32 %v3970_v42 }
 0xd79   :  { %v9149_v25 = vpop.eup %6357 }
 0xd7a   :  { %v3681_v36 = vpack.c.bf16 %v9147_v50, %v9149_v25  ;;  %v6360_v29 = vpop.eup %6359 }
 0xd7b   :  { %v3974_v54 = vmul.f32 %v6360_v29, %v9053_v1 }
 0xd7c   :  { %5960 = vmatprep.mubr.msk.bf16.mxu1 %vm847_vm4, %v3681_v36  ;;  %v4472_v36 = vpop.permute.xlu0 %4471 }
 0xd7d   :  { %5961 = vmatmul.mubr.msk.bf16.vlgmr.msra.gmra.mrb[36].mxu1 %vm847_vm4, %v3682_v2 }
 0xd7e   :  { %5965 = vmatpush3.bf16.msra.mxu1 %v6155_v20  ;;  %5972 = vmatprep.mubr.msk.bf16.mxu1 %vm6680_vm8, %v10294_v34 }
 0xd7f   :  { %5966 = vmatprep.subr.bf16.mxu1 %v10294_v34 }
 0xd82   :  { %5967 = vmatpush3.bf16.msra.mxu1 %v6156_v17 }
 0xd83   :  { %5968 = vmatprep.subr.bf16.mxu1 %v10294_v34 }
 0xd86   :  { %5969 = vmatpush3.bf16.msra.mxu1 %v6157_v16 }
 0xd87   :  { %5970 = vmatprep.subr.bf16.mxu1 %v10294_v34 }
 0xd8a   :  { %5971 = vmatpush3.bf16.msra.mxu1 %v6158_v33  ;;  %v4498_v33 = vpop.permute.xlu0 %4497 }
 0xd8b   :  { %6016 = vmatprep.subr.bf16.mxu1 %v10294_v34 }
 0xd8d   :  { %5973 = vmatmul.mubr.msk.bf16.vlgmr.msra.gmra.mrb[40].mxu1 %vm117_vm0, %v3852_v39 }
 0xd8e   :  { %5976 = vmatprep.mubr.msk.bf16.mxu1 %vm6680_vm8, %v10294_v34  ;;  %v4506_v29 = vpop.permute.xlu0 %4505 }
 0xd9f   :  { %v3963_v12 = vpop.xlane.xlu1 %3962 }
 0xda0   :  { %v3967_v43 = vmul.f32 0.015625, %v3963_v12 }
 0xda2   :  { %v3969_v7 = vadd.f32 1.1920929e-07, %v3967_v43 }
 0xda4   :  { %6361 = vrsqrt.f32 %v3969_v7 }
 0xdae   :  { %v6362_v3 = vpop.eup %6361 }
 0xdaf   :  { %v3973_v51 = vmul.f32 %v6362_v3, %v9067_v61  ;;  %v4206_v61 = vpop.permute.xlu1 %4205 }
 0xdb1   :  { %v3975_v5 = vpack.c.bf16 %v3974_v54, %v3973_v51 }
 0xdb3   :  { %5993 = vmatmul.mubr.msk.bf16.vlgmr.msra.gmra.mrb[36].mxu0 %vm117_vm0, %v3975_v5  ;;  %v9197_v24 = vpop.permute.xlu1 %4225 }
 0xdb4   :  { %6004 = vmatprep.mubr.msk.bf16.mxu0 %vm6680_vm8, %v10294_v34 }
 0xdb7   :  { %v4470_v0 = vpop.permute.xlu1 %4469 }
 0xdbb   :  { %v4478_v11 = vpop.permute.xlu1 %4477 }
 0xdbf   :  { %v4480_v20 = vpop.permute.xlu1 %4479 }
 0xdc3   :  { %v4496_v12 = vpop.permute.xlu1 %4495 }
 0xdc7   :  { %v4504_v3 = vpop.permute.xlu1 %4503 }
 0xe50   :  { %v9187_v62 = vpop.f32.mrb[36].mxu1 }
 0xe51   :  { %v9189_v39 = vpop.f32.mrb[37].mxu1 }
 0xe52   :  { %v5963_v28 = vpop.f32.mrb[38].mxu1 }
 0xe53   :  { %v9191_v63 = vpop.f32.mrb[39].mxu1 }
 0xe60   :  { %v9193_v18 = vpop.f32.mrb[40].mxu1 }
 0xe61   :  { %v5974_v40 = vpop.f32.mrb[41].mxu1 }
 0xe62   :  { %v9195_v1 = vpop.f32.mrb[42].mxu1 }
 0xe63   :  { %v5975_v49 = vpop.f32.mrb[43].mxu1 }
 0xe86   :  { %v9201_v2 = vpop.f32.mrb[36].mxu0 }
 0xe87   :  { %v5994_v17 = vpop.f32.mrb[37].mxu0  ;;  %v4211_v16 = vmul.f32 %v4206_v61, %v9201_v2  ;;  %v4233_v43 = vmul.f32 %v9201_v2, %v9100_v19  ;;  %v4483_v54 = vmul.f32 %v4478_v11, %v9201_v2  ;;  %v4509_v5 = vmul.f32 %v4504_v3, %v9201_v2 }
 0xe88   :  { %v9204_v44 = vpop.f32.mrb[38].mxu0  ;;  %v9229_v49 = vmul.f32 %v9201_v2, %v9201_v2 }
 0xe89   :  { %v5995_v6 = vpop.f32.mrb[39].mxu0  ;;  %4215 = vrot.lane.b32.xlu1 %v4211_v16, %s6671_s11  ;;  %v4234_v42 = vmul.f32 %v9204_v44, %v9105_v48  ;;  %v4484_v7 = vmul.f32 %v4480_v20, %v9204_v44  ;;  %v4510_v51 = vmul.f32 %v4506_v29, %v9204_v44  ;;  %v9223_v28 = vmul.f32 %v9204_v44, %v9204_v44 }
 0xe8a   :  { %v4249_v61 = vsel %vm449_vm1, %v9229_v49, 0.0  ;;  %v4212_v11 = vmul.f32 %v4208_v31, %v9204_v44  ;;  %v4476_v6 = vmul.f32 %v4472_v36, %v9204_v44  ;;  %v4502_v31 = vmul.f32 %v4498_v33, %v9204_v44 }
 0xe8b   :  { %4239 = vrot.lane.b32.xlu0 %v4234_v42, %s6663_s26  ;;  %v4252_v40 = vsel %vm449_vm1, %v9223_v28, 0.0  ;;  %v3751_v36 = vsel %vm847_vm4, %v9145_v15, 0.0  ;;  %v3745_v33 = vsel %vm847_vm4, %v9149_v25, 0.0 }
 0xe8d   :  { %4237 = vrot.lane.b32.xlu1 %v4233_v43, %s6663_s26 }
 0xe8f   :  { %4489 = vrot.lane.b32.xlu0 %v4484_v7, %s6671_s11  ;;  %v4475_v7 = vmul.f32 %v4470_v0, %v9201_v2  ;;  %v3748_v0 = vsel %vm847_vm4, %v9147_v50, 0.0 }
 0xe91   :  { %4487 = vrot.lane.b32.xlu1 %v4483_v54, %s6671_s11 }
 0xe93   :  { %4515 = vrot.lane.b32.xlu0 %v4510_v51, %s6663_s26 }
 0xe95   :  { %4513 = vrot.lane.b32.xlu1 %v4509_v5, %s6663_s26  ;;  %v4501_v5 = vmul.f32 %v4496_v12, %v9201_v2 }
 0xeb2   :  { %4253 = vadd.xlane.f32.xlu0 %v4252_v40 }
 0xeb9   :  { %4250 = vadd.xlane.f32.xlu1 %v4249_v61 }
 0xeca   :  { %4217 = vrot.lane.b32.xlu1 %v4212_v11, %s6671_s11 }
 0xefb   :  { %v9235_v20 = vpop.permute.xlu1 %4215 }
 0xefd   :  { %v9237_v17 = vpop.permute.xlu0 %4239 }
 0xeff   :  { %v9239_v16 = vpop.permute.xlu1 %4237 }
 0xf01   :  { %v4490_v42 = vpop.permute.xlu0 %4489 }
 0xf02   :  { %v4494_v43 = vadd.f32 %v4490_v42, %v4476_v6 }
 0xf03   :  { %v4488_v29 = vpop.permute.xlu1 %4487 }
 0xf04   :  { %v4493_v54 = vadd.f32 %v4488_v29, %v4475_v7  ;;  %4525 = vrot.lane.b32.xlu0 %v4494_v43, %s6673_s29 }
 0xf05   :  { %v4516_v3 = vpop.permute.xlu0 %4515 }
 0xf06   :  { %v4520_v51 = vsub.f32 %v4502_v31, %v4516_v3  ;;  %4523 = vrot.lane.b32.xlu1 %v4493_v54, %s6673_s29 }
 0xf07   :  { %v4514_v40 = vpop.permute.xlu1 %4513 }
 0xf08   :  { %v4519_v61 = vsub.f32 %v4501_v5, %v4514_v40  ;;  %4533 = vrot.lane.b32.xlu0 %v4520_v51, %s6673_s29 }
 0xf0a   :  { %4531 = vrot.lane.b32.xlu1 %v4519_v61, %s6673_s29 }
 0xf27   :  { %3749 = vadd.xlane.f32.xlu0 %v3748_v0 }
 0xf2e   :  { %3752 = vadd.xlane.f32.xlu1 %v3751_v36 }
 0xf32   :  { %3746 = vadd.xlane.f32.xlu1 %v3745_v33 }
 0xf3d   :  { %4543 = vrot.lane.b32.xlu0 %v9223_v28, %s6673_s29 }
 0xf3f   :  { %v9259_v12 = vpop.xlane.xlu0 %4253 }
 0xf43   :  { %4541 = vrot.lane.b32.xlu1 %v9229_v49, %s6673_s29 }
 0xf46   :  { %v9261_v11 = vpop.xlane.xlu1 %4250 }
 0xf4a   :  { %v9265_v6 = vpop.permute.xlu1 %4217 }
 0xf76   :  { %v9263_v50 = vpop.permute.xlu0 %4525 }
 0xf77   :  { %10474 = vst [vmem:[#allocation53_spill] sm:$0xff] %v9263_v50 }
 0xf78   :  { %v9269_v42 = vpop.permute.xlu1 %4523 }
 0xf7a   :  { %v9267_v15 = vpop.permute.xlu0 %4533 }
 0xf7b   :  { %10475 = vst [vmem:[#allocation56_spill] sm:$0xff] %v9267_v15 }
 0xf7c   :  { %v9271_v43 = vpop.permute.xlu1 %4531 }
 0xfb4   :  { %v3750_v25 = vpop.xlane.xlu0 %3749 }
 0xfb5   :  { %6363 = vrcp.f32 %v3750_v25 }
 0xfb8   :  { %v4544_v7 = vpop.permute.xlu0 %4543 }
 0xfb9   :  { %v4550_v29 = vsel %vm449_vm1, %v4544_v7, 0.0 }
 0xfba   :  { %4551 = vadd.xlane.f32.xlu0 %v4550_v29 }
 0xfbb   :  { %v3753_v54 = vpop.xlane.xlu1 %3752 }
 0xfbc   :  { %6365 = vrcp.f32 %v3753_v54 }
 0xfbd   :  { %6367 = vrcp.f32 %v9049_v60 }
 0xfbf   :  { %v3747_v31 = vpop.xlane.xlu1 %3746  ;;  %v6364_v51 = vpop.eup %6363 }
 0xfc0   :  { %6369 = vrcp.f32 %v3747_v31  ;;  %v3758_v61 = vmul.f32 %v6364_v51, %v9191_v63  ;;  %v6092_v31 = vunpack.i.h.bf16 %v9047_v13  ;;  %v6091_v51 = vunpack.i.l.bf16 %v9047_v13 }
 0xfc1   :  { %6371 = vrcp.f32 %v9025_v4 }
 0xfc2   :  { %6373 = vrcp.f32 %v9027_v55 }
 0xfc3   :  { %v4542_v3 = vpop.permute.xlu1 %4541  ;;  %6375 = vrcp.f32 %v9041_v30  ;;  %v6112_v30 = vunpack.i.h.bf16 %v9180_v32 }
 0xfc4   :  { %v4547_v5 = vsel %vm449_vm1, %v4542_v3, 0.0  ;;  %6377 = vrcp.f32 %v9043_v22  ;;  %v6111_v22 = vunpack.i.l.bf16 %v9180_v32 }
 0xfc5   :  { %4548 = vadd.xlane.f32.xlu1 %v4547_v5 }
 0xfc6   :  { %v6366_v40 = vpop.eup %6365 }
 0xfc7   :  { %v3759_v0 = vmul.f32 %v6366_v40, %v9187_v62  ;;  %v6368_v36 = vpop.eup %6367 }
 0xfc8   :  { %v3589_v7 = vmul.f32 %v6368_v36, %v9023_v26  ;;  %v6097_v36 = vunpack.i.h.bf16 %v9045_v58 }
 0xfc9   :  { %v6118_v33 = vpack.i.bf16 %v3759_v0, %v3758_v61  ;;  %v10477_v61 = vld [vmem:[#allocation78_spill] sm:$0xff] }
 0xfca   :  { %v6370_v25 = vpop.eup %6369 }
 0xfcb   :  { %v3757_v29 = vmul.f32 %v6370_v25, %v9189_v39  ;;  %v6372_v54 = vpop.eup %6371 }
 0xfcc   :  { %v6374_v55 = vpop.eup %6373  ;;  %v1110_v0 = vmul.f32 %v6372_v54, %v10477_v61 }
 0xfcd   :  { %v6113_v60 = vpack.i.bf16 %v3757_v29, %v3589_v7  ;;  %v10478_v7 = vld [vmem:[#allocation66_spill] sm:$0xff] }
 0xfce   :  { %v940_v29 = vmul.f32 %v6374_v55, %v10478_v7 }
 0xfd0   :  { %4867 = vrot.lane.b32.xlu0 %v9100_v19, %s6677_s23 }
 0xfd4   :  { %5197 = vrot.lane.b32.xlu0 %v9100_v19, %s6678_s0 }
 0xfd6   :  { %4841 = vrot.lane.b32.xlu1 %v9100_v19, %s6676_s30 }
 0xfd8   :  { %5223 = vrot.lane.b32.xlu0 %v9100_v19, %s6672_s28 }
 0xfda   :  { %4843 = vrot.lane.b32.xlu1 %v9105_v48, %s6676_s30 }
 0xfdc   :  { %4903 = vrot.lane.b32.xlu0 %v9229_v49, %s6675_s20 }
 0xfde   :  { %4869 = vrot.lane.b32.xlu1 %v9105_v48, %s6677_s23 }
 0xfe0   :  { %5259 = vrot.lane.b32.xlu0 %v9229_v49, %s6668_s17 }
 0xfe2   :  { %5199 = vrot.lane.b32.xlu1 %v9105_v48, %s6678_s0 }
 0xfe4   :  { %4833 = vrot.lane.b32.xlu0 %v9114_v47, %s6677_s23 }
 0xfe6   :  { %6114 = vrot.lane.b32.xlu1 %v6113_v60, %s6672_s28  ;;  %v3835_v60 = vsel %vm449_vm1, %v1110_v0, %v6092_v31 }
 0xfe8   :  { %4859 = vrot.lane.b32.xlu0 %v9114_v47, %s6676_s30 }
 0xfea   :  { %5225 = vrot.lane.b32.xlu1 %v9105_v48, %s6672_s28 }
 0xfec   :  { %5189 = vrot.lane.b32.xlu0 %v9114_v47, %s6672_s28 }
 0xfee   :  { %4905 = vrot.lane.b32.xlu1 %v9223_v28, %s6675_s20 }
 0xff0   :  { %5215 = vrot.lane.b32.xlu0 %v9114_v47, %s6678_s0 }
 0xff2   :  { %5261 = vrot.lane.b32.xlu1 %v9223_v28, %s6668_s17 }
 0xff6   :  { %4835 = vrot.lane.b32.xlu1 %v9119_v8, %s6677_s23 }
 0xffa   :  { %4861 = vrot.lane.b32.xlu1 %v9119_v8, %s6676_s30 }
 0xffe   :  { %5191 = vrot.lane.b32.xlu1 %v9119_v8, %s6672_s28 }
0x1002   :  { %5217 = vrot.lane.b32.xlu1 %v9119_v8, %s6678_s0 }
0x1047   :  { %v9321_v26 = vpop.xlane.xlu0 %4551 }
0x1048   :  { %10476 = vst [vmem:[#allocation55_spill] sm:$0xff] %v9321_v26  ;;  %v10536_v26 = vld [vmem:[#allocation62_spill] sm:$0xff] }
0x104b   :  { %v4868_v62 = vpop.permute.xlu0 %4867 }
0x104c   :  { %v4873_v49 = vmul.f32 %v4868_v62, %v9201_v2 }
0x104f   :  { %v5198_v8 = vpop.permute.xlu0 %5197 }
0x1050   :  { %v5203_v5 = vmul.f32 %v5198_v8, %v9201_v2 }
0x1052   :  { %v9323_v19 = vpop.xlane.xlu1 %4548 }
0x1053   :  { %v5224_v25 = vpop.permute.xlu0 %5223 }
0x1056   :  { %v4842_v48 = vpop.permute.xlu1 %4841 }
0x1057   :  { %v4847_v47 = vmul.f32 %v4842_v48, %v9201_v2  ;;  %v3834_v48 = vsel %vm449_vm1, %v940_v29, %v6091_v51  ;;  %v4904_v31 = vpop.permute.xlu0 %4903 }
0x1059   :  { %4851 = vrot.lane.b32.xlu0 %v4847_v47, %s6671_s11  ;;  %v5229_v47 = vmul.f32 %v5224_v25, %v9201_v2 }
0x105a   :  { %v4844_v39 = vpop.permute.xlu1 %4843 }
0x105b   :  { %v4848_v63 = vmul.f32 %v4844_v39, %v9204_v44 }
0x105d   :  { %6119 = vrot.lane.b32.xlu0 %v6118_v33, %s6672_s28  ;;  %4853 = vrot.lane.b32.xlu1 %v4848_v63, %s6671_s11  ;;  %v6096_v33 = vunpack.i.l.bf16 %v9045_v58  ;;  %v3842_v63 = vsel %vm3838_vm9, %v3835_v60, %v6097_v36 }
0x105e   :  { %v4870_v28 = vpop.permute.xlu1 %4869 }
0x105f   :  { %v4874_v4 = vmul.f32 %v4870_v28, %v9204_v44  ;;  %v3841_v58 = vsel %vm3838_vm9, %v3834_v48, %v6096_v33  ;;  %v6376_v48 = vpop.eup %6375 }
0x1061   :  { %4877 = vrot.lane.b32.xlu0 %v4873_v49, %s6663_s26  ;;  %4879 = vrot.lane.b32.xlu1 %v4874_v4, %s6663_s26 }
0x1062   :  { %v5200_v3 = vpop.permute.xlu1 %5199 }
0x1063   :  { %v5204_v40 = vmul.f32 %v5200_v3, %v9204_v44 }
0x1065   :  { %5207 = vrot.lane.b32.xlu1 %v5203_v5, %s6671_s11  ;;  %5209 = vrot.lane.b32.xlu0 %v5204_v40, %s6671_s11  ;;  %v4909_v5 = vsel %vm449_vm1, %v4904_v31, 0.0  ;;  %v5260_v40 = vpop.permute.xlu0 %5259 }
0x1066   :  { %v6115_v13 = vpop.permute.xlu1 %6114  ;;  %v5265_v0 = vsel %vm449_vm1, %v5260_v40, 0.0 }
0x1067   :  { %v6117_v62 = vunpack.i.h.bf16 %v6115_v13  ;;  %v6116_v39 = vunpack.i.l.bf16 %v6115_v13 }
0x1069   :  { %v3849_v8 = vsel %vm3845_vm10, %v3842_v63, %v6117_v62  ;;  %v3848_v28 = vsel %vm3845_vm10, %v3841_v58, %v6116_v39  ;;  %5233 = vrot.lane.b32.xlu1 %v5229_v47, %s6663_s26  ;;  %v4834_v36 = vpop.permute.xlu0 %4833  ;;  %v6378_v62 = vpop.eup %6377  ;;  %v6107_v39 = vunpack.i.h.bf16 %v9178_v35 }
0x106a   :  { %v5226_v49 = vpop.permute.xlu1 %5225  ;;  %v3853_v4 = vpack.c.bf16 %v3849_v8, %v3848_v28  ;;  %v4839_v47 = vmul.f32 %v4834_v36, %v9201_v2  ;;  %v6106_v8 = vunpack.i.l.bf16 %v9178_v35 }
0x106b   :  { %v5230_v54 = vmul.f32 %v5226_v49, %v9204_v44  ;;  %v10479_v49 = vld [vmem:[#allocation77_spill] sm:$0xff] }
0x106c   :  { %5977 = vmatmul.mubr.msk.bf16.gmra.mrb[44].mxu1 %vm117_vm0, %v3853_v4  ;;  %v1112_v4 = vmul.f32 %v6376_v48, %v10479_v49 }
0x106d   :  { %5235 = vrot.lane.b32.xlu0 %v5230_v54, %s6663_s26  ;;  %5980 = vmatprep.mubr.msk.bf16.mxu1 %vm6680_vm8, %v10294_v34  ;;  %v4860_v25 = vpop.permute.xlu0 %4859  ;;  %v10480_v54 = vld [vmem:[#allocation79_spill] sm:$0xff] }
0x106e   :  { %v4906_v55 = vpop.permute.xlu1 %4905  ;;  %v4865_v32 = vmul.f32 %v4860_v25, %v9201_v2 }
0x106f   :  { %v4912_v3 = vsel %vm449_vm1, %v4906_v55, 0.0  ;;  %v1111_v55 = vmul.f32 %v6378_v62, %v10480_v54 }
0x1071   :  { %v5190_v29 = vpop.permute.xlu0 %5189  ;;  %v3836_v40 = vsel %vm449_vm1, %v1111_v55, %v6106_v8 }
0x1072   :  { %v5262_v51 = vpop.permute.xlu1 %5261  ;;  %v3843_v36 = vsel %vm3838_vm9, %v3836_v40, %v6111_v22 }
0x1073   :  { %v5268_v61 = vsel %vm449_vm1, %v5262_v51, 0.0 }
0x1075   :  { %v5216_v13 = vpop.permute.xlu0 %5215 }
0x1076   :  { %v4836_v33 = vpop.permute.xlu1 %4835  ;;  %v5221_v55 = vmul.f32 %v5216_v13, %v9201_v2 }
0x1077   :  { %v4840_v31 = vmul.f32 %v4836_v33, %v9204_v44 }
0x107a   :  { %v4862_v7 = vpop.permute.xlu1 %4861 }
0x107e   :  { %v5192_v60 = vpop.permute.xlu1 %5191 }
0x1082   :  { %v5218_v63 = vpop.permute.xlu1 %5217 }
0x108c   :  { %4913 = vadd.xlane.f32.xlu0 %v4912_v3  ;;  %v3837_v3 = vsel %vm449_vm1, %v1112_v4, %v6107_v39  ;;  %v5195_v4 = vmul.f32 %v5190_v29, %v9201_v2 }
0x108d   :  { %4910 = vadd.xlane.f32.xlu1 %v4909_v5  ;;  %v3844_v48 = vsel %vm3838_vm9, %v3837_v3, %v6112_v30  ;;  %v5196_v30 = vmul.f32 %v5192_v60, %v9204_v44  ;;  %v5222_v60 = vmul.f32 %v5218_v63, %v9204_v44 }
0x1090   :  { %5269 = vadd.xlane.f32.xlu0 %v5268_v61 }
0x1091   :  { %5266 = vadd.xlane.f32.xlu1 %v5265_v0 }
0x10cb   :  { %v4852_v58 = vpop.permute.xlu0 %4851 }
0x10cc   :  { %v4857_v28 = vadd.f32 %v4852_v58, %v4839_v47  ;;  %v4866_v47 = vmul.f32 %v4862_v7, %v9204_v44 }
0x10ce   :  { %4887 = vrot.lane.b32.xlu1 %v4857_v28, %s6675_s20 }
0x10cf   :  { %v6120_v51 = vpop.permute.xlu0 %6119  ;;  %v4854_v5 = vpop.permute.xlu1 %4853 }
0x10d0   :  { %v6122_v35 = vunpack.i.h.bf16 %v6120_v51  ;;  %v6121_v61 = vunpack.i.l.bf16 %v6120_v51  ;;  %v4858_v0 = vadd.f32 %v4854_v5, %v4840_v31  ;;  %v6544_v5 = vld [vmem:[%s10193_s1] sm:$0xff] }
0x10d1   :  { %v3953_v13 = vadd.f32 %v6544_v5, %v9193_v18  ;;  %v6165_v18 = vld [vmem:[#allocation5 + $0x10] sm:$0xff]  }
0x10d2   :  { %v3851_v33 = vsel %vm3845_vm10, %v3844_v48, %v6122_v35  ;;  %v3850_v62 = vsel %vm3845_vm10, %v3843_v36, %v6121_v61  ;;  %4889 = vrot.lane.b32.xlu0 %v4858_v0, %s6675_s20  ;;  %v6545_v35 = vld [vmem:[%s10193_s1 + $0x8] sm:$0xff]  ;;  %v6163_v48 = vld [vmem:[#allocation5] sm:$0xff]  }
0x10d3   :  { %v4878_v39 = vpop.permute.xlu0 %4877  ;;  %v4880_v58 = vpop.permute.xlu1 %4879  ;;  %v3854_v8 = vpack.c.bf16 %v3851_v33, %v3850_v62  ;;  %v3976_v40 = vmul.f32 %v3953_v13, %v3953_v13  ;;  %v3954_v61 = vadd.f32 %v6545_v35, %v9195_v1  ;;  %5997 = vmatpush3.bf16.msra.mxu0 %v6163_v48  ;;  %v6546_v33 = vld [vmem:[%s10193_s1 + $0x10] sm:$0xff] }
0x10d4   :  { %v4883_v28 = vsub.f32 %v4865_v32, %v4878_v39  ;;  %v4884_v49 = vsub.f32 %v4866_v47, %v4880_v58  ;;  %5998 = vmatprep.subr.bf16.mxu0 %v10294_v34  ;;  %v6164_v32 = vld [vmem:[#allocation5 + $0x8] sm:$0xff]   ;;  %v6166_v47 = vld [vmem:[#allocation5 + $0x18] sm:$0xff]  }
0x10d5   :  { %5981 = vmatmul.mubr.msk.bf16.gmra.mrb[48].mxu1 %vm117_vm0, %v3854_v8  ;;  %v3977_v63 = vmul.f32 %v3954_v61, %v3954_v61  ;;  %v3982_v0 = vsel %vm117_vm0, %v3976_v40, 0.0 }
0x10d6   :  { %4895 = vrot.lane.b32.xlu1 %v4883_v28, %s6675_s20  ;;  %4897 = vrot.lane.b32.xlu0 %v4884_v49, %s6675_s20  ;;  %v6547_v28 = vld [vmem:[%s10193_s1 + $0x18] sm:$0xff] }
0x10d7   :  { %v5210_v25 = vpop.permute.xlu0 %5209  ;;  %v5208_v7 = vpop.permute.xlu1 %5207  ;;  %6024 = vmatprep.mubr.msk.bf16.mxu1 %vm6680_vm8, %v10294_v34  ;;  %v3985_v36 = vsel %vm117_vm0, %v3977_v63, 0.0  ;;  %5999 = vmatpush3.bf16.msra.mxu0 %v6164_v32 }
0x10d8   :  { %v5214_v22 = vadd.f32 %v5210_v25, %v5196_v30  ;;  %v5213_v54 = vadd.f32 %v5208_v7, %v5195_v4  ;;  %6000 = vmatprep.subr.bf16.mxu0 %v10294_v34 }
0x10da   :  { %5245 = vrot.lane.b32.xlu0 %v5214_v22, %s6668_s17  ;;  %5243 = vrot.lane.b32.xlu1 %v5213_v54, %s6668_s17 }
0x10db   :  { %v5234_v29 = vpop.permute.xlu1 %5233  ;;  %6001 = vmatpush3.bf16.msra.mxu0 %v6165_v18 }
0x10dc   :  { %v5239_v31 = vsub.f32 %v5221_v55, %v5234_v29  ;;  %6002 = vmatprep.subr.bf16.mxu0 %v10294_v34 }
0x10de   :  { %5251 = vrot.lane.b32.xlu1 %v5239_v31, %s6668_s17 }
0x10df   :  { %v5236_v3 = vpop.permute.xlu0 %5235  ;;  %6003 = vmatpush3.bf16.msra.mxu0 %v6166_v47 }
0x10e0   :  { %v5240_v51 = vsub.f32 %v5222_v60, %v5236_v3 }
0x10e2   :  { %5253 = vrot.lane.b32.xlu0 %v5240_v51, %s6668_s17 }
0x1101   :  { %3983 = vadd.xlane.f32.xlu0 %v3982_v0 }
0x1105   :  { %3986 = vadd.xlane.f32.xlu0 %v3985_v36 }
0x1119   :  { %v9421_v22 = vpop.xlane.xlu0 %4913 }
0x111a   :  { %10481 = vst [vmem:[#allocation82_spill] sm:$0xff] %v9421_v22 }
0x111d   :  { %v9423_v54 = vpop.xlane.xlu0 %5269 }
0x111e   :  { %10482 = vst [vmem:[#allocation54_spill] sm:$0xff] %v9423_v54 }
0x113f   :  { %v3938_v1 = vpop.f32.mrb[44].mxu1 }
0x1140   :  { %v9412_v62 = vadd.f32 %v6546_v33, %v3938_v1  ;;  %v5978_v39 = vpop.f32.mrb[45].mxu1  ;;  %v6548_v1 = vld [vmem:[%s10193_s1 + $0x20] sm:$0xff] }
0x1141   :  { %v3941_v58 = vpop.f32.mrb[46].mxu1 }
0x1142   :  { %v3978_v8 = vmul.f32 %v9412_v62, %v9412_v62  ;;  %v3956_v49 = vadd.f32 %v6547_v28, %v3941_v58  ;;  %v5979_v4 = vpop.f32.mrb[47].mxu1 }
0x1144   :  { %v3979_v30 = vmul.f32 %v3956_v49, %v3956_v49  ;;  %v3988_v25 = vsel %vm117_vm0, %v3978_v8, 0.0  ;;  %v9425_v55 = vpop.permute.xlu0 %4889 }
0x1145   :  { %3989 = vadd.xlane.f32.xlu1 %v3988_v25  ;;  %10483 = vst [vmem:[#allocation52_spill] sm:$0xff] %v9425_v55  ;;  %v10538_v55 = vld [vmem:[#allocation64_spill] sm:$0xff] }
0x1146   :  { %v3991_v7 = vsel %vm117_vm0, %v3979_v30, 0.0 }
0x1147   :  { %3992 = vadd.xlane.f32.xlu0 %v3991_v7  ;;  %v9444_v7 = vpop.xlane.xlu1 %4910 }
0x1148   :  { %v9427_v29 = vpop.permute.xlu0 %4897 }
0x1149   :  { %10484 = vst [vmem:[#allocation57_spill] sm:$0xff] %v9427_v29 }
0x114c   :  { %v9429_v31 = vpop.permute.xlu0 %5245 }
0x114d   :  { %10485 = vst [vmem:[#allocation90_spill] sm:$0xff] %v9429_v31 }
0x1154   :  { %v9431_v60 = vpop.permute.xlu0 %5253 }
0x1155   :  { %10486 = vst [vmem:[#allocation91_spill] sm:$0xff] %v9431_v60 }
0x118e   :  { %v3984_v3 = vpop.xlane.xlu0 %3983 }
0x118f   :  { %v4000_v51 = vmul.f32 0.015625, %v3984_v3  ;;  %v9446_v3 = vpop.xlane.xlu1 %5266 }
0x1191   :  { %v4006_v5 = vadd.f32 1.1920929e-07, %v4000_v51 }
0x1192   :  { %v3987_v40 = vpop.xlane.xlu0 %3986 }
0x1193   :  { %v4001_v35 = vmul.f32 0.015625, %v3987_v40  ;;  %6379 = vrsqrt.f32 %v4006_v5  ;;  %v9448_v51 = vpop.permute.xlu1 %4887 }
0x1195   :  { %v4007_v63 = vadd.f32 1.1920929e-07, %v4001_v35 }
0x1197   :  { %6381 = vrsqrt.f32 %v4007_v63  ;;  %v9450_v5 = vpop.permute.xlu1 %4895 }
0x119b   :  { %v9452_v40 = vpop.permute.xlu1 %5243 }
0x119d   :  { %v6380_v0 = vpop.eup %6379 }
0x119e   :  { %v4018_v48 = vmul.f32 %v6380_v0, %v3953_v13  ;;  %v6549_v13 = vld [vmem:[%s10193_s1 + $0x28] sm:$0xff] }
0x119f   :  { %v9454_v35 = vpop.permute.xlu1 %5251 }
0x11a1   :  { %v6382_v36 = vpop.eup %6381 }
0x11a2   :  { %v4019_v32 = vmul.f32 %v6382_v36, %v3954_v61 }
0x11a4   :  { %v4024_v18 = vpack.c.bf16 %v4019_v32, %v4018_v48 }
0x11a6   :  { %6005 = vmatmul.mubr.msk.bf16.vlgmr.msra.gmra.mrb[40].mxu0 %vm117_vm0, %v4024_v18 }
0x11a7   :  { %6008 = vmatprep.mubr.msk.bf16.mxu0 %vm6680_vm8, %v10294_v34 }
0x11a8   :  { %v3946_v47 = vpop.f32.mrb[48].mxu1 }
0x11a9   :  { %v3957_v33 = vadd.f32 %v6548_v1, %v3946_v47  ;;  %v5982_v39 = vpop.f32.mrb[49].mxu1 }
0x11aa   :  { %v3949_v58 = vpop.f32.mrb[50].mxu1 }
0x11ab   :  { %v3980_v8 = vmul.f32 %v3957_v33, %v3957_v33  ;;  %v3958_v61 = vadd.f32 %v6549_v13, %v3949_v58  ;;  %v5983_v28 = vpop.f32.mrb[51].mxu1 }
0x11ad   :  { %v3981_v4 = vmul.f32 %v3958_v61, %v3958_v61  ;;  %v3994_v30 = vsel %vm117_vm0, %v3980_v8, 0.0 }
0x11ae   :  { %3995 = vadd.xlane.f32.xlu1 %v3994_v30 }
0x11af   :  { %v3997_v25 = vsel %vm117_vm0, %v3981_v4, 0.0 }
0x11b0   :  { %3998 = vadd.xlane.f32.xlu0 %v3997_v25 }
0x11d2   :  { %v3990_v63 = vpop.xlane.xlu1 %3989 }
0x11d3   :  { %v4002_v0 = vmul.f32 0.015625, %v3990_v63 }
0x11d4   :  { %v3993_v36 = vpop.xlane.xlu0 %3992 }
0x11d5   :  { %v4008_v48 = vadd.f32 1.1920929e-07, %v4002_v0  ;;  %v4003_v32 = vmul.f32 0.015625, %v3993_v36 }
0x11d7   :  { %6383 = vrsqrt.f32 %v4008_v48  ;;  %v4009_v18 = vadd.f32 1.1920929e-07, %v4003_v32 }
0x11d9   :  { %6385 = vrsqrt.f32 %v4009_v18 }
0x11e1   :  { %v6384_v47 = vpop.eup %6383 }
0x11e2   :  { %v4020_v39 = vmul.f32 %v6384_v47, %v9412_v62  ;;  %v6550_v47 = vld [vmem:[%s10200_s8] sm:$0xff] }
0x11e3   :  { %v6386_v1 = vpop.eup %6385 }
0x11e4   :  { %v4021_v58 = vmul.f32 %v6386_v1, %v3956_v49 }
0x11e6   :  { %v4025_v8 = vpack.c.bf16 %v4021_v58, %v4020_v39  ;;  %v10488_v39 = vld [vmem:[#allocation14_spill] sm:$0xff] }
0x11e8   :  { %6009 = vmatmul.mubr.msk.bf16.gmra.mrb[44].mxu0 %vm117_vm0, %v4025_v8 }
0x11e9   :  { %6012 = vmatprep.mubr.msk.bf16.mxu0 %vm6680_vm8, %v10294_v34 }
0x123b   :  { %v3996_v13 = vpop.xlane.xlu1 %3995 }
0x123c   :  { %v4004_v28 = vmul.f32 0.015625, %v3996_v13 }
0x123d   :  { %v3999_v4 = vpop.xlane.xlu0 %3998 }
0x123e   :  { %v4010_v30 = vadd.f32 1.1920929e-07, %v4004_v28  ;;  %v4005_v25 = vmul.f32 0.015625, %v3999_v4  ;;  %v10491_v28 = vld [vmem:[#allocation44_spill] sm:$0xff] }
0x1240   :  { %6387 = vrsqrt.f32 %v4010_v30  ;;  %v4011_v63 = vadd.f32 1.1920929e-07, %v4005_v25  ;;  %v10492_v30 = vld [vmem:[#allocation96_spill] sm:$0xff] }
0x1242   :  { %6389 = vrsqrt.f32 %v4011_v63 }
0x124a   :  { %v6388_v0 = vpop.eup %6387 }
0x124b   :  { %v4022_v48 = vmul.f32 %v6388_v0, %v3957_v33  ;;  %v10490_v33 = vld [vmem:[#allocation95_spill] sm:$0xff]  ;;  %v10493_v0 = vld [vmem:[#allocation46_spill] sm:$0xff] }
0x124c   :  { %v6390_v36 = vpop.eup %6389 }
0x124d   :  { %v4023_v32 = vmul.f32 %v6390_v36, %v3958_v61 }
0x124f   :  { %v4026_v62 = vpack.c.bf16 %v4023_v32, %v4022_v48  ;;  %v10494_v48 = vld [vmem:[#allocation59_spill] sm:$0xff] }
0x1251   :  { %6013 = vmatmul.mubr.msk.bf16.gmra.mrb[48].mxu0 %vm117_vm0, %v4026_v62  ;;  %v10495_v62 = vld [vmem:[#allocation61_spill] sm:$0xff] }
0x1279   :  { %v9461_v49 = vpop.f32.mrb[40].mxu0 }
0x127a   :  { %10487 = vst [vmem:[#allocation101_spill] sm:$0xff] %v9461_v49  ;;  %v6006_v18 = vpop.f32.mrb[41].mxu0  ;;  %v4313_v1 = vmul.f32 %v6550_v47, %v9461_v49  ;;  %v4271_v58 = vmul.f32 %v9461_v49, %v10488_v39  ;;  %v5287_v61 = vmul.f32 %v9461_v49, %v10490_v33  ;;  %v4569_v4 = vmul.f32 %v9461_v49, %v10491_v28  ;;  %v6551_v47 = vld [vmem:[%s10200_s8 + $0x8] sm:$0xff]  ;;  %v10496_v39 = vld [vmem:[#allocation47_spill] sm:$0xff] }
0x127b   :  { %v9469_v8 = vpop.f32.mrb[42].mxu0  ;;  %v5329_v25 = vmul.f32 %v9461_v49, %v10492_v30  ;;  %v4355_v63 = vmul.f32 %v9461_v49, %v9461_v49  ;;  %v4611_v36 = vmul.f32 %v9461_v49, %v10493_v0  ;;  %v4931_v32 = vmul.f32 %v9461_v49, %v10494_v48  ;;  %v10499_v30 = vld [vmem:[#allocation16_spill] sm:$0xff] }
0x127c   :  { %10489 = vst [vmem:[#allocation102_spill] sm:$0xff] %v9469_v8  ;;  %v6007_v13 = vpop.f32.mrb[43].mxu0  ;;  %4325 = vrot.lane.b32.xlu1 %v4313_v1, %s6663_s26  ;;  %4283 = vrot.lane.b32.xlu0 %v4271_v58, %s6671_s11  ;;  %v4973_v18 = vmul.f32 %v9461_v49, %v10495_v62  ;;  %v4314_v1 = vmul.f32 %v6551_v47, %v9469_v8 }
0x127d   :  { %v4570_v58 = vmul.f32 %v9469_v8, %v10496_v39  ;;  %v10497_v13 = vld [vmem:[#allocation12_spill] sm:$0xff] }
0x127e   :  { %v5288_v33 = vmul.f32 %v9469_v8, %v10497_v13 }
0x1280   :  { %5299 = vrot.lane.b32.xlu1 %v5287_v61, %s6671_s11  ;;  %4581 = vrot.lane.b32.xlu0 %v4569_v4, %s6671_s11  ;;  %v10498_v61 = vld [vmem:[#allocation19_spill] sm:$0xff]  ;;  %v4361_v4 = vsel %vm449_vm1, %v4355_v63, 0.0 }
0x1281   :  { %v5330_v28 = vmul.f32 %v9469_v8, %v10498_v61 }
0x1284   :  { %5341 = vrot.lane.b32.xlu1 %v5329_v25, %s6663_s26  ;;  %4707 = vrot.lane.b32.xlu0 %v4355_v63, %s6673_s29  ;;  %v4272_v25 = vmul.f32 %v9469_v8, %v10499_v30 }
0x1288   :  { %5063 = vrot.lane.b32.xlu0 %v4355_v63, %s6675_s20 }
0x128c   :  { %5419 = vrot.lane.b32.xlu0 %v4355_v63, %s6668_s17 }
0x1290   :  { %4623 = vrot.lane.b32.xlu0 %v4611_v36, %s6663_s26  ;;  %v4356_v36 = vmul.f32 %v9469_v8, %v9469_v8 }
0x1292   :  { %v4364_v63 = vsel %vm449_vm1, %v4356_v36, 0.0 }
0x1294   :  { %4943 = vrot.lane.b32.xlu0 %v4931_v32, %s6671_s11 }
0x1298   :  { %4985 = vrot.lane.b32.xlu0 %v4973_v18, %s6663_s26  ;;  %v10500_v18 = vld [vmem:[#allocation49_spill] sm:$0xff] }
0x1299   :  { %v4612_v47 = vmul.f32 %v9469_v8, %v10500_v18 }
0x129c   :  { %4327 = vrot.lane.b32.xlu0 %v4314_v1, %s6663_s26  ;;  %v10501_v1 = vld [vmem:[#allocation58_spill] sm:$0xff] }
0x129d   :  { %v4932_v39 = vmul.f32 %v9469_v8, %v10501_v1  ;;  %v10504_v1 = vld [vmem:[#allocation13_spill] sm:$0xff] }
0x12a0   :  { %4583 = vrot.lane.b32.xlu0 %v4570_v58, %s6671_s11  ;;  %v10502_v58 = vld [vmem:[#allocation60_spill] sm:$0xff] }
0x12a1   :  { %v4974_v13 = vmul.f32 %v9469_v8, %v10502_v58 }
0x12a4   :  { %5301 = vrot.lane.b32.xlu0 %v5288_v33, %s6671_s11 }
0x12a8   :  { %4362 = vadd.xlane.f32.xlu1 %v4361_v4  ;;  %5343 = vrot.lane.b32.xlu0 %v5330_v28, %s6663_s26 }
0x12b9   :  { %4285 = vrot.lane.b32.xlu1 %v4272_v25, %s6671_s11 }
0x12bb   :  { %v9514_v0 = vpop.f32.mrb[44].mxu0 }
0x12bc   :  { %v6010_v48 = vpop.f32.mrb[45].mxu0 }
0x12bd   :  { %v9518_v32 = vpop.f32.mrb[46].mxu0  ;;  %4709 = vrot.lane.b32.xlu1 %v4356_v36, %s6673_s29 }
0x12be   :  { %v6011_v62 = vpop.f32.mrb[47].mxu0  ;;  %v4934_v31 = vmul.f32 %v9518_v32, %v10536_v26  ;;  %v4976_v29 = vmul.f32 %v9518_v32, %v10538_v55  ;;  %v10539_v26 = vld [vmem:[#allocation28_spill] sm:$0xff] }
0x12c1   :  { %5065 = vrot.lane.b32.xlu1 %v4356_v36, %s6675_s20 }
0x12c5   :  { %5421 = vrot.lane.b32.xlu1 %v4356_v36, %s6668_s17 }
0x12c7   :  { %4365 = vadd.xlane.f32.xlu0 %v4364_v63  ;;  %v10503_v63 = vld [vmem:[#allocation40_spill] sm:$0xff] }
0x12c8   :  { %v4563_v18 = vmul.f32 %v9461_v49, %v10503_v63 }
0x12c9   :  { %4625 = vrot.lane.b32.xlu1 %v4612_v47, %s6663_s26 }
0x12cd   :  { %4945 = vrot.lane.b32.xlu1 %v4932_v39, %s6671_s11  ;;  %v4605_v39 = vmul.f32 %v9461_v49, %v10504_v1  ;;  %v5323_v1 = vmul.f32 %v9461_v49, %v8655_v10 }
0x12d1   :  { %4987 = vrot.lane.b32.xlu1 %v4974_v13, %s6663_s26 }
0x12ee   :  { %v4284_v33 = vpop.permute.xlu0 %4283 }
0x12f2   :  { %v4582_v61 = vpop.permute.xlu0 %4581 }
0x12f3   :  { %v4599_v47 = vadd.f32 %v4582_v61, %v4563_v18  ;;  %v5281_v18 = vmul.f32 %v9461_v49, %v8653_v21  ;;  %v4255_v21 = vmul.f32 0.0625, %v9261_v11  ;;  %v6552_v11 = vld [vmem:[%s10199_s7] sm:$0xff] }
0x12f6   :  { %v4708_v28 = vpop.permute.xlu0 %4707 }
0x12f7   :  { %v4725_v4 = vsel %vm449_vm1, %v4708_v28, 0.0  ;;  %v4326_v28 = vpop.permute.xlu1 %4325 }
0x12f8   :  { %4726 = vadd.xlane.f32.xlu0 %v4725_v4  ;;  %v10505_v4 = vld [vmem:[#allocation70_spill] sm:$0xff] }
0x12fa   :  { %v5064_v30 = vpop.permute.xlu0 %5063 }
0x12fb   :  { %v5081_v25 = vsel %vm449_vm1, %v5064_v30, 0.0  ;;  %v4925_v30 = vmul.f32 %v9461_v49, %v10505_v4  ;;  %v5300_v61 = vpop.permute.xlu1 %5299 }
0x12fc   :  { %5082 = vadd.xlane.f32.xlu1 %v5081_v25 }
0x12fe   :  { %v5420_v36 = vpop.permute.xlu0 %5419 }
0x12ff   :  { %v5437_v48 = vsel %vm449_vm1, %v5420_v36, 0.0 }
0x1300   :  { %5438 = vadd.xlane.f32.xlu1 %v5437_v48  ;;  %v10506_v48 = vld [vmem:[#allocation72_spill] sm:$0xff] }
0x1301   :  { %v4967_v34 = vmul.f32 %v9461_v49, %v10506_v48 }
0x1302   :  { %v4624_v62 = vpop.permute.xlu0 %4623 }
0x1303   :  { %v4641_v13 = vsub.f32 %v4605_v39, %v4624_v62  ;;  %v5317_v62 = vadd.f32 %v5300_v61, %v5281_v18  ;;  %v4231_v18 = vmul.f32 %v9197_v24, %v9201_v2 }
0x1305   :  { %v4243_v24 = vsub.f32 %v4231_v18, %v9239_v16 }
0x1306   :  { %v4944_v58 = vpop.permute.xlu0 %4943 }
0x1307   :  { %v4961_v25 = vadd.f32 %v4944_v58, %v4925_v30  ;;  %v4257_v30 = vadd.f32 1.1920929e-07, %v4255_v21 }
0x1309   :  { %6391 = vrsqrt.f32 %v4257_v30 }
0x130a   :  { %v4986_v36 = vpop.permute.xlu0 %4985 }
0x130b   :  { %v5003_v63 = vsub.f32 %v4967_v34, %v4986_v36 }
0x1311   :  { %4653 = vrot.lane.b32.xlu1 %v4599_v47, %s6673_s29  ;;  %v5342_v47 = vpop.permute.xlu1 %5341 }
0x1312   :  { %v5359_v39 = vsub.f32 %v5323_v1, %v5342_v47  ;;  %v4265_v1 = vmul.f32 %v6552_v11, %v9461_v49 }
0x1314   :  { %v4301_v30 = vadd.f32 %v4284_v33, %v4265_v1 }
0x1315   :  { %4677 = vrot.lane.b32.xlu1 %v4641_v13, %s6673_s29 }
0x1319   :  { %5015 = vrot.lane.b32.xlu1 %v4961_v25, %s6675_s20 }
0x131d   :  { %5039 = vrot.lane.b32.xlu1 %v5003_v63, %s6675_s20  ;;  %v6392_v63 = vpop.eup %6391 }
0x1321   :  { %5371 = vrot.lane.b32.xlu1 %v5317_v62, %s6668_s17  ;;  %v10507_v62 = vld [vmem:[#allocation24_spill] sm:$0xff] }
0x1322   :  { %v4307_v47 = vmul.f32 %v9461_v49, %v10507_v62 }
0x1324   :  { %v9553_v58 = vpop.f32.mrb[48].mxu0  ;;  %v4343_v21 = vsub.f32 %v4307_v47, %v4326_v28  ;;  %v10508_v47 = vld [vmem:[#allocation38_spill] sm:$0xff] }
0x1325   :  { %v6014_v13 = vpop.f32.mrb[49].mxu0  ;;  %5395 = vrot.lane.b32.xlu1 %v5359_v39, %s6668_s17  ;;  %v4564_v1 = vmul.f32 %v9469_v8, %v10508_v47 }
0x1326   :  { %v9556_v4 = vpop.f32.mrb[50].mxu0  ;;  %v6553_v13 = vld [vmem:[%s10201_s9] sm:$0xff] }
0x1327   :  { %v6015_v34 = vpop.f32.mrb[51].mxu0 }
0x1328   :  { %v4201_v34 = vmul.f32 %v6553_v13, %v9201_v2  ;;  %v10509_v13 = vld [vmem:[#allocation20_spill] sm:$0xff] }
0x1335   :  { %v4363_v25 = vpop.xlane.xlu1 %4362 }
0x1336   :  { %v4379_v36 = vmul.f32 0.0625, %v4363_v25  ;;  %v4261_v25 = vmul.f32 0.25, %v6392_v63 }
0x1338   :  { %v4385_v48 = vadd.f32 1.1920929e-07, %v4379_v36 }
0x1339   :  { %v9559_v61 = vpop.permute.xlu1 %4285 }
0x133a   :  { %6393 = vrsqrt.f32 %v4385_v48  ;;  %v4221_v48 = vadd.f32 %v9235_v20, %v4201_v34  ;;  %v4328_v20 = vpop.permute.xlu0 %4327  ;;  %v4273_v34 = vmul.f32 %v9514_v0, %v10509_v13  ;;  %v10515_v13 = vld [vmem:[#allocation35_spill] sm:$0xff] }
0x133d   :  { %v4710_v10 = vpop.permute.xlu1 %4709 }
0x133e   :  { %v4728_v39 = vsel %vm449_vm1, %v4710_v10, 0.0  ;;  %v4245_v10 = vsel %vm436_vm2, %v4221_v48, %v4243_v24  ;;  %v4584_v63 = vpop.permute.xlu0 %4583 }
0x133f   :  { %4729 = vadd.xlane.f32.xlu0 %v4728_v39  ;;  %v4349_v39 = vsel %vm436_vm2, %v4301_v30, %v4343_v21  ;;  %v9579_v49 = vmul.f32 %v4261_v25, %v4245_v10  ;;  %v4600_v24 = vadd.f32 %v4584_v63, %v4564_v1  ;;  %v10510_v21 = vld [vmem:[#allocation39_spill] sm:$0xff]  ;;  %v6554_v30 = vld [vmem:[%s10200_s8 + $0x10] sm:$0xff]  ;;  %v10512_v10 = vld [vmem:[#allocation48_spill] sm:$0xff] }
0x1340   :  { %v4315_v25 = vmul.f32 %v6554_v30, %v9514_v0 }
0x1341   :  { %v5066_v36 = vpop.permute.xlu1 %5065 }
0x1342   :  { %v5084_v62 = vsel %vm449_vm1, %v5066_v36, 0.0 }
0x1343   :  { %5085 = vadd.xlane.f32.xlu0 %v5084_v62  ;;  %v10511_v62 = vld [vmem:[#allocation69_spill] sm:$0xff] }
0x1344   :  { %v6394_v11 = vpop.eup %6393 }
0x1345   :  { %v5422_v50 = vpop.permute.xlu1 %5421  ;;  %v4397_v2 = vmul.f32 %v6394_v11, %v4349_v39  ;;  %v4926_v11 = vmul.f32 %v9469_v8, %v10511_v62  ;;  %v4571_v39 = vmul.f32 %v9514_v0, %v10512_v10  ;;  %v10518_v10 = vld [vmem:[#allocation97_spill] sm:$0xff] }
0x1346   :  { %v5440_v16 = vsel %vm449_vm1, %v5422_v50, 0.0  ;;  %v4606_v50 = vmul.f32 %v9469_v8, %v10510_v21 }
0x1347   :  { %5441 = vadd.xlane.f32.xlu0 %v5440_v16  ;;  %v4403_v33 = vmul.f32 %v4397_v2, %v9579_v49 }
0x1349   :  { %v4404_v28 = vsel %vm449_vm1, %v4403_v33, 0.0  ;;  %v4626_v18 = vpop.permute.xlu1 %4625  ;;  %v5302_v33 = vpop.permute.xlu0 %5301 }
0x134a   :  { %4405 = vadd.xlane.f32.xlu1 %v4404_v28  ;;  %v4642_v48 = vsub.f32 %v4606_v50, %v4626_v18  ;;  %v10513_v28 = vld [vmem:[#allocation71_spill] sm:$0xff]  ;;  %v10514_v18 = vld [vmem:[#allocation30_spill] sm:$0xff] }
0x134b   :  { %v4968_v63 = vmul.f32 %v9469_v8, %v10513_v28  ;;  %v4613_v47 = vmul.f32 %v9514_v0, %v10514_v18  ;;  %v10520_v28 = vld [vmem:[#allocation99_spill] sm:$0xff]  ;;  %v10521_v18 = vld [vmem:[#allocation100_spill] sm:$0xff] }
0x134d   :  { %v4946_v36 = vpop.permute.xlu1 %4945  ;;  %v5344_v30 = vpop.permute.xlu0 %5343 }
0x134e   :  { %v4962_v2 = vadd.f32 %v4946_v36, %v4926_v11  ;;  %v10517_v36 = vld [vmem:[#allocation65_spill] sm:$0xff] }
0x1351   :  { %v4988_v16 = vpop.permute.xlu1 %4987 }
0x1352   :  { %v5004_v1 = vsub.f32 %v4968_v63, %v4988_v16  ;;  %v10519_v16 = vld [vmem:[#allocation98_spill] sm:$0xff]  ;;  %v5290_v63 = vmul.f32 %v9518_v32, %v10520_v28  ;;  %v10526_v28 = vld [vmem:[#allocation80_spill] sm:$0xff] }
0x1354   :  { %v4366_v11 = vpop.xlane.xlu0 %4365 }
0x135b   :  { %4287 = vrot.lane.b32.xlu1 %v4273_v34, %s6671_s11  ;;  %v5282_v34 = vmul.f32 %v9469_v8, %v10515_v13 }
0x135d   :  { %4655 = vrot.lane.b32.xlu0 %v4600_v24, %s6673_s29  ;;  %v10516_v24 = vld [vmem:[#allocation63_spill] sm:$0xff]  ;;  %v5318_v50 = vadd.f32 %v5302_v33, %v5282_v34  ;;  %v10522_v34 = vld [vmem:[#allocation22_spill] sm:$0xff] }
0x135e   :  { %v4933_v21 = vmul.f32 %v9514_v0, %v10516_v24  ;;  %v4275_v24 = vmul.f32 %v9553_v58, %v10522_v34 }
0x135f   :  { %4329 = vrot.lane.b32.xlu1 %v4315_v25, %s6663_s26  ;;  %v5324_v25 = vmul.f32 %v9469_v8, %v8665_v14  ;;  %v5331_v14 = vmul.f32 %v9514_v0, %v10519_v16 }
0x1361   :  { %4679 = vrot.lane.b32.xlu0 %v4642_v48, %s6673_s29  ;;  %v4975_v48 = vmul.f32 %v9514_v0, %v10517_v36  ;;  %v5360_v62 = vsub.f32 %v5324_v25, %v5344_v30 }
0x1363   :  { %4585 = vrot.lane.b32.xlu1 %v4571_v39, %s6671_s11  ;;  %v5289_v39 = vmul.f32 %v9514_v0, %v10518_v10 }
0x1365   :  { %5017 = vrot.lane.b32.xlu0 %v4962_v2, %s6675_s20  ;;  %v4380_v2 = vmul.f32 0.0625, %v4366_v11 }
0x1367   :  { %4627 = vrot.lane.b32.xlu1 %v4613_v47, %s6663_s26  ;;  %v4386_v33 = vadd.f32 1.1920929e-07, %v4380_v2  ;;  %v5332_v47 = vmul.f32 %v9518_v32, %v10521_v18  ;;  %v10527_v18 = vld [vmem:[#allocation81_spill] sm:$0xff] }
0x1369   :  { %5041 = vrot.lane.b32.xlu0 %v5004_v1, %s6675_s20  ;;  %6395 = vrsqrt.f32 %v4386_v33  ;;  %v6555_v1 = vld [vmem:[%s10199_s7 + $0x8] sm:$0xff] }
0x136a   :  { %v4266_v13 = vmul.f32 %v6555_v1, %v9469_v8  ;;  %v4357_v1 = vmul.f32 %v9514_v0, %v9514_v0 }
0x136b   :  { %4947 = vrot.lane.b32.xlu1 %v4933_v21, %s6671_s11  ;;  %v10523_v21 = vld [vmem:[#allocation25_spill] sm:$0xff] }
0x136c   :  { %v4302_v30 = vadd.f32 %v9559_v61, %v4266_v13 }
0x136d   :  { %5373 = vrot.lane.b32.xlu0 %v5318_v50, %s6668_s17  ;;  %v4308_v50 = vmul.f32 %v9469_v8, %v10523_v21 }
0x136f   :  { %4989 = vrot.lane.b32.xlu1 %v4975_v48, %s6663_s26  ;;  %v4344_v36 = vsub.f32 %v4308_v50, %v4328_v20  ;;  %v6556_v48 = vld [vmem:[%s10200_s8 + $0x20] sm:$0xff]  ;;  %v4359_v20 = vmul.f32 %v9553_v58, %v9553_v58 }
0x1371   :  { %5397 = vrot.lane.b32.xlu0 %v5360_v62, %s6668_s17  ;;  %v4317_v62 = vmul.f32 %v6556_v48, %v9553_v58  ;;  %v4350_v11 = vsel %vm436_vm2, %v4302_v30, %v4344_v36  ;;  %v4373_v30 = vsel %vm449_vm1, %v4359_v20, 0.0  ;;  %v4367_v36 = vsel %vm449_vm1, %v4357_v1, 0.0 }
0x1373   :  { %5303 = vrot.lane.b32.xlu1 %v5289_v39, %s6671_s11  ;;  %v6396_v25 = vpop.eup %6395  ;;  %v10524_v39 = vld [vmem:[#allocation31_spill] sm:$0xff] }
0x1374   :  { %v4398_v10 = vmul.f32 %v6396_v25, %v4350_v11  ;;  %v4573_v2 = vmul.f32 %v9553_v58, %v10524_v39  ;;  %v9694_v11 = vmul.f32 %v9556_v4, %v9556_v4 }
0x1376   :  { %v4407_v61 = vmul.f32 %v4398_v10, %v9579_v49 }
0x1377   :  { %5345 = vrot.lane.b32.xlu1 %v5331_v14, %s6663_s26  ;;  %v10525_v14 = vld [vmem:[#allocation33_spill] sm:$0xff] }
0x1378   :  { %v4408_v16 = vsel %vm449_vm1, %v4407_v61, 0.0  ;;  %v4615_v33 = vmul.f32 %v9553_v58, %v10525_v14  ;;  %v10529_v61 = vld [vmem:[#allocation21_spill] sm:$0xff] }
0x137b   :  { %5305 = vrot.lane.b32.xlu1 %v5290_v63, %s6671_s11  ;;  %v4935_v63 = vmul.f32 %v9553_v58, %v10526_v28 }
0x137f   :  { %5347 = vrot.lane.b32.xlu1 %v5332_v47, %s6663_s26  ;;  %v4977_v47 = vmul.f32 %v9553_v58, %v10527_v18 }
0x1383   :  { %4291 = vrot.lane.b32.xlu1 %v4275_v24, %s6671_s11 }
0x1385   :  { %v9711_v14 = vpop.xlane.xlu0 %4726 }
0x1387   :  { %4333 = vrot.lane.b32.xlu1 %v4317_v62, %s6663_s26 }
0x1389   :  { %v9672_v13 = vpop.xlane.xlu1 %5082 }
0x138b   :  { %4589 = vrot.lane.b32.xlu1 %v4573_v2, %s6671_s11 }
0x138d   :  { %v9676_v34 = vpop.xlane.xlu1 %5438 }
0x138f   :  { %4715 = vrot.lane.b32.xlu1 %v4359_v20, %s6673_s29 }
0x1390   :  { %4409 = vadd.xlane.f32.xlu0 %v4408_v16 }
0x1391   :  { %v9678_v24 = vpop.permute.xlu1 %4653 }
0x1393   :  { %5071 = vrot.lane.b32.xlu1 %v4359_v20, %s6675_s20 }
0x1395   :  { %v9680_v21 = vpop.permute.xlu1 %4677 }
0x1397   :  { %5427 = vrot.lane.b32.xlu1 %v4359_v20, %s6668_s17  ;;  %v4274_v20 = vmul.f32 %v9518_v32, %v10529_v61 }
0x1399   :  { %v9682_v50 = vpop.permute.xlu1 %5015 }
0x139b   :  { %4631 = vrot.lane.b32.xlu1 %v4615_v33, %s6663_s26  ;;  %v6557_v33 = vld [vmem:[%s10200_s8 + $0x18] sm:$0xff] }
0x139c   :  { %v4316_v28 = vmul.f32 %v6557_v33, %v9518_v32 }
0x139d   :  { %v9685_v25 = vpop.permute.xlu1 %5039 }
0x139f   :  { %4951 = vrot.lane.b32.xlu1 %v4935_v63, %s6671_s11 }
0x13a1   :  { %v9688_v48 = vpop.permute.xlu1 %5371 }
0x13a3   :  { %4993 = vrot.lane.b32.xlu1 %v4977_v47, %s6663_s26  ;;  %v10531_v47 = vld [vmem:[#allocation50_spill] sm:$0xff] }
0x13a5   :  { %v9690_v62 = vpop.permute.xlu1 %5395 }
0x13a6   :  { %4711 = vrot.lane.b32.xlu0 %v4357_v1, %s6673_s29 }
0x13aa   :  { %5067 = vrot.lane.b32.xlu0 %v4357_v1, %s6675_s20 }
0x13ae   :  { %5423 = vrot.lane.b32.xlu0 %v4357_v1, %s6668_s17  ;;  %v4572_v1 = vmul.f32 %v9518_v32, %v10531_v47  ;;  %v10534_v47 = vld [vmem:[#allocation32_spill] sm:$0xff] }
0x13c7   :  { %4374 = vadd.xlane.f32.xlu1 %v4373_v30 }
0x13cc   :  { %v9718_v18 = vpop.xlane.xlu0 %4729 }
0x13cd   :  { %4368 = vadd.xlane.f32.xlu0 %v4367_v36  ;;  %10530 = vst [vmem:[#allocation93_spill] sm:$0xff] %v9718_v18  ;;  %v4358_v36 = vmul.f32 %v9518_v32, %v9518_v32  ;;  %v4311_v18 = vmul.f32 %v9553_v58, %v10539_v26 }
0x13d0   :  { %v9725_v61 = vpop.xlane.xlu0 %5085 }
0x13d1   :  { %10532 = vst [vmem:[#allocation37_spill] sm:$0xff] %v9725_v61 }
0x13d7   :  { %v9696_v10 = vpop.xlane.xlu1 %4405 }
0x13d8   :  { %10528 = vst [vmem:[#allocation89_spill] sm:$0xff] %v9696_v10  ;;  %4717 = vrot.lane.b32.xlu1 %v9694_v11, %s6673_s29 }
0x13db   :  { %v9700_v39 = vpop.permute.xlu1 %4287 }
0x13dc   :  { %5073 = vrot.lane.b32.xlu1 %v9694_v11, %s6675_s20 }
0x13df   :  { %v9704_v2 = vpop.permute.xlu1 %4329 }
0x13e0   :  { %5429 = vrot.lane.b32.xlu1 %v9694_v11, %s6668_s17 }
0x13e3   :  { %v4586_v16 = vpop.permute.xlu1 %4585  ;;  %4289 = vrot.lane.b32.xlu0 %v4274_v20, %s6671_s11 }
0x13e7   :  { %v4628_v63 = vpop.permute.xlu1 %4627  ;;  %4331 = vrot.lane.b32.xlu0 %v4316_v28, %s6663_s26  ;;  %v9733_v28 = vpop.xlane.xlu0 %5441 }
0x13e8   :  { %10533 = vst [vmem:[#allocation94_spill] sm:$0xff] %v9733_v28 }
0x13eb   :  { %v4948_v30 = vpop.permute.xlu1 %4947  ;;  %4587 = vrot.lane.b32.xlu0 %v4572_v1, %s6671_s11  ;;  %v4614_v1 = vmul.f32 %v9518_v32, %v10534_v47  ;;  %v9740_v10 = vpop.permute.xlu0 %4655  ;;  %v6558_v47 = vld [vmem:[%s10199_s7 + $0x20] sm:$0xff] }
0x13ec   :  { %10535 = vst [vmem:[#allocation92_spill] sm:$0xff] %v9740_v10  ;;  %v4269_v10 = vmul.f32 %v6558_v47, %v9553_v58 }
0x13ef   :  { %v9727_v20 = vpop.permute.xlu1 %4989  ;;  %4713 = vrot.lane.b32.xlu0 %v4358_v36, %s6673_s29  ;;  %v9750_v28 = vpop.permute.xlu0 %4679 }
0x13f0   :  { %10537 = vst [vmem:[#allocation67_spill] sm:$0xff] %v9750_v28 }
0x13f3   :  { %v9730_v33 = vpop.permute.xlu1 %5303  ;;  %5069 = vrot.lane.b32.xlu0 %v4358_v36, %s6675_s20  ;;  %v9761_v54 = vpop.permute.xlu0 %5017 }
0x13f7   :  { %v9735_v8 = vpop.permute.xlu1 %5345  ;;  %5425 = vrot.lane.b32.xlu0 %v4358_v36, %s6668_s17  ;;  %v9766_v55 = vpop.permute.xlu0 %5041 }
0x13fb   :  { %v9742_v15 = vpop.permute.xlu1 %5305  ;;  %4629 = vrot.lane.b32.xlu0 %v4614_v1, %s6663_s26  ;;  %v9768_v56 = vpop.permute.xlu0 %5373 }
0x13fc   :  { %10540 = vst [vmem:[#allocation68_spill] sm:$0xff] %v9768_v56  ;;  %v10542_v56 = vld [vmem:[#allocation17_spill] sm:$0xff] }
0x13ff   :  { %v9747_v60 = vpop.permute.xlu1 %5347  ;;  %4949 = vrot.lane.b32.xlu0 %v4934_v31, %s6671_s11  ;;  %v9770_v22 = vpop.permute.xlu0 %5397 }
0x1403   :  { %v4292_v61 = vpop.permute.xlu1 %4291  ;;  %4991 = vrot.lane.b32.xlu0 %v4976_v29, %s6663_s26 }
0x1404   :  { %v4305_v1 = vadd.f32 %v4292_v61, %v4269_v10  ;;  %v4370_v10 = vsel %vm449_vm1, %v4358_v36, 0.0 }
0x1407   :  { %v4334_v31 = vpop.permute.xlu1 %4333 }
0x1408   :  { %v4347_v28 = vsub.f32 %v4311_v18, %v4334_v31  ;;  %v5291_v31 = vmul.f32 %v9553_v58, %v8843_v57 }
0x140a   :  { %v9764_v23 = vsel %vm436_vm2, %v4305_v1, %v4347_v28 }
0x141d   :  { %v9772_v47 = vpop.xlane.xlu0 %4409 }
0x141e   :  { %10541 = vst [vmem:[#allocation78_spill] sm:$0xff] %v9772_v47  ;;  %v4565_v47 = vmul.f32 %v9514_v0, %v10542_v56 }
0x1420   :  { %v4601_v36 = vadd.f32 %v4586_v16, %v4565_v47 }
0x1421   :  { %v4712_v29 = vpop.permute.xlu0 %4711 }
0x1422   :  { %4371 = vadd.xlane.f32.xlu0 %v4370_v10  ;;  %v4731_v61 = vsel %vm449_vm1, %v4712_v29, 0.0  ;;  %v5333_v29 = vmul.f32 %v9553_v58, %v8858_v41  ;;  %v10543_v10 = vld [vmem:[#allocation15_spill] sm:$0xff]  ;;  %v6559_v41 = vld [vmem:[%s10200_s8 + $0x28] sm:$0xff] }
0x1423   :  { %4732 = vadd.xlane.f32.xlu1 %v4731_v61  ;;  %v4607_v61 = vmul.f32 %v9514_v0, %v10543_v10  ;;  %v4318_v47 = vmul.f32 %v6559_v41, %v9556_v4 }
0x1425   :  { %v5068_v26 = vpop.permute.xlu0 %5067 }
0x1426   :  { %v5087_v18 = vsel %vm449_vm1, %v5068_v26, 0.0  ;;  %v4643_v26 = vsub.f32 %v4607_v61, %v4628_v63  ;;  %v10548_v61 = vld [vmem:[#allocation36_spill] sm:$0xff] }
0x1427   :  { %5088 = vadd.xlane.f32.xlu1 %v5087_v18  ;;  %v10544_v18 = vld [vmem:[#allocation23_spill] sm:$0xff] }
0x1428   :  { %v4276_v57 = vmul.f32 %v9556_v4, %v10544_v18 }
0x1429   :  { %v5424_v28 = vpop.permute.xlu0 %5423 }
0x142a   :  { %v5443_v1 = vsel %vm449_vm1, %v5424_v28, 0.0  ;;  %v10545_v28 = vld [vmem:[#allocation74_spill] sm:$0xff] }
0x142b   :  { %5444 = vadd.xlane.f32.xlu1 %v5443_v1  ;;  %v4927_v56 = vmul.f32 %v9514_v0, %v10545_v28  ;;  %v10546_v1 = vld [vmem:[#allocation76_spill] sm:$0xff] }
0x142c   :  { %v4969_v63 = vmul.f32 %v9514_v0, %v10546_v1 }
0x142d   :  { %v4963_v16 = vadd.f32 %v4948_v30, %v4927_v56  ;;  %v5283_v30 = vmul.f32 %v9514_v0, %v8657_v52  ;;  %v5334_v56 = vmul.f32 %v9556_v4, %v8847_v38 }
0x142f   :  { %v5319_v10 = vadd.f32 %v9730_v33, %v5283_v30  ;;  %v5292_v33 = vmul.f32 %v9556_v4, %v8831_v59  ;;  %v4590_v59 = vpop.permute.xlu1 %4589 }
0x1433   :  { %v4716_v30 = vpop.permute.xlu1 %4715 }
0x1438   :  { %5307 = vrot.lane.b32.xlu0 %v5291_v31, %s6671_s11  ;;  %v5005_v31 = vsub.f32 %v4969_v63, %v9727_v20  ;;  %v10549_v20 = vld [vmem:[#allocation83_spill] sm:$0xff] }
0x1439   :  { %v4936_v18 = vmul.f32 %v9556_v4, %v10549_v20 }
0x143c   :  { %5349 = vrot.lane.b32.xlu0 %v5333_v29, %s6663_s26  ;;  %4657 = vrot.lane.b32.xlu1 %v4601_v36, %s6673_s29  ;;  %v10547_v36 = vld [vmem:[#allocation34_spill] sm:$0xff] }
0x143d   :  { %v4574_v29 = vmul.f32 %v9556_v4, %v10547_v36 }
0x1440   :  { %4293 = vrot.lane.b32.xlu0 %v4276_v57, %s6671_s11  ;;  %4681 = vrot.lane.b32.xlu1 %v4643_v26, %s6673_s29  ;;  %v4616_v26 = vmul.f32 %v9556_v4, %v10548_v61  ;;  %v10550_v57 = vld [vmem:[#allocation84_spill] sm:$0xff]  ;;  %v5072_v61 = vpop.permute.xlu1 %5071 }
0x1441   :  { %v4978_v52 = vmul.f32 %v9556_v4, %v10550_v57  ;;  %v5093_v20 = vsel %vm449_vm1, %v5072_v61, 0.0 }
0x1444   :  { %4335 = vrot.lane.b32.xlu0 %v4318_v47, %s6663_s26  ;;  %5019 = vrot.lane.b32.xlu1 %v4963_v16, %s6675_s20 }
0x1448   :  { %4591 = vrot.lane.b32.xlu0 %v4574_v29, %s6671_s11  ;;  %5043 = vrot.lane.b32.xlu1 %v5005_v31, %s6675_s20 }
0x144c   :  { %4633 = vrot.lane.b32.xlu0 %v4616_v26, %s6663_s26  ;;  %5375 = vrot.lane.b32.xlu1 %v5319_v10, %s6668_s17  ;;  %v4376_v10 = vsel %vm449_vm1, %v9694_v11, 0.0  ;;  %v4737_v26 = vsel %vm449_vm1, %v4716_v30, 0.0  ;;  %v10553_v30 = vld [vmem:[#allocation73_spill] sm:$0xff] }
0x1450   :  { %4953 = vrot.lane.b32.xlu0 %v4936_v18, %s6671_s11  ;;  %v5428_v18 = vpop.permute.xlu1 %5427 }
0x1454   :  { %4995 = vrot.lane.b32.xlu0 %v4978_v52, %s6663_s26  ;;  %v10551_v52 = vld [vmem:[#allocation41_spill] sm:$0xff] }
0x1458   :  { %5309 = vrot.lane.b32.xlu0 %v5292_v33, %s6671_s11  ;;  %v4566_v33 = vmul.f32 %v9518_v32, %v10551_v52  ;;  %v5284_v52 = vmul.f32 %v9518_v32, %v8669_v46 }
0x145a   :  { %v9824_v28 = vpop.xlane.xlu0 %4368 }
0x145c   :  { %5351 = vrot.lane.b32.xlu0 %v5334_v56, %s6663_s26  ;;  %v5449_v56 = vsel %vm449_vm1, %v5428_v18, 0.0 }
0x145e   :  { %v9829_v16 = vpop.permute.xlu0 %4289 }
0x1462   :  { %v9831_v41 = vpop.permute.xlu0 %4331 }
0x1466   :  { %v4588_v47 = vpop.permute.xlu0 %4587 }
0x146a   :  { %v4714_v1 = vpop.permute.xlu0 %4713 }
0x146b   :  { %v4734_v31 = vsel %vm449_vm1, %v4714_v1, 0.0  ;;  %v4602_v1 = vadd.f32 %v4588_v47, %v4566_v33  ;;  %v5320_v33 = vadd.f32 %v9742_v15, %v5284_v52 }
0x146e   :  { %v5070_v63 = vpop.permute.xlu0 %5069 }
0x146f   :  { %v5090_v36 = vsel %vm449_vm1, %v5070_v63, 0.0  ;;  %v10552_v63 = vld [vmem:[#allocation18_spill] sm:$0xff] }
0x1470   :  { %4735 = vadd.xlane.f32.xlu1 %v4734_v31  ;;  %v4608_v11 = vmul.f32 %v9518_v32, %v10552_v63  ;;  %v4632_v31 = vpop.permute.xlu1 %4631 }
0x1472   :  { %v5426_v29 = vpop.permute.xlu0 %5425 }
0x1473   :  { %v5446_v38 = vsel %vm449_vm1, %v5426_v29, 0.0 }
0x1474   :  { %5091 = vadd.xlane.f32.xlu1 %v5090_v36  ;;  %v4952_v61 = vpop.permute.xlu1 %4951 }
0x1476   :  { %v4630_v57 = vpop.permute.xlu0 %4629 }
0x1477   :  { %v4644_v29 = vsub.f32 %v4608_v11, %v4630_v57 }
0x1478   :  { %5447 = vadd.xlane.f32.xlu1 %v5446_v38  ;;  %v4928_v38 = vmul.f32 %v9518_v32, %v10553_v30  ;;  %v4994_v57 = vpop.permute.xlu1 %4993  ;;  %v10556_v30 = vld [vmem:[#allocation43_spill] sm:$0xff] }
0x1479   :  { %v4567_v46 = vmul.f32 %v9553_v58, %v10556_v30  ;;  %v5285_v30 = vmul.f32 %v9553_v58, %v8880_v53  ;;  %v4381_v53 = vmul.f32 0.0625, %v9824_v28  ;;  %v6561_v28 = vld [vmem:[%s10199_s7 + $0x28] sm:$0xff] }
0x147a   :  { %v4950_v36 = vpop.permute.xlu0 %4949 }
0x147b   :  { %4377 = vadd.xlane.f32.xlu0 %v4376_v10  ;;  %v4964_v10 = vadd.f32 %v4950_v36, %v4928_v38  ;;  %v10557_v38 = vld [vmem:[#allocation85_spill] sm:$0xff] }
0x147c   :  { %v4375_v11 = vpop.xlane.xlu1 %4374 }
0x147f   :  { %4738 = vadd.xlane.f32.xlu0 %v4737_v26  ;;  %v4992_v26 = vpop.permute.xlu0 %4991 }
0x1483   :  { %5094 = vadd.xlane.f32.xlu0 %v5093_v20  ;;  %v10554_v20 = vld [vmem:[#allocation75_spill] sm:$0xff] }
0x1484   :  { %v4970_v47 = vmul.f32 %v9518_v32, %v10554_v20  ;;  %v5325_v20 = vmul.f32 %v9514_v0, %v8659_v27 }
0x1486   :  { %v5006_v18 = vsub.f32 %v4970_v47, %v4992_v26  ;;  %v9868_v26 = vpop.permute.xlu1 %4717  ;;  %v10558_v47 = vld [vmem:[#allocation86_spill] sm:$0xff] }
0x1487   :  { %5450 = vadd.xlane.f32.xlu0 %v5449_v56  ;;  %v5326_v56 = vmul.f32 %v9518_v32, %v8673_v37  ;;  %v4603_v37 = vadd.f32 %v4590_v59, %v4567_v46 }
0x1489   :  { %4659 = vrot.lane.b32.xlu1 %v4602_v1, %s6673_s29  ;;  %v10555_v1 = vld [vmem:[#allocation42_spill] sm:$0xff]  ;;  %v5362_v36 = vsub.f32 %v5326_v56, %v9747_v60  ;;  %v4971_v60 = vmul.f32 %v9553_v58, %v10558_v47  ;;  %v4915_v56 = vmul.f32 0.0625, %v9444_v7  ;;  %v10559_v47 = vld [vmem:[#allocation27_spill] sm:$0xff] }
0x148a   :  { %v4609_v63 = vmul.f32 %v9553_v58, %v10555_v1  ;;  %v9879_v59 = vpop.permute.xlu1 %5073 }
0x148b   :  { %v4917_v46 = vadd.f32 1.1920929e-07, %v4915_v56  ;;  %v4383_v56 = vmul.f32 0.0625, %v4375_v11 }
0x148d   :  { %4683 = vrot.lane.b32.xlu1 %v4644_v29, %s6673_s29  ;;  %v4645_v29 = vsub.f32 %v4609_v63, %v4632_v31  ;;  %v5361_v31 = vsub.f32 %v5325_v20, %v9735_v8  ;;  %v4389_v11 = vadd.f32 1.1920929e-07, %v4383_v56 }
0x148e   :  { %v9882_v52 = vpop.permute.xlu1 %5429 }
0x1491   :  { %5021 = vrot.lane.b32.xlu1 %v4964_v10, %s6675_s20  ;;  %v4929_v10 = vmul.f32 %v9553_v58, %v10557_v38 }
0x1493   :  { %v4965_v15 = vadd.f32 %v4952_v61, %v4929_v10  ;;  %v4553_v61 = vmul.f32 0.0625, %v9323_v19  ;;  %v5271_v19 = vmul.f32 0.0625, %v9446_v3  ;;  %v4310_v3 = vmul.f32 %v9518_v32, %v10559_v47 }
0x1495   :  { %5045 = vrot.lane.b32.xlu1 %v5006_v18, %s6675_s20  ;;  %v5007_v18 = vsub.f32 %v4971_v60, %v4994_v57  ;;  %v4555_v27 = vadd.f32 1.1920929e-07, %v4553_v61  ;;  %v5099_v57 = vmul.f32 0.0625, %v9672_v13  ;;  %v5327_v13 = vmul.f32 %v9553_v58, %v8883_v45 }
0x1496   :  { %v4346_v45 = vsub.f32 %v4310_v3, %v9831_v41  ;;  %v4695_v41 = vsel %vm436_vm2, %v9678_v24, %v9680_v21  ;;  %v4537_v24 = vsel %vm436_vm2, %v9269_v42, %v9271_v43  ;;  %v5057_v21 = vsel %vm436_vm2, %v9682_v50, %v9685_v25  ;;  %v10561_v25 = vld [vmem:[#allocation26_spill] sm:$0xff] }
0x1497   :  { %6397 = vrsqrt.f32 %v4555_v27  ;;  %v5105_v7 = vadd.f32 1.1920929e-07, %v5099_v57  ;;  %v5413_v50 = vsel %vm436_vm2, %v9688_v48, %v9690_v62 }
0x1499   :  { %5377 = vrot.lane.b32.xlu1 %v5320_v33, %s6668_s17  ;;  %v4743_v33 = vmul.f32 0.0625, %v9711_v14 }
0x149b   :  { %v4749_v8 = vadd.f32 1.1920929e-07, %v4743_v33 }
0x149d   :  { %4685 = vrot.lane.b32.xlu0 %v4645_v29, %s6673_s29  ;;  %5401 = vrot.lane.b32.xlu1 %v5362_v36, %s6668_s17 }
0x14a1   :  { %5023 = vrot.lane.b32.xlu0 %v4965_v15, %s6675_s20  ;;  %4661 = vrot.lane.b32.xlu1 %v4603_v37, %s6673_s29  ;;  %v5455_v37 = vmul.f32 0.0625, %v9676_v34  ;;  %v5273_v15 = vadd.f32 1.1920929e-07, %v5271_v19  ;;  %v6560_v34 = vld [vmem:[%s10199_s7 + $0x18] sm:$0xff]  ;;  %v6398_v33 = vpop.eup %6397 }
0x14a2   :  { %v4268_v61 = vmul.f32 %v6560_v34, %v9518_v32 }
0x14a5   :  { %5047 = vrot.lane.b32.xlu0 %v5007_v18, %s6675_s20  ;;  %5399 = vrot.lane.b32.xlu1 %v5361_v31, %s6668_s17  ;;  %v4256_v31 = vmul.f32 0.0625, %v9259_v12  ;;  %v5461_v18 = vadd.f32 1.1920929e-07, %v5455_v37  ;;  %v4270_v12 = vmul.f32 %v6561_v28, %v9556_v4 }
0x14af   :  { %v4372_v1 = vpop.xlane.xlu0 %4371 }
0x14b0   :  { %v4382_v63 = vmul.f32 0.0625, %v4372_v1  ;;  %v4733_v36 = vpop.xlane.xlu1 %4732  ;;  %v4387_v1 = vadd.f32 1.1920929e-07, %v4381_v53 }
0x14b1   :  { %v4745_v47 = vmul.f32 0.0625, %v4733_v36  ;;  %v4309_v36 = vmul.f32 %v9514_v0, %v10561_v25 }
0x14b2   :  { %v4388_v29 = vadd.f32 1.1920929e-07, %v4382_v63 }
0x14b3   :  { %v5308_v38 = vpop.permute.xlu0 %5307  ;;  %v4345_v48 = vsub.f32 %v4309_v36, %v9704_v2 }
0x14b4   :  { %6399 = vrsqrt.f32 %v4388_v29  ;;  %v5321_v10 = vadd.f32 %v5308_v38, %v5285_v30  ;;  %v5089_v14 = vpop.xlane.xlu1 %5088  ;;  %v4258_v29 = vadd.f32 1.1920929e-07, %v4256_v31  ;;  %v10560_v38 = vld [vmem:[#allocation29_spill] sm:$0xff] }
0x14b5   :  { %6401 = vrsqrt.f32 %v4749_v8  ;;  %v4304_v8 = vadd.f32 %v9829_v16, %v4268_v61  ;;  %v5101_v28 = vmul.f32 0.0625, %v5089_v14 }
0x14b6   :  { %5379 = vrot.lane.b32.xlu0 %v5321_v10, %s6668_s17  ;;  %6403 = vrsqrt.f32 %v4917_v46  ;;  %v4559_v46 = vmul.f32 0.25, %v6398_v33  ;;  %v4312_v10 = vmul.f32 %v9556_v4, %v10560_v38 }
0x14b7   :  { %v5350_v20 = vpop.permute.xlu0 %5349  ;;  %6405 = vrsqrt.f32 %v5105_v7  ;;  %v4352_v19 = vsel %vm436_vm2, %v4304_v8, %v4346_v45  ;;  %v4751_v45 = vadd.f32 1.1920929e-07, %v4745_v47 }
0x14b8   :  { %v5363_v60 = vsub.f32 %v5327_v13, %v5350_v20  ;;  %v9903_v27 = vpop.xlane.xlu1 %5444  ;;  %6407 = vrsqrt.f32 %v5273_v15  ;;  %v9925_v3 = vmul.f32 %v4559_v46, %v4537_v24 }
0x14b9   :  { %6409 = vrsqrt.f32 %v5461_v18  ;;  %v4901_v18 = vsel %vm436_vm2, %v9448_v51, %v9450_v5  ;;  %v5257_v51 = vsel %vm436_vm2, %v9452_v40, %v9454_v35  ;;  %v6562_v5 = vld [vmem:[%s10199_s7 + $0x10] sm:$0xff] }
0x14ba   :  { %5403 = vrot.lane.b32.xlu0 %v5363_v60, %s6668_s17  ;;  %6411 = vrsqrt.f32 %v4387_v1  ;;  %v4267_v1 = vmul.f32 %v6562_v5, %v9514_v0 }
0x14bb   :  { %v4294_v63 = vpop.permute.xlu0 %4293  ;;  %6413 = vrsqrt.f32 %v4258_v29 }
0x14bc   :  { %v4306_v57 = vadd.f32 %v4294_v63, %v4270_v12  ;;  %v4658_v15 = vpop.permute.xlu1 %4657  ;;  %6415 = vrsqrt.f32 %v4389_v11  ;;  %v4303_v29 = vadd.f32 %v9700_v39, %v4267_v1  ;;  %v4232_v11 = vmul.f32 %v9199_v9, %v9204_v44  ;;  %v10563_v1 = vld [vmem:[#allocation51_spill] sm:$0xff] }
0x14bd   :  { %6417 = vrsqrt.f32 %v4751_v45  ;;  %v5452_v45 = vsel %vm449_vm1, %v9882_v52, 0.0 }
0x14be   :  { %v6400_v30 = vpop.eup %6399  ;;  %v4351_v46 = vsel %vm436_vm2, %v4303_v29, %v4345_v48  ;;  %v4610_v48 = vmul.f32 %v9556_v4, %v10563_v1 }
0x14bf   :  { %v6402_v7 = vpop.eup %6401  ;;  %v4336_v37 = vpop.permute.xlu0 %4335  ;;  %v9917_v13 = vmul.f32 %v6400_v30, %v4352_v19  ;;  %v6563_v30 = vld [vmem:[%s10201_s9 + $0x8] sm:$0xff]  ;;  %s6681_s9 = smov [#allocation8]  }
0x14c0   :  { %v4761_v16 = vmul.f32 %v6402_v7, %v4695_v41  ;;  %v4348_v53 = vsub.f32 %v4312_v10, %v4336_v37  ;;  %v6404_v20 = vpop.eup %6403  ;;  %v4682_v33 = vpop.permute.xlu1 %4681  ;;  %v5107_v41 = vadd.f32 1.1920929e-07, %v5101_v28  ;;  %v4202_v2 = vmul.f32 %v6563_v30, %v9204_v44  ;;  %v10566_v30 = vld [vmem:[#allocation82_spill] sm:$0xff] }
0x14c1   :  { %v6406_v31 = vpop.eup %6405  ;;  %v4921_v34 = vmul.f32 0.25, %v6404_v20 }
0x14c2   :  { %v9928_v60 = vsel %vm436_vm2, %v4306_v57, %v4348_v53  ;;  %v5117_v61 = vmul.f32 %v6406_v31, %v5057_v21  ;;  %v4767_v42 = vmul.f32 %v4761_v16, %v9925_v3  ;;  %v6408_v43 = vpop.eup %6407  ;;  %v4222_v37 = vadd.f32 %v9265_v6, %v4202_v2 }
0x14c3   :  { %v9939_v12 = vmul.f32 %v4921_v34, %v4901_v18  ;;  %v6410_v56 = vpop.eup %6409  ;;  %v5277_v62 = vmul.f32 0.25, %v6408_v43  ;;  %6419 = vrsqrt.f32 %v5107_v41  ;;  %v4244_v53 = vsub.f32 %v4232_v11, %v9237_v17  ;;  %v4592_v28 = vpop.permute.xlu0 %4591  ;;  %v10565_v41 = vld [vmem:[#allocation88_spill] sm:$0xff] }
0x14c4   :  { %v5473_v63 = vmul.f32 %v6410_v56, %v5413_v50  ;;  %v4768_v14 = vsel %vm449_vm1, %v4767_v42, 0.0  ;;  %v6412_v57 = vpop.eup %6411  ;;  %v5020_v19 = vpop.permute.xlu1 %5019  ;;  %v4697_v31 = vsel %vm436_vm2, %v4658_v15, %v4682_v33  ;;  %v5096_v50 = vsel %vm449_vm1, %v9879_v59, 0.0  ;;  %v10562_v56 = vld [vmem:[#allocation45_spill] sm:$0xff] }
0x14c5   :  { %v5123_v8 = vmul.f32 %v5117_v61, %v9939_v12  ;;  %v9952_v40 = vmul.f32 %v5277_v62, %v5257_v51  ;;  %v6414_v35 = vpop.eup %6413  ;;  %v4399_v39 = vmul.f32 %v6412_v57, %v4351_v46  ;;  %v4246_v47 = vsel %vm436_vm2, %v4222_v37, %v4244_v53 }
0x14c6   :  { %v6416_v7 = vpop.eup %6415  ;;  %v4262_v16 = vmul.f32 0.25, %v6414_v35  ;;  %v4568_v51 = vmul.f32 %v9556_v4, %v10562_v56  ;;  %v4972_v35 = vmul.f32 %v9556_v4, %v10565_v41  ;;  %v4916_v2 = vmul.f32 0.0625, %v10566_v30 }
0x14c7   :  { %v5124_v38 = vsel %vm449_vm1, %v5123_v8, 0.0  ;;  %v5479_v10 = vmul.f32 %v5473_v63, %v9952_v40  ;;  %v4411_v24 = vmul.f32 %v4399_v39, %v9579_v49  ;;  %v4401_v21 = vmul.f32 %v6416_v7, %v9764_v23  ;;  %v6418_v44 = vpop.eup %6417  ;;  %v4634_v33 = vpop.permute.xlu0 %4633 }
0x14c8   :  { %v9970_v18 = vmul.f32 %v4262_v16, %v4246_v47  ;;  %v5044_v9 = vpop.permute.xlu1 %5043  ;;  %v4763_v6 = vmul.f32 %v6418_v44, %v4697_v31  ;;  %v4740_v23 = vsel %vm449_vm1, %v9868_v26, 0.0  ;;  %v4604_v59 = vadd.f32 %v4592_v28, %v4568_v51  ;;  %v10573_v28 = vld [vmem:[#allocation52_spill] sm:$0xff] }
0x14c9   :  { %4769 = vadd.xlane.f32.xlu1 %v4768_v14  ;;  %v5480_v20 = vsel %vm449_vm1, %v5479_v10, 0.0  ;;  %v4412_v34 = vsel %vm449_vm1, %v4411_v24, 0.0  ;;  %v5059_v61 = vsel %vm436_vm2, %v5020_v19, %v5044_v9  ;;  %v4646_v62 = vsub.f32 %v4610_v48, %v4634_v33  ;;  %v10564_v14 = vld [vmem:[#allocation87_spill] sm:$0xff]  ;;  %v10574_v48 = vld [vmem:[#allocation94_spill] sm:$0xff] }
0x14ca   :  { %v4440_v17 = vmul.f32 %v4401_v21, %v9970_v18  ;;  %v4775_v43 = vmul.f32 %v4763_v6, %v9925_v3  ;;  %v4930_v8 = vmul.f32 %v9556_v4, %v10564_v14  ;;  %v10567_v10 = vld [vmem:[#allocation103_spill] sm:$0xff]  ;;  %v4918_v7 = vadd.f32 1.1920929e-07, %v4916_v2  ;;  %v10569_v21 = vld [vmem:[#allocation54_spill] sm:$0xff] }
0x14cb   :  { %v4954_v5 = vpop.permute.xlu0 %4953  ;;  %v5286_v39 = vmul.f32 %v9556_v4, %v10567_v10  ;;  %v5272_v47 = vmul.f32 0.0625, %v10569_v21  ;;  %v5457_v56 = vmul.f32 0.0625, %v9903_v27 }
0x14cc   :  { %v4441_v15 = vsel %vm449_vm1, %v4440_v17, 0.0  ;;  %v4776_v25 = vsel %vm449_vm1, %v4775_v43, 0.0  ;;  %v9991_v63 = vpop.permute.xlu1 %5375  ;;  %v4966_v57 = vadd.f32 %v4954_v5, %v4930_v8  ;;  %6421 = vrsqrt.f32 %v4918_v7  ;;  %v10577_v7 = vld [vmem:[#allocation55_spill] sm:$0xff] }
0x14cd   :  { %5125 = vadd.xlane.f32.xlu1 %v5124_v38  ;;  %v6420_v49 = vpop.eup %6419  ;;  %v5274_v6 = vadd.f32 1.1920929e-07, %v5272_v47 }
0x14ce   :  { %v5119_v42 = vmul.f32 %v6420_v49, %v5059_v61  ;;  %v10570_v49 = vld [vmem:[#allocation93_spill] sm:$0xff] }
0x14cf   :  { %v4996_v52 = vpop.permute.xlu0 %4995 }
0x14d0   :  { %v5131_v36 = vmul.f32 %v5119_v42, %v9939_v12  ;;  %v5008_v19 = vsub.f32 %v4972_v35, %v4996_v52 }
0x14d1   :  { %5481 = vadd.xlane.f32.xlu1 %v5480_v20  ;;  %v10568_v20 = vld [vmem:[#allocation104_spill] sm:$0xff] }
0x14d2   :  { %v5132_v26 = vsel %vm449_vm1, %v5131_v36, 0.0  ;;  %v5328_v24 = vmul.f32 %v9556_v4, %v10568_v20  ;;  %v10578_v20 = vld [vmem:[#allocation67_spill] sm:$0xff] }
0x14d3   :  { %v5310_v46 = vpop.permute.xlu0 %5309 }
0x14d4   :  { %v5322_v37 = vadd.f32 %v5310_v46, %v5286_v39 }
0x14d5   :  { %4413 = vadd.xlane.f32.xlu1 %v4412_v34 }
0x14d6   :  { %v6422_v43 = vpop.eup %6421 }
0x14d7   :  { %v5352_v53 = vpop.permute.xlu0 %5351  ;;  %v4922_v51 = vmul.f32 0.25, %v6422_v43  ;;  %v5058_v43 = vsel %vm436_vm2, %v9761_v54, %v9766_v55 }
0x14d8   :  { %v5364_v9 = vsub.f32 %v5328_v24, %v5352_v53  ;;  %v10579_v24 = vld [vmem:[#allocation92_spill] sm:$0xff] }
0x14d9   :  { %4442 = vadd.xlane.f32.xlu1 %v4441_v15  ;;  %4741 = vadd.xlane.f32.xlu0 %v4740_v23  ;;  %v4744_v23 = vmul.f32 0.0625, %v10570_v49  ;;  %v4696_v21 = vsel %vm436_vm2, %v10579_v24, %v10578_v20  ;;  %v10581_v24 = vld [vmem:[#allocation56_spill] sm:$0xff] }
0x14dd   :  { %4777 = vadd.xlane.f32.xlu1 %v4776_v25  ;;  %5097 = vadd.xlane.f32.xlu0 %v5096_v50  ;;  %v4750_v50 = vadd.f32 1.1920929e-07, %v4744_v23  ;;  %v10571_v25 = vld [vmem:[#allocation37_spill] sm:$0xff] }
0x14de   :  { %v5100_v36 = vmul.f32 0.0625, %v10571_v25 }
0x14e0   :  { %v5106_v1 = vadd.f32 1.1920929e-07, %v5100_v36 }
0x14e1   :  { %5133 = vadd.xlane.f32.xlu1 %v5132_v26  ;;  %5453 = vadd.xlane.f32.xlu0 %v5452_v45  ;;  %v10572_v26 = vld [vmem:[#allocation57_spill] sm:$0xff] }
0x14e2   :  { %v4902_v33 = vsel %vm436_vm2, %v10573_v28, %v10572_v26 }
0x14e3   :  { %v10022_v14 = vmul.f32 %v4922_v51, %v4902_v33 }
0x14f7   :  { %4663 = vrot.lane.b32.xlu0 %v4604_v59, %s6673_s29 }
0x14fb   :  { %4687 = vrot.lane.b32.xlu0 %v4646_v62, %s6673_s29  ;;  %v5456_v62 = vmul.f32 0.0625, %v10574_v48 }
0x14fd   :  { %v9996_v29 = vpop.xlane.xlu1 %4735  ;;  %v5462_v27 = vadd.f32 1.1920929e-07, %v5456_v62 }
0x14ff   :  { %5025 = vrot.lane.b32.xlu0 %v4966_v57, %s6675_s20  ;;  %v5463_v57 = vadd.f32 1.1920929e-07, %v5457_v56 }
0x1501   :  { %v5092_v38 = vpop.xlane.xlu1 %5091 }
0x1502   :  { %v5102_v11 = vmul.f32 0.0625, %v5092_v38  ;;  %v10576_v38 = vld [vmem:[#allocation90_spill] sm:$0xff] }
0x1503   :  { %5049 = vrot.lane.b32.xlu0 %v5008_v19, %s6675_s20  ;;  %v10575_v19 = vld [vmem:[#allocation91_spill] sm:$0xff] }
0x1504   :  { %v5108_v31 = vadd.f32 1.1920929e-07, %v5102_v11  ;;  %v5258_v10 = vsel %vm436_vm2, %v10576_v38, %v10575_v19  ;;  %v4554_v11 = vmul.f32 0.0625, %v10577_v7 }
0x1505   :  { %v5448_v16 = vpop.xlane.xlu1 %5447 }
0x1506   :  { %6423 = vrsqrt.f32 %v5108_v31  ;;  %v5458_v34 = vmul.f32 0.0625, %v5448_v16 }
0x1507   :  { %5381 = vrot.lane.b32.xlu0 %v5322_v37, %s6668_s17  ;;  %6425 = vrsqrt.f32 %v5274_v6 }
0x1508   :  { %v4378_v17 = vpop.xlane.xlu0 %4377  ;;  %v5464_v42 = vadd.f32 1.1920929e-07, %v5458_v34 }
0x1509   :  { %v10009_v44 = vpop.permute.xlu1 %4659  ;;  %v4384_v39 = vmul.f32 0.0625, %v4378_v17  ;;  %v4556_v17 = vadd.f32 1.1920929e-07, %v4554_v11 }
0x150a   :  { %6427 = vrsqrt.f32 %v5464_v42 }
0x150b   :  { %5405 = vrot.lane.b32.xlu0 %v5364_v9, %s6668_s17  ;;  %6429 = vrsqrt.f32 %v4750_v50  ;;  %v4390_v49 = vadd.f32 1.1920929e-07, %v4384_v39  ;;  %v4746_v50 = vmul.f32 0.0625, %v9996_v29 }
0x150c   :  { %v4739_v45 = vpop.xlane.xlu0 %4738  ;;  %6431 = vrsqrt.f32 %v5106_v1 }
0x150d   :  { %v10012_v61 = vpop.permute.xlu1 %4683  ;;  %6433 = vrsqrt.f32 %v5463_v57  ;;  %v4752_v1 = vadd.f32 1.1920929e-07, %v4746_v50  ;;  %v4747_v54 = vmul.f32 0.0625, %v4739_v45 }
0x150e   :  { %6435 = vrsqrt.f32 %v5462_v27  ;;  %v4698_v39 = vsel %vm436_vm2, %v10009_v44, %v10012_v61 }
0x150f   :  { %6437 = vrsqrt.f32 %v4390_v49 }
0x1510   :  { %v6424_v59 = vpop.eup %6423  ;;  %v5095_v41 = vpop.xlane.xlu0 %5094  ;;  %6439 = vrsqrt.f32 %v4556_v17 }
0x1511   :  { %v5022_v15 = vpop.permute.xlu1 %5021  ;;  %v6426_v2 = vpop.eup %6425  ;;  %6441 = vrsqrt.f32 %v4752_v1  ;;  %v10584_v1 = vld [vmem:[#allocation89_spill] sm:$0xff] }
0x1512   :  { %v5278_v37 = vmul.f32 0.25, %v6426_v2 }
0x1514   :  { %v6428_v53 = vpop.eup %6427  ;;  %v10034_v31 = vmul.f32 %v5278_v37, %v5258_v10  ;;  %v5451_v9 = vpop.xlane.xlu0 %5450 }
0x1515   :  { %v5046_v5 = vpop.permute.xlu1 %5045  ;;  %v6430_v34 = vpop.eup %6429 }
0x1516   :  { %v5060_v52 = vsel %vm436_vm2, %v5022_v15, %v5046_v5  ;;  %v4762_v23 = vmul.f32 %v6430_v34, %v4696_v21  ;;  %v6432_v36 = vpop.eup %6431  ;;  %v10580_v5 = vld [vmem:[#allocation68_spill] sm:$0xff]  ;;  %v10582_v21 = vld [vmem:[#allocation53_spill] sm:$0xff] }
0x1517   :  { %v5120_v8 = vmul.f32 %v6424_v59, %v5060_v52  ;;  %v5118_v26 = vmul.f32 %v6432_v36, %v5058_v43  ;;  %v6434_v51 = vpop.eup %6433  ;;  %v5414_v59 = vsel %vm436_vm2, %v10580_v5, %v9770_v22 }
0x1518   :  { %v4686_v28 = vpop.permute.xlu0 %4685  ;;  %v4771_v56 = vmul.f32 %v4762_v23, %v9925_v3  ;;  %v6436_v48 = vpop.eup %6435  ;;  %v4753_v3 = vadd.f32 1.1920929e-07, %v4747_v54 }
0x1519   :  { %v5378_v35 = vpop.permute.xlu1 %5377  ;;  %v5156_v30 = vmul.f32 %v5120_v8, %v10022_v14  ;;  %v5474_v62 = vmul.f32 %v6436_v48, %v5414_v59  ;;  %v5127_v57 = vmul.f32 %v5118_v26, %v9939_v12  ;;  %v6438_v2 = vpop.eup %6437  ;;  %v10583_v59 = vld [vmem:[#allocation78_spill] sm:$0xff] }
0x151a   :  { %v4772_v52 = vsel %vm449_vm1, %v4771_v56, 0.0  ;;  %6443 = vrsqrt.f32 %v4753_v3  ;;  %v6440_v19 = vpop.eup %6439  ;;  %v4402_v10 = vmul.f32 %v6438_v2, %v9928_v60  ;;  %v4415_v54 = vmax.f32 %v10584_v1, %v10583_v59 }
0x151b   :  { %v5157_v46 = vsel %vm449_vm1, %v5156_v30, 0.0  ;;  %v5128_v45 = vsel %vm449_vm1, %v5127_v57, 0.0  ;;  %v4560_v7 = vmul.f32 0.25, %v6440_v19  ;;  %v6442_v11 = vpop.eup %6441 }
0x151c   :  { %5158 = vadd.xlane.f32.xlu1 %v5157_v46  ;;  %v5024_v30 = vpop.permute.xlu0 %5023  ;;  %v5459_v46 = vmul.f32 0.0625, %v5451_v9  ;;  %v4764_v37 = vmul.f32 %v6442_v11, %v4698_v39  ;;  %v4444_v20 = vmul.f32 %v4402_v10, %v9970_v18 }
0x151d   :  { %v5402_v16 = vpop.permute.xlu1 %5401 }
0x151e   :  { %v5416_v47 = vsel %vm436_vm2, %v5378_v35, %v5402_v16  ;;  %v5103_v35 = vmul.f32 0.0625, %v5095_v41  ;;  %v4436_v41 = vmul.f32 %v9917_v13, %v9970_v18  ;;  %v4538_v13 = vsel %vm436_vm2, %v10582_v21, %v10581_v24 }
0x151f   :  { %v5476_v6 = vmul.f32 %v6428_v53, %v5416_v47  ;;  %v10067_v44 = vmul.f32 %v4560_v7, %v4538_v13  ;;  %v4445_v9 = vsel %vm449_vm1, %v4444_v20, 0.0 }
0x1520   :  { %v5109_v27 = vadd.f32 1.1920929e-07, %v5103_v35  ;;  %v5048_v38 = vpop.permute.xlu0 %5047  ;;  %v4437_v53 = vsel %vm449_vm1, %v4436_v41, 0.0 }
0x1521   :  { %v4662_v42 = vpop.permute.xlu1 %4661  ;;  %v5512_v15 = vmul.f32 %v5476_v6, %v10034_v31  ;;  %v4800_v6 = vmul.f32 %v4764_v37, %v10067_v44  ;;  %v5061_v34 = vsel %vm436_vm2, %v5024_v30, %v5048_v38 }
0x1522   :  { %6445 = vrsqrt.f32 %v5109_v27  ;;  %v4699_v60 = vsel %vm436_vm2, %v4662_v42, %v4686_v28 }
0x1523   :  { %v5513_v25 = vsel %vm449_vm1, %v5512_v15, 0.0  ;;  %v4801_v23 = vsel %vm449_vm1, %v4800_v6, 0.0 }
0x1524   :  { %5514 = vadd.xlane.f32.xlu1 %v5513_v25  ;;  %v6444_v61 = vpop.eup %6443 }
0x1525   :  { %v5400_v33 = vpop.permute.xlu1 %5399  ;;  %v4765_v47 = vmul.f32 %v6444_v61, %v4699_v60 }
0x1526   :  { %v5415_v55 = vsel %vm436_vm2, %v9991_v63, %v5400_v33  ;;  %v5483_v63 = vmul.f32 %v5474_v62, %v9952_v40 }
0x1527   :  { %v5475_v29 = vmul.f32 %v6434_v51, %v5415_v55  ;;  %v4804_v15 = vmul.f32 %v4765_v47, %v10067_v44 }
0x1528   :  { %v5484_v12 = vsel %vm449_vm1, %v5483_v63, 0.0  ;;  %v5380_v16 = vpop.permute.xlu0 %5379 }
0x1529   :  { %v5487_v8 = vmul.f32 %v5475_v29, %v9952_v40  ;;  %v5465_v40 = vadd.f32 1.1920929e-07, %v5459_v46  ;;  %v4805_v25 = vsel %vm449_vm1, %v4804_v15, 0.0 }
0x152a   :  { %4773 = vadd.xlane.f32.xlu0 %v4772_v52 }
0x152b   :  { %v5488_v22 = vsel %vm449_vm1, %v5487_v8, 0.0  ;;  %6447 = vrsqrt.f32 %v5465_v40  ;;  %v10586_v40 = vld [vmem:[#allocation102_spill] sm:$0xff] }
0x152c   :  { %5489 = vadd.xlane.f32.xlu1 %v5488_v22  ;;  %v5404_v18 = vpop.permute.xlu0 %5403  ;;  %v6446_v49 = vpop.eup %6445 }
0x152d   :  { %v5121_v17 = vmul.f32 %v6446_v49, %v5061_v34  ;;  %v5417_v42 = vsel %vm436_vm2, %v5380_v16, %v5404_v18 }
0x152e   :  { %5129 = vadd.xlane.f32.xlu0 %v5128_v45 }
0x152f   :  { %v5160_v36 = vmul.f32 %v5121_v17, %v10022_v14 }
0x1531   :  { %v5161_v26 = vsel %vm449_vm1, %v5160_v36, 0.0 }
0x1532   :  { %5485 = vadd.xlane.f32.xlu0 %v5484_v12  ;;  %v10585_v12 = vld [vmem:[#allocation101_spill] sm:$0xff] }
0x1535   :  { %v6448_v43 = vpop.eup %6447 }
0x1536   :  { %4438 = vadd.xlane.f32.xlu0 %v4437_v53  ;;  %v5477_v50 = vmul.f32 %v6448_v43, %v5417_v42 }
0x1538   :  { %v5516_v28 = vmul.f32 %v5477_v50, %v10034_v31 }
0x153a   :  { %4446 = vadd.xlane.f32.xlu0 %v4445_v9  ;;  %v5517_v33 = vsel %vm449_vm1, %v5516_v28, 0.0 }
0x153e   :  { %4802 = vadd.xlane.f32.xlu0 %v4801_v23 }
0x1542   :  { %4806 = vadd.xlane.f32.xlu0 %v4805_v25 }
0x1546   :  { %5162 = vadd.xlane.f32.xlu0 %v5161_v26 }
0x154a   :  { %5518 = vadd.xlane.f32.xlu0 %v5517_v33 }
0x1556   :  { %v10080_v56 = vpop.xlane.xlu1 %4769 }
0x155a   :  { %v10082_v51 = vpop.xlane.xlu1 %5125 }
0x155e   :  { %v10084_v5 = vpop.xlane.xlu1 %5481 }
0x1562   :  { %v4414_v55 = vpop.xlane.xlu1 %4413 }
0x1563   :  { %v4416_v29 = vmax.f32 %v4415_v54, %v4414_v55 }
0x1565   :  { %v4417_v48 = vsub.f32 %v10584_v1, %v4416_v29  ;;  %v4420_v62 = vsub.f32 %v10583_v59, %v4416_v29  ;;  %v4423_v52 = vsub.f32 %v4414_v55, %v4416_v29 }
0x1566   :  { %v4742_v8 = vpop.xlane.xlu0 %4741  ;;  %v4443_v36 = vpop.xlane.xlu1 %4442 }
0x1567   :  { %v4418_v57 = vmul.f32 1.442695, %v4417_v48  ;;  %v4421_v3 = vmul.f32 1.442695, %v4420_v62  ;;  %v4424_v35 = vmul.f32 1.442695, %v4423_v52 }
0x1568   :  { %v4748_v30 = vmul.f32 0.0625, %v4742_v8 }
0x1569   :  { %6449 = vpow2.f32 %v4418_v57 }
0x156a   :  { %6451 = vpow2.f32 %v4421_v3  ;;  %v4754_v22 = vadd.f32 1.1920929e-07, %v4748_v30  ;;  %v5098_v45 = vpop.xlane.xlu0 %5097  ;;  %v4778_v26 = vpop.xlane.xlu1 %4777 }
0x156b   :  { %6453 = vpow2.f32 %v4424_v35  ;;  %v5104_v63 = vmul.f32 0.0625, %v5098_v45 }
0x156c   :  { %6455 = vrsqrt.f32 %v4754_v22 }
0x156d   :  { %v5110_v27 = vadd.f32 1.1920929e-07, %v5104_v63 }
0x156e   :  { %v5454_v2 = vpop.xlane.xlu0 %5453  ;;  %v5134_v28 = vpop.xlane.xlu1 %5133 }
0x156f   :  { %6457 = vrsqrt.f32 %v5110_v27  ;;  %v5460_v39 = vmul.f32 0.0625, %v5454_v2 }
0x1571   :  { %v5466_v21 = vadd.f32 1.1920929e-07, %v5460_v39 }
0x1572   :  { %v4664_v46 = vpop.permute.xlu0 %4663 }
0x1573   :  { %v10090_v19 = vpop.eup %6449  ;;  %6459 = vrsqrt.f32 %v5466_v21 }
0x1574   :  { %v10092_v38 = vpop.eup %6451  ;;  %v4428_v41 = vmul.f32 %v10090_v19, %v10585_v12 }
0x1575   :  { %v10096_v10 = vpop.eup %6453  ;;  %v4430_v7 = vmul.f32 %v10092_v38, %v10586_v40 }
0x1576   :  { %v4688_v11 = vpop.permute.xlu0 %4687  ;;  %v6456_v37 = vpop.eup %6455  ;;  %v4432_v20 = vmul.f32 %v10096_v10, %v9514_v0 }
0x1577   :  { %v4700_v16 = vsel %vm436_vm2, %v4664_v46, %v4688_v11  ;;  %v4431_v53 = vadd.f32 %v4430_v7, %v4428_v41 }
0x1578   :  { %v4766_v24 = vmul.f32 %v6456_v37, %v4700_v16 }
0x1579   :  { %v10103_v13 = vadd.f32 %v4432_v20, %v4431_v53  ;;  %v6458_v6 = vpop.eup %6457 }
0x157a   :  { %v5026_v60 = vpop.permute.xlu0 %5025  ;;  %v4808_v61 = vmul.f32 %v4766_v24, %v10067_v44 }
0x157c   :  { %v4809_v47 = vsel %vm449_vm1, %v4808_v61, 0.0 }
0x157d   :  { %4810 = vadd.xlane.f32.xlu0 %v4809_v47  ;;  %v6460_v42 = vpop.eup %6459 }
0x157e   :  { %v5050_v9 = vpop.permute.xlu0 %5049 }
0x157f   :  { %v5062_v34 = vsel %vm436_vm2, %v5026_v60, %v5050_v9 }
0x1580   :  { %v5122_v18 = vmul.f32 %v6458_v6, %v5062_v34 }
0x1582   :  { %v5382_v49 = vpop.permute.xlu0 %5381  ;;  %v5164_v17 = vmul.f32 %v5122_v18, %v10022_v14 }
0x1584   :  { %v5165_v23 = vsel %vm449_vm1, %v5164_v17, 0.0 }
0x1585   :  { %5166 = vadd.xlane.f32.xlu0 %v5165_v23 }
0x1586   :  { %v5406_v15 = vpop.permute.xlu0 %5405 }
0x1587   :  { %v5418_v43 = vsel %vm436_vm2, %v5382_v49, %v5406_v15 }
0x1588   :  { %v5478_v44 = vmul.f32 %v6460_v42, %v5418_v43 }
0x158a   :  { %v5520_v50 = vmul.f32 %v5478_v44, %v10034_v31 }
0x158c   :  { %v5521_v25 = vsel %vm449_vm1, %v5520_v50, 0.0 }
0x158d   :  { %5522 = vadd.xlane.f32.xlu0 %v5521_v25 }
0x15a9   :  { %v10114_v14 = vpop.xlane.xlu1 %5158 }
0x15b1   :  { %v10118_v31 = vpop.xlane.xlu1 %5514 }
0x15b7   :  { %v4774_v33 = vpop.xlane.xlu0 %4773 }
0x15b8   :  { %v4779_v59 = vmax.f32 %v10080_v56, %v4774_v33 }
0x15ba   :  { %v4780_v1 = vmax.f32 %v4779_v59, %v4778_v26 }
0x15bb   :  { %v5130_v54 = vpop.xlane.xlu0 %5129 }
0x15bc   :  { %v4781_v55 = vsub.f32 %v10080_v56, %v4780_v1  ;;  %v4784_v29 = vsub.f32 %v4774_v33, %v4780_v1  ;;  %v4787_v48 = vsub.f32 %v4778_v26, %v4780_v1  ;;  %v5135_v62 = vmax.f32 %v10082_v51, %v5130_v54  ;;  %v5490_v56 = vpop.xlane.xlu1 %5489 }
0x15be   :  { %v4782_v52 = vmul.f32 1.442695, %v4781_v55  ;;  %v4785_v8 = vmul.f32 1.442695, %v4784_v29  ;;  %v4788_v57 = vmul.f32 1.442695, %v4787_v48  ;;  %v5136_v3 = vmax.f32 %v5135_v62, %v5134_v28 }
0x15bf   :  { %v5486_v35 = vpop.xlane.xlu0 %5485  ;;  %v4426_v62 = vadd.f32 %v10092_v38, %v10090_v19 }
0x15c0   :  { %6461 = vpow2.f32 %v4782_v52  ;;  %v5137_v30 = vsub.f32 %v10082_v51, %v5136_v3  ;;  %v5140_v22 = vsub.f32 %v5130_v54, %v5136_v3  ;;  %v5143_v45 = vsub.f32 %v5134_v28, %v5136_v3 }
0x15c1   :  { %6463 = vpow2.f32 %v4785_v8  ;;  %v5491_v63 = vmax.f32 %v10084_v5, %v5486_v35 }
0x15c2   :  { %6465 = vpow2.f32 %v4788_v57  ;;  %v5138_v2 = vmul.f32 1.442695, %v5137_v30  ;;  %v5141_v27 = vmul.f32 1.442695, %v5140_v22  ;;  %v5144_v46 = vmul.f32 1.442695, %v5143_v45 }
0x15c3   :  { %v5492_v41 = vmax.f32 %v5491_v63, %v5490_v56  ;;  %v4439_v39 = vpop.xlane.xlu0 %4438 }
0x15c4   :  { %6467 = vpow2.f32 %v5138_v2  ;;  %v4448_v51 = vmax.f32 %v4439_v39, %v4443_v36 }
0x15c5   :  { %6469 = vpow2.f32 %v5141_v27  ;;  %v5493_v7 = vsub.f32 %v10084_v5, %v5492_v41  ;;  %v5496_v11 = vsub.f32 %v5486_v35, %v5492_v41  ;;  %v5499_v37 = vsub.f32 %v5490_v56, %v5492_v41 }
0x15c6   :  { %6471 = vpow2.f32 %v5144_v46  ;;  %v4427_v56 = vadd.f32 %v10096_v10, %v4426_v62 }
0x15c7   :  { %v5494_v16 = vmul.f32 1.442695, %v5493_v7  ;;  %v5497_v53 = vmul.f32 1.442695, %v5496_v11  ;;  %v5500_v20 = vmul.f32 1.442695, %v5499_v37  ;;  %v4447_v24 = vpop.xlane.xlu0 %4446 }
0x15c8   :  { %v4449_v21 = vmax.f32 %v4448_v51, %v4447_v24  ;;  %v6167_v51 = vld [vmem:[#allocation7] sm:$0xff]  }
0x15c9   :  { %6473 = vpow2.f32 %v5494_v16  ;;  %6017 = vmatpush3.bf16.msra.mxu1 %v6167_v51 }
0x15ca   :  { %v6462_v60 = vpop.eup %6461  ;;  %6475 = vpow2.f32 %v5497_v53  ;;  %v4450_v61 = vsub.f32 %v4439_v39, %v4449_v21  ;;  %v4453_v47 = vsub.f32 %v4443_v36, %v4449_v21  ;;  %v4456_v9 = vsub.f32 %v4447_v24, %v4449_v21 }
0x15cb   :  { %v6464_v6 = vpop.eup %6463  ;;  %6477 = vpow2.f32 %v5500_v20  ;;  %v4792_v34 = vmul.f32 %v6462_v60, %v10585_v12  ;;  %v10587_v53 = vmov 0.0  }
0x15cc   :  { %v6466_v5 = vpop.eup %6465  ;;  %v4790_v18 = vadd.f32 %v6464_v6, %v6462_v60  ;;  %v4451_v49 = vmul.f32 1.442695, %v4450_v61  ;;  %v4454_v17 = vmul.f32 1.442695, %v4453_v47  ;;  %v4457_v23 = vmul.f32 1.442695, %v4456_v9  ;;  %6018 = vmatprep.subr.bf16.mxu1 %v10587_v53  ;;  %v4803_v9 = vpop.xlane.xlu0 %4802 }
0x15cd   :  { %v4794_v15 = vmul.f32 %v6464_v6, %v10586_v40  ;;  %v4796_v42 = vmul.f32 %v6466_v5, %v9514_v0 }
0x15ce   :  { %v6468_v43 = vpop.eup %6467  ;;  %v4791_v44 = vadd.f32 %v6466_v5, %v4790_v18  ;;  %6479 = vpow2.f32 %v4451_v49 }
0x15cf   :  { %v6470_v50 = vpop.eup %6469  ;;  %6481 = vpow2.f32 %v4454_v17  ;;  %v4795_v25 = vadd.f32 %v4794_v15, %v4792_v34  ;;  %v5148_v36 = vmul.f32 %v6468_v43, %v10585_v12 }
0x15d0   :  { %v6472_v26 = vpop.eup %6471  ;;  %6483 = vrcp.f32 %v4791_v44  ;;  %v5146_v28 = vadd.f32 %v6470_v50, %v6468_v43  ;;  %v5150_v33 = vmul.f32 %v6470_v50, %v10586_v40  ;;  %v4807_v6 = vpop.xlane.xlu0 %4806 }
0x15d1   :  { %6485 = vpow2.f32 %v4457_v23  ;;  %v4797_v59 = vadd.f32 %v4796_v42, %v4795_v25  ;;  %v5152_v1 = vmul.f32 %v6472_v26, %v9514_v0  ;;  %v4812_v18 = vmax.f32 %v4803_v9, %v4807_v6 }
0x15d2   :  { %v5147_v54 = vadd.f32 %v6472_v26, %v5146_v28  ;;  %v5151_v55 = vadd.f32 %v5150_v33, %v5148_v36 }
0x15d3   :  { %v6474_v29 = vpop.eup %6473 }
0x15d4   :  { %v6476_v48 = vpop.eup %6475  ;;  %6487 = vrcp.f32 %v5147_v54  ;;  %v5153_v52 = vadd.f32 %v5152_v1, %v5151_v55  ;;  %v5504_v8 = vmul.f32 %v6474_v29, %v10585_v12  ;;  %v5163_v34 = vpop.xlane.xlu0 %5162 }
0x15d5   :  { %v6478_v57 = vpop.eup %6477  ;;  %v5502_v3 = vadd.f32 %v6476_v48, %v6474_v29  ;;  %v5506_v35 = vmul.f32 %v6476_v48, %v10586_v40  ;;  %v5168_v25 = vmax.f32 %v10114_v14, %v5163_v34 }
0x15d6   :  { %v5508_v30 = vmul.f32 %v6478_v57, %v9514_v0 }
0x15d7   :  { %v5503_v22 = vadd.f32 %v6478_v57, %v5502_v3  ;;  %v5507_v45 = vadd.f32 %v5506_v35, %v5504_v8 }
0x15d8   :  { %v6480_v63 = vpop.eup %6479  ;;  %v5519_v5 = vpop.xlane.xlu0 %5518 }
0x15d9   :  { %v6482_v2 = vpop.eup %6481  ;;  %6489 = vrcp.f32 %v5503_v22  ;;  %v4461_v27 = vmul.f32 %v6480_v63, %v9518_v32  ;;  %v5509_v19 = vadd.f32 %v5508_v30, %v5507_v45  ;;  %v5524_v55 = vmax.f32 %v10118_v31, %v5519_v5 }
0x15da   :  { %v6484_v38 = vpop.eup %6483  ;;  %v4459_v46 = vadd.f32 %v6482_v2, %v6480_v63  ;;  %v4463_v12 = vmul.f32 %v6482_v2, %v9553_v58  ;;  %6491 = vrcp.f32 %v4427_v56 }
0x15db   :  { %v6486_v41 = vpop.eup %6485  ;;  %v10137_v39 = vmul.f32 %v6484_v38, %v4797_v59 }
0x15dc   :  { %v4460_v40 = vadd.f32 %v6486_v41, %v4459_v46  ;;  %v4464_v0 = vadd.f32 %v4463_v12, %v4461_v27  ;;  %v4465_v7 = vmul.f32 %v6486_v41, %v9556_v4 }
0x15de   :  { %v6488_v11 = vpop.eup %6487  ;;  %6493 = vrcp.f32 %v4460_v40  ;;  %v4466_v10 = vadd.f32 %v4465_v7, %v4464_v0  ;;  %v6168_v7 = vld [vmem:[#allocation7 + $0x8] sm:$0xff]  }
0x15df   :  { %v10140_v37 = vmul.f32 %v6488_v11, %v5153_v52  ;;  %6019 = vmatpush3.bf16.msra.mxu1 %v6168_v7 }
0x15e0   :  { %6020 = vmatprep.subr.bf16.mxu1 %v10587_v53 }
0x15e3   :  { %v6490_v16 = vpop.eup %6489 }
0x15e4   :  { %v10143_v20 = vmul.f32 %v6490_v16, %v5509_v19  ;;  %v6492_v24 = vpop.eup %6491 }
0x15e5   :  { %v4435_v60 = vmul.f32 %v6492_v24, %v10103_v13 }
0x15e8   :  { %v6494_v21 = vpop.eup %6493 }
0x15e9   :  { %v4468_v61 = vmul.f32 %v6494_v21, %v4466_v10 }
0x15eb   :  { %v6123_v47 = vpack.i.bf16 %v4468_v61, %v4435_v60 }
0x15ed   :  { %6124 = vrot.lane.b32.xlu1 %v6123_v47, %s6659_s18 }
0x160a   :  { %v4811_v49 = vpop.xlane.xlu0 %4810 }
0x160b   :  { %v4813_v17 = vmax.f32 %v4812_v18, %v4811_v49 }
0x160d   :  { %v4814_v23 = vsub.f32 %v4803_v9, %v4813_v17  ;;  %v4817_v15 = vsub.f32 %v4807_v6, %v4813_v17  ;;  %v4820_v42 = vsub.f32 %v4811_v49, %v4813_v17  ;;  %v6169_v9 = vld [vmem:[#allocation7 + $0x10] sm:$0xff]   ;;  %v6170_v49 = vld [vmem:[#allocation7 + $0x18] sm:$0xff]  }
0x160e   :  { %6021 = vmatpush3.bf16.msra.mxu1 %v6169_v9 }
0x160f   :  { %v4815_v43 = vmul.f32 1.442695, %v4814_v23  ;;  %v4818_v44 = vmul.f32 1.442695, %v4817_v15  ;;  %v4821_v50 = vmul.f32 1.442695, %v4820_v42  ;;  %6022 = vmatprep.subr.bf16.mxu1 %v10587_v53 }
0x1611   :  { %6495 = vpow2.f32 %v4815_v43 }
0x1612   :  { %6497 = vpow2.f32 %v4818_v44  ;;  %v5167_v13 = vpop.xlane.xlu0 %5166  ;;  %6023 = vmatpush3.bf16.msra.mxu1 %v6170_v49 }
0x1613   :  { %6499 = vpow2.f32 %v4821_v50  ;;  %v5169_v36 = vmax.f32 %v5168_v25, %v5167_v13 }
0x1615   :  { %v5170_v26 = vsub.f32 %v10114_v14, %v5169_v36  ;;  %v5173_v28 = vsub.f32 %v5163_v34, %v5169_v36  ;;  %v5176_v33 = vsub.f32 %v5167_v13, %v5169_v36 }
0x1617   :  { %v5171_v59 = vmul.f32 1.442695, %v5170_v26  ;;  %v5174_v1 = vmul.f32 1.442695, %v5173_v28  ;;  %v5177_v54 = vmul.f32 1.442695, %v5176_v33 }
0x1619   :  { %6501 = vpow2.f32 %v5171_v59 }
0x161a   :  { %6503 = vpow2.f32 %v5174_v1  ;;  %v5523_v29 = vpop.xlane.xlu0 %5522 }
0x161b   :  { %v6496_v48 = vpop.eup %6495  ;;  %6505 = vpow2.f32 %v5177_v54  ;;  %v5525_v62 = vmax.f32 %v5524_v55, %v5523_v29 }
0x161c   :  { %v6498_v52 = vpop.eup %6497  ;;  %v4825_v8 = vmul.f32 %v6496_v48, %v9518_v32 }
0x161d   :  { %v6500_v57 = vpop.eup %6499  ;;  %v4823_v3 = vadd.f32 %v6498_v52, %v6496_v48  ;;  %v5526_v14 = vsub.f32 %v10118_v31, %v5525_v62  ;;  %v5529_v35 = vsub.f32 %v5519_v5, %v5525_v62  ;;  %v5532_v30 = vsub.f32 %v5523_v29, %v5525_v62 }
0x161e   :  { %v4827_v22 = vmul.f32 %v6498_v52, %v9553_v58  ;;  %v4829_v19 = vmul.f32 %v6500_v57, %v9556_v4 }
0x161f   :  { %v4824_v45 = vadd.f32 %v6500_v57, %v4823_v3  ;;  %v5527_v63 = vmul.f32 1.442695, %v5526_v14  ;;  %v5530_v56 = vmul.f32 1.442695, %v5529_v35  ;;  %v5533_v2 = vmul.f32 1.442695, %v5532_v30 }
0x1620   :  { %v4828_v27 = vadd.f32 %v4827_v22, %v4825_v8 }
0x1621   :  { %6507 = vrcp.f32 %v4824_v45 }
0x1622   :  { %6509 = vpow2.f32 %v5527_v63  ;;  %v4830_v38 = vadd.f32 %v4829_v19, %v4828_v27 }
0x1623   :  { %v6502_v46 = vpop.eup %6501  ;;  %6511 = vpow2.f32 %v5530_v56 }
0x1624   :  { %v6504_v12 = vpop.eup %6503  ;;  %6513 = vpow2.f32 %v5533_v2  ;;  %v5181_v31 = vmul.f32 %v6502_v46, %v9518_v32 }
0x1625   :  { %v6506_v41 = vpop.eup %6505  ;;  %v5179_v40 = vadd.f32 %v6504_v12, %v6502_v46  ;;  %v5183_v0 = vmul.f32 %v6504_v12, %v9553_v58 }
0x1626   :  { %v5185_v51 = vmul.f32 %v6506_v41, %v9556_v4 }
0x1627   :  { %v5180_v11 = vadd.f32 %v6506_v41, %v5179_v40  ;;  %v5184_v10 = vadd.f32 %v5183_v0, %v5181_v31 }
0x1629   :  { %6515 = vrcp.f32 %v5180_v11  ;;  %v5186_v16 = vadd.f32 %v5185_v51, %v5184_v10 }
0x162b   :  { %v6508_v24 = vpop.eup %6507 }
0x162c   :  { %v6510_v21 = vpop.eup %6509  ;;  %v4832_v60 = vmul.f32 %v6508_v24, %v4830_v38 }
0x162d   :  { %v6512_v61 = vpop.eup %6511  ;;  %v5537_v47 = vmul.f32 %v6510_v21, %v9518_v32 }
0x162e   :  { %v6514_v6 = vpop.eup %6513  ;;  %v5535_v34 = vadd.f32 %v6512_v61, %v6510_v21  ;;  %v6128_v5 = vpack.i.bf16 %v4832_v60, %v10137_v39  ;;  %v5539_v18 = vmul.f32 %v6512_v61, %v9553_v58 }
0x162f   :  { %v5541_v15 = vmul.f32 %v6514_v6, %v9556_v4 }
0x1630   :  { %v5536_v17 = vadd.f32 %v6514_v6, %v5535_v34  ;;  %6129 = vrot.lane.b32.xlu0 %v6128_v5, %s6659_s18  ;;  %v5540_v23 = vadd.f32 %v5539_v18, %v5537_v47 }
0x1632   :  { %6517 = vrcp.f32 %v5536_v17  ;;  %v5542_v42 = vadd.f32 %v5541_v15, %v5540_v23 }
0x1633   :  { %v6516_v32 = vpop.eup %6515 }
0x1634   :  { %v5188_v43 = vmul.f32 %v6516_v32, %v5186_v16 }
0x1636   :  { %v6133_v44 = vpack.i.bf16 %v5188_v43, %v10140_v37 }
0x1638   :  { %6134 = vrot.lane.b32.xlu1 %v6133_v44, %s6659_s18 }
0x163c   :  { %v6518_v58 = vpop.eup %6517 }
0x163d   :  { %v5544_v39 = vmul.f32 %v6518_v58, %v5542_v42 }
0x163f   :  { %v6138_v50 = vpack.i.bf16 %v5544_v39, %v10143_v20 }
0x1641   :  { %6139 = vrot.lane.b32.xlu1 %v6138_v50, %s6659_s18  ;;  %s5667_s18 = sshll.u32 %s6681_s9, 4  ;;  %s5668_s18 = int_to_ptr.vmem [resolvable:$true] %s5667_s18 }
0x1642   :  { %s6630_s17 = scalar_lea.vmem %s5668_s18, 256  ;;  %p6635_p11 = scmp.lt.s32.totalorder %s5668_s18, %s5668_s18 }
0x1643   :  { %p6631_p10 = scmp.ne.s32.totalorder %s5668_s18, %s6630_s17  ;;  %p6636_p12 = scmp.lt.s32.totalorder %s6630_s17, %s6630_s17 }
0x1645   :  { %p6637_p13 = por %p6636_p12, %p6635_p11 }
0x1647   :  { %p6638_p0 = pnand %p6637_p13, %p6631_p10 }
0x165f   :  { %v6125_v25 = vpop.permute.xlu1 %6124 }
0x1660   :  { %v6127_v33 = vunpack.i.h.bf16 %v6125_v25  ;;  %v6126_v59 = vunpack.i.l.bf16 %v6125_v25 }
0x16a2   :  { %v6130_v13 = vpop.permute.xlu0 %6129 }
0x16a3   :  { %v6132_v36 = vunpack.i.h.bf16 %v6130_v13  ;;  %v6131_v53 = vunpack.i.l.bf16 %v6130_v13 }
0x16a5   :  { %v5578_v37 = vsel %vm449_vm1, %v6127_v33, %v6132_v36  ;;  %v5577_v54 = vsel %vm449_vm1, %v6126_v59, %v6131_v53 }
0x16aa   :  { %v6135_v4 = vpop.permute.xlu1 %6134 }
0x16ab   :  { %v6137_v26 = vunpack.i.h.bf16 %v6135_v4  ;;  %v6136_v28 = vunpack.i.l.bf16 %v6135_v4 }
0x16ad   :  { %v5579_v20 = vsel %vm3838_vm9, %v5577_v54, %v6136_v28  ;;  %v5580_v48 = vsel %vm3838_vm9, %v5578_v37, %v6137_v26 }
0x16b3   :  { %v6140_v1 = vpop.permute.xlu1 %6139 }
0x16b4   :  { %v6142_v55 = vunpack.i.h.bf16 %v6140_v1  ;;  %v6141_v29 = vunpack.i.l.bf16 %v6140_v1 }
0x16b6   :  { %v5581_v62 = vsel %vm3845_vm10, %v5579_v20, %v6141_v29  ;;  %v5582_v52 = vsel %vm3845_vm10, %v5580_v48, %v6142_v55 }
0x16b7   :  { %v5583_v8 = vpack.c.bf16 %v5582_v52, %v5581_v62 }
0x16b9   :  { %6025 = vmatmul.mubr.msk.bf16.vlgmr.msra.gmra.mrb[52].mxu1 %vm117_vm0, %v5583_v8 }
0x178c   :  { %v5653_v57 = vpop.f32.mrb[52].mxu1 }
0x178d   :  { %5660 = vst.msk [vmem:[#allocation8] sm:$0xff] %vm117_vm0, %v5653_v57  ;;  %v6026_v3 = vpop.f32.mrb[53].mxu1 }
0x178e   :  { %v5656_v14 = vpop.f32.mrb[54].mxu1 }
0x178f   :  { %5661 = vst.msk [vmem:[#allocation8 + $0x8] sm:$0xff] %vm117_vm0, %v5656_v14  ;;  %v6027_v35 = vpop.f32.mrb[55].mxu1 }
0x1790   :  { %6641 = shalt.err (!%p6638_p0)
}
0x1791   :  { %s6642_s24 = scalar_lea.hbm %s10205_s13, 256 }
0x1792   :  { %p6643_p1 = scmp.ne.s32.totalorder %s10205_s13, %s6642_s24  ;;  %p6646_p2 = scmp.lt.u32.totalorder %s6642_s24, %s10205_s13 }
0x1794   :  { %p6648_p3 = pnand %p6646_p2, %p6643_p1 }
0x1796   :  { %6651 = shalt.err (!%p6648_p3)
}
0x1797   :  { %5673 = dma.vmem_to_hbm [thread:$0]  %s5668_s18, 256, %s10205_s13, [#allocation4], %s6662_s5, %s6662_s5, %s6663_s26  }
0x1798   :  { %6656 = dma.done.wait [#allocation4], 256  }
0x1799   :  { %6657 = vsyncadd [#allocation4], 4294967040 }
0x179a   :  { %5677 = vsyncpa [#allocation3], 1 }
0x179b   :  { %5678 = vsyncpa [#allocation6], 1 }
0x179c   :  { %5679 = vsyncpa [#allocation4], 1 }

</bundles_post_ra>
